<compile_context>
chip_gen: v7x
topology: tpu7x:2x2x1
jax: 0.10.0
libtpu: 0.0.40
codegen_flags: <defaults>
</compile_context>

<pallas_src>
import functools
import math

import jax
import jax.numpy as jnp
import numpy as np
from jax.experimental import pallas as pl
from jax.experimental.pallas import tpu as pltpu


def _round_up(x, m):
    return ((x + m - 1) // m) * m


def _pick_batch_tile(batch):
    # 256-wide tiles preferred on v6e/v7x; fall back to smaller divisors.
    for t in (256, 128, 64, 32, 16, 8):
        if batch % t == 0:
            return t
    raise ValueError("batch size must be a multiple of 8")


# ---------------------------------------------------------------------------
# Kernel 1 (row-tiled): text-encoder Linear + L2 norm + temperature folding.
# ---------------------------------------------------------------------------
def _preprocess_kernel(scales_ref, img_ref, txt_ref, w_ref, b_ref,
                       img_n_ref, txt_s_ref, to_s_ref):
    eps2 = 1e-24  # (F.normalize eps = 1e-12) ** 2

    img = img_ref[...].astype(jnp.float32)
    txt = txt_ref[...].astype(jnp.float32)

    # Text-encoder stand-in: Linear(C, C); bf16 MXU operands, f32 accumulate.
    txt_outs = jnp.dot(txt.astype(jnp.bfloat16), w_ref[...],
                       preferred_element_type=jnp.float32) + b_ref[...]

    def l2n(x):
        ss = jnp.sum(x * x, axis=-1, keepdims=True)
        return x * jax.lax.rsqrt(jnp.maximum(ss, eps2))

    img_n = l2n(img)
    txt_n = l2n(txt)
    to_n = l2n(txt_outs)

    scale_main = scales_ref[0:1, 0:1]   # (1, 1) f32, already exp+clamped
    scale_ml = scales_ref[0:1, 1:2]

    # Fold the temperature into the text-side operands once; cast to bf16 once.
    img_n_ref[...] = img_n.astype(jnp.bfloat16)
    txt_s_ref[...] = (txt_n * scale_main).astype(jnp.bfloat16)
    to_s_ref[...] = (to_n * scale_ml).astype(jnp.bfloat16)


# ---------------------------------------------------------------------------
# Kernel 2 (flash-style tiled): both contrastive losses from one S tile each.
# ---------------------------------------------------------------------------
def _tiled_loss_kernel(img_ref, txt_ref, to_ref,
                       loss_main_ref, loss_ml_ref,
                       row_acc_main, row_acc_ml,
                       m_im, l_im, m_iml, l_iml,
                       m_t, l_t, m_o, l_o,
                       *, inv_2b):
    qi = pl.program_id(0)
    ki = pl.program_id(1)
    nq = pl.num_programs(0)
    nk = pl.num_programs(1)

    img = img_ref[...]   # (TB, C) bf16, L2-normalized
    txt = txt_ref[...]   # (TB, C) bf16, normalized * scale_main (folded)
    to = to_ref[...]     # (TB, C) bf16, normalized * scale_ml   (folded)

    # One MXU matmul per similarity matrix per tile; both softmax directions
    # reuse the same tile (row LSE = img->txt, column LSE = txt->img).
    # NT dot_general: contracting dim 1 of both operands (no explicit vxpose).
    dn = (((1,), (1,)), ((), ()))
    s_main = jax.lax.dot_general(img, txt, dn, preferred_element_type=jnp.float32)
    s_ml = jax.lax.dot_general(img, to, dn, preferred_element_type=jnp.float32)

    @pl.when(jnp.logical_and(qi == 0, ki == 0))
    def _zero_accs():
        row_acc_main[...] = jnp.zeros_like(row_acc_main)
        row_acc_ml[...] = jnp.zeros_like(row_acc_ml)

    # ---- img-direction: online LSE along the lane (text) axis, over ki -----
    def row_update(s, m_ref, l_ref):
        rm = jnp.max(s, axis=-1, keepdims=True)                    # (TB, 1)
        rs = jnp.sum(jnp.exp(s - rm), axis=-1, keepdims=True)      # (TB, 1)

        @pl.when(ki == 0)
        def _():
            m_ref[...] = rm
            l_ref[...] = rs

        @pl.when(ki > 0)
        def _():
            m_old = m_ref[...]
            m_new = jnp.maximum(m_old, rm)
            l_ref[...] = (l_ref[...] * jnp.exp(m_old - m_new)
                          + rs * jnp.exp(rm - m_new))
            m_ref[...] = m_new

    row_update(s_main, m_im, l_im)
    row_update(s_ml, m_iml, l_iml)

    # ---- txt/to-direction: online LSE along the sublane (img) axis, over qi.
    #      Per-ki state lives in (nk, 1, TB) scratch indexed by the dynamic ki.
    def col_update(s, m_ref, l_ref):
        cm = jnp.max(s, axis=0, keepdims=True)                     # (1, TB)
        cs = jnp.sum(jnp.exp(s - cm), axis=0, keepdims=True)       # (1, TB)

        @pl.when(qi == 0)
        def _():
            m_ref[ki] = cm
            l_ref[ki] = cs

        @pl.when(qi > 0)
        def _():
            m_old = m_ref[ki]
            l_old = l_ref[ki]
            m_new = jnp.maximum(m_old, cm)
            l_ref[ki] = (l_old * jnp.exp(m_old - m_new)
                         + cs * jnp.exp(cm - m_new))
            m_ref[ki] = m_new

    col_update(s_main, m_t, l_t)
    col_update(s_ml, m_o, l_o)

    # ---- positive-pair (diagonal) logits: only on qi == ki tiles ------------
    @pl.when(qi == ki)
    def _diag():
        rows = jax.lax.broadcasted_iota(jnp.int32, s_main.shape, 0)
        cols = jax.lax.broadcasted_iota(jnp.int32, s_main.shape, 1)
        eye = rows == cols
        d_main = jnp.sum(jnp.where(eye, s_main, 0.0), axis=-1, keepdims=True)
        d_ml = jnp.sum(jnp.where(eye, s_ml, 0.0), axis=-1, keepdims=True)
        # each positive logit is subtracted once per softmax direction (x2).
        row_acc_main[...] += -2.0 * d_main
        row_acc_ml[...] += -2.0 * d_ml

    # ---- row LSE finished for this qi tile -> fold into running per-slot sum
    @pl.when(ki == nk - 1)
    def _fold_rows():
        row_acc_main[...] += m_im[...] + jnp.log(l_im[...])
        row_acc_ml[...] += m_iml[...] + jnp.log(l_iml[...])

    # ---- final combine on the very last grid step ---------------------------
    @pl.when(jnp.logical_and(qi == nq - 1, ki == nk - 1))
    def _finalize():
        t_all = m_t[...] + jnp.log(l_t[...])                 # (nk, 1, TB)
        o_all = m_o[...] + jnp.log(l_o[...])
        lse_txt = jnp.sum(jnp.sum(t_all, axis=0), axis=-1, keepdims=True)  # (1,1)
        lse_to = jnp.sum(jnp.sum(o_all, axis=0), axis=-1, keepdims=True)
        row_main = jnp.sum(row_acc_main[...], axis=0, keepdims=True)       # (1,1)
        row_ml = jnp.sum(row_acc_ml[...], axis=0, keepdims=True)
        loss_main_ref[...] = (row_main + lse_txt) * inv_2b
        loss_ml_ref[...] = (row_ml + lse_to) * inv_2b


# ---------------------------------------------------------------------------
# Forward pass (multi_label=1, share_temperature=False) — fully jit-able.
# ---------------------------------------------------------------------------
def multilabel_contrastive_forward(image_x, text_x, params,
                                   multi_label_loss_weight=1.0):
    batch, feat = image_x.shape
    assert text_x.shape == (batch, feat)

    # Lane-dense feature padding (exact: zero features change nothing).
    cp = 128 if feat <= 128 else _round_up(feat, 256)
    pad = cp - feat
    w = params["text_w"].astype(jnp.bfloat16)
    b = params["text_b"].astype(jnp.float32).reshape(1, feat)
    if pad:
        image_x = jnp.pad(image_x, ((0, 0), (0, pad)))
        text_x = jnp.pad(text_x, ((0, 0), (0, pad)))
        w = jnp.pad(w, ((0, pad), (0, pad)))
        b = jnp.pad(b, ((0, 0), (0, pad)))

    tb = _pick_batch_tile(batch)
    nb = batch // tb

    # Temperatures (exp + clamp) — tiny scalar math, folded into the text-side
    # operands by the preprocess kernel.
    scale_main = jnp.minimum(
        jnp.exp(jnp.asarray(params["logit_scale"], jnp.float32)), 100.0)
    scale_ml = jnp.minimum(
        jnp.exp(jnp.asarray(params["multi_label_logit_scale"], jnp.float32)), 100.0)
    scales = jnp.stack([scale_main, scale_ml]).reshape(1, 2)

    # ---- kernel 1: text encoder + L2 norm + temperature fold (row-tiled) ----
    img_n, txt_s, to_s = pl.pallas_call(
        _preprocess_kernel,
        out_shape=(
            jax.ShapeDtypeStruct((batch, cp), jnp.bfloat16),
            jax.ShapeDtypeStruct((batch, cp), jnp.bfloat16),
            jax.ShapeDtypeStruct((batch, cp), jnp.bfloat16),
        ),
        grid=(nb,),
        in_specs=[
            pl.BlockSpec((1, 2), lambda i: (0, 0)),      # scales
            pl.BlockSpec((tb, cp), lambda i: (i, 0)),    # image_x rows
            pl.BlockSpec((tb, cp), lambda i: (i, 0)),    # text_x rows
            pl.BlockSpec((cp, cp), lambda i: (0, 0)),    # text_w (resident)
            pl.BlockSpec((1, cp), lambda i: (0, 0)),     # text_b
        ],
        out_specs=(
            pl.BlockSpec((tb, cp), lambda i: (i, 0)),
            pl.BlockSpec((tb, cp), lambda i: (i, 0)),
            pl.BlockSpec((tb, cp), lambda i: (i, 0)),
        ),
        compiler_params=pltpu.CompilerParams(
            dimension_semantics=("parallel",),
            vmem_limit_bytes=32 * 1024 * 1024,
        ),
    )(scales, image_x, text_x, w, b)

    # ---- kernel 2: tiled bidirectional contrastive losses -------------------
    kernel = functools.partial(_tiled_loss_kernel, inv_2b=0.5 / batch)
    cost = pl.CostEstimate(
        flops=4 * batch * batch * cp,            # two bf16 S matmuls
        transcendentals=4 * batch * batch,       # exp per element per direction
        bytes_accessed=(2 * nb + 1) * batch * cp * 2 + 8,
    )
    loss_main, loss_ml = pl.pallas_call(
        kernel,
        out_shape=(
            jax.ShapeDtypeStruct((1, 1), jnp.float32),
            jax.ShapeDtypeStruct((1, 1), jnp.float32),
        ),
        grid=(nb, nb),                            # (query tiles, kv tiles); kv last
        in_specs=[
            pl.BlockSpec((tb, cp), lambda qi, ki: (qi, 0)),   # img_n
            pl.BlockSpec((tb, cp), lambda qi, ki: (ki, 0)),   # txt_n * scale_main
            pl.BlockSpec((tb, cp), lambda qi, ki: (ki, 0)),   # to_n  * scale_ml
        ],
        out_specs=(
            pl.BlockSpec((1, 1), lambda qi, ki: (0, 0)),
            pl.BlockSpec((1, 1), lambda qi, ki: (0, 0)),
        ),
        scratch_shapes=[
            pltpu.VMEM((tb, 1), jnp.float32),      # row_acc_main
            pltpu.VMEM((tb, 1), jnp.float32),      # row_acc_ml
            pltpu.VMEM((tb, 1), jnp.float32),      # m_im
            pltpu.VMEM((tb, 1), jnp.float32),      # l_im
            pltpu.VMEM((tb, 1), jnp.float32),      # m_iml
            pltpu.VMEM((tb, 1), jnp.float32),      # l_iml
            pltpu.VMEM((nb, 1, tb), jnp.float32),  # m_t  (per-ki column state)
            pltpu.VMEM((nb, 1, tb), jnp.float32),  # l_t
            pltpu.VMEM((nb, 1, tb), jnp.float32),  # m_o
            pltpu.VMEM((nb, 1, tb), jnp.float32),  # l_o
        ],
        compiler_params=pltpu.CompilerParams(
            dimension_semantics=("arbitrary", "arbitrary"),
            vmem_limit_bytes=32 * 1024 * 1024,
        ),
        cost_estimate=cost,
    )(img_n, txt_s, to_s)

    loss_main = loss_main[0, 0]
    ml_weighted = multi_label_loss_weight * loss_ml[0, 0]
    total = loss_main + ml_weighted
    # Losses stay as JAX arrays (no .item() host sync): jit-friendly.
    losses_dict = {"loss": loss_main, "multi_label_loss": ml_weighted}
    return total, losses_dict


def init_params(key, feat_dim, contrast_temperature=0.07):
    (kw,) = jax.random.split(key, 1)
    log_scale = jnp.asarray(math.log(1.0 / contrast_temperature), jnp.float32)
    return {
        "logit_scale": log_scale,
        # share_temperature=False -> separate parameter (same init value)
        "multi_label_logit_scale": log_scale,
        # stored [C_in, C_out] so x @ W; bf16 to halve weight DMA bytes
        "text_w": (0.02 * jax.random.normal(kw, (feat_dim, feat_dim),
                                            jnp.float32)).astype(jnp.bfloat16),
        "text_b": jnp.zeros((feat_dim,), jnp.float32),
    }


# Pure-JAX f32 reference (mirrors the PyTorch module with world_size == 1).
def _reference_forward(image_x, text_x, params, multi_label_loss_weight=1.0):
    def l2n(x):
        return x / jnp.maximum(jnp.linalg.norm(x, axis=-1, keepdims=True), 1e-12)

    img_n = l2n(image_x)
    txt_n = l2n(text_x)
    to = text_x @ params["text_w"].astype(jnp.float32) + params["text_b"]
    to_n = l2n(to)

    def bidir_ce(a, b, scale):
        logits = (a @ b.T) * scale
        lse_r = jax.scipy.special.logsumexp(logits, axis=-1)
        lse_c = jax.scipy.special.logsumexp(logits, axis=0)
        diag = jnp.diagonal(logits)
        return 0.5 * (jnp.mean(lse_r - diag) + jnp.mean(lse_c - diag))

    s_main = jnp.minimum(jnp.exp(params["logit_scale"]), 100.0)
    s_ml = jnp.minimum(jnp.exp(params["multi_label_logit_scale"]), 100.0)
    loss = bidir_ce(img_n, txt_n, s_main)
    ml = multi_label_loss_weight * bidir_ce(img_n, to_n, s_ml)
    return loss + ml, {"loss": loss, "multi_label_loss": ml}


if __name__ == "__main__":
    key = jax.random.PRNGKey(0)
    k_img, k_txt, k_par = jax.random.split(key, 3)

    # Small shapes: batch=256 (tiled 128x128 -> 2x2 grid), feature dim=192
    # (padded to a lane-dense 256 inside the wrapper).
    B, C = 256, 192
    image_x = jax.random.normal(k_img, (B, C), jnp.float32)
    text_x = jax.random.normal(k_txt, (B, C), jnp.float32)
    params = init_params(k_par, C, contrast_temperature=0.07)

    forward = jax.jit(multilabel_contrastive_forward)
    total_loss, losses_dict = forward(image_x, text_x, params)
    jax.block_until_ready(total_loss)
    jax.block_until_ready(losses_dict["loss"])
    jax.block_until_ready(losses_dict["multi_label_loss"])

    # Sanity check vs. the f32 reference (loose tolerance: bf16 MXU operands).
    ref_total, ref_dict = _reference_forward(image_x, text_x, params)
    np.testing.assert_allclose(float(total_loss), float(ref_total),
                               rtol=5e-2, atol=1e-3)
    np.testing.assert_allclose(float(losses_dict["loss"]),
                               float(ref_dict["loss"]), rtol=5e-2, atol=1e-3)
    np.testing.assert_allclose(float(losses_dict["multi_label_loss"]),
                               float(ref_dict["multi_label_loss"]),
                               rtol=5e-2, atol=1e-3)

    print("KERNEL_OK")
</pallas_src>

<mosaic_0001>
module attributes {stable_mosaic.version = 11 : i64} {
  func.func @_preprocess_kernel(%arg0: i32, %arg1: memref<1x2xf32, #tpu.memory_space<vmem>>, %arg2: memref<256x256xf32, #tpu.memory_space<vmem>>, %arg3: memref<256x256xf32, #tpu.memory_space<vmem>>, %arg4: memref<256x256xbf16, #tpu.memory_space<vmem>>, %arg5: memref<1x256xf32, #tpu.memory_space<vmem>>, %arg6: memref<256x256xbf16, #tpu.memory_space<vmem>>, %arg7: memref<256x256xbf16, #tpu.memory_space<vmem>>, %arg8: memref<256x256xbf16, #tpu.memory_space<vmem>>) attributes {dimension_semantics = [#tpu.dimension_semantics<parallel>], iteration_bounds = array<i64: 1>, scalar_prefetch = 0 : i64, scratch_operands = 0 : i64, tpu.core_type = #tpu.core_type<tc>, window_params = [{pipeline_mode = #tpu.pipeline_mode<synchronous>, transform_indices = @transform_0, window_bounds = array<i64: 1, 2>}, {transform_indices = @transform_1, window_bounds = array<i64: 256, 256>}, {transform_indices = @transform_2, window_bounds = array<i64: 256, 256>}, {pipeline_mode = #tpu.pipeline_mode<synchronous>, transform_indices = @transform_3, window_bounds = array<i64: 256, 256>}, {pipeline_mode = #tpu.pipeline_mode<synchronous>, transform_indices = @transform_4, window_bounds = array<i64: 1, 256>}, {transform_indices = @transform_5, window_bounds = array<i64: 256, 256>}, {transform_indices = @transform_6, window_bounds = array<i64: 256, 256>}, {transform_indices = @transform_7, window_bounds = array<i64: 256, 256>}]} {
    %c0 = arith.constant 0 : index
    %c0_0 = arith.constant 0 : index
    %0 = vector.load %arg2[%c0, %c0_0] : memref<256x256xf32, #tpu.memory_space<vmem>>, vector<256x256xf32>
    %c0_1 = arith.constant 0 : index
    %c0_2 = arith.constant 0 : index
    %1 = vector.load %arg3[%c0_1, %c0_2] : memref<256x256xf32, #tpu.memory_space<vmem>>, vector<256x256xf32>
    %2 = arith.truncf %1 : vector<256x256xf32> to vector<256x256xbf16>
    %c0_3 = arith.constant 0 : index
    %c0_4 = arith.constant 0 : index
    %3 = vector.load %arg4[%c0_3, %c0_4] : memref<256x256xbf16, #tpu.memory_space<vmem>>, vector<256x256xbf16>
    %cst = arith.constant dense<0.000000e+00> : vector<256x256xf32>
    %4 = tpu.matmul %2, %3, %cst {dimension_numbers = #tpu.dot_dimension_numbers<[1], [0], [0], [1], [0, 0, 1, 1], [], []>} : vector<256x256xbf16>, vector<256x256xbf16>, vector<256x256xf32> -> vector<256x256xf32>
    %c0_5 = arith.constant 0 : index
    %c0_6 = arith.constant 0 : index
    %5 = vector.load %arg5[%c0_5, %c0_6] : memref<1x256xf32, #tpu.memory_space<vmem>>, vector<1x256xf32>
    %6 = vector.broadcast %5 : vector<1x256xf32> to vector<256x256xf32>
    %7 = arith.addf %4, %6 : vector<256x256xf32>
    %8 = arith.mulf %0, %0 : vector<256x256xf32>
    %cst_7 = arith.constant dense<0.000000e+00> : vector<256xf32>
    %9 = vector.multi_reduction <add>, %8, %cst_7 [1] : vector<256x256xf32> to vector<256xf32>
    %10 = vector.shape_cast %9 : vector<256xf32> to vector<256x1xf32>
    %cst_8 = arith.constant 1.000000e-24 : f32
    %11 = vector.broadcast %cst_8 : f32 to vector<256x1xf32>
    %12 = arith.maximumf %10, %11 : vector<256x1xf32>
    %13 = math.rsqrt %12 : vector<256x1xf32>
    %14 = vector.broadcast %13 : vector<256x1xf32> to vector<256x256xf32>
    %15 = arith.mulf %0, %14 : vector<256x256xf32>
    %16 = arith.mulf %1, %1 : vector<256x256xf32>
    %cst_9 = arith.constant dense<0.000000e+00> : vector<256xf32>
    %17 = vector.multi_reduction <add>, %16, %cst_9 [1] : vector<256x256xf32> to vector<256xf32>
    %18 = vector.shape_cast %17 : vector<256xf32> to vector<256x1xf32>
    %cst_10 = arith.constant 1.000000e-24 : f32
    %19 = vector.broadcast %cst_10 : f32 to vector<256x1xf32>
    %20 = arith.maximumf %18, %19 : vector<256x1xf32>
    %21 = math.rsqrt %20 : vector<256x1xf32>
    %22 = vector.broadcast %21 : vector<256x1xf32> to vector<256x256xf32>
    %23 = arith.mulf %1, %22 : vector<256x256xf32>
    %24 = arith.mulf %7, %7 : vector<256x256xf32>
    %cst_11 = arith.constant dense<0.000000e+00> : vector<256xf32>
    %25 = vector.multi_reduction <add>, %24, %cst_11 [1] : vector<256x256xf32> to vector<256xf32>
    %26 = vector.shape_cast %25 : vector<256xf32> to vector<256x1xf32>
    %cst_12 = arith.constant 1.000000e-24 : f32
    %27 = vector.broadcast %cst_12 : f32 to vector<256x1xf32>
    %28 = arith.maximumf %26, %27 : vector<256x1xf32>
    %29 = math.rsqrt %28 : vector<256x1xf32>
    %30 = vector.broadcast %29 : vector<256x1xf32> to vector<256x256xf32>
    %31 = arith.mulf %7, %30 : vector<256x256xf32>
    %c0_13 = arith.constant 0 : index
    %c0_14 = arith.constant 0 : index
    %32 = vector.load %arg1[%c0_13, %c0_14] : memref<1x2xf32, #tpu.memory_space<vmem>>, vector<1x1xf32>
    %c0_15 = arith.constant 0 : index
    %c1 = arith.constant 1 : index
    %33 = vector.load %arg1[%c0_15, %c1] : memref<1x2xf32, #tpu.memory_space<vmem>>, vector<1x1xf32>
    %34 = arith.truncf %15 : vector<256x256xf32> to vector<256x256xbf16>
    %c0_16 = arith.constant 0 : index
    %c0_17 = arith.constant 0 : index
    %35 = vector.load %arg6[%c0_16, %c0_17] : memref<256x256xbf16, #tpu.memory_space<vmem>>, vector<256x256xbf16>
    tpu.vector_store %arg6[%c0_16, %c0_17], %34 {strides = array<i32>} : memref<256x256xbf16, #tpu.memory_space<vmem>>, vector<256x256xbf16>,
    %36 = vector.broadcast %32 : vector<1x1xf32> to vector<256x256xf32>
    %37 = arith.mulf %23, %36 : vector<256x256xf32>
    %38 = arith.truncf %37 : vector<256x256xf32> to vector<256x256xbf16>
    %c0_18 = arith.constant 0 : index
    %c0_19 = arith.constant 0 : index
    %39 = vector.load %arg7[%c0_18, %c0_19] : memref<256x256xbf16, #tpu.memory_space<vmem>>, vector<256x256xbf16>
    tpu.vector_store %arg7[%c0_18, %c0_19], %38 {strides = array<i32>} : memref<256x256xbf16, #tpu.memory_space<vmem>>, vector<256x256xbf16>,
    %40 = vector.broadcast %33 : vector<1x1xf32> to vector<256x256xf32>
    %41 = arith.mulf %31, %40 : vector<256x256xf32>
    %42 = arith.truncf %41 : vector<256x256xf32> to vector<256x256xbf16>
    %c0_20 = arith.constant 0 : index
    %c0_21 = arith.constant 0 : index
    %43 = vector.load %arg8[%c0_20, %c0_21] : memref<256x256xbf16, #tpu.memory_space<vmem>>, vector<256x256xbf16>
    tpu.vector_store %arg8[%c0_20, %c0_21], %42 {strides = array<i32>} : memref<256x256xbf16, #tpu.memory_space<vmem>>, vector<256x256xbf16>,
    return
  }
  func.func @transform_0(%arg0: i32) -> (i32, i32) {
    %c0_i32 = arith.constant 0 : i32
    %c0_i32_0 = arith.constant 0 : i32
    %c0_i32_1 = arith.constant 0 : i32
    return %c0_i32, %c0_i32_0 : i32, i32
  }
  func.func @transform_1(%arg0: i32) -> (i32, i32) {
    %c0_i32 = arith.constant 0 : i32
    %c0_i32_0 = arith.constant 0 : i32
    return %arg0, %c0_i32 : i32, i32
  }
  func.func @transform_2(%arg0: i32) -> (i32, i32) {
    %c0_i32 = arith.constant 0 : i32
    %c0_i32_0 = arith.constant 0 : i32
    return %arg0, %c0_i32 : i32, i32
  }
  func.func @transform_3(%arg0: i32) -> (i32, i32) {
    %c0_i32 = arith.constant 0 : i32
    %c0_i32_0 = arith.constant 0 : i32
    %c0_i32_1 = arith.constant 0 : i32
    return %c0_i32, %c0_i32_0 : i32, i32
  }
  func.func @transform_4(%arg0: i32) -> (i32, i32) {
    %c0_i32 = arith.constant 0 : i32
    %c0_i32_0 = arith.constant 0 : i32
    %c0_i32_1 = arith.constant 0 : i32
    return %c0_i32, %c0_i32_0 : i32, i32
  }
  func.func @transform_5(%arg0: i32) -> (i32, i32) {
    %c0_i32 = arith.constant 0 : i32
    %c0_i32_0 = arith.constant 0 : i32
    return %arg0, %c0_i32 : i32, i32
  }
  func.func @transform_6(%arg0: i32) -> (i32, i32) {
    %c0_i32 = arith.constant 0 : i32
    %c0_i32_0 = arith.constant 0 : i32
    return %arg0, %c0_i32 : i32, i32
  }
  func.func @transform_7(%arg0: i32) -> (i32, i32) {
    %c0_i32 = arith.constant 0 : i32
    %c0_i32_0 = arith.constant 0 : i32
    return %arg0, %c0_i32 : i32, i32
  }
}

module attributes {stable_mosaic.version = 11 : i64} {
  func.func @_tiled_loss_kernel(%arg0: i32, %arg1: i32, %arg2: memref<256x256xbf16, #tpu.memory_space<vmem>>, %arg3: memref<256x256xbf16, #tpu.memory_space<vmem>>, %arg4: memref<256x256xbf16, #tpu.memory_space<vmem>>, %arg5: memref<1x1xf32, #tpu.memory_space<vmem>>, %arg6: memref<1x1xf32, #tpu.memory_space<vmem>>, %arg7: memref<256x1xf32, #tpu.memory_space<vmem>>, %arg8: memref<256x1xf32, #tpu.memory_space<vmem>>, %arg9: memref<256x1xf32, #tpu.memory_space<vmem>>, %arg10: memref<256x1xf32, #tpu.memory_space<vmem>>, %arg11: memref<256x1xf32, #tpu.memory_space<vmem>>, %arg12: memref<256x1xf32, #tpu.memory_space<vmem>>, %arg13: memref<1x1x256xf32, #tpu.memory_space<vmem>>, %arg14: memref<1x1x256xf32, #tpu.memory_space<vmem>>, %arg15: memref<1x1x256xf32, #tpu.memory_space<vmem>>, %arg16: memref<1x1x256xf32, #tpu.memory_space<vmem>>) attributes {dimension_semantics = [#tpu.dimension_semantics<arbitrary>, #tpu.dimension_semantics<arbitrary>], iteration_bounds = array<i64: 1, 1>, scalar_prefetch = 0 : i64, scratch_operands = 10 : i64, tpu.core_type = #tpu.core_type<tc>, window_params = [{transform_indices = @transform_0, window_bounds = array<i64: 256, 256>}, {transform_indices = @transform_1, window_bounds = array<i64: 256, 256>}, {transform_indices = @transform_2, window_bounds = array<i64: 256, 256>}, {pipeline_mode = #tpu.pipeline_mode<synchronous>, transform_indices = @transform_3, window_bounds = array<i64: 1, 1>}, {pipeline_mode = #tpu.pipeline_mode<synchronous>, transform_indices = @transform_4, window_bounds = array<i64: 1, 1>}]} {
    %c0 = arith.constant 0 : index
    %c0_0 = arith.constant 0 : index
    %0 = vector.load %arg2[%c0, %c0_0] : memref<256x256xbf16, #tpu.memory_space<vmem>>, vector<256x256xbf16>
    %c0_1 = arith.constant 0 : index
    %c0_2 = arith.constant 0 : index
    %1 = vector.load %arg3[%c0_1, %c0_2] : memref<256x256xbf16, #tpu.memory_space<vmem>>, vector<256x256xbf16>
    %c0_3 = arith.constant 0 : index
    %c0_4 = arith.constant 0 : index
    %2 = vector.load %arg4[%c0_3, %c0_4] : memref<256x256xbf16, #tpu.memory_space<vmem>>, vector<256x256xbf16>
    %cst = arith.constant dense<0.000000e+00> : vector<256x256xf32>
    %3 = tpu.matmul %0, %1, %cst {dimension_numbers = #tpu.dot_dimension_numbers<[1], [1], [0], [0], [0, 0, 1, 0], [], []>} : vector<256x256xbf16>, vector<256x256xbf16>, vector<256x256xf32> -> vector<256x256xf32>
    %cst_5 = arith.constant dense<0.000000e+00> : vector<256x256xf32>
    %4 = tpu.matmul %0, %2, %cst_5 {dimension_numbers = #tpu.dot_dimension_numbers<[1], [1], [0], [0], [0, 0, 1, 0], [], []>} : vector<256x256xbf16>, vector<256x256xbf16>, vector<256x256xf32> -> vector<256x256xf32>
    %c0_i32 = arith.constant 0 : i32
    %5 = arith.cmpi eq, %arg0, %c0_i32 : i32
    %c0_i32_6 = arith.constant 0 : i32
    %6 = arith.cmpi eq, %arg1, %c0_i32_6 : i32
    %7 = arith.andi %5, %6 : i1
    %8 = arith.extui %7 : i1 to i32
    %c0_i32_7 = arith.constant 0 : i32
    %9 = arith.cmpi ne, %8, %c0_i32_7 : i32
    scf.if %9 {
      %cst_38 = arith.constant 0.000000e+00 : f32
      %73 = vector.broadcast %cst_38 : f32 to vector<256x1xf32>
      %c0_39 = arith.constant 0 : index
      %c0_40 = arith.constant 0 : index
      %74 = vector.load %arg7[%c0_39, %c0_40] : memref<256x1xf32, #tpu.memory_space<vmem>>, vector<256x1xf32>
      tpu.vector_store %arg7[%c0_39, %c0_40], %73 {strides = array<i32>} : memref<256x1xf32, #tpu.memory_space<vmem>>, vector<256x1xf32>,
      %cst_41 = arith.constant 0.000000e+00 : f32
      %75 = vector.broadcast %cst_41 : f32 to vector<256x1xf32>
      %c0_42 = arith.constant 0 : index
      %c0_43 = arith.constant 0 : index
      %76 = vector.load %arg8[%c0_42, %c0_43] : memref<256x1xf32, #tpu.memory_space<vmem>>, vector<256x1xf32>
      tpu.vector_store %arg8[%c0_42, %c0_43], %75 {strides = array<i32>} : memref<256x1xf32, #tpu.memory_space<vmem>>, vector<256x1xf32>,
    } else {
    }
    %cst_8 = arith.constant dense<0xFF800000> : vector<256xf32>
    %10 = vector.multi_reduction <maximumf>, %3, %cst_8 [1] : vector<256x256xf32> to vector<256xf32>
    %11 = vector.shape_cast %10 : vector<256xf32> to vector<256x1xf32>
    %12 = vector.broadcast %11 : vector<256x1xf32> to vector<256x256xf32>
    %13 = arith.subf %3, %12 : vector<256x256xf32>
    %14 = math.exp %13 : vector<256x256xf32>
    %cst_9 = arith.constant dense<0.000000e+00> : vector<256xf32>
    %15 = vector.multi_reduction <add>, %14, %cst_9 [1] : vector<256x256xf32> to vector<256xf32>
    %16 = vector.shape_cast %15 : vector<256xf32> to vector<256x1xf32>
    %c0_i32_10 = arith.constant 0 : i32
    %17 = arith.cmpi eq, %arg1, %c0_i32_10 : i32
    %18 = arith.extui %17 : i1 to i32
    %c0_i32_11 = arith.constant 0 : i32
    %19 = arith.cmpi ne, %18, %c0_i32_11 : i32
    scf.if %19 {
      %c0_38 = arith.constant 0 : index
      %c0_39 = arith.constant 0 : index
      %73 = vector.load %arg9[%c0_38, %c0_39] : memref<256x1xf32, #tpu.memory_space<vmem>>, vector<256x1xf32>
      tpu.vector_store %arg9[%c0_38, %c0_39], %11 {strides = array<i32>} : memref<256x1xf32, #tpu.memory_space<vmem>>, vector<256x1xf32>,
      %c0_40 = arith.constant 0 : index
      %c0_41 = arith.constant 0 : index
      %74 = vector.load %arg10[%c0_40, %c0_41] : memref<256x1xf32, #tpu.memory_space<vmem>>, vector<256x1xf32>
      tpu.vector_store %arg10[%c0_40, %c0_41], %16 {strides = array<i32>} : memref<256x1xf32, #tpu.memory_space<vmem>>, vector<256x1xf32>,
    } else {
    }
    %c0_i32_12 = arith.constant 0 : i32
    %20 = arith.cmpi sgt, %arg1, %c0_i32_12 : i32
    %21 = arith.extui %20 : i1 to i32
    %c0_i32_13 = arith.constant 0 : i32
    %22 = arith.cmpi ne, %21, %c0_i32_13 : i32
    scf.if %22 {
      %c0_38 = arith.constant 0 : index
      %c0_39 = arith.constant 0 : index
      %73 = vector.load %arg9[%c0_38, %c0_39] : memref<256x1xf32, #tpu.memory_space<vmem>>, vector<256x1xf32>
      %74 = arith.maximumf %73, %11 : vector<256x1xf32>
      %c0_40 = arith.constant 0 : index
      %c0_41 = arith.constant 0 : index
      %75 = vector.load %arg10[%c0_40, %c0_41] : memref<256x1xf32, #tpu.memory_space<vmem>>, vector<256x1xf32>
      %76 = arith.subf %73, %74 : vector<256x1xf32>
      %77 = math.exp %76 : vector<256x1xf32>
      %78 = arith.mulf %75, %77 : vector<256x1xf32>
      %79 = arith.subf %11, %74 : vector<256x1xf32>
      %80 = math.exp %79 : vector<256x1xf32>
      %81 = arith.mulf %16, %80 : vector<256x1xf32>
      %82 = arith.addf %78, %81 : vector<256x1xf32>
      %c0_42 = arith.constant 0 : index
      %c0_43 = arith.constant 0 : index
      %83 = vector.load %arg10[%c0_42, %c0_43] : memref<256x1xf32, #tpu.memory_space<vmem>>, vector<256x1xf32>
      tpu.vector_store %arg10[%c0_42, %c0_43], %82 {strides = array<i32>} : memref<256x1xf32, #tpu.memory_space<vmem>>, vector<256x1xf32>,
      %c0_44 = arith.constant 0 : index
      %c0_45 = arith.constant 0 : index
      %84 = vector.load %arg9[%c0_44, %c0_45] : memref<256x1xf32, #tpu.memory_space<vmem>>, vector<256x1xf32>
      tpu.vector_store %arg9[%c0_44, %c0_45], %74 {strides = array<i32>} : memref<256x1xf32, #tpu.memory_space<vmem>>, vector<256x1xf32>,
    } else {
    }
    %cst_14 = arith.constant dense<0xFF800000> : vector<256xf32>
    %23 = vector.multi_reduction <maximumf>, %4, %cst_14 [1] : vector<256x256xf32> to vector<256xf32>
    %24 = vector.shape_cast %23 : vector<256xf32> to vector<256x1xf32>
    %25 = vector.broadcast %24 : vector<256x1xf32> to vector<256x256xf32>
    %26 = arith.subf %4, %25 : vector<256x256xf32>
    %27 = math.exp %26 : vector<256x256xf32>
    %cst_15 = arith.constant dense<0.000000e+00> : vector<256xf32>
    %28 = vector.multi_reduction <add>, %27, %cst_15 [1] : vector<256x256xf32> to vector<256xf32>
    %29 = vector.shape_cast %28 : vector<256xf32> to vector<256x1xf32>
    %c0_i32_16 = arith.constant 0 : i32
    %30 = arith.cmpi eq, %arg1, %c0_i32_16 : i32
    %31 = arith.extui %30 : i1 to i32
    %c0_i32_17 = arith.constant 0 : i32
    %32 = arith.cmpi ne, %31, %c0_i32_17 : i32
    scf.if %32 {
      %c0_38 = arith.constant 0 : index
      %c0_39 = arith.constant 0 : index
      %73 = vector.load %arg11[%c0_38, %c0_39] : memref<256x1xf32, #tpu.memory_space<vmem>>, vector<256x1xf32>
      tpu.vector_store %arg11[%c0_38, %c0_39], %24 {strides = array<i32>} : memref<256x1xf32, #tpu.memory_space<vmem>>, vector<256x1xf32>,
      %c0_40 = arith.constant 0 : index
      %c0_41 = arith.constant 0 : index
      %74 = vector.load %arg12[%c0_40, %c0_41] : memref<256x1xf32, #tpu.memory_space<vmem>>, vector<256x1xf32>
      tpu.vector_store %arg12[%c0_40, %c0_41], %29 {strides = array<i32>} : memref<256x1xf32, #tpu.memory_space<vmem>>, vector<256x1xf32>,
    } else {
    }
    %c0_i32_18 = arith.constant 0 : i32
    %33 = arith.cmpi sgt, %arg1, %c0_i32_18 : i32
    %34 = arith.extui %33 : i1 to i32
    %c0_i32_19 = arith.constant 0 : i32
    %35 = arith.cmpi ne, %34, %c0_i32_19 : i32
    scf.if %35 {
      %c0_38 = arith.constant 0 : index
      %c0_39 = arith.constant 0 : index
      %73 = vector.load %arg11[%c0_38, %c0_39] : memref<256x1xf32, #tpu.memory_space<vmem>>, vector<256x1xf32>
      %74 = arith.maximumf %73, %24 : vector<256x1xf32>
      %c0_40 = arith.constant 0 : index
      %c0_41 = arith.constant 0 : index
      %75 = vector.load %arg12[%c0_40, %c0_41] : memref<256x1xf32, #tpu.memory_space<vmem>>, vector<256x1xf32>
      %76 = arith.subf %73, %74 : vector<256x1xf32>
      %77 = math.exp %76 : vector<256x1xf32>
      %78 = arith.mulf %75, %77 : vector<256x1xf32>
      %79 = arith.subf %24, %74 : vector<256x1xf32>
      %80 = math.exp %79 : vector<256x1xf32>
      %81 = arith.mulf %29, %80 : vector<256x1xf32>
      %82 = arith.addf %78, %81 : vector<256x1xf32>
      %c0_42 = arith.constant 0 : index
      %c0_43 = arith.constant 0 : index
      %83 = vector.load %arg12[%c0_42, %c0_43] : memref<256x1xf32, #tpu.memory_space<vmem>>, vector<256x1xf32>
      tpu.vector_store %arg12[%c0_42, %c0_43], %82 {strides = array<i32>} : memref<256x1xf32, #tpu.memory_space<vmem>>, vector<256x1xf32>,
      %c0_44 = arith.constant 0 : index
      %c0_45 = arith.constant 0 : index
      %84 = vector.load %arg11[%c0_44, %c0_45] : memref<256x1xf32, #tpu.memory_space<vmem>>, vector<256x1xf32>
      tpu.vector_store %arg11[%c0_44, %c0_45], %74 {strides = array<i32>} : memref<256x1xf32, #tpu.memory_space<vmem>>, vector<256x1xf32>,
    } else {
    }
    %cst_20 = arith.constant dense<0xFF800000> : vector<256xf32>
    %36 = vector.multi_reduction <maximumf>, %3, %cst_20 [0] : vector<256x256xf32> to vector<256xf32>
    %37 = vector.shape_cast %36 : vector<256xf32> to vector<1x256xf32>
    %38 = vector.broadcast %37 : vector<1x256xf32> to vector<256x256xf32>
    %39 = arith.subf %3, %38 : vector<256x256xf32>
    %40 = math.exp %39 : vector<256x256xf32>
    %cst_21 = arith.constant dense<0.000000e+00> : vector<256xf32>
    %41 = vector.multi_reduction <add>, %40, %cst_21 [0] : vector<256x256xf32> to vector<256xf32>
    %42 = vector.shape_cast %41 : vector<256xf32> to vector<1x256xf32>
    %c0_i32_22 = arith.constant 0 : i32
    %43 = arith.cmpi eq, %arg0, %c0_i32_22 : i32
    %44 = arith.extui %43 : i1 to i32
    %c0_i32_23 = arith.constant 0 : i32
    %45 = arith.cmpi ne, %44, %c0_i32_23 : i32
    scf.if %45 {
      %73 = arith.index_cast %arg1 : i32 to index
      %c0_38 = arith.constant 0 : index
      %c0_39 = arith.constant 0 : index
      %74 = vector.load %arg13[%73, %c0_38, %c0_39] : memref<1x1x256xf32, #tpu.memory_space<vmem>>, vector<1x1x256xf32>
      %75 = vector.shape_cast %74 : vector<1x1x256xf32> to vector<1x256xf32>
      %76 = vector.shape_cast %37 : vector<1x256xf32> to vector<1x1x256xf32>
      tpu.vector_store %arg13[%73, %c0_38, %c0_39], %76 {strides = array<i32>} : memref<1x1x256xf32, #tpu.memory_space<vmem>>, vector<1x1x256xf32>,
      %77 = arith.index_cast %arg1 : i32 to index
      %c0_40 = arith.constant 0 : index
      %c0_41 = arith.constant 0 : index
      %78 = vector.load %arg14[%77, %c0_40, %c0_41] : memref<1x1x256xf32, #tpu.memory_space<vmem>>, vector<1x1x256xf32>
      %79 = vector.shape_cast %78 : vector<1x1x256xf32> to vector<1x256xf32>
      %80 = vector.shape_cast %42 : vector<1x256xf32> to vector<1x1x256xf32>
      tpu.vector_store %arg14[%77, %c0_40, %c0_41], %80 {strides = array<i32>} : memref<1x1x256xf32, #tpu.memory_space<vmem>>, vector<1x1x256xf32>,
    } else {
    }
    %c0_i32_24 = arith.constant 0 : i32
    %46 = arith.cmpi sgt, %arg0, %c0_i32_24 : i32
    %47 = arith.extui %46 : i1 to i32
    %c0_i32_25 = arith.constant 0 : i32
    %48 = arith.cmpi ne, %47, %c0_i32_25 : i32
    scf.if %48 {
      %73 = arith.index_cast %arg1 : i32 to index
      %c0_38 = arith.constant 0 : index
      %c0_39 = arith.constant 0 : index
      %74 = vector.load %arg13[%73, %c0_38, %c0_39] : memref<1x1x256xf32, #tpu.memory_space<vmem>>, vector<1x1x256xf32>
      %75 = vector.shape_cast %74 : vector<1x1x256xf32> to vector<1x256xf32>
      %76 = arith.index_cast %arg1 : i32 to index
      %c0_40 = arith.constant 0 : index
      %c0_41 = arith.constant 0 : index
      %77 = vector.load %arg14[%76, %c0_40, %c0_41] : memref<1x1x256xf32, #tpu.memory_space<vmem>>, vector<1x1x256xf32>
      %78 = vector.shape_cast %77 : vector<1x1x256xf32> to vector<1x256xf32>
      %79 = arith.maximumf %75, %37 : vector<1x256xf32>
      %80 = arith.subf %75, %79 : vector<1x256xf32>
      %81 = math.exp %80 : vector<1x256xf32>
      %82 = arith.mulf %78, %81 : vector<1x256xf32>
      %83 = arith.subf %37, %79 : vector<1x256xf32>
      %84 = math.exp %83 : vector<1x256xf32>
      %85 = arith.mulf %42, %84 : vector<1x256xf32>
      %86 = arith.addf %82, %85 : vector<1x256xf32>
      %87 = arith.index_cast %arg1 : i32 to index
      %c0_42 = arith.constant 0 : index
      %c0_43 = arith.constant 0 : index
      %88 = vector.load %arg14[%87, %c0_42, %c0_43] : memref<1x1x256xf32, #tpu.memory_space<vmem>>, vector<1x1x256xf32>
      %89 = vector.shape_cast %88 : vector<1x1x256xf32> to vector<1x256xf32>
      %90 = vector.shape_cast %86 : vector<1x256xf32> to vector<1x1x256xf32>
      tpu.vector_store %arg14[%87, %c0_42, %c0_43], %90 {strides = array<i32>} : memref<1x1x256xf32, #tpu.memory_space<vmem>>, vector<1x1x256xf32>,
      %91 = arith.index_cast %arg1 : i32 to index
      %c0_44 = arith.constant 0 : index
      %c0_45 = arith.constant 0 : index
      %92 = vector.load %arg13[%91, %c0_44, %c0_45] : memref<1x1x256xf32, #tpu.memory_space<vmem>>, vector<1x1x256xf32>
      %93 = vector.shape_cast %92 : vector<1x1x256xf32> to vector<1x256xf32>
      %94 = vector.shape_cast %79 : vector<1x256xf32> to vector<1x1x256xf32>
      tpu.vector_store %arg13[%91, %c0_44, %c0_45], %94 {strides = array<i32>} : memref<1x1x256xf32, #tpu.memory_space<vmem>>, vector<1x1x256xf32>,
    } else {
    }
    %cst_26 = arith.constant dense<0xFF800000> : vector<256xf32>
    %49 = vector.multi_reduction <maximumf>, %4, %cst_26 [0] : vector<256x256xf32> to vector<256xf32>
    %50 = vector.shape_cast %49 : vector<256xf32> to vector<1x256xf32>
    %51 = vector.broadcast %50 : vector<1x256xf32> to vector<256x256xf32>
    %52 = arith.subf %4, %51 : vector<256x256xf32>
    %53 = math.exp %52 : vector<256x256xf32>
    %cst_27 = arith.constant dense<0.000000e+00> : vector<256xf32>
    %54 = vector.multi_reduction <add>, %53, %cst_27 [0] : vector<256x256xf32> to vector<256xf32>
    %55 = vector.shape_cast %54 : vector<256xf32> to vector<1x256xf32>
    %c0_i32_28 = arith.constant 0 : i32
    %56 = arith.cmpi eq, %arg0, %c0_i32_28 : i32
    %57 = arith.extui %56 : i1 to i32
    %c0_i32_29 = arith.constant 0 : i32
    %58 = arith.cmpi ne, %57, %c0_i32_29 : i32
    scf.if %58 {
      %73 = arith.index_cast %arg1 : i32 to index
      %c0_38 = arith.constant 0 : index
      %c0_39 = arith.constant 0 : index
      %74 = vector.load %arg15[%73, %c0_38, %c0_39] : memref<1x1x256xf32, #tpu.memory_space<vmem>>, vector<1x1x256xf32>
      %75 = vector.shape_cast %74 : vector<1x1x256xf32> to vector<1x256xf32>
      %76 = vector.shape_cast %50 : vector<1x256xf32> to vector<1x1x256xf32>
      tpu.vector_store %arg15[%73, %c0_38, %c0_39], %76 {strides = array<i32>} : memref<1x1x256xf32, #tpu.memory_space<vmem>>, vector<1x1x256xf32>,
      %77 = arith.index_cast %arg1 : i32 to index
      %c0_40 = arith.constant 0 : index
      %c0_41 = arith.constant 0 : index
      %78 = vector.load %arg16[%77, %c0_40, %c0_41] : memref<1x1x256xf32, #tpu.memory_space<vmem>>, vector<1x1x256xf32>
      %79 = vector.shape_cast %78 : vector<1x1x256xf32> to vector<1x256xf32>
      %80 = vector.shape_cast %55 : vector<1x256xf32> to vector<1x1x256xf32>
      tpu.vector_store %arg16[%77, %c0_40, %c0_41], %80 {strides = array<i32>} : memref<1x1x256xf32, #tpu.memory_space<vmem>>, vector<1x1x256xf32>,
    } else {
    }
    %c0_i32_30 = arith.constant 0 : i32
    %59 = arith.cmpi sgt, %arg0, %c0_i32_30 : i32
    %60 = arith.extui %59 : i1 to i32
    %c0_i32_31 = arith.constant 0 : i32
    %61 = arith.cmpi ne, %60, %c0_i32_31 : i32
    scf.if %61 {
      %73 = arith.index_cast %arg1 : i32 to index
      %c0_38 = arith.constant 0 : index
      %c0_39 = arith.constant 0 : index
      %74 = vector.load %arg15[%73, %c0_38, %c0_39] : memref<1x1x256xf32, #tpu.memory_space<vmem>>, vector<1x1x256xf32>
      %75 = vector.shape_cast %74 : vector<1x1x256xf32> to vector<1x256xf32>
      %76 = arith.index_cast %arg1 : i32 to index
      %c0_40 = arith.constant 0 : index
      %c0_41 = arith.constant 0 : index
      %77 = vector.load %arg16[%76, %c0_40, %c0_41] : memref<1x1x256xf32, #tpu.memory_space<vmem>>, vector<1x1x256xf32>
      %78 = vector.shape_cast %77 : vector<1x1x256xf32> to vector<1x256xf32>
      %79 = arith.maximumf %75, %50 : vector<1x256xf32>
      %80 = arith.subf %75, %79 : vector<1x256xf32>
      %81 = math.exp %80 : vector<1x256xf32>
      %82 = arith.mulf %78, %81 : vector<1x256xf32>
      %83 = arith.subf %50, %79 : vector<1x256xf32>
      %84 = math.exp %83 : vector<1x256xf32>
      %85 = arith.mulf %55, %84 : vector<1x256xf32>
      %86 = arith.addf %82, %85 : vector<1x256xf32>
      %87 = arith.index_cast %arg1 : i32 to index
      %c0_42 = arith.constant 0 : index
      %c0_43 = arith.constant 0 : index
      %88 = vector.load %arg16[%87, %c0_42, %c0_43] : memref<1x1x256xf32, #tpu.memory_space<vmem>>, vector<1x1x256xf32>
      %89 = vector.shape_cast %88 : vector<1x1x256xf32> to vector<1x256xf32>
      %90 = vector.shape_cast %86 : vector<1x256xf32> to vector<1x1x256xf32>
      tpu.vector_store %arg16[%87, %c0_42, %c0_43], %90 {strides = array<i32>} : memref<1x1x256xf32, #tpu.memory_space<vmem>>, vector<1x1x256xf32>,
      %91 = arith.index_cast %arg1 : i32 to index
      %c0_44 = arith.constant 0 : index
      %c0_45 = arith.constant 0 : index
      %92 = vector.load %arg15[%91, %c0_44, %c0_45] : memref<1x1x256xf32, #tpu.memory_space<vmem>>, vector<1x1x256xf32>
      %93 = vector.shape_cast %92 : vector<1x1x256xf32> to vector<1x256xf32>
      %94 = vector.shape_cast %79 : vector<1x256xf32> to vector<1x1x256xf32>
      tpu.vector_store %arg15[%91, %c0_44, %c0_45], %94 {strides = array<i32>} : memref<1x1x256xf32, #tpu.memory_space<vmem>>, vector<1x1x256xf32>,
    } else {
    }
    %62 = arith.cmpi eq, %arg0, %arg1 : i32
    %63 = arith.extui %62 : i1 to i32
    %c0_i32_32 = arith.constant 0 : i32
    %64 = arith.cmpi ne, %63, %c0_i32_32 : i32
    scf.if %64 {
      %73 = tpu.iota {dimensions = array<i32: 0>} : vector<256x256xi32>
      %74 = tpu.iota {dimensions = array<i32: 1>} : vector<256x256xi32>
      %75 = arith.cmpi eq, %73, %74 : vector<256x256xi32>
      %cst_38 = arith.constant 0.000000e+00 : f32
      %76 = vector.broadcast %cst_38 : f32 to vector<256x256xf32>
      %77 = arith.select %75, %3, %76 : vector<256x256xi1>, vector<256x256xf32>
      %cst_39 = arith.constant dense<0.000000e+00> : vector<256xf32>
      %78 = vector.multi_reduction <add>, %77, %cst_39 [1] : vector<256x256xf32> to vector<256xf32>
      %79 = vector.shape_cast %78 : vector<256xf32> to vector<256x1xf32>
      %cst_40 = arith.constant 0.000000e+00 : f32
      %80 = vector.broadcast %cst_40 : f32 to vector<256x256xf32>
      %81 = arith.select %75, %4, %80 : vector<256x256xi1>, vector<256x256xf32>
      %cst_41 = arith.constant dense<0.000000e+00> : vector<256xf32>
      %82 = vector.multi_reduction <add>, %81, %cst_41 [1] : vector<256x256xf32> to vector<256xf32>
      %83 = vector.shape_cast %82 : vector<256xf32> to vector<256x1xf32>
      %c0_42 = arith.constant 0 : index
      %c0_43 = arith.constant 0 : index
      %84 = vector.load %arg7[%c0_42, %c0_43] : memref<256x1xf32, #tpu.memory_space<vmem>>, vector<256x1xf32>
      %cst_44 = arith.constant -2.000000e+00 : f32
      %85 = vector.broadcast %cst_44 : f32 to vector<256x1xf32>
      %86 = arith.mulf %85, %79 : vector<256x1xf32>
      %87 = arith.addf %84, %86 : vector<256x1xf32>
      %c0_45 = arith.constant 0 : index
      %c0_46 = arith.constant 0 : index
      %88 = vector.load %arg7[%c0_45, %c0_46] : memref<256x1xf32, #tpu.memory_space<vmem>>, vector<256x1xf32>
      tpu.vector_store %arg7[%c0_45, %c0_46], %87 {strides = array<i32>} : memref<256x1xf32, #tpu.memory_space<vmem>>, vector<256x1xf32>,
      %c0_47 = arith.constant 0 : index
      %c0_48 = arith.constant 0 : index
      %89 = vector.load %arg8[%c0_47, %c0_48] : memref<256x1xf32, #tpu.memory_space<vmem>>, vector<256x1xf32>
      %cst_49 = arith.constant -2.000000e+00 : f32
      %90 = vector.broadcast %cst_49 : f32 to vector<256x1xf32>
      %91 = arith.mulf %90, %83 : vector<256x1xf32>
      %92 = arith.addf %89, %91 : vector<256x1xf32>
      %c0_50 = arith.constant 0 : index
      %c0_51 = arith.constant 0 : index
      %93 = vector.load %arg8[%c0_50, %c0_51] : memref<256x1xf32, #tpu.memory_space<vmem>>, vector<256x1xf32>
      tpu.vector_store %arg8[%c0_50, %c0_51], %92 {strides = array<i32>} : memref<256x1xf32, #tpu.memory_space<vmem>>, vector<256x1xf32>,
    } else {
    }
    %c0_i32_33 = arith.constant 0 : i32
    %65 = arith.cmpi eq, %arg1, %c0_i32_33 : i32
    %66 = arith.extui %65 : i1 to i32
    %c0_i32_34 = arith.constant 0 : i32
    %67 = arith.cmpi ne, %66, %c0_i32_34 : i32
    scf.if %67 {
      %c0_38 = arith.constant 0 : index
      %c0_39 = arith.constant 0 : index
      %73 = vector.load %arg7[%c0_38, %c0_39] : memref<256x1xf32, #tpu.memory_space<vmem>>, vector<256x1xf32>
      %c0_40 = arith.constant 0 : index
      %c0_41 = arith.constant 0 : index
      %74 = vector.load %arg9[%c0_40, %c0_41] : memref<256x1xf32, #tpu.memory_space<vmem>>, vector<256x1xf32>
      %c0_42 = arith.constant 0 : index
      %c0_43 = arith.constant 0 : index
      %75 = vector.load %arg10[%c0_42, %c0_43] : memref<256x1xf32, #tpu.memory_space<vmem>>, vector<256x1xf32>
      %76 = math.log %75 : vector<256x1xf32>
      %77 = arith.addf %74, %76 : vector<256x1xf32>
      %78 = arith.addf %73, %77 : vector<256x1xf32>
      %c0_44 = arith.constant 0 : index
      %c0_45 = arith.constant 0 : index
      %79 = vector.load %arg7[%c0_44, %c0_45] : memref<256x1xf32, #tpu.memory_space<vmem>>, vector<256x1xf32>
      tpu.vector_store %arg7[%c0_44, %c0_45], %78 {strides = array<i32>} : memref<256x1xf32, #tpu.memory_space<vmem>>, vector<256x1xf32>,
      %c0_46 = arith.constant 0 : index
      %c0_47 = arith.constant 0 : index
      %80 = vector.load %arg8[%c0_46, %c0_47] : memref<256x1xf32, #tpu.memory_space<vmem>>, vector<256x1xf32>
      %c0_48 = arith.constant 0 : index
      %c0_49 = arith.constant 0 : index
      %81 = vector.load %arg11[%c0_48, %c0_49] : memref<256x1xf32, #tpu.memory_space<vmem>>, vector<256x1xf32>
      %c0_50 = arith.constant 0 : index
      %c0_51 = arith.constant 0 : index
      %82 = vector.load %arg12[%c0_50, %c0_51] : memref<256x1xf32, #tpu.memory_space<vmem>>, vector<256x1xf32>
      %83 = math.log %82 : vector<256x1xf32>
      %84 = arith.addf %81, %83 : vector<256x1xf32>
      %85 = arith.addf %80, %84 : vector<256x1xf32>
      %c0_52 = arith.constant 0 : index
      %c0_53 = arith.constant 0 : index
      %86 = vector.load %arg8[%c0_52, %c0_53] : memref<256x1xf32, #tpu.memory_space<vmem>>, vector<256x1xf32>
      tpu.vector_store %arg8[%c0_52, %c0_53], %85 {strides = array<i32>} : memref<256x1xf32, #tpu.memory_space<vmem>>, vector<256x1xf32>,
    } else {
    }
    %c0_i32_35 = arith.constant 0 : i32
    %68 = arith.cmpi eq, %arg0, %c0_i32_35 : i32
    %c0_i32_36 = arith.constant 0 : i32
    %69 = arith.cmpi eq, %arg1, %c0_i32_36 : i32
    %70 = arith.andi %68, %69 : i1
    %71 = arith.extui %70 : i1 to i32
    %c0_i32_37 = arith.constant 0 : i32
    %72 = arith.cmpi ne, %71, %c0_i32_37 : i32
    scf.if %72 {
      %c0_38 = arith.constant 0 : index
      %c0_39 = arith.constant 0 : index
      %c0_40 = arith.constant 0 : index
      %73 = vector.load %arg13[%c0_38, %c0_39, %c0_40] : memref<1x1x256xf32, #tpu.memory_space<vmem>>, vector<1x1x256xf32>
      %c0_41 = arith.constant 0 : index
      %c0_42 = arith.constant 0 : index
      %c0_43 = arith.constant 0 : index
      %74 = vector.load %arg14[%c0_41, %c0_42, %c0_43] : memref<1x1x256xf32, #tpu.memory_space<vmem>>, vector<1x1x256xf32>
      %75 = math.log %74 : vector<1x1x256xf32>
      %76 = arith.addf %73, %75 : vector<1x1x256xf32>
      %c0_44 = arith.constant 0 : index
      %c0_45 = arith.constant 0 : index
      %c0_46 = arith.constant 0 : index
      %77 = vector.load %arg15[%c0_44, %c0_45, %c0_46] : memref<1x1x256xf32, #tpu.memory_space<vmem>>, vector<1x1x256xf32>
      %c0_47 = arith.constant 0 : index
      %c0_48 = arith.constant 0 : index
      %c0_49 = arith.constant 0 : index
      %78 = vector.load %arg16[%c0_47, %c0_48, %c0_49] : memref<1x1x256xf32, #tpu.memory_space<vmem>>, vector<1x1x256xf32>
      %79 = math.log %78 : vector<1x1x256xf32>
      %80 = arith.addf %77, %79 : vector<1x1x256xf32>
      %cst_50 = arith.constant dense<0.000000e+00> : vector<1x256xf32>
      %81 = vector.multi_reduction <add>, %76, %cst_50 [0] : vector<1x1x256xf32> to vector<1x256xf32>
      %cst_51 = arith.constant dense<0.000000e+00> : vector<1xf32>
      %82 = vector.multi_reduction <add>, %81, %cst_51 [1] : vector<1x256xf32> to vector<1xf32>
      %83 = vector.shape_cast %82 : vector<1xf32> to vector<1x1xf32>
      %cst_52 = arith.constant dense<0.000000e+00> : vector<1x256xf32>
      %84 = vector.multi_reduction <add>, %80, %cst_52 [0] : vector<1x1x256xf32> to vector<1x256xf32>
      %cst_53 = arith.constant dense<0.000000e+00> : vector<1xf32>
      %85 = vector.multi_reduction <add>, %84, %cst_53 [1] : vector<1x256xf32> to vector<1xf32>
      %86 = vector.shape_cast %85 : vector<1xf32> to vector<1x1xf32>
      %c0_54 = arith.constant 0 : index
      %c0_55 = arith.constant 0 : index
      %87 = vector.load %arg7[%c0_54, %c0_55] : memref<256x1xf32, #tpu.memory_space<vmem>>, vector<256x1xf32>
      %cst_56 = arith.constant dense<0.000000e+00> : vector<1xf32>
      %88 = vector.multi_reduction <add>, %87, %cst_56 [0] : vector<256x1xf32> to vector<1xf32>
      %89 = vector.shape_cast %88 : vector<1xf32> to vector<1x1xf32>
      %c0_57 = arith.constant 0 : index
      %c0_58 = arith.constant 0 : index
      %90 = vector.load %arg8[%c0_57, %c0_58] : memref<256x1xf32, #tpu.memory_space<vmem>>, vector<256x1xf32>
      %cst_59 = arith.constant dense<0.000000e+00> : vector<1xf32>
      %91 = vector.multi_reduction <add>, %90, %cst_59 [0] : vector<256x1xf32> to vector<1xf32>
      %92 = vector.shape_cast %91 : vector<1xf32> to vector<1x1xf32>
      %93 = arith.addf %89, %83 : vector<1x1xf32>
      %cst_60 = arith.constant 0.001953125 : f32
      %94 = vector.broadcast %cst_60 : f32 to vector<1x1xf32>
      %95 = arith.mulf %93, %94 : vector<1x1xf32>
      %c0_61 = arith.constant 0 : index
      %c0_62 = arith.constant 0 : index
      %96 = vector.load %arg5[%c0_61, %c0_62] : memref<1x1xf32, #tpu.memory_space<vmem>>, vector<1x1xf32>
      tpu.vector_store %arg5[%c0_61, %c0_62], %95 {strides = array<i32>} : memref<1x1xf32, #tpu.memory_space<vmem>>, vector<1x1xf32>,
      %97 = arith.addf %92, %86 : vector<1x1xf32>
      %cst_63 = arith.constant 0.001953125 : f32
      %98 = vector.broadcast %cst_63 : f32 to vector<1x1xf32>
      %99 = arith.mulf %97, %98 : vector<1x1xf32>
      %c0_64 = arith.constant 0 : index
      %c0_65 = arith.constant 0 : index
      %100 = vector.load %arg6[%c0_64, %c0_65] : memref<1x1xf32, #tpu.memory_space<vmem>>, vector<1x1xf32>
      tpu.vector_store %arg6[%c0_64, %c0_65], %99 {strides = array<i32>} : memref<1x1xf32, #tpu.memory_space<vmem>>, vector<1x1xf32>,
    } else {
    }
    return
  }
  func.func @transform_0(%arg0: i32, %arg1: i32) -> (i32, i32) {
    %c0_i32 = arith.constant 0 : i32
    %c0_i32_0 = arith.constant 0 : i32
    return %arg0, %c0_i32 : i32, i32
  }
  func.func @transform_1(%arg0: i32, %arg1: i32) -> (i32, i32) {
    %c0_i32 = arith.constant 0 : i32
    %c0_i32_0 = arith.constant 0 : i32
    return %arg1, %c0_i32 : i32, i32
  }
  func.func @transform_2(%arg0: i32, %arg1: i32) -> (i32, i32) {
    %c0_i32 = arith.constant 0 : i32
    %c0_i32_0 = arith.constant 0 : i32
    return %arg1, %c0_i32 : i32, i32
  }
  func.func @transform_3(%arg0: i32, %arg1: i32) -> (i32, i32) {
    %c0_i32 = arith.constant 0 : i32
    %c0_i32_0 = arith.constant 0 : i32
    %c0_i32_1 = arith.constant 0 : i32
    return %c0_i32, %c0_i32_0 : i32, i32
  }
  func.func @transform_4(%arg0: i32, %arg1: i32) -> (i32, i32) {
    %c0_i32 = arith.constant 0 : i32
    %c0_i32_0 = arith.constant 0 : i32
    %c0_i32_1 = arith.constant 0 : i32
    return %c0_i32, %c0_i32_0 : i32, i32
  }
}

</mosaic_0001>

<bundles_post_ra>
// kernel: multilabel_contrastive_forward.2
= control target key start
LH: loop header
LB: loop body
LE: loop exit
PB: predicated region body
PF: predicated region fallthrough
CT: control target
= control target key end

     0   :  { %s5956_s3 = inlined_call_operand.vmem [shape: bf16[256,256], index: 3, kind: input, shape index: {}]   ;;  %s5957_s2 = inlined_call_operand.vmem [shape: f32[256,256], index: 2, kind: input, shape index: {}]   ;;  %s5958_s1 = inlined_call_operand.vmem [shape: f32[256,256], index: 1, kind: input, shape index: {}]   ;;  %s5959_s5 = inlined_call_operand.vmem [shape: bf16[256,256], index: 5, kind: output, shape index: {0}]   ;;  %s5960_s4 = inlined_call_operand.vmem [shape: f32[1,256], index: 4, kind: input, shape index: {}]   ;;  %s5961_s0 = inlined_call_operand.vmem [shape: f32[1,2], index: 0, kind: input, shape index: {}]   ;;  %s5962_s7 = inlined_call_operand.vmem [shape: bf16[256,256], index: 7, kind: output, shape index: {2}]   ;;  %s5963_s6 = inlined_call_operand.vmem [shape: bf16[256,256], index: 6, kind: output, shape index: {1}]  }
   0x1   :  { %v2532_v0 = vld [vmem:[%s5956_s3 + $0x4] ss:$8 sps:$4 sm:$0xff]   ;;  %v2534_v1 = vld [vmem:[%s5956_s3] ss:$8 sps:$4 sm:$0xff]   ;;  %v2535_v2 = vld [vmem:[%s5956_s3 + $0x14] ss:$8 sps:$4 sm:$0xff]  }
   0x2   :  { %387 = vmatprep.subr.bf16.mxu0 %v2532_v0  ;;  %2495 = vmatprep.subr.bf16.mxu1 %v2532_v0  ;;  %v2537_v3 = vld [vmem:[%s5956_s3 + $0x10] ss:$8 sps:$4 sm:$0xff]   ;;  %v2538_v4 = vld [vmem:[%s5956_s3 + $0x24] ss:$8 sps:$4 sm:$0xff]   ;;  %v2540_v5 = vld [vmem:[%s5956_s3 + $0x20] ss:$8 sps:$4 sm:$0xff]  }
   0x3   :  { %388 = vmatpush1.bf16.msra.mxu0 %v2534_v1  ;;  %2511 = vmatpush1.bf16.msra.mxu1 %v2534_v1  ;;  %v2541_v6 = vld [vmem:[%s5956_s3 + $0x34] ss:$8 sps:$4 sm:$0xff]   ;;  %v2543_v7 = vld [vmem:[%s5956_s3 + $0x30] ss:$8 sps:$4 sm:$0xff]   ;;  %v2544_v8 = vld [vmem:[%s5956_s3 + $0x44] ss:$8 sps:$4 sm:$0xff]  }
   0x4   :  { %389 = vmatprep.subr.bf16.mxu0 %v2535_v2  ;;  %2496 = vmatprep.subr.bf16.mxu1 %v2535_v2  ;;  %v2546_v9 = vld [vmem:[%s5956_s3 + $0x40] ss:$8 sps:$4 sm:$0xff]   ;;  %v2547_v10 = vld [vmem:[%s5956_s3 + $0x54] ss:$8 sps:$4 sm:$0xff]   ;;  %v2549_v11 = vld [vmem:[%s5956_s3 + $0x50] ss:$8 sps:$4 sm:$0xff]  }
   0x5   :  { %v2550_v12 = vld [vmem:[%s5956_s3 + $0x64] ss:$8 sps:$4 sm:$0xff]   ;;  %v2925_v14 = vld [vmem:[%s5957_s2 + $0x18] sm:$0xff]  ;;  %v2552_v17 = vld [vmem:[%s5956_s3 + $0x60] ss:$8 sps:$4 sm:$0xff]  }
   0x6   :  { %v2920_v13 = vld [vmem:[%s5957_s2 + $0x8] sm:$0xff]  ;;  %v2940_v18 = vld [vmem:[%s5957_s2 + $0x118] sm:$0xff]  ;;  %v2980_v31 = vld [vmem:[%s5958_s1] sm:$0xff] }
   0x7   :  { %390 = vmatpush1.bf16.msra.mxu0 %v2537_v3  ;;  %2512 = vmatpush1.bf16.msra.mxu1 %v2537_v3  ;;  %v152_v15 = vpack.c.bf16 %v2925_v14, %v2920_v13  ;;  %v2932_v16 = vld [vmem:[%s5957_s2 + $0x108] sm:$0xff]  ;;  %v2553_v19 = vld [vmem:[%s5956_s3 + $0x74] ss:$8 sps:$4 sm:$0xff]   ;;  %v2555_v21 = vld [vmem:[%s5956_s3 + $0x70] ss:$8 sps:$4 sm:$0xff]   ;;  %6076 = vst [vmem:[#allocation2_spill] sm:$0xff] %v2980_v31  ;;  %v580_v33 = vmul.f32 %v2980_v31, %v2980_v31 }
   0x8   :  { %391 = vmatprep.subr.bf16.mxu0 %v2538_v4  ;;  %2497 = vmatprep.subr.bf16.mxu1 %v2538_v4  ;;  %v168_v20 = vpack.c.bf16 %v2940_v18, %v2932_v16  ;;  %v2556_v22 = vld [vmem:[%s5956_s3 + $0x84] ss:$8 sps:$4 sm:$0xff]   ;;  %v2558_v23 = vld [vmem:[%s5956_s3 + $0x80] ss:$8 sps:$4 sm:$0xff]   ;;  %v2559_v24 = vld [vmem:[%s5956_s3 + $0x94] ss:$8 sps:$4 sm:$0xff]  }
   0x9   :  { %419 = vmatprep.mubr.bf16.mxu0 %v152_v15  ;;  %v2561_v25 = vld [vmem:[%s5956_s3 + $0x90] ss:$8 sps:$4 sm:$0xff]   ;;  %v2562_v26 = vld [vmem:[%s5956_s3 + $0xa4] ss:$8 sps:$4 sm:$0xff]   ;;  %v2564_v27 = vld [vmem:[%s5956_s3 + $0xa0] ss:$8 sps:$4 sm:$0xff]  }
   0xa   :  { %499 = vmatprep.mubr.bf16.mxu1 %v168_v20  ;;  %v2565_v28 = vld [vmem:[%s5956_s3 + $0xb4] ss:$8 sps:$4 sm:$0xff]   ;;  %v2567_v29 = vld [vmem:[%s5956_s3 + $0xb0] ss:$8 sps:$4 sm:$0xff]   ;;  %v2568_v30 = vld [vmem:[%s5956_s3 + $0xc4] ss:$8 sps:$4 sm:$0xff]  }
   0xb   :  { %392 = vmatpush1.bf16.msra.mxu0 %v2540_v5  ;;  %2513 = vmatpush1.bf16.msra.mxu1 %v2540_v5  ;;  %v2985_v32 = vld [vmem:[%s5958_s1 + $0x8] sm:$0xff]  ;;  %v2992_v34 = vld [vmem:[%s5958_s1 + $0x20] sm:$0xff]  ;;  %v3008_v39 = vld [vmem:[%s5958_s1 + $0x10] sm:$0xff] }
   0xc   :  { %393 = vmatprep.subr.bf16.mxu0 %v2541_v6  ;;  %2498 = vmatprep.subr.bf16.mxu1 %v2541_v6  ;;  %6077 = vst [vmem:[#allocation3_spill] sm:$0xff] %v2985_v32  ;;  %6078 = vst [vmem:[#allocation4_spill] sm:$0xff] %v2992_v34  ;;  %v2997_v35 = vld [vmem:[%s5958_s1 + $0x28] sm:$0xff]  ;;  %v581_v36 = vmul.f32 %v2985_v32, %v2985_v32  ;;  %v584_v37 = vmul.f32 %v2992_v34, %v2992_v34  ;;  %v3013_v40 = vld [vmem:[%s5958_s1 + $0x18] sm:$0xff] }
   0xd   :  { %6079 = vst [vmem:[#allocation5_spill] sm:$0xff] %v2997_v35  ;;  %v585_v38 = vmul.f32 %v2997_v35, %v2997_v35  ;;  %6080 = vst [vmem:[#allocation6_spill] sm:$0xff] %v3008_v39  ;;  %v3018_v41 = vld [vmem:[%s5958_s1 + $0x30] sm:$0xff]  ;;  %v582_v42 = vmul.f32 %v3008_v39, %v3008_v39  ;;  %v583_v43 = vmul.f32 %v3013_v40, %v3013_v40  ;;  %v3027_v44 = vld [vmem:[%s5958_s1 + $0x38] sm:$0xff] }
   0xe   :  { %6081 = vst [vmem:[#allocation7_spill] sm:$0xff] %v3013_v40  ;;  %6082 = vst [vmem:[#allocation8_spill] sm:$0xff] %v3018_v41  ;;  %v586_v45 = vmul.f32 %v3018_v41, %v3018_v41  ;;  %v3034_v46 = vld [vmem:[%s5958_s1 + $0x40] sm:$0xff]  ;;  %v3039_v47 = vld [vmem:[%s5958_s1 + $0x48] sm:$0xff]  ;;  %v644_v48 = vadd.f32 %v581_v36, %v580_v33  ;;  %v587_v50 = vmul.f32 %v3027_v44, %v3027_v44 }
   0xf   :  { %394 = vmatpush1.bf16.msra.mxu0 %v2543_v7  ;;  %2514 = vmatpush1.bf16.msra.mxu1 %v2543_v7  ;;  %6083 = vst [vmem:[#allocation9_spill] sm:$0xff] %v3027_v44  ;;  %6084 = vst [vmem:[#allocation10_spill] sm:$0xff] %v3034_v46  ;;  %v650_v49 = vadd.f32 %v585_v38, %v584_v37  ;;  %v3046_v51 = vld [vmem:[%s5958_s1 + $0x50] sm:$0xff]  ;;  %v3051_v52 = vld [vmem:[%s5958_s1 + $0x58] sm:$0xff]  ;;  %v647_v55 = vadd.f32 %v583_v43, %v582_v42 }
  0x10   :  { %395 = vmatprep.subr.bf16.mxu0 %v2544_v8  ;;  %2499 = vmatprep.subr.bf16.mxu1 %v2544_v8  ;;  %6085 = vst [vmem:[#allocation11_spill] sm:$0xff] %v3039_v47  ;;  %6086 = vst [vmem:[#allocation12_spill] sm:$0xff] %v3046_v51  ;;  %v2570_v53 = vld [vmem:[%s5956_s3 + $0xc0] ss:$8 sps:$4 sm:$0xff]   ;;  %v2571_v54 = vld [vmem:[%s5956_s3 + $0xd4] ss:$8 sps:$4 sm:$0xff]   ;;  %v588_v56 = vmul.f32 %v3034_v46, %v3034_v46  ;;  %v589_v57 = vmul.f32 %v3039_v47, %v3039_v47 }
  0x11   :  { %6087 = vst [vmem:[#allocation13_spill] sm:$0xff] %v3051_v52  ;;  %645 = vadd.xlane.f32.xlu0 %v644_v48  ;;  %651 = vadd.xlane.f32.xlu1 %v650_v49  ;;  %v653_v58 = vadd.f32 %v587_v50, %v586_v45  ;;  %v590_v59 = vmul.f32 %v3046_v51, %v3046_v51  ;;  %v3070_v61 = vld [vmem:[%s5958_s1 + $0x60] sm:$0xff]  ;;  %v3075_v62 = vld [vmem:[%s5958_s1 + $0x68] sm:$0xff]  ;;  %v3080_v63 = vld [vmem:[%s5958_s1 + $0x70] sm:$0xff] }
  0x12   :  { %v591_v60 = vmul.f32 %v3051_v52, %v3051_v52  ;;  %6088 = vst [vmem:[#allocation14_spill] sm:$0xff] %v3070_v61  ;;  %6089 = vst [vmem:[#allocation15_spill] sm:$0xff] %v3075_v62  ;;  %v3085_v0 = vld [vmem:[%s5958_s1 + $0x78] sm:$0xff]  ;;  %v2574_v2 = vld [vmem:[%s5956_s3 + $0xe4] ss:$8 sps:$4 sm:$0xff]   ;;  %v656_v3 = vadd.f32 %v589_v57, %v588_v56  ;;  %v592_v4 = vmul.f32 %v3070_v61, %v3070_v61 }
  0x13   :  { %396 = vmatpush1.bf16.msra.mxu0 %v2546_v9  ;;  %2515 = vmatpush1.bf16.msra.mxu1 %v2546_v9  ;;  %6090 = vst [vmem:[#allocation16_spill] sm:$0xff] %v3080_v63  ;;  %6091 = vst [vmem:[#allocation17_spill] sm:$0xff] %v3085_v0  ;;  %v2573_v1 = vld [vmem:[%s5956_s3 + $0xd0] ss:$8 sps:$4 sm:$0xff]   ;;  %v593_v5 = vmul.f32 %v3075_v62, %v3075_v62  ;;  %v3100_v6 = vld [vmem:[%s5958_s1 + $0x80] sm:$0xff]  ;;  %v594_v8 = vmul.f32 %v3080_v63, %v3080_v63 }
  0x14   :  { %397 = vmatprep.subr.bf16.mxu0 %v2547_v10  ;;  %2500 = vmatprep.subr.bf16.mxu1 %v2547_v10  ;;  %6092 = vst [vmem:[#allocation18_spill] sm:$0xff] %v3100_v6  ;;  %v659_v7 = vadd.f32 %v591_v60, %v590_v59  ;;  %v595_v9 = vmul.f32 %v3085_v0, %v3085_v0  ;;  %v3109_v10 = vld [vmem:[%s5958_s1 + $0x88] sm:$0xff]  ;;  %v3166_v33 = vld [vmem:[%s5958_s1 + $0xb8] sm:$0xff]  ;;  %v3171_v36 = vld [vmem:[%s5957_s2 + $0x100] sm:$0xff] }
  0x15   :  { %648 = vadd.xlane.f32.xlu0 %v647_v55  ;;  %654 = vadd.xlane.f32.xlu1 %v653_v58  ;;  %6093 = vst [vmem:[#allocation19_spill] sm:$0xff] %v3109_v10  ;;  %v2576_v15 = vld [vmem:[%s5956_s3 + $0xe0] ss:$8 sps:$4 sm:$0xff]   ;;  %v597_v20 = vmul.f32 %v3109_v10, %v3109_v10  ;;  %6099 = vst [vmem:[#allocation25_spill] sm:$0xff] %v3166_v33  ;;  %v3176_v37 = vld [vmem:[%s5957_s2 + $0x110] sm:$0xff]  ;;  %v603_v55 = vmul.f32 %v3166_v33, %v3166_v33 }
  0x16   :  { %v3181_v38 = vld [vmem:[%s5957_s2 + $0x28] sm:$0xff]  ;;  %v3186_v42 = vld [vmem:[%s5957_s2 + $0x38] sm:$0xff]  ;;  %v3209_v56 = vld [vmem:[%s5958_s1 + $0xc0] sm:$0xff]  ;;  %v167_v60 = vpack.c.bf16 %v3176_v37, %v3171_v36 }
  0x17   :  { %398 = vmatpush1.bf16.msra.mxu0 %v2549_v11  ;;  %2516 = vmatpush1.bf16.msra.mxu1 %v2549_v11  ;;  %v3114_v11 = vld [vmem:[%s5958_s1 + $0x90] sm:$0xff]  ;;  %v3191_v43 = vld [vmem:[%s5957_s2 + $0x128] sm:$0xff]  ;;  %v3196_v45 = vld [vmem:[%s5957_s2 + $0x138] sm:$0xff]  ;;  %6100 = vst [vmem:[#allocation26_spill] sm:$0xff] %v3209_v56 }
  0x18   :  { %399 = vmatprep.subr.bf16.mxu0 %v2550_v12  ;;  %2501 = vmatprep.subr.bf16.mxu1 %v2550_v12  ;;  %6094 = vst [vmem:[#allocation20_spill] sm:$0xff] %v3114_v11  ;;  %v3119_v12 = vld [vmem:[%s5958_s1 + $0x98] sm:$0xff]  ;;  %v3214_v57 = vld [vmem:[%s5958_s1 + $0xc8] sm:$0xff]  ;;  %v3219_v58 = vld [vmem:[%s5958_s1 + $0xd0] sm:$0xff] }
  0x19   :  { %6095 = vst [vmem:[#allocation21_spill] sm:$0xff] %v3119_v12  ;;  %657 = vadd.xlane.f32.xlu0 %v656_v3  ;;  %660 = vadd.xlane.f32.xlu1 %v659_v7  ;;  %6101 = vst [vmem:[#allocation27_spill] sm:$0xff] %v3214_v57  ;;  %v170_v3 = vpack.c.bf16 %v3196_v45, %v3191_v43  ;;  %v606_v7 = vmul.f32 %v3219_v58, %v3219_v58  ;;  %v3521_v52 = vld [vmem:[%s5958_s1 + $0x180] sm:$0xff] }
  0x1a   :  { %6102 = vst [vmem:[#allocation28_spill] sm:$0xff] %v3219_v58  ;;  %v3345_v58 = vld [vmem:[%s5957_s2 + $0x40] sm:$0xff]  ;;  %6126 = vst [vmem:[#allocation52_spill] sm:$0xff] %v3521_v52 }
  0x1b   :  { %400 = vmatpush1.bf16.msra.mxu0 %v2552_v17  ;;  %2517 = vmatpush1.bf16.msra.mxu1 %v2552_v17  ;;  %v596_v17 = vmul.f32 %v3100_v6, %v3100_v6  ;;  %v3553_v51 = vld [vmem:[%s5957_s2 + $0x80] sm:$0xff] }
  0x1c   :  { %401 = vmatprep.subr.bf16.mxu0 %v2553_v19  ;;  %2502 = vmatprep.subr.bf16.mxu1 %v2553_v19  ;;  %v2577_v19 = vld [vmem:[%s5956_s3 + $0xf4] ss:$8 sps:$4 sm:$0xff]   ;;  %v3625_v35 = vld [vmem:[%s5958_s1 + $0x1c0] sm:$0xff] }
  0x1d   :  { %v668_v48 = vadd.f32 %v597_v20, %v596_v17  ;;  %v3255_v20 = vld [vmem:[%s5958_s1 + $0xe8] sm:$0xff]  ;;  %6137 = vst [vmem:[#allocation63_spill] sm:$0xff] %v3625_v35  ;;  %v3657_v34 = vld [vmem:[%s5957_s2 + $0xa0] sm:$0xff] }
  0x1e   :  { %6105 = vst [vmem:[#allocation31_spill] sm:$0xff] %v3255_v20 }
  0x1f   :  { %402 = vmatpush1.bf16.msra.mxu0 %v2555_v21  ;;  %2518 = vmatpush1.bf16.msra.mxu1 %v2555_v21  ;;  %v598_v21 = vmul.f32 %v3114_v11, %v3114_v11  ;;  %v3449_v11 = vld [vmem:[%s5957_s2 + $0x60] sm:$0xff] }
  0x20   :  { %403 = vmatprep.subr.bf16.mxu0 %v2556_v22  ;;  %2503 = vmatprep.subr.bf16.mxu1 %v2556_v22  ;;  %v599_v22 = vmul.f32 %v3119_v12, %v3119_v12  ;;  %v3417_v12 = vld [vmem:[%s5958_s1 + $0x140] sm:$0xff] }
  0x21   :  { %6116 = vst [vmem:[#allocation42_spill] sm:$0xff] %v3417_v12 }
  0x22   :  { %v671_v49 = vadd.f32 %v599_v22, %v598_v21  ;;  %v3260_v21 = vld [vmem:[%s5957_s2 + $0x30] sm:$0xff] }
  0x23   :  { %404 = vmatpush1.bf16.msra.mxu0 %v2558_v23  ;;  %2519 = vmatpush1.bf16.msra.mxu1 %v2558_v23  ;;  %v2579_v23 = vld [vmem:[%s5956_s3 + $0xf0] ss:$8 sps:$4 sm:$0xff]  }
  0x24   :  { %405 = vmatprep.subr.bf16.mxu0 %v2559_v24  ;;  %2504 = vmatprep.subr.bf16.mxu1 %v2559_v24  ;;  %v3141_v24 = vld [vmem:[%s5957_s2] sm:$0xff]  ;;  %v3265_v22 = vld [vmem:[%s5958_s1 + $0xf0] sm:$0xff] }
  0x25   :  { %6106 = vst [vmem:[#allocation32_spill] sm:$0xff] %v3265_v22 }
  0x27   :  { %406 = vmatpush1.bf16.msra.mxu0 %v2561_v25  ;;  %2520 = vmatpush1.bf16.msra.mxu1 %v2561_v25  ;;  %v3146_v25 = vld [vmem:[%s5957_s2 + $0x10] sm:$0xff] }
  0x28   :  { %407 = vmatprep.subr.bf16.mxu0 %v2562_v26  ;;  %2505 = vmatprep.subr.bf16.mxu1 %v2562_v26  ;;  %v662_v26 = vadd.f32 %v593_v5, %v592_v4  ;;  %v151_v59 = vpack.c.bf16 %v3146_v25, %v3141_v24  ;;  %v604_v4 = vmul.f32 %v3209_v56, %v3209_v56 }
  0x29   :  { %v605_v5 = vmul.f32 %v3214_v57, %v3214_v57 }
  0x2a   :  { %663 = vadd.xlane.f32.xlu0 %v662_v26  ;;  %v3275_v26 = vld [vmem:[%s5957_s2 + $0x120] sm:$0xff] }
  0x2b   :  { %408 = vmatpush1.bf16.msra.mxu0 %v2564_v27  ;;  %2521 = vmatpush1.bf16.msra.mxu1 %v2564_v27  ;;  %v665_v27 = vadd.f32 %v595_v9, %v594_v8  ;;  %v3243_v8 = vld [vmem:[%s5957_s2 + $0x20] sm:$0xff] }
  0x2c   :  { %409 = vmatprep.subr.bf16.mxu0 %v2565_v28  ;;  %2506 = vmatprep.subr.bf16.mxu1 %v2565_v28  ;;  %v3151_v28 = vld [vmem:[%s5958_s1 + $0xa0] sm:$0xff] }
  0x2d   :  { %6096 = vst [vmem:[#allocation22_spill] sm:$0xff] %v3151_v28  ;;  %v600_v50 = vmul.f32 %v3151_v28, %v3151_v28  ;;  %666 = vadd.xlane.f32.xlu1 %v665_v27  ;;  %v3280_v27 = vld [vmem:[%s5957_s2 + $0x130] sm:$0xff] }
  0x2e   :  { %669 = vadd.xlane.f32.xlu0 %v668_v48  ;;  %v3285_v48 = vld [vmem:[%s5957_s2 + $0x48] sm:$0xff] }
  0x2f   :  { %410 = vmatpush1.bf16.msra.mxu0 %v2567_v29  ;;  %2522 = vmatpush1.bf16.msra.mxu1 %v2567_v29  ;;  %v3156_v29 = vld [vmem:[%s5958_s1 + $0xa8] sm:$0xff] }
  0x30   :  { %411 = vmatprep.subr.bf16.mxu0 %v2568_v30  ;;  %2507 = vmatprep.subr.bf16.mxu1 %v2568_v30  ;;  %6097 = vst [vmem:[#allocation23_spill] sm:$0xff] %v3156_v29  ;;  %v3161_v30 = vld [vmem:[%s5958_s1 + $0xb0] sm:$0xff] }
  0x31   :  { %6098 = vst [vmem:[#allocation24_spill] sm:$0xff] %v3161_v30  ;;  %672 = vadd.xlane.f32.xlu1 %v671_v49  ;;  %v3290_v49 = vld [vmem:[%s5957_s2 + $0x58] sm:$0xff] }
  0x33   :  { %412 = vmatpush1.bf16.msra.mxu0 %v2570_v53  ;;  %2523 = vmatpush1.bf16.msra.mxu1 %v2570_v53  ;;  %v601_v53 = vmul.f32 %v3156_v29, %v3156_v29 }
  0x34   :  { %413 = vmatprep.subr.bf16.mxu0 %v2571_v54  ;;  %2508 = vmatprep.subr.bf16.mxu1 %v2571_v54  ;;  %v602_v54 = vmul.f32 %v3161_v30, %v3161_v30 }
  0x35   :  { %v674_v9 = vadd.f32 %v601_v53, %v600_v50  ;;  %v3295_v50 = vld [vmem:[%s5957_s2 + $0x148] sm:$0xff]  ;;  %v3300_v53 = vld [vmem:[%s5957_s2 + $0x158] sm:$0xff] }
  0x37   :  { %414 = vmatpush1.bf16.msra.mxu0 %v2573_v1  ;;  %2524 = vmatpush1.bf16.msra.mxu1 %v2573_v1  ;;  %v3228_v1 = vld [vmem:[%s5958_s1 + $0xd8] sm:$0xff] }
  0x38   :  { %415 = vmatprep.subr.bf16.mxu0 %v2574_v2  ;;  %2509 = vmatprep.subr.bf16.mxu1 %v2574_v2  ;;  %6103 = vst [vmem:[#allocation29_spill] sm:$0xff] %v3228_v1  ;;  %v154_v2 = vpack.c.bf16 %v3186_v42, %v3181_v38  ;;  %v607_v17 = vmul.f32 %v3228_v1, %v3228_v1  ;;  %v3313_v1 = vld [vmem:[%s5958_s1 + $0x100] sm:$0xff] }
  0x39   :  { %675 = vadd.xlane.f32.xlu0 %v674_v9  ;;  %6108 = vst [vmem:[#allocation34_spill] sm:$0xff] %v3313_v1  ;;  %v3327_v9 = vld [vmem:[%s5958_s1 + $0x110] sm:$0xff] }
  0x3a   :  { %6110 = vst [vmem:[#allocation36_spill] sm:$0xff] %v3327_v9  ;;  %v614_v56 = vmul.f32 %v3327_v9, %v3327_v9 }
  0x3b   :  { %416 = vmatpush1.bf16.msra.mxu0 %v2576_v15  ;;  %2525 = vmatpush1.bf16.msra.mxu1 %v2576_v15  ;;  %v677_v15 = vadd.f32 %v603_v55, %v602_v54  ;;  %v680_v54 = vadd.f32 %v605_v5, %v604_v4  ;;  %v3318_v4 = vld [vmem:[%s5958_s1 + $0x108] sm:$0xff]  ;;  %v153_v5 = vpack.c.bf16 %v3260_v21, %v3243_v8 }
  0x3c   :  { %417 = vmatprep.subr.bf16.mxu0 %v2577_v19  ;;  %2510 = vmatprep.subr.bf16.mxu1 %v2577_v19  ;;  %v3250_v19 = vld [vmem:[%s5958_s1 + $0xe0] sm:$0xff]  ;;  %6109 = vst [vmem:[#allocation35_spill] sm:$0xff] %v3318_v4 }
  0x3d   :  { %6104 = vst [vmem:[#allocation30_spill] sm:$0xff] %v3250_v19  ;;  %v608_v55 = vmul.f32 %v3250_v19, %v3250_v19  ;;  %678 = vadd.xlane.f32.xlu1 %v677_v15  ;;  %v3332_v15 = vld [vmem:[%s5958_s1 + $0x118] sm:$0xff]  ;;  %v613_v19 = vmul.f32 %v3318_v4, %v3318_v4  ;;  %681 = vadd.xlane.f32.xlu0 %v680_v54  ;;  %v3359_v4 = vld [vmem:[%s5958_s1 + $0x128] sm:$0xff]  ;;  %v3364_v54 = vld [vmem:[%s5957_s2 + $0x50] sm:$0xff] }
  0x3e   :  { %6111 = vst [vmem:[#allocation37_spill] sm:$0xff] %v3332_v15  ;;  %6113 = vst [vmem:[#allocation39_spill] sm:$0xff] %v3359_v4  ;;  %v617_v33 = vmul.f32 %v3359_v4, %v3359_v4  ;;  %v620_v4 = vmul.f32 %v3417_v12, %v3417_v12 }
  0x3f   :  { %418 = vmatpush1.bf16.msra.mxu0 %v2579_v23  ;;  %2526 = vmatpush1.bf16.msra.mxu1 %v2579_v23  ;;  %v3270_v23 = vld [vmem:[%s5958_s1 + $0xf8] sm:$0xff] }
  0x40   :  { %6107 = vst [vmem:[#allocation33_spill] sm:$0xff] %v3270_v23 }
  0x42   :  { %420 = vmatmul.mubr.bf16.vlgmr.msra.gmra.mrb[0].mxu0 %v151_v59  ;;  %500 = vmatmul.mubr.bf16.vlgmr.msra.gmra.mrb[0].mxu1 %v167_v60  ;;  %v609_v59 = vmul.f32 %v3255_v20, %v3255_v20  ;;  %v683_v60 = vadd.f32 %v607_v17, %v606_v7  ;;  %v169_v7 = vpack.c.bf16 %v3280_v27, %v3275_v26 }
  0x43   :  { %429 = vmatprep.mubr.bf16.mxu0 %v154_v2  ;;  %509 = vmatprep.mubr.bf16.mxu1 %v170_v3  ;;  %v610_v2 = vmul.f32 %v3265_v22, %v3265_v22  ;;  %v611_v3 = vmul.f32 %v3270_v23, %v3270_v23  ;;  %v156_v17 = vpack.c.bf16 %v3290_v49, %v3285_v48 }
  0x44   :  { %v172_v23 = vpack.c.bf16 %v3300_v53, %v3295_v50  ;;  %v686_v22 = vadd.f32 %v609_v59, %v608_v55  ;;  %v612_v20 = vmul.f32 %v3313_v1, %v3313_v1  ;;  %684 = vadd.xlane.f32.xlu1 %v683_v60  ;;  %v615_v55 = vmul.f32 %v3332_v15, %v3332_v15  ;;  %v3354_v59 = vld [vmem:[%s5958_s1 + $0x120] sm:$0xff]  ;;  %v3369_v60 = vld [vmem:[%s5958_s1 + $0x130] sm:$0xff]  ;;  %v3404_v15 = vld [vmem:[%s5957_s2 + $0x178] sm:$0xff] }
  0x45   :  { %v689_v57 = vadd.f32 %v611_v3, %v610_v2  ;;  %6112 = vst [vmem:[#allocation38_spill] sm:$0xff] %v3354_v59  ;;  %6114 = vst [vmem:[#allocation40_spill] sm:$0xff] %v3369_v60  ;;  %v3374_v2 = vld [vmem:[%s5958_s1 + $0x138] sm:$0xff]  ;;  %v3379_v3 = vld [vmem:[%s5957_s2 + $0x140] sm:$0xff]  ;;  %v616_v1 = vmul.f32 %v3354_v59, %v3354_v59  ;;  %v618_v29 = vmul.f32 %v3369_v60, %v3369_v60 }
  0x46   :  { %6115 = vst [vmem:[#allocation41_spill] sm:$0xff] %v3374_v2  ;;  %v692_v9 = vadd.f32 %v613_v19, %v612_v20  ;;  %687 = vadd.xlane.f32.xlu0 %v686_v22  ;;  %v695_v30 = vadd.f32 %v615_v55, %v614_v56  ;;  %v619_v28 = vmul.f32 %v3374_v2, %v3374_v2  ;;  %v3422_v19 = vld [vmem:[%s5958_s1 + $0x148] sm:$0xff]  ;;  %v3431_v20 = vld [vmem:[%s5958_s1 + $0x150] sm:$0xff]  ;;  %v3436_v22 = vld [vmem:[%s5958_s1 + $0x158] sm:$0xff] }
  0x47   :  { %6117 = vst [vmem:[#allocation43_spill] sm:$0xff] %v3422_v19  ;;  %6118 = vst [vmem:[#allocation44_spill] sm:$0xff] %v3431_v20  ;;  %v698_v60 = vadd.f32 %v617_v33, %v616_v1  ;;  %v621_v59 = vmul.f32 %v3422_v19, %v3422_v19  ;;  %v622_v6 = vmul.f32 %v3431_v20, %v3431_v20  ;;  %v3458_v1 = vld [vmem:[%s5958_s1 + $0x160] sm:$0xff]  ;;  %v3463_v19 = vld [vmem:[%s5958_s1 + $0x168] sm:$0xff] }
  0x48   :  { %690 = vadd.xlane.f32.xlu1 %v689_v57  ;;  %v155_v57 = vpack.c.bf16 %v3364_v54, %v3345_v58  ;;  %6119 = vst [vmem:[#allocation45_spill] sm:$0xff] %v3436_v22  ;;  %v701_v10 = vadd.f32 %v619_v28, %v618_v29  ;;  %v623_v33 = vmul.f32 %v3436_v22, %v3436_v22  ;;  %6120 = vst [vmem:[#allocation46_spill] sm:$0xff] %v3458_v1  ;;  %v3468_v28 = vld [vmem:[%s5957_s2 + $0x70] sm:$0xff]  ;;  %v3508_v22 = vld [vmem:[%s5957_s2 + $0x198] sm:$0xff] }
  0x49   :  { %6121 = vst [vmem:[#allocation47_spill] sm:$0xff] %v3463_v19  ;;  %v3473_v29 = vld [vmem:[%s5958_s1 + $0x170] sm:$0xff]  ;;  %6125 = vst [vmem:[#allocation51_spill] sm:$0xff] %v3508_v22  ;;  %v704_v20 = vadd.f32 %v621_v59, %v620_v4  ;;  %v624_v12 = vmul.f32 %v3458_v1, %v3458_v1  ;;  %v625_v0 = vmul.f32 %v3463_v19, %v3463_v19  ;;  %v3526_v4 = vld [vmem:[%s5958_s1 + $0x188] sm:$0xff] }
  0x4a   :  { %430 = vmatmul.mubr.bf16.gmra.mrb[4].mxu0 %v153_v5  ;;  %510 = vmatmul.mubr.bf16.gmra.mrb[4].mxu1 %v169_v7  ;;  %v3384_v5 = vld [vmem:[%s5957_s2 + $0x150] sm:$0xff]  ;;  %v3389_v7 = vld [vmem:[%s5957_s2 + $0x68] sm:$0xff]  ;;  %6122 = vst [vmem:[#allocation48_spill] sm:$0xff] %v3473_v29  ;;  %v707_v63 = vadd.f32 %v623_v33, %v622_v6  ;;  %v626_v62 = vmul.f32 %v3473_v29, %v3473_v29  ;;  %6127 = vst [vmem:[#allocation53_spill] sm:$0xff] %v3526_v4 }
  0x4b   :  { %439 = vmatprep.mubr.bf16.mxu0 %v156_v17  ;;  %519 = vmatprep.mubr.bf16.mxu1 %v172_v23  ;;  %v3394_v17 = vld [vmem:[%s5957_s2 + $0x78] sm:$0xff]  ;;  %v3399_v23 = vld [vmem:[%s5957_s2 + $0x168] sm:$0xff]  ;;  %v171_v56 = vpack.c.bf16 %v3384_v5, %v3379_v3  ;;  %v3535_v59 = vld [vmem:[%s5958_s1 + $0x190] sm:$0xff]  ;;  %v710_v29 = vadd.f32 %v625_v0, %v624_v12  ;;  %v628_v19 = vmul.f32 %v3521_v52, %v3521_v52 }
  0x4c   :  { %v158_v55 = vpack.c.bf16 %v3394_v17, %v3389_v7  ;;  %v174_v2 = vpack.c.bf16 %v3404_v15, %v3399_v23  ;;  %693 = vadd.xlane.f32.xlu0 %v692_v9  ;;  %696 = vadd.xlane.f32.xlu1 %v695_v30  ;;  %v3478_v30 = vld [vmem:[%s5958_s1 + $0x178] sm:$0xff]  ;;  %v3483_v9 = vld [vmem:[%s5957_s2 + $0x160] sm:$0xff]  ;;  %6128 = vst [vmem:[#allocation54_spill] sm:$0xff] %v3535_v59 }
  0x4d   :  { %6123 = vst [vmem:[#allocation49_spill] sm:$0xff] %v3478_v30  ;;  %v627_v61 = vmul.f32 %v3478_v30, %v3478_v30  ;;  %v629_v1 = vmul.f32 %v3526_v4, %v3526_v4  ;;  %v630_v46 = vmul.f32 %v3535_v59, %v3535_v59  ;;  %v3562_v12 = vld [vmem:[%s5958_s1 + $0x1a0] sm:$0xff]  ;;  %v3567_v4 = vld [vmem:[%s5958_s1 + $0x1a8] sm:$0xff] }
  0x4e   :  { %6130 = vst [vmem:[#allocation56_spill] sm:$0xff] %v3562_v12  ;;  %6131 = vst [vmem:[#allocation57_spill] sm:$0xff] %v3567_v4  ;;  %v632_v52 = vmul.f32 %v3562_v12, %v3562_v12  ;;  %v633_v44 = vmul.f32 %v3567_v4, %v3567_v4  ;;  %v636_v4 = vmul.f32 %v3625_v35, %v3625_v35 }
  0x4f   :  { %v713_v47 = vadd.f32 %v627_v61, %v626_v62  ;;  %v3572_v61 = vld [vmem:[%s5957_s2 + $0x90] sm:$0xff]  ;;  %v716_v59 = vadd.f32 %v629_v1, %v628_v19  ;;  %v3630_v19 = vld [vmem:[%s5958_s1 + $0x1c8] sm:$0xff] }
  0x50   :  { %699 = vadd.xlane.f32.xlu0 %v698_v60  ;;  %702 = vadd.xlane.f32.xlu1 %v701_v10  ;;  %v157_v10 = vpack.c.bf16 %v3468_v28, %v3449_v11  ;;  %v3540_v60 = vld [vmem:[%s5958_s1 + $0x198] sm:$0xff]  ;;  %v3577_v62 = vld [vmem:[%s5958_s1 + $0x1b0] sm:$0xff]  ;;  %6138 = vst [vmem:[#allocation64_spill] sm:$0xff] %v3630_v19  ;;  %v637_v12 = vmul.f32 %v3630_v19, %v3630_v19  ;;  %v3671_v19 = vld [vmem:[%s5958_s1 + $0x1e8] sm:$0xff] }
  0x51   :  { %6129 = vst [vmem:[#allocation55_spill] sm:$0xff] %v3540_v60  ;;  %v631_v0 = vmul.f32 %v3540_v60, %v3540_v60  ;;  %6132 = vst [vmem:[#allocation58_spill] sm:$0xff] %v3577_v62  ;;  %v3612_v60 = vld [vmem:[%s5957_s2 + $0x1b8] sm:$0xff]  ;;  %v634_v40 = vmul.f32 %v3577_v62, %v3577_v62  ;;  %v3639_v1 = vld [vmem:[%s5958_s1 + $0x1d0] sm:$0xff]  ;;  %v722_v62 = vadd.f32 %v633_v44, %v632_v52 }
  0x52   :  { %440 = vmatmul.mubr.bf16.gmra.mrb[8].mxu0 %v155_v57  ;;  %520 = vmatmul.mubr.bf16.gmra.mrb[8].mxu1 %v171_v56  ;;  %v3488_v57 = vld [vmem:[%s5957_s2 + $0x170] sm:$0xff]  ;;  %v3493_v56 = vld [vmem:[%s5957_s2 + $0x88] sm:$0xff]  ;;  %6136 = vst [vmem:[#allocation62_spill] sm:$0xff] %v3612_v60  ;;  %6139 = vst [vmem:[#allocation65_spill] sm:$0xff] %v3639_v1  ;;  %v638_v31 = vmul.f32 %v3639_v1, %v3639_v1  ;;  %v728_v1 = vadd.f32 %v637_v12, %v636_v4 }
  0x53   :  { %449 = vmatprep.mubr.bf16.mxu0 %v158_v55  ;;  %529 = vmatprep.mubr.bf16.mxu1 %v174_v2  ;;  %v3498_v55 = vld [vmem:[%s5957_s2 + $0x98] sm:$0xff]  ;;  %v3503_v2 = vld [vmem:[%s5957_s2 + $0x188] sm:$0xff]  ;;  %v173_v6 = vpack.c.bf16 %v3488_v57, %v3483_v9  ;;  %v719_v41 = vadd.f32 %v631_v0, %v630_v46  ;;  %v3666_v52 = vld [vmem:[%s5958_s1 + $0x1e0] sm:$0xff]  ;;  %6142 = vst [vmem:[#allocation68_spill] sm:$0xff] %v3671_v19 }
  0x54   :  { %6124 = vst [vmem:[#allocation50_spill] sm:$0xff] %v3503_v2  ;;  %v160_v33 = vpack.c.bf16 %v3498_v55, %v3493_v56  ;;  %v176_v30 = vpack.c.bf16 %v3508_v22, %v3503_v2  ;;  %705 = vadd.xlane.f32.xlu0 %v704_v20  ;;  %708 = vadd.xlane.f32.xlu1 %v707_v63  ;;  %v3582_v63 = vld [vmem:[%s5958_s1 + $0x1b8] sm:$0xff]  ;;  %v3587_v20 = vld [vmem:[%s5957_s2 + $0x180] sm:$0xff]  ;;  %6141 = vst [vmem:[#allocation67_spill] sm:$0xff] %v3666_v52 }
  0x55   :  { %6133 = vst [vmem:[#allocation59_spill] sm:$0xff] %v3582_v63  ;;  %v635_v39 = vmul.f32 %v3582_v63, %v3582_v63  ;;  %v640_v35 = vmul.f32 %v3666_v52, %v3666_v52  ;;  %v3745_v52 = vld [vmem:[%s5957_s2 + $0xc0] sm:$0xff] }
  0x57   :  { %v725_v32 = vadd.f32 %v635_v39, %v634_v40  ;;  %v3676_v39 = vld [vmem:[%s5957_s2 + $0xb0] sm:$0xff] }
  0x58   :  { %711 = vadd.xlane.f32.xlu0 %v710_v29  ;;  %714 = vadd.xlane.f32.xlu1 %v713_v47  ;;  %v159_v47 = vpack.c.bf16 %v3572_v61, %v3553_v51  ;;  %v3644_v29 = vld [vmem:[%s5958_s1 + $0x1d8] sm:$0xff]  ;;  %v3681_v40 = vld [vmem:[%s5958_s1 + $0x1f0] sm:$0xff]  ;;  %v161_v2 = vpack.c.bf16 %v3676_v39, %v3657_v34 }
  0x59   :  { %6140 = vst [vmem:[#allocation66_spill] sm:$0xff] %v3644_v29  ;;  %v639_v44 = vmul.f32 %v3644_v29, %v3644_v29  ;;  %6143 = vst [vmem:[#allocation69_spill] sm:$0xff] %v3681_v40  ;;  %v3716_v29 = vld [vmem:[%s5957_s2 + $0x1d8] sm:$0xff]  ;;  %v642_v22 = vmul.f32 %v3681_v40, %v3681_v40 }
  0x5a   :  { %450 = vmatmul.mubr.bf16.gmra.mrb[12].mxu0 %v157_v10  ;;  %530 = vmatmul.mubr.bf16.gmra.mrb[12].mxu1 %v173_v6  ;;  %v3592_v10 = vld [vmem:[%s5957_s2 + $0x190] sm:$0xff]  ;;  %v3597_v6 = vld [vmem:[%s5957_s2 + $0xa8] sm:$0xff] }
  0x5b   :  { %459 = vmatprep.mubr.bf16.mxu0 %v160_v33  ;;  %539 = vmatprep.mubr.bf16.mxu1 %v176_v30  ;;  %6134 = vst [vmem:[#allocation60_spill] sm:$0xff] %v3592_v10  ;;  %v3602_v33 = vld [vmem:[%s5957_s2 + $0xb8] sm:$0xff]  ;;  %v3607_v30 = vld [vmem:[%s5957_s2 + $0x1a8] sm:$0xff]  ;;  %v175_v46 = vpack.c.bf16 %v3592_v10, %v3587_v20 }
  0x5c   :  { %6135 = vst [vmem:[#allocation61_spill] sm:$0xff] %v3607_v30  ;;  %v162_v0 = vpack.c.bf16 %v3602_v33, %v3597_v6  ;;  %v178_v63 = vpack.c.bf16 %v3612_v60, %v3607_v30  ;;  %717 = vadd.xlane.f32.xlu0 %v716_v59  ;;  %720 = vadd.xlane.f32.xlu1 %v719_v41  ;;  %v3686_v41 = vld [vmem:[%s5958_s1 + $0x1f8] sm:$0xff]  ;;  %v3691_v59 = vld [vmem:[%s5957_s2 + $0x1a0] sm:$0xff] }
  0x5d   :  { %6144 = vst [vmem:[#allocation70_spill] sm:$0xff] %v3686_v41  ;;  %v641_v60 = vmul.f32 %v3671_v19, %v3671_v19  ;;  %v731_v30 = vadd.f32 %v639_v44, %v638_v31  ;;  %v643_v10 = vmul.f32 %v3686_v41, %v3686_v41  ;;  %v868_v31 = vmul.f32 %v3141_v24, %v3141_v24  ;;  %v3765_v24 = vld [vmem:[%s5957_s2 + $0xe8] sm:$0xff] }
  0x5e   :  { %v871_v44 = vmul.f32 %v2925_v14, %v2925_v14  ;;  %v870_v19 = vmul.f32 %v3146_v25, %v3146_v25  ;;  %v3755_v14 = vld [vmem:[%s5957_s2 + $0x1c0] sm:$0xff]  ;;  %v3770_v25 = vld [vmem:[%s5957_s2 + $0xf8] sm:$0xff] }
  0x5f   :  { %v734_v41 = vadd.f32 %v641_v60, %v640_v35  ;;  %v737_v40 = vadd.f32 %v643_v10, %v642_v22  ;;  %v3760_v35 = vld [vmem:[%s5957_s2 + $0x1d0] sm:$0xff]  ;;  %v3775_v22 = vld [vmem:[%s5957_s2 + $0x1e8] sm:$0xff]  ;;  %v872_v10 = vmul.f32 %v3243_v8, %v3243_v8  ;;  %v166_v8 = vpack.c.bf16 %v3770_v25, %v3765_v24 }
  0x60   :  { %723 = vadd.xlane.f32.xlu0 %v722_v62  ;;  %726 = vadd.xlane.f32.xlu1 %v725_v32  ;;  %v869_v32 = vmul.f32 %v2920_v13, %v2920_v13  ;;  %v3750_v13 = vld [vmem:[%s5957_s2 + $0xd0] sm:$0xff] }
  0x62   :  { %460 = vmatmul.mubr.bf16.gmra.mrb[16].mxu0 %v159_v47  ;;  %540 = vmatmul.mubr.bf16.gmra.mrb[16].mxu1 %v175_v46  ;;  %v3696_v47 = vld [vmem:[%s5957_s2 + $0x1b0] sm:$0xff]  ;;  %v3701_v46 = vld [vmem:[%s5957_s2 + $0xc8] sm:$0xff]  ;;  %v932_v60 = vadd.f32 %v869_v32, %v868_v31  ;;  %v179_v31 = vpack.c.bf16 %v3760_v35, %v3755_v14  ;;  %v879_v32 = vmul.f32 %v3290_v49, %v3290_v49 }
  0x63   :  { %469 = vmatprep.mubr.bf16.mxu0 %v162_v0  ;;  %549 = vmatprep.mubr.bf16.mxu1 %v178_v63  ;;  %v3706_v0 = vld [vmem:[%s5957_s2 + $0xd8] sm:$0xff]  ;;  %v3711_v63 = vld [vmem:[%s5957_s2 + $0x1c8] sm:$0xff]  ;;  %v177_v4 = vpack.c.bf16 %v3696_v47, %v3691_v59  ;;  %v3820_v49 = vld [vmem:[%s5957_s2 + $0x1f0] sm:$0xff] }
  0x64   :  { %v164_v12 = vpack.c.bf16 %v3706_v0, %v3701_v46  ;;  %v180_v62 = vpack.c.bf16 %v3716_v29, %v3711_v63  ;;  %729 = vadd.xlane.f32.xlu0 %v728_v1  ;;  %732 = vadd.xlane.f32.xlu1 %v731_v30  ;;  %v873_v30 = vmul.f32 %v3181_v38, %v3181_v38 }
  0x65   :  { %v935_v1 = vadd.f32 %v871_v44, %v870_v19  ;;  %v876_v19 = vmul.f32 %v3345_v58, %v3345_v58  ;;  %v115_v44 = vld [vmem:[%s5957_s2 + $0xe0] sm:$0xff]  ;;  %v117_v58 = vld [vmem:[%s5957_s2 + $0xf0] sm:$0xff] }
  0x68   :  { %735 = vadd.xlane.f32.xlu0 %v734_v41  ;;  %738 = vadd.xlane.f32.xlu1 %v737_v40  ;;  %v938_v40 = vadd.f32 %v873_v30, %v872_v10  ;;  %v878_v41 = vmul.f32 %v3364_v54, %v3364_v54  ;;  %v881_v10 = vmul.f32 %v3389_v7, %v3389_v7 }
  0x69   :  { %v885_v7 = vmul.f32 %v3493_v56, %v3493_v56 }
  0x6a   :  { %470 = vmatmul.mubr.bf16.gmra.mrb[20].mxu0 %v161_v2  ;;  %550 = vmatmul.mubr.bf16.gmra.mrb[20].mxu1 %v177_v4  ;;  %v3780_v2 = vld [vmem:[%s5957_s2 + $0x1f8] sm:$0xff]  ;;  %v874_v4 = vmul.f32 %v3260_v21, %v3260_v21  ;;  %v877_v21 = vmul.f32 %v3285_v48, %v3285_v48  ;;  %v3815_v48 = vld [vmem:[%s5957_s2 + $0x1e0] sm:$0xff]  ;;  %v947_v30 = vadd.f32 %v879_v32, %v878_v41 }
  0x6b   :  { %479 = vmatprep.mubr.bf16.mxu0 %v164_v12  ;;  %559 = vmatprep.mubr.bf16.mxu1 %v180_v62  ;;  %v875_v12 = vmul.f32 %v3186_v42, %v3186_v42  ;;  %v163_v62 = vpack.c.bf16 %v3750_v13, %v3745_v52  ;;  %v182_v38 = vpack.c.bf16 %v3780_v2, %v3775_v22 }
  0x6c   :  { %933 = vadd.xlane.f32.xlu0 %v932_v60  ;;  %936 = vadd.xlane.f32.xlu1 %v935_v1  ;;  %v944_v54 = vadd.f32 %v877_v21, %v876_v19  ;;  %v880_v60 = vmul.f32 %v3449_v11, %v3449_v11  ;;  %v882_v1 = vmul.f32 %v3468_v28, %v3468_v28 }
  0x6d   :  { %v941_v42 = vadd.f32 %v875_v12, %v874_v4  ;;  %v883_v4 = vmul.f32 %v3394_v17, %v3394_v17  ;;  %v165_v12 = vpack.c.bf16 %v117_v58, %v115_v44  ;;  %v884_v11 = vmul.f32 %v3553_v51, %v3553_v51 }
  0x6e   :  { %v886_v28 = vmul.f32 %v3572_v61, %v3572_v61  ;;  %v887_v17 = vmul.f32 %v3498_v55, %v3498_v55  ;;  %v889_v51 = vmul.f32 %v3597_v6, %v3597_v6  ;;  %v890_v19 = vmul.f32 %v3676_v39, %v3676_v39 }
  0x6f   :  { %v891_v61 = vmul.f32 %v3602_v33, %v3602_v33  ;;  %v892_v55 = vmul.f32 %v3745_v52, %v3745_v52  ;;  %v894_v6 = vmul.f32 %v3750_v13, %v3750_v13  ;;  %v895_v41 = vmul.f32 %v3706_v0, %v3706_v0 }
  0x70   :  { %939 = vadd.xlane.f32.xlu0 %v938_v40  ;;  %942 = vadd.xlane.f32.xlu1 %v941_v42  ;;  %v888_v40 = vmul.f32 %v3657_v34, %v3657_v34  ;;  %v959_v56 = vadd.f32 %v887_v17, %v886_v28  ;;  %v893_v42 = vmul.f32 %v3701_v46, %v3701_v46  ;;  %v6147_v28 = vld [vmem:[#allocation51_spill] sm:$0xff] }
  0x71   :  { %v965_v34 = vadd.f32 %v891_v61, %v890_v19  ;;  %v896_v32 = vmul.f32 %v115_v44, %v115_v44  ;;  %v897_v33 = vmul.f32 %v3765_v24, %v3765_v24  ;;  %v971_v52 = vadd.f32 %v895_v41, %v894_v6 }
  0x72   :  { %480 = vmatmul.mubr.bf16.gmra.mrb[24].mxu0 %v163_v62  ;;  %560 = vmatmul.mubr.bf16.gmra.mrb[24].mxu1 %v179_v31  ;;  %v181_v62 = vpack.c.bf16 %v3820_v49, %v3815_v48  ;;  %v950_v31 = vadd.f32 %v881_v10, %v880_v60  ;;  %v962_v21 = vadd.f32 %v889_v51, %v888_v40 }
  0x73   :  { %489 = vmatprep.mubr.bf16.mxu0 %v166_v8  ;;  %569 = vmatprep.mubr.bf16.mxu1 %v182_v38  ;;  %v953_v8 = vadd.f32 %v883_v4, %v882_v1  ;;  %v956_v38 = vadd.f32 %v885_v7, %v884_v11  ;;  %v968_v39 = vadd.f32 %v893_v42, %v892_v55  ;;  %v6145_v11 = vld [vmem:[#allocation50_spill] sm:$0xff] }
  0x74   :  { %945 = vadd.xlane.f32.xlu0 %v944_v54  ;;  %948 = vadd.xlane.f32.xlu1 %v947_v30  ;;  %v898_v54 = vmul.f32 %v117_v58, %v117_v58  ;;  %v899_v46 = vmul.f32 %v3770_v25, %v3770_v25  ;;  %v974_v60 = vadd.f32 %v897_v33, %v896_v32 }
  0x75   :  { %v900_v10 = vmul.f32 %v3171_v36, %v3171_v36  ;;  %v901_v13 = vmul.f32 %v2932_v16, %v2932_v16  ;;  %v902_v24 = vmul.f32 %v3176_v37, %v3176_v37  ;;  %v903_v44 = vmul.f32 %v2940_v18, %v2940_v18 }
  0x76   :  { %v977_v0 = vadd.f32 %v899_v46, %v898_v54  ;;  %v904_v25 = vmul.f32 %v3275_v26, %v3275_v26  ;;  %v905_v30 = vmul.f32 %v3191_v43, %v3191_v43  ;;  %v906_v16 = vmul.f32 %v3280_v27, %v3280_v27 }
  0x77   :  { %v980_v58 = vadd.f32 %v901_v13, %v900_v10  ;;  %v983_v36 = vadd.f32 %v903_v44, %v902_v24  ;;  %v907_v1 = vmul.f32 %v3196_v45, %v3196_v45  ;;  %v908_v18 = vmul.f32 %v3379_v3, %v3379_v3 }
  0x78   :  { %951 = vadd.xlane.f32.xlu0 %v950_v31  ;;  %954 = vadd.xlane.f32.xlu1 %v953_v8  ;;  %v986_v37 = vadd.f32 %v905_v30, %v904_v25  ;;  %v909_v4 = vmul.f32 %v3295_v50, %v3295_v50  ;;  %v910_v43 = vmul.f32 %v3384_v5, %v3384_v5 }
  0x79   :  { %v989_v26 = vadd.f32 %v907_v1, %v906_v16  ;;  %v912_v45 = vmul.f32 %v3483_v9, %v3483_v9  ;;  %v914_v50 = vmul.f32 %v3488_v57, %v3488_v57  ;;  %v915_v31 = vmul.f32 %v3404_v15, %v3404_v15  ;;  %v6151_v1 = vld [vmem:[#allocation3_spill] sm:$0xff] }
  0x7a   :  { %490 = vmatmul.mubr.bf16.gmra.mrb[28].mxu0 %v165_v12  ;;  %570 = vmatmul.mubr.bf16.gmra.mrb[28].mxu1 %v181_v62  ;;  %v911_v12 = vmul.f32 %v3300_v53, %v3300_v53  ;;  %v992_v27 = vadd.f32 %v909_v4, %v908_v18  ;;  %v913_v62 = vmul.f32 %v3399_v23, %v3399_v23  ;;  %v6146_v23 = vld [vmem:[#allocation60_spill] sm:$0xff] }
  0x7b   :  { %v916_v53 = vmul.f32 %v3587_v20, %v3587_v20  ;;  %v917_v7 = vmul.f32 %v6145_v11, %v6145_v11  ;;  %v1001_v9 = vadd.f32 %v915_v31, %v914_v50  ;;  %v918_v8 = vmul.f32 %v6146_v23, %v6146_v23  ;;  %v6152_v18 = vld [vmem:[#allocation4_spill] sm:$0xff] }
  0x7c   :  { %957 = vadd.xlane.f32.xlu0 %v956_v38  ;;  %960 = vadd.xlane.f32.xlu1 %v959_v56  ;;  %v995_v3 = vadd.f32 %v911_v12, %v910_v43  ;;  %v998_v5 = vadd.f32 %v913_v62, %v912_v45  ;;  %v919_v17 = vmul.f32 %v6147_v28, %v6147_v28  ;;  %v6148_v38 = vld [vmem:[#allocation61_spill] sm:$0xff]  ;;  %v6149_v56 = vld [vmem:[#allocation62_spill] sm:$0xff]  ;;  %v6156_v23 = vld [vmem:[#allocation8_spill] sm:$0xff] }
  0x7d   :  { %v1004_v57 = vadd.f32 %v917_v7, %v916_v53  ;;  %v920_v15 = vmul.f32 %v3691_v59, %v3691_v59  ;;  %v921_v40 = vmul.f32 %v6148_v38, %v6148_v38  ;;  %v922_v51 = vmul.f32 %v3696_v47, %v3696_v47  ;;  %v6154_v53 = vld [vmem:[#allocation6_spill] sm:$0xff]  ;;  %v6155_v7 = vld [vmem:[#allocation7_spill] sm:$0xff]  ;;  %v6157_v28 = vld [vmem:[#allocation9_spill] sm:$0xff] }
  0x7e   :  { %v1007_v20 = vadd.f32 %v919_v17, %v918_v8  ;;  %v923_v19 = vmul.f32 %v6149_v56, %v6149_v56  ;;  %v924_v61 = vmul.f32 %v3755_v14, %v3755_v14  ;;  %v926_v59 = vmul.f32 %v3760_v35, %v3760_v35 }
  0x7f   :  { %v927_v55 = vmul.f32 %v3716_v29, %v3716_v29  ;;  %v1010_v42 = vadd.f32 %v921_v40, %v920_v15  ;;  %v928_v41 = vmul.f32 %v3815_v48, %v3815_v48  ;;  %v930_v14 = vmul.f32 %v3820_v49, %v3820_v49 }
  0x80   :  { %963 = vadd.xlane.f32.xlu0 %v962_v21  ;;  %966 = vadd.xlane.f32.xlu1 %v965_v34  ;;  %v925_v21 = vmul.f32 %v3711_v63, %v3711_v63  ;;  %v1013_v34 = vadd.f32 %v923_v19, %v922_v51  ;;  %v929_v63 = vmul.f32 %v3775_v22, %v3775_v22 }
  0x81   :  { %v1019_v6 = vadd.f32 %v927_v55, %v926_v59  ;;  %v931_v29 = vmul.f32 %v3780_v2, %v3780_v2  ;;  %v6159_v59 = vld [vmem:[#allocation11_spill] sm:$0xff] }
  0x82   :  { %v1016_v47 = vadd.f32 %v925_v21, %v924_v61  ;;  %v1022_v35 = vadd.f32 %v929_v63, %v928_v41  ;;  %v6158_v61 = vld [vmem:[#allocation10_spill] sm:$0xff] }
  0x84   :  { %969 = vadd.xlane.f32.xlu0 %v968_v39  ;;  %972 = vadd.xlane.f32.xlu1 %v971_v52  ;;  %v1025_v39 = vadd.f32 %v931_v29, %v930_v14 }
  0x88   :  { %975 = vadd.xlane.f32.xlu0 %v974_v60  ;;  %978 = vadd.xlane.f32.xlu1 %v977_v0 }
  0x8c   :  { %981 = vadd.xlane.f32.xlu0 %v980_v58  ;;  %984 = vadd.xlane.f32.xlu1 %v983_v36  ;;  %v6150_v36 = vld [vmem:[#allocation2_spill] sm:$0xff] }
  0x90   :  { %987 = vadd.xlane.f32.xlu0 %v986_v37  ;;  %990 = vadd.xlane.f32.xlu1 %v989_v26  ;;  %v6153_v26 = vld [vmem:[#allocation5_spill] sm:$0xff] }
  0x94   :  { %993 = vadd.xlane.f32.xlu0 %v992_v27  ;;  %996 = vadd.xlane.f32.xlu1 %v995_v3 }
  0x98   :  { %999 = vadd.xlane.f32.xlu0 %v998_v5  ;;  %1002 = vadd.xlane.f32.xlu1 %v1001_v9 }
  0x9c   :  { %1005 = vadd.xlane.f32.xlu0 %v1004_v57  ;;  %1008 = vadd.xlane.f32.xlu1 %v1007_v20 }
  0x9e   :  { %v646_v32 = vpop.xlane.xlu0 %645  ;;  %v652_v33 = vpop.xlane.xlu1 %651 }
  0x9f   :  { %v740_v48 = vmax.f32 %v646_v32, 1e-24  ;;  %v742_v52 = vmax.f32 %v652_v33, 1e-24 }
  0xa0   :  { %1011 = vadd.xlane.f32.xlu0 %v1010_v42  ;;  %1014 = vadd.xlane.f32.xlu1 %v1013_v34  ;;  %v6160_v42 = vld [vmem:[#allocation12_spill] sm:$0xff] }
  0xa1   :  { %2580 = vrsqrt.f32 %v740_v48  ;;  %v6162_v48 = vld [vmem:[#allocation14_spill] sm:$0xff] }
  0xa2   :  { %2582 = vrsqrt.f32 %v742_v52  ;;  %v649_v54 = vpop.xlane.xlu0 %648  ;;  %v655_v22 = vpop.xlane.xlu1 %654 }
  0xa3   :  { %v741_v46 = vmax.f32 %v649_v54, 1e-24  ;;  %v743_v60 = vmax.f32 %v655_v22, 1e-24  ;;  %v6163_v54 = vld [vmem:[#allocation15_spill] sm:$0xff] }
  0xa4   :  { %1017 = vadd.xlane.f32.xlu0 %v1016_v47  ;;  %1020 = vadd.xlane.f32.xlu1 %v1019_v6  ;;  %v6161_v47 = vld [vmem:[#allocation13_spill] sm:$0xff] }
  0xa5   :  { %2584 = vrsqrt.f32 %v741_v46  ;;  %v6164_v46 = vld [vmem:[#allocation16_spill] sm:$0xff] }
  0xa6   :  { %2586 = vrsqrt.f32 %v743_v60  ;;  %v658_v49 = vpop.xlane.xlu0 %657  ;;  %v661_v2 = vpop.xlane.xlu1 %660 }
  0xa7   :  { %v744_v10 = vmax.f32 %v658_v49, 1e-24  ;;  %v745_v13 = vmax.f32 %v661_v2, 1e-24  ;;  %v6165_v49 = vld [vmem:[#allocation17_spill] sm:$0xff] }
  0xa8   :  { %1023 = vadd.xlane.f32.xlu0 %v1022_v35  ;;  %1026 = vadd.xlane.f32.xlu1 %v1025_v39 }
  0xa9   :  { %2588 = vrsqrt.f32 %v744_v10 }
  0xaa   :  { %2590 = vrsqrt.f32 %v745_v13 }
  0xab   :  { %v2581_v44 = vpop.eup %2580 }
  0xac   :  { %v2583_v30 = vpop.eup %2582  ;;  %v804_v16 = vmul.f32 %v2581_v44, %v6150_v36  ;;  %v805_v37 = vmul.f32 %v2581_v44, %v6151_v1  ;;  %v6166_v36 = vld [vmem:[#allocation18_spill] sm:$0xff]  ;;  %v6167_v1 = vld [vmem:[#allocation19_spill] sm:$0xff] }
  0xad   :  { %v808_v4 = vmul.f32 %v2583_v30, %v6152_v18  ;;  %v809_v43 = vmul.f32 %v2583_v30, %v6153_v26  ;;  %v6033_v18 = vmov 1  }
  0xae   :  { %v2399_v12 = vpack.c.bf16 %v805_v37, %v804_v16  ;;  %2530 = vset.pattern.permute.xlu1 %v6033_v18 }
  0xaf   :  { %v2585_v62 = vpop.eup %2584  ;;  %v2401_v3 = vpack.c.bf16 %v809_v43, %v808_v4  ;;  %v6168_v4 = vld [vmem:[#allocation20_spill] sm:$0xff]  ;;  %v6169_v43 = vld [vmem:[#allocation21_spill] sm:$0xff] }
  0xb0   :  { %v2587_v5 = vpop.eup %2586  ;;  %1637 = vst [vmem:[%s5959_s5] sm:$0xff] %v2399_v12  ;;  %v806_v11 = vmul.f32 %v2585_v62, %v6154_v53  ;;  %v807_v9 = vmul.f32 %v2585_v62, %v6155_v7 }
  0xb1   :  { %1639 = vst [vmem:[%s5959_s5 + $0x10] sm:$0xff] %v2401_v3  ;;  %v810_v8 = vmul.f32 %v2587_v5, %v6156_v23  ;;  %v811_v17 = vmul.f32 %v2587_v5, %v6157_v28 }
  0xb2   :  { %v2400_v57 = vpack.c.bf16 %v807_v9, %v806_v11  ;;  %v6170_v11 = vld [vmem:[#allocation22_spill] sm:$0xff]  ;;  %v6171_v9 = vld [vmem:[#allocation23_spill] sm:$0xff] }
  0xb3   :  { %v2589_v40 = vpop.eup %2588  ;;  %v2402_v20 = vpack.c.bf16 %v811_v17, %v810_v8  ;;  %v6172_v8 = vld [vmem:[#allocation24_spill] sm:$0xff]  ;;  %v6173_v17 = vld [vmem:[#allocation25_spill] sm:$0xff] }
  0xb4   :  { %v2591_v19 = vpop.eup %2590  ;;  %1638 = vst [vmem:[%s5959_s5 + $0x8] sm:$0xff] %v2400_v57  ;;  %v812_v21 = vmul.f32 %v2589_v40, %v6158_v61  ;;  %v813_v55 = vmul.f32 %v2589_v40, %v6159_v59 }
  0xb5   :  { %1640 = vst [vmem:[%s5959_s5 + $0x18] sm:$0xff] %v2402_v20  ;;  %v814_v34 = vmul.f32 %v2591_v19, %v6160_v42  ;;  %v815_v6 = vmul.f32 %v2591_v19, %v6161_v47 }
  0xb6   :  { %v2403_v41 = vpack.c.bf16 %v813_v55, %v812_v21  ;;  %v6174_v21 = vld [vmem:[#allocation26_spill] sm:$0xff]  ;;  %v6175_v55 = vld [vmem:[#allocation27_spill] sm:$0xff] }
  0xb7   :  { %v664_v0 = vpop.xlane.xlu0 %663  ;;  %v2404_v35 = vpack.c.bf16 %v815_v6, %v814_v34  ;;  %v6176_v34 = vld [vmem:[#allocation28_spill] sm:$0xff]  ;;  %v6177_v6 = vld [vmem:[#allocation29_spill] sm:$0xff] }
  0xb8   :  { %v746_v58 = vmax.f32 %v664_v0, 1e-24  ;;  %1641 = vst [vmem:[%s5959_s5 + $0x20] sm:$0xff] %v2403_v41 }
  0xb9   :  { %1642 = vst [vmem:[%s5959_s5 + $0x28] sm:$0xff] %v2404_v35 }
  0xba   :  { %v667_v24 = vpop.xlane.xlu1 %666  ;;  %2592 = vrsqrt.f32 %v746_v58 }
  0xbb   :  { %v747_v25 = vmax.f32 %v667_v24, 1e-24  ;;  %v670_v27 = vpop.xlane.xlu0 %669 }
  0xbc   :  { %v748_v50 = vmax.f32 %v670_v27, 1e-24 }
  0xbd   :  { %2594 = vrsqrt.f32 %v747_v25 }
  0xbe   :  { %v673_v45 = vpop.xlane.xlu1 %672  ;;  %2596 = vrsqrt.f32 %v748_v50 }
  0xbf   :  { %v749_v31 = vmax.f32 %v673_v45, 1e-24 }
  0xc1   :  { %2598 = vrsqrt.f32 %v749_v31 }
  0xc4   :  { %v2593_v29 = vpop.eup %2592 }
  0xc5   :  { %v816_v52 = vmul.f32 %v2593_v29, %v6162_v48  ;;  %v817_v22 = vmul.f32 %v2593_v29, %v6163_v54 }
  0xc6   :  { %v676_v15 = vpop.xlane.xlu0 %675 }
  0xc7   :  { %v750_v51 = vmax.f32 %v676_v15, 1e-24  ;;  %v2595_v33 = vpop.eup %2594  ;;  %v2405_v10 = vpack.c.bf16 %v817_v22, %v816_v52  ;;  %v6178_v52 = vld [vmem:[#allocation30_spill] sm:$0xff]  ;;  %v6179_v22 = vld [vmem:[#allocation31_spill] sm:$0xff] }
  0xc8   :  { %v818_v60 = vmul.f32 %v2595_v33, %v6164_v46  ;;  %v819_v2 = vmul.f32 %v2595_v33, %v6165_v49  ;;  %v2597_v24 = vpop.eup %2596 }
  0xc9   :  { %2600 = vrsqrt.f32 %v750_v51  ;;  %1643 = vst [vmem:[%s5959_s5 + $0x30] sm:$0xff] %v2405_v10  ;;  %v820_v16 = vmul.f32 %v2597_v24, %v6166_v36  ;;  %v821_v37 = vmul.f32 %v2597_v24, %v6167_v1 }
  0xca   :  { %v679_v38 = vpop.xlane.xlu1 %678  ;;  %v682_v63 = vpop.xlane.xlu0 %681  ;;  %v2406_v44 = vpack.c.bf16 %v819_v2, %v818_v60  ;;  %v6180_v60 = vld [vmem:[#allocation32_spill] sm:$0xff]  ;;  %v6181_v2 = vld [vmem:[#allocation33_spill] sm:$0xff] }
  0xcb   :  { %v751_v56 = vmax.f32 %v679_v38, 1e-24  ;;  %v752_v39 = vmax.f32 %v682_v63, 1e-24  ;;  %v2599_v30 = vpop.eup %2598  ;;  %v2407_v27 = vpack.c.bf16 %v821_v37, %v820_v16  ;;  %v6182_v16 = vld [vmem:[#allocation34_spill] sm:$0xff]  ;;  %v6183_v37 = vld [vmem:[#allocation35_spill] sm:$0xff] }
  0xcc   :  { %1644 = vst [vmem:[%s5959_s5 + $0x38] sm:$0xff] %v2406_v44  ;;  %v822_v26 = vmul.f32 %v2599_v30, %v6168_v4  ;;  %v823_v12 = vmul.f32 %v2599_v30, %v6169_v43 }
  0xcd   :  { %2602 = vrsqrt.f32 %v751_v56  ;;  %1645 = vst [vmem:[%s5959_s5 + $0x40] sm:$0xff] %v2407_v27 }
  0xce   :  { %2604 = vrsqrt.f32 %v752_v39  ;;  %v2408_v50 = vpack.c.bf16 %v823_v12, %v822_v26  ;;  %v6184_v26 = vld [vmem:[#allocation36_spill] sm:$0xff]  ;;  %v6185_v12 = vld [vmem:[#allocation37_spill] sm:$0xff] }
  0xd0   :  { %1646 = vst [vmem:[%s5959_s5 + $0x48] sm:$0xff] %v2408_v50 }
  0xd1   :  { %v685_v14 = vpop.xlane.xlu1 %684 }
  0xd2   :  { %v753_v32 = vmax.f32 %v685_v14, 1e-24 }
  0xd3   :  { %v688_v13 = vpop.xlane.xlu0 %687  ;;  %v2601_v3 = vpop.eup %2600 }
  0xd4   :  { %2606 = vrsqrt.f32 %v753_v32  ;;  %v754_v58 = vmax.f32 %v688_v13, 1e-24  ;;  %v824_v7 = vmul.f32 %v2601_v3, %v6170_v11  ;;  %v825_v23 = vmul.f32 %v2601_v3, %v6171_v9  ;;  %v6186_v9 = vld [vmem:[#allocation38_spill] sm:$0xff] }
  0xd5   :  { %v691_v0 = vpop.xlane.xlu1 %690 }
  0xd6   :  { %v755_v25 = vmax.f32 %v691_v0, 1e-24  ;;  %2608 = vrsqrt.f32 %v754_v58  ;;  %v2409_v15 = vpack.c.bf16 %v825_v23, %v824_v7 }
  0xd7   :  { %v2603_v53 = vpop.eup %2602 }
  0xd8   :  { %2610 = vrsqrt.f32 %v755_v25  ;;  %v826_v28 = vmul.f32 %v2603_v53, %v6172_v8  ;;  %v827_v57 = vmul.f32 %v2603_v53, %v6173_v17  ;;  %v2605_v20 = vpop.eup %2604  ;;  %1647 = vst [vmem:[%s5959_s5 + $0x50] sm:$0xff] %v2409_v15  ;;  %v6187_v8 = vld [vmem:[#allocation39_spill] sm:$0xff]  ;;  %v6188_v17 = vld [vmem:[#allocation40_spill] sm:$0xff]  ;;  %v6189_v15 = vld [vmem:[#allocation41_spill] sm:$0xff] }
  0xd9   :  { %v694_v45 = vpop.xlane.xlu0 %693  ;;  %v697_v62 = vpop.xlane.xlu1 %696  ;;  %v828_v59 = vmul.f32 %v2605_v20, %v6174_v21  ;;  %v829_v42 = vmul.f32 %v2605_v20, %v6175_v55  ;;  %v6190_v55 = vld [vmem:[#allocation42_spill] sm:$0xff] }
  0xda   :  { %v756_v31 = vmax.f32 %v694_v45, 1e-24  ;;  %v757_v5 = vmax.f32 %v697_v62, 1e-24  ;;  %v2410_v51 = vpack.c.bf16 %v827_v57, %v826_v28  ;;  %v2837_v45 = vmov 0  }
  0xdb   :  { %v2411_v63 = vpack.c.bf16 %v829_v42, %v828_v59  ;;  %2529 = vset.pattern.permute.xlu0 %v2837_v45  ;;  %v6201_v45 = vld [vmem:[#allocation55_spill] sm:$0xff] }
  0xdc   :  { %2612 = vrsqrt.f32 %v756_v31  ;;  %1648 = vst [vmem:[%s5959_s5 + $0x58] sm:$0xff] %v2410_v51 }
  0xdd   :  { %2614 = vrsqrt.f32 %v757_v5  ;;  %v700_v38 = vpop.xlane.xlu0 %699  ;;  %v703_v40 = vpop.xlane.xlu1 %702  ;;  %1649 = vst [vmem:[%s5959_s5 + $0x60] sm:$0xff] %v2411_v63  ;;  %v6193_v63 = vld [vmem:[#allocation45_spill] sm:$0xff] }
  0xde   :  { %v758_v56 = vmax.f32 %v700_v38, 1e-24  ;;  %v759_v19 = vmax.f32 %v703_v40, 1e-24  ;;  %v2607_v61 = vpop.eup %2606 }
  0xdf   :  { %v830_v47 = vmul.f32 %v2607_v61, %v6176_v34  ;;  %v831_v41 = vmul.f32 %v2607_v61, %v6177_v6  ;;  %v6191_v34 = vld [vmem:[#allocation43_spill] sm:$0xff]  ;;  %v6192_v6 = vld [vmem:[#allocation44_spill] sm:$0xff] }
  0xe0   :  { %2616 = vrsqrt.f32 %v758_v56  ;;  %v2609_v35 = vpop.eup %2608 }
  0xe1   :  { %2618 = vrsqrt.f32 %v759_v19  ;;  %v706_v14 = vpop.xlane.xlu0 %705  ;;  %v709_v29 = vpop.xlane.xlu1 %708  ;;  %v2412_v39 = vpack.c.bf16 %v831_v41, %v830_v47  ;;  %v832_v54 = vmul.f32 %v2609_v35, %v6178_v52  ;;  %v833_v46 = vmul.f32 %v2609_v35, %v6179_v22  ;;  %v6194_v22 = vld [vmem:[#allocation46_spill] sm:$0xff] }
  0xe2   :  { %v760_v32 = vmax.f32 %v706_v14, 1e-24  ;;  %v761_v33 = vmax.f32 %v709_v29, 1e-24  ;;  %v2611_v48 = vpop.eup %2610 }
  0xe3   :  { %1650 = vst [vmem:[%s5959_s5 + $0x68] sm:$0xff] %v2412_v39  ;;  %v834_v49 = vmul.f32 %v2611_v48, %v6180_v60  ;;  %v835_v10 = vmul.f32 %v2611_v48, %v6181_v2  ;;  %v2413_v13 = vpack.c.bf16 %v833_v46, %v832_v54  ;;  %v6195_v60 = vld [vmem:[#allocation47_spill] sm:$0xff]  ;;  %v6196_v2 = vld [vmem:[#allocation48_spill] sm:$0xff] }
  0xe4   :  { %2620 = vrsqrt.f32 %v760_v32 }
  0xe5   :  { %2622 = vrsqrt.f32 %v761_v33  ;;  %v712_v0 = vpop.xlane.xlu0 %711  ;;  %v715_v24 = vpop.xlane.xlu1 %714  ;;  %v2414_v58 = vpack.c.bf16 %v835_v10, %v834_v49  ;;  %1651 = vst [vmem:[%s5959_s5 + $0x70] sm:$0xff] %v2413_v13  ;;  %v6197_v13 = vld [vmem:[#allocation49_spill] sm:$0xff] }
  0xe6   :  { %v2613_v44 = vpop.eup %2612  ;;  %v762_v25 = vmax.f32 %v712_v0, 1e-24  ;;  %v763_v30 = vmax.f32 %v715_v24, 1e-24 }
  0xe7   :  { %v2615_v36 = vpop.eup %2614  ;;  %v836_v1 = vmul.f32 %v2613_v44, %v6182_v16  ;;  %v837_v4 = vmul.f32 %v2613_v44, %v6183_v37  ;;  %1652 = vst [vmem:[%s5959_s5 + $0x78] sm:$0xff] %v2414_v58  ;;  %v6198_v37 = vld [vmem:[#allocation52_spill] sm:$0xff] }
  0xe8   :  { %v838_v43 = vmul.f32 %v2615_v36, %v6184_v26  ;;  %v839_v27 = vmul.f32 %v2615_v36, %v6185_v12  ;;  %2624 = vrsqrt.f32 %v762_v25  ;;  %v6199_v26 = vld [vmem:[#allocation53_spill] sm:$0xff]  ;;  %v6200_v12 = vld [vmem:[#allocation54_spill] sm:$0xff] }
  0xe9   :  { %v2415_v62 = vpack.c.bf16 %v837_v4, %v836_v1  ;;  %2626 = vrsqrt.f32 %v763_v30  ;;  %v718_v3 = vpop.xlane.xlu0 %717  ;;  %v721_v50 = vpop.xlane.xlu1 %720 }
  0xea   :  { %v2617_v31 = vpop.eup %2616  ;;  %v2416_v5 = vpack.c.bf16 %v839_v27, %v838_v43  ;;  %v764_v53 = vmax.f32 %v718_v3, 1e-24  ;;  %v765_v11 = vmax.f32 %v721_v50, 1e-24 }
  0xeb   :  { %v2619_v7 = vpop.eup %2618  ;;  %1653 = vst [vmem:[%s5959_s5 + $0x80] sm:$0xff] %v2415_v62  ;;  %v840_v23 = vmul.f32 %v2617_v31, %v6186_v9  ;;  %v841_v28 = vmul.f32 %v2617_v31, %v6187_v8 }
  0xec   :  { %1654 = vst [vmem:[%s5959_s5 + $0x88] sm:$0xff] %v2416_v5  ;;  %v842_v57 = vmul.f32 %v2619_v7, %v6188_v17  ;;  %v843_v38 = vmul.f32 %v2619_v7, %v6189_v15  ;;  %2628 = vrsqrt.f32 %v764_v53  ;;  %v6202_v53 = vld [vmem:[#allocation56_spill] sm:$0xff]  ;;  %v6203_v7 = vld [vmem:[#allocation57_spill] sm:$0xff] }
  0xed   :  { %v2417_v40 = vpack.c.bf16 %v841_v28, %v840_v23  ;;  %2630 = vrsqrt.f32 %v765_v11  ;;  %v724_v20 = vpop.xlane.xlu0 %723  ;;  %v727_v51 = vpop.xlane.xlu1 %726  ;;  %v6204_v23 = vld [vmem:[#allocation58_spill] sm:$0xff]  ;;  %v6205_v28 = vld [vmem:[#allocation59_spill] sm:$0xff] }
  0xee   :  { %v2621_v56 = vpop.eup %2620  ;;  %v2418_v19 = vpack.c.bf16 %v843_v38, %v842_v57  ;;  %v766_v61 = vmax.f32 %v724_v20, 1e-24  ;;  %v767_v21 = vmax.f32 %v727_v51, 1e-24  ;;  %v6206_v20 = vld [vmem:[#allocation63_spill] sm:$0xff] }
  0xef   :  { %v2623_v59 = vpop.eup %2622  ;;  %1655 = vst [vmem:[%s5959_s5 + $0x90] sm:$0xff] %v2417_v40  ;;  %v844_v42 = vmul.f32 %v2621_v56, %v6190_v55  ;;  %v845_v47 = vmul.f32 %v2621_v56, %v6191_v34  ;;  %v6207_v56 = vld [vmem:[#allocation64_spill] sm:$0xff] }
  0xf0   :  { %1656 = vst [vmem:[%s5959_s5 + $0x98] sm:$0xff] %v2418_v19  ;;  %v846_v41 = vmul.f32 %v2623_v59, %v6192_v6  ;;  %v847_v14 = vmul.f32 %v2623_v59, %v6193_v63  ;;  %2632 = vrsqrt.f32 %v766_v61  ;;  %v6208_v61 = vld [vmem:[#allocation65_spill] sm:$0xff]  ;;  %v6209_v59 = vld [vmem:[#allocation66_spill] sm:$0xff]  ;;  %v6210_v63 = vld [vmem:[#allocation67_spill] sm:$0xff] }
  0xf1   :  { %v2419_v29 = vpack.c.bf16 %v845_v47, %v844_v42  ;;  %2634 = vrsqrt.f32 %v767_v21  ;;  %v730_v35 = vpop.xlane.xlu0 %729  ;;  %v733_v39 = vpop.xlane.xlu1 %732  ;;  %v217_v42 = vlaneseq }
  0xf2   :  { %v2625_v32 = vpop.eup %2624  ;;  %v2420_v33 = vpack.c.bf16 %v847_v14, %v846_v41  ;;  %v768_v48 = vmax.f32 %v730_v35, 1e-24  ;;  %v769_v52 = vmax.f32 %v733_v39, 1e-24  ;;  %v6212_v39 = vld [vmem:[#allocation69_spill] sm:$0xff] }
  0xf3   :  { %v2627_v54 = vpop.eup %2626  ;;  %1657 = vst [vmem:[%s5959_s5 + $0xa0] sm:$0xff] %v2419_v29  ;;  %v848_v46 = vmul.f32 %v2625_v32, %v6194_v22  ;;  %v849_v49 = vmul.f32 %v2625_v32, %v6195_v60  ;;  %v6211_v29 = vld [vmem:[#allocation68_spill] sm:$0xff]  ;;  %v215_v60 = vld [vmem:[%s5960_s4] sm:$0x3] }
  0xf4   :  { %1658 = vst [vmem:[%s5959_s5 + $0xa8] sm:$0xff] %v2420_v33  ;;  %v850_v10 = vmul.f32 %v2627_v54, %v6196_v2  ;;  %v851_v0 = vmul.f32 %v2627_v54, %v6197_v13  ;;  %2636 = vrsqrt.f32 %v768_v48  ;;  %v6213_v33 = vld [vmem:[#allocation70_spill] sm:$0xff] }
  0xf5   :  { %v2421_v24 = vpack.c.bf16 %v849_v49, %v848_v46  ;;  %2638 = vrsqrt.f32 %v769_v52  ;;  %v736_v44 = vpop.xlane.xlu0 %735  ;;  %v739_v58 = vpop.xlane.xlu1 %738  ;;  %v218_v52 = vshrl.u32 %v217_v42, 7 }
  0xf6   :  { %v2629_v25 = vpop.eup %2628  ;;  %v2422_v30 = vpack.c.bf16 %v851_v0, %v850_v10  ;;  %v770_v36 = vmax.f32 %v736_v44, 1e-24  ;;  %v771_v16 = vmax.f32 %v739_v58, 1e-24 }
  0xf7   :  { %v2631_v1 = vpop.eup %2630  ;;  %1659 = vst [vmem:[%s5959_s5 + $0xb0] sm:$0xff] %v2421_v24  ;;  %v852_v4 = vmul.f32 %v2629_v25, %v6198_v37  ;;  %v853_v43 = vmul.f32 %v2629_v25, %v6199_v26  ;;  %v219_v46 = vsub.s32 0, %v218_v52  ;;  %v223_v49 = vsub.s32 1, %v218_v52 }
  0xf8   :  { %1660 = vst [vmem:[%s5959_s5 + $0xb8] sm:$0xff] %v2422_v30  ;;  %v854_v27 = vmul.f32 %v2631_v1, %v6200_v12  ;;  %v855_v62 = vmul.f32 %v2631_v1, %v6201_v45  ;;  %2640 = vrsqrt.f32 %v770_v36 }
  0xf9   :  { %v2423_v3 = vpack.c.bf16 %v853_v43, %v852_v4  ;;  %2642 = vrsqrt.f32 %v771_v16  ;;  %v4088_v2 = vrot.slane %v215_v60, %v219_v46  ;;  %v4090_v10 = vrot.slane %v215_v60, %v223_v49 }
  0xfa   :  { %v2633_v50 = vpop.eup %2632  ;;  %v2424_v31 = vpack.c.bf16 %v855_v62, %v854_v27 }
  0xfb   :  { %v2635_v5 = vpop.eup %2634  ;;  %1661 = vst [vmem:[%s5959_s5 + $0xc0] sm:$0xff] %v2423_v3  ;;  %v856_v11 = vmul.f32 %v2633_v50, %v6202_v53  ;;  %v857_v9 = vmul.f32 %v2633_v50, %v6203_v7 }
  0xfc   :  { %1662 = vst [vmem:[%s5959_s5 + $0xc8] sm:$0xff] %v2424_v31  ;;  %v858_v8 = vmul.f32 %v2635_v5, %v6204_v23  ;;  %v859_v17 = vmul.f32 %v2635_v5, %v6205_v28 }
  0xfd   :  { %v2425_v57 = vpack.c.bf16 %v857_v9, %v856_v11 }
  0xfe   :  { %v2637_v15 = vpop.eup %2636  ;;  %v2426_v38 = vpack.c.bf16 %v859_v17, %v858_v8 }
  0xff   :  { %v2639_v40 = vpop.eup %2638  ;;  %1663 = vst [vmem:[%s5959_s5 + $0xd0] sm:$0xff] %v2425_v57  ;;  %v860_v51 = vmul.f32 %v2637_v15, %v6206_v20  ;;  %v861_v19 = vmul.f32 %v2637_v15, %v6207_v56 }
 0x100   :  { %1664 = vst [vmem:[%s5959_s5 + $0xd8] sm:$0xff] %v2426_v38  ;;  %v862_v21 = vmul.f32 %v2639_v40, %v6208_v61  ;;  %v863_v55 = vmul.f32 %v2639_v40, %v6209_v59 }
 0x101   :  { %v2427_v34 = vpack.c.bf16 %v861_v19, %v860_v51 }
 0x102   :  { %v2641_v47 = vpop.eup %2640  ;;  %v2428_v6 = vpack.c.bf16 %v863_v55, %v862_v21 }
 0x103   :  { %v2643_v41 = vpop.eup %2642  ;;  %1665 = vst [vmem:[%s5959_s5 + $0xe0] sm:$0xff] %v2427_v34  ;;  %v864_v14 = vmul.f32 %v2641_v47, %v6210_v63  ;;  %v865_v35 = vmul.f32 %v2641_v47, %v6211_v29 }
 0x104   :  { %1666 = vst [vmem:[%s5959_s5 + $0xe8] sm:$0xff] %v2428_v6  ;;  %v866_v32 = vmul.f32 %v2643_v41, %v6212_v39  ;;  %v867_v48 = vmul.f32 %v2643_v41, %v6213_v33 }
 0x105   :  { %v2429_v54 = vpack.c.bf16 %v865_v35, %v864_v14 }
 0x106   :  { %v2430_v22 = vpack.c.bf16 %v867_v48, %v866_v32 }
 0x107   :  { %1667 = vst [vmem:[%s5959_s5 + $0xf0] sm:$0xff] %v2429_v54 }
 0x108   :  { %1668 = vst [vmem:[%s5959_s5 + $0xf8] sm:$0xff] %v2430_v22 }
 0x115   :  { %v421_v13 = vpop.f32.mrb[0].mxu0  ;;  %v501_v0 = vpop.f32.mrb[0].mxu1 }
 0x116   :  { %v4093_v24 = vadd.f32 %v421_v13, %v4088_v2  ;;  %v423_v44 = vpop.f32.mrb[1].mxu0  ;;  %v4096_v58 = vadd.f32 %v501_v0, %v4088_v2  ;;  %v503_v25 = vpop.f32.mrb[1].mxu1 }
 0x117   :  { %v4099_v30 = vadd.f32 %v423_v44, %v4090_v10  ;;  %v425_v36 = vpop.f32.mrb[2].mxu0  ;;  %v4102_v16 = vadd.f32 %v503_v25, %v4090_v10  ;;  %v505_v1 = vpop.f32.mrb[2].mxu1 }
 0x118   :  { %v1156_v37 = vmul.f32 %v4093_v24, %v4093_v24  ;;  %v1188_v4 = vmul.f32 %v4096_v58, %v4096_v58  ;;  %v4109_v26 = vadd.f32 %v425_v36, %v4088_v2  ;;  %v427_v43 = vpop.f32.mrb[3].mxu0  ;;  %v4112_v12 = vadd.f32 %v505_v1, %v4088_v2  ;;  %v507_v27 = vpop.f32.mrb[3].mxu1 }
 0x119   :  { %v1157_v45 = vmul.f32 %v4099_v30, %v4099_v30  ;;  %v1189_v62 = vmul.f32 %v4102_v16, %v4102_v16  ;;  %v4119_v3 = vadd.f32 %v427_v43, %v4090_v10  ;;  %v4122_v50 = vadd.f32 %v507_v27, %v4090_v10 }
 0x11a   :  { %v1158_v31 = vmul.f32 %v4109_v26, %v4109_v26  ;;  %v1190_v53 = vmul.f32 %v4112_v12, %v4112_v12 }
 0x11b   :  { %v1159_v5 = vmul.f32 %v4119_v3, %v4119_v3  ;;  %v1191_v11 = vmul.f32 %v4122_v50, %v4122_v50  ;;  %v1220_v7 = vadd.f32 %v1157_v45, %v1156_v37  ;;  %v1268_v28 = vadd.f32 %v1189_v62, %v1188_v4 }
 0x11d   :  { %v431_v9 = vpop.f32.mrb[4].mxu0  ;;  %1221 = vadd.xlane.f32.xlu0 %v1220_v7  ;;  %v511_v23 = vpop.f32.mrb[4].mxu1  ;;  %v1223_v8 = vadd.f32 %v1159_v5, %v1158_v31  ;;  %v1271_v19 = vadd.f32 %v1191_v11, %v1190_v53 }
 0x11e   :  { %v4133_v17 = vadd.f32 %v431_v9, %v4088_v2  ;;  %v433_v57 = vpop.f32.mrb[5].mxu0  ;;  %v4136_v15 = vadd.f32 %v511_v23, %v4088_v2  ;;  %v513_v38 = vpop.f32.mrb[5].mxu1 }
 0x11f   :  { %v4139_v40 = vadd.f32 %v433_v57, %v4090_v10  ;;  %v435_v20 = vpop.f32.mrb[6].mxu0  ;;  %v4142_v51 = vadd.f32 %v513_v38, %v4090_v10  ;;  %1224 = vadd.xlane.f32.xlu1 %v1223_v8  ;;  %v515_v56 = vpop.f32.mrb[6].mxu1 }
 0x120   :  { %v1160_v61 = vmul.f32 %v4133_v17, %v4133_v17  ;;  %v1192_v21 = vmul.f32 %v4136_v15, %v4136_v15  ;;  %v4149_v59 = vadd.f32 %v435_v20, %v4088_v2  ;;  %v437_v55 = vpop.f32.mrb[7].mxu0  ;;  %v4152_v42 = vadd.f32 %v515_v56, %v4088_v2  ;;  %v517_v34 = vpop.f32.mrb[7].mxu1 }
 0x121   :  { %v1161_v47 = vmul.f32 %v4139_v40, %v4139_v40  ;;  %v1193_v6 = vmul.f32 %v4142_v51, %v4142_v51  ;;  %v4159_v41 = vadd.f32 %v437_v55, %v4090_v10  ;;  %v4162_v63 = vadd.f32 %v517_v34, %v4090_v10  ;;  %1269 = vadd.xlane.f32.xlu0 %v1268_v28 }
 0x122   :  { %v1162_v14 = vmul.f32 %v4149_v59, %v4149_v59  ;;  %v1194_v35 = vmul.f32 %v4152_v42, %v4152_v42 }
 0x123   :  { %v1163_v29 = vmul.f32 %v4159_v41, %v4159_v41  ;;  %v1195_v39 = vmul.f32 %v4162_v63, %v4162_v63  ;;  %1272 = vadd.xlane.f32.xlu1 %v1271_v19  ;;  %v1226_v32 = vadd.f32 %v1161_v47, %v1160_v61  ;;  %v1274_v54 = vadd.f32 %v1193_v6, %v1192_v21 }
 0x125   :  { %v441_v33 = vpop.f32.mrb[8].mxu0  ;;  %1227 = vadd.xlane.f32.xlu0 %v1226_v32  ;;  %v521_v48 = vpop.f32.mrb[8].mxu1  ;;  %v1229_v52 = vadd.f32 %v1163_v29, %v1162_v14  ;;  %v1277_v36 = vadd.f32 %v1195_v39, %v1194_v35 }
 0x126   :  { %v4173_v22 = vadd.f32 %v441_v33, %v4088_v2  ;;  %v443_v46 = vpop.f32.mrb[9].mxu0  ;;  %v4176_v60 = vadd.f32 %v521_v48, %v4088_v2  ;;  %v523_v49 = vpop.f32.mrb[9].mxu1 }
 0x127   :  { %v4179_v13 = vadd.f32 %v443_v46, %v4090_v10  ;;  %v445_v0 = vpop.f32.mrb[10].mxu0  ;;  %v4182_v44 = vadd.f32 %v523_v49, %v4090_v10  ;;  %1230 = vadd.xlane.f32.xlu1 %v1229_v52  ;;  %v525_v25 = vpop.f32.mrb[10].mxu1 }
 0x128   :  { %v1164_v1 = vmul.f32 %v4173_v22, %v4173_v22  ;;  %v1196_v37 = vmul.f32 %v4176_v60, %v4176_v60  ;;  %v4189_v4 = vadd.f32 %v445_v0, %v4088_v2  ;;  %v447_v43 = vpop.f32.mrb[11].mxu0  ;;  %v4192_v27 = vadd.f32 %v525_v25, %v4088_v2  ;;  %v527_v45 = vpop.f32.mrb[11].mxu1 }
 0x129   :  { %v1165_v62 = vmul.f32 %v4179_v13, %v4179_v13  ;;  %v1197_v31 = vmul.f32 %v4182_v44, %v4182_v44  ;;  %v4199_v5 = vadd.f32 %v447_v43, %v4090_v10  ;;  %v4202_v53 = vadd.f32 %v527_v45, %v4090_v10  ;;  %1275 = vadd.xlane.f32.xlu0 %v1274_v54 }
 0x12a   :  { %6214 = vst [vmem:[#allocation50_spill] sm:$0xff] %v4192_v27  ;;  %v1166_v11 = vmul.f32 %v4189_v4, %v4189_v4  ;;  %v1198_v9 = vmul.f32 %v4192_v27, %v4192_v27 }
 0x12b   :  { %6215 = vst [vmem:[#allocation60_spill] sm:$0xff] %v4202_v53  ;;  %v1167_v7 = vmul.f32 %v4199_v5, %v4199_v5  ;;  %v1199_v23 = vmul.f32 %v4202_v53, %v4202_v53  ;;  %1278 = vadd.xlane.f32.xlu1 %v1277_v36  ;;  %v1232_v8 = vadd.f32 %v1165_v62, %v1164_v1 }
 0x12c   :  { %v1280_v20 = vadd.f32 %v1197_v31, %v1196_v37 }
 0x12d   :  { %v451_v28 = vpop.f32.mrb[12].mxu0  ;;  %1233 = vadd.xlane.f32.xlu0 %v1232_v8  ;;  %v531_v57 = vpop.f32.mrb[12].mxu1  ;;  %v1235_v38 = vadd.f32 %v1167_v7, %v1166_v11  ;;  %v1283_v14 = vadd.f32 %v1199_v23, %v1198_v9 }
 0x12e   :  { %v4213_v56 = vadd.f32 %v451_v28, %v4088_v2  ;;  %v453_v19 = vpop.f32.mrb[13].mxu0  ;;  %v4216_v61 = vadd.f32 %v531_v57, %v4088_v2  ;;  %v533_v21 = vpop.f32.mrb[13].mxu1 }
 0x12f   :  { %v4219_v55 = vadd.f32 %v453_v19, %v4090_v10  ;;  %v455_v34 = vpop.f32.mrb[14].mxu0  ;;  %v4222_v47 = vadd.f32 %v533_v21, %v4090_v10  ;;  %1236 = vadd.xlane.f32.xlu1 %v1235_v38  ;;  %v535_v6 = vpop.f32.mrb[14].mxu1 }
 0x130   :  { %6216 = vst [vmem:[#allocation51_spill] sm:$0xff] %v4213_v56  ;;  %6217 = vst [vmem:[#allocation61_spill] sm:$0xff] %v4216_v61  ;;  %v1168_v29 = vmul.f32 %v4213_v56, %v4213_v56  ;;  %v1200_v35 = vmul.f32 %v4216_v61, %v4216_v61  ;;  %v4229_v39 = vadd.f32 %v455_v34, %v4088_v2  ;;  %v457_v32 = vpop.f32.mrb[15].mxu0  ;;  %v537_v48 = vpop.f32.mrb[15].mxu1 }
 0x131   :  { %6218 = vst [vmem:[#allocation62_spill] sm:$0xff] %v4219_v55  ;;  %6219 = vst [vmem:[#allocation2_spill] sm:$0xff] %v4222_v47  ;;  %v4232_v33 = vadd.f32 %v535_v6, %v4088_v2  ;;  %v1169_v52 = vmul.f32 %v4219_v55, %v4219_v55  ;;  %v1201_v54 = vmul.f32 %v4222_v47, %v4222_v47  ;;  %1281 = vadd.xlane.f32.xlu0 %v1280_v20 }
 0x132   :  { %6220 = vst [vmem:[#allocation3_spill] sm:$0xff] %v4229_v39  ;;  %v4239_v46 = vadd.f32 %v457_v32, %v4090_v10  ;;  %v4242_v49 = vadd.f32 %v537_v48, %v4090_v10  ;;  %v1170_v0 = vmul.f32 %v4229_v39, %v4229_v39 }
 0x133   :  { %6221 = vst [vmem:[#allocation4_spill] sm:$0xff] %v4232_v33  ;;  %v1202_v36 = vmul.f32 %v4232_v33, %v4232_v33  ;;  %1284 = vadd.xlane.f32.xlu1 %v1283_v14  ;;  %v1238_v37 = vadd.f32 %v1169_v52, %v1168_v29  ;;  %v1286_v31 = vadd.f32 %v1201_v54, %v1200_v35 }
 0x134   :  { %6222 = vst [vmem:[#allocation5_spill] sm:$0xff] %v4239_v46  ;;  %6223 = vst [vmem:[#allocation6_spill] sm:$0xff] %v4242_v49  ;;  %v1171_v25 = vmul.f32 %v4239_v46, %v4239_v46  ;;  %v1203_v1 = vmul.f32 %v4242_v49, %v4242_v49 }
 0x135   :  { %v461_v43 = vpop.f32.mrb[16].mxu0  ;;  %1239 = vadd.xlane.f32.xlu0 %v1238_v37  ;;  %v541_v45 = vpop.f32.mrb[16].mxu1 }
 0x136   :  { %v1241_v62 = vadd.f32 %v1171_v25, %v1170_v0  ;;  %v4253_v11 = vadd.f32 %v461_v43, %v4088_v2  ;;  %v463_v7 = vpop.f32.mrb[17].mxu0  ;;  %v4256_v9 = vadd.f32 %v541_v45, %v4088_v2  ;;  %v543_v23 = vpop.f32.mrb[17].mxu1  ;;  %v1289_v20 = vadd.f32 %v1203_v1, %v1202_v36 }
 0x137   :  { %v4259_v8 = vadd.f32 %v463_v7, %v4090_v10  ;;  %v465_v28 = vpop.f32.mrb[18].mxu0  ;;  %v4262_v57 = vadd.f32 %v543_v23, %v4090_v10  ;;  %v545_v38 = vpop.f32.mrb[18].mxu1 }
 0x138   :  { %6224 = vst [vmem:[#allocation7_spill] sm:$0xff] %v4253_v11  ;;  %6225 = vst [vmem:[#allocation8_spill] sm:$0xff] %v4256_v9  ;;  %1242 = vadd.xlane.f32.xlu1 %v1241_v62  ;;  %v1172_v19 = vmul.f32 %v4253_v11, %v4253_v11  ;;  %v1204_v21 = vmul.f32 %v4256_v9, %v4256_v9  ;;  %v4269_v34 = vadd.f32 %v465_v28, %v4088_v2  ;;  %v467_v6 = vpop.f32.mrb[19].mxu0  ;;  %v547_v29 = vpop.f32.mrb[19].mxu1 }
 0x139   :  { %6226 = vst [vmem:[#allocation9_spill] sm:$0xff] %v4259_v8  ;;  %6227 = vst [vmem:[#allocation10_spill] sm:$0xff] %v4262_v57  ;;  %v4272_v14 = vadd.f32 %v545_v38, %v4088_v2  ;;  %v1173_v35 = vmul.f32 %v4259_v8, %v4259_v8  ;;  %v1205_v32 = vmul.f32 %v4262_v57, %v4262_v57  ;;  %1287 = vadd.xlane.f32.xlu0 %v1286_v31 }
 0x13a   :  { %6228 = vst [vmem:[#allocation11_spill] sm:$0xff] %v4269_v34  ;;  %v4279_v48 = vadd.f32 %v467_v6, %v4090_v10  ;;  %v4282_v52 = vadd.f32 %v547_v29, %v4090_v10  ;;  %v1174_v54 = vmul.f32 %v4269_v34, %v4269_v34 }
 0x13b   :  { %6229 = vst [vmem:[#allocation12_spill] sm:$0xff] %v4272_v14  ;;  %v1206_v25 = vmul.f32 %v4272_v14, %v4272_v14  ;;  %v1244_v1 = vadd.f32 %v1173_v35, %v1172_v19  ;;  %v1292_v62 = vadd.f32 %v1205_v32, %v1204_v21 }
 0x13c   :  { %6230 = vst [vmem:[#allocation13_spill] sm:$0xff] %v4279_v48  ;;  %6231 = vst [vmem:[#allocation14_spill] sm:$0xff] %v4282_v52  ;;  %v1175_v0 = vmul.f32 %v4279_v48, %v4279_v48  ;;  %v1207_v36 = vmul.f32 %v4282_v52, %v4282_v52  ;;  %1290 = vadd.xlane.f32.xlu1 %v1289_v20 }
 0x13d   :  { %v471_v37 = vpop.f32.mrb[20].mxu0  ;;  %1245 = vadd.xlane.f32.xlu0 %v1244_v1  ;;  %v551_v43 = vpop.f32.mrb[20].mxu1 }
 0x13e   :  { %v1247_v45 = vadd.f32 %v1175_v0, %v1174_v54  ;;  %v4293_v31 = vadd.f32 %v471_v37, %v4088_v2  ;;  %v473_v7 = vpop.f32.mrb[21].mxu0  ;;  %v4296_v23 = vadd.f32 %v551_v43, %v4088_v2  ;;  %v553_v28 = vpop.f32.mrb[21].mxu1  ;;  %v1295_v29 = vadd.f32 %v1207_v36, %v1206_v25 }
 0x13f   :  { %v4299_v38 = vadd.f32 %v473_v7, %v4090_v10  ;;  %v475_v6 = vpop.f32.mrb[22].mxu0  ;;  %v4302_v20 = vadd.f32 %v553_v28, %v4090_v10  ;;  %v555_v19 = vpop.f32.mrb[22].mxu1 }
 0x140   :  { %6232 = vst [vmem:[#allocation15_spill] sm:$0xff] %v4293_v31  ;;  %6233 = vst [vmem:[#allocation16_spill] sm:$0xff] %v4296_v23  ;;  %1248 = vadd.xlane.f32.xlu1 %v1247_v45  ;;  %v1176_v21 = vmul.f32 %v4293_v31, %v4293_v31  ;;  %v1208_v35 = vmul.f32 %v4296_v23, %v4296_v23  ;;  %v4309_v32 = vadd.f32 %v475_v6, %v4088_v2  ;;  %v477_v54 = vpop.f32.mrb[23].mxu0  ;;  %v557_v1 = vpop.f32.mrb[23].mxu1 }
 0x141   :  { %6234 = vst [vmem:[#allocation17_spill] sm:$0xff] %v4299_v38  ;;  %6235 = vst [vmem:[#allocation18_spill] sm:$0xff] %v4302_v20  ;;  %v4312_v0 = vadd.f32 %v555_v19, %v4088_v2  ;;  %v1177_v37 = vmul.f32 %v4299_v38, %v4299_v38  ;;  %v1209_v25 = vmul.f32 %v4302_v20, %v4302_v20  ;;  %1293 = vadd.xlane.f32.xlu0 %v1292_v62 }
 0x142   :  { %6236 = vst [vmem:[#allocation19_spill] sm:$0xff] %v4309_v32  ;;  %v4319_v36 = vadd.f32 %v477_v54, %v4090_v10  ;;  %v4322_v43 = vadd.f32 %v557_v1, %v4090_v10  ;;  %v1178_v45 = vmul.f32 %v4309_v32, %v4309_v32  ;;  %v4332_v54 = vpop.xlane.xlu0 %933 }
 0x143   :  { %6237 = vst [vmem:[#allocation20_spill] sm:$0xff] %v4312_v0  ;;  %v1210_v28 = vmul.f32 %v4312_v0, %v4312_v0  ;;  %v1250_v19 = vadd.f32 %v1177_v37, %v1176_v21  ;;  %v1298_v20 = vadd.f32 %v1209_v25, %v1208_v35  ;;  %v1028_v8 = vmax.f32 %v4332_v54, 1e-24 }
 0x144   :  { %6238 = vst [vmem:[#allocation21_spill] sm:$0xff] %v4319_v36  ;;  %6239 = vst [vmem:[#allocation22_spill] sm:$0xff] %v4322_v43  ;;  %v1179_v7 = vmul.f32 %v4319_v36, %v4319_v36  ;;  %v1211_v6 = vmul.f32 %v4322_v43, %v4322_v43  ;;  %1296 = vadd.xlane.f32.xlu1 %v1295_v29 }
 0x145   :  { %v481_v18 = vpop.f32.mrb[24].mxu0  ;;  %1251 = vadd.xlane.f32.xlu0 %v1250_v19  ;;  %v561_v1 = vpop.f32.mrb[24].mxu1  ;;  %2644 = vrsqrt.f32 %v1028_v8 }
 0x146   :  { %v1253_v62 = vadd.f32 %v1179_v7, %v1178_v45  ;;  %v4335_v23 = vadd.f32 %v481_v18, %v4088_v2  ;;  %v483_v32 = vpop.f32.mrb[25].mxu0  ;;  %v4338_v36 = vadd.f32 %v561_v1, %v4088_v2  ;;  %v563_v0 = vpop.f32.mrb[25].mxu1  ;;  %v1301_v19 = vadd.f32 %v1211_v6, %v1210_v28 }
 0x147   :  { %v4341_v38 = vadd.f32 %v483_v32, %v4090_v10  ;;  %v485_v29 = vpop.f32.mrb[26].mxu0  ;;  %v4344_v21 = vadd.f32 %v563_v0, %v4090_v10  ;;  %v565_v37 = vpop.f32.mrb[26].mxu1 }
 0x148   :  { %6240 = vst [vmem:[#allocation23_spill] sm:$0xff] %v4335_v23  ;;  %6241 = vst [vmem:[#allocation24_spill] sm:$0xff] %v4338_v36  ;;  %1254 = vadd.xlane.f32.xlu1 %v1253_v62  ;;  %v1180_v35 = vmul.f32 %v4335_v23, %v4335_v23  ;;  %v1212_v18 = vmul.f32 %v4338_v36, %v4338_v36  ;;  %v4351_v25 = vadd.f32 %v485_v29, %v4088_v2  ;;  %v487_v45 = vpop.f32.mrb[27].mxu0  ;;  %v567_v7 = vpop.f32.mrb[27].mxu1 }
 0x149   :  { %6242 = vst [vmem:[#allocation25_spill] sm:$0xff] %v4341_v38  ;;  %6243 = vst [vmem:[#allocation26_spill] sm:$0xff] %v4344_v21  ;;  %v4354_v32 = vadd.f32 %v565_v37, %v4088_v2  ;;  %v1181_v0 = vmul.f32 %v4341_v38, %v4341_v38  ;;  %v1213_v28 = vmul.f32 %v4344_v21, %v4344_v21  ;;  %1299 = vadd.xlane.f32.xlu0 %v1298_v20  ;;  %v4376_v38 = vpop.xlane.xlu0 %939 }
 0x14a   :  { %6244 = vst [vmem:[#allocation27_spill] sm:$0xff] %v4351_v25  ;;  %v4361_v6 = vadd.f32 %v487_v45, %v4090_v10  ;;  %v4364_v1 = vadd.f32 %v567_v7, %v4090_v10  ;;  %v1182_v62 = vmul.f32 %v4351_v25, %v4351_v25  ;;  %v4374_v45 = vpop.xlane.xlu1 %936  ;;  %v1030_v49 = vmax.f32 %v4376_v38, 1e-24 }
 0x14b   :  { %6245 = vst [vmem:[#allocation28_spill] sm:$0xff] %v4354_v32  ;;  %v1214_v37 = vmul.f32 %v4354_v32, %v4354_v32  ;;  %v1256_v21 = vadd.f32 %v1181_v0, %v1180_v35  ;;  %v1304_v25 = vadd.f32 %v1213_v28, %v1212_v18  ;;  %v1029_v11 = vmax.f32 %v4374_v45, 1e-24 }
 0x14c   :  { %6246 = vst [vmem:[#allocation29_spill] sm:$0xff] %v4361_v6  ;;  %6247 = vst [vmem:[#allocation30_spill] sm:$0xff] %v4364_v1  ;;  %v1183_v29 = vmul.f32 %v4361_v6, %v4361_v6  ;;  %v1215_v36 = vmul.f32 %v4364_v1, %v4364_v1  ;;  %1302 = vadd.xlane.f32.xlu1 %v1301_v19 }
 0x14d   :  { %v491_v7 = vpop.f32.mrb[28].mxu0  ;;  %1257 = vadd.xlane.f32.xlu0 %v1256_v21  ;;  %v571_v20 = vpop.f32.mrb[28].mxu1  ;;  %2646 = vrsqrt.f32 %v1029_v11 }
 0x14e   :  { %v1259_v23 = vadd.f32 %v1183_v29, %v1182_v62  ;;  %v4379_v43 = vadd.f32 %v491_v7, %v4088_v2  ;;  %v493_v6 = vpop.f32.mrb[29].mxu0  ;;  %v4382_v32 = vadd.f32 %v571_v20, %v4088_v2  ;;  %v573_v31 = vpop.f32.mrb[29].mxu1  ;;  %v1307_v1 = vadd.f32 %v1215_v36, %v1214_v37 }
 0x14f   :  { %v4385_v19 = vadd.f32 %v493_v6, %v4090_v10  ;;  %v495_v35 = vpop.f32.mrb[30].mxu0  ;;  %v4388_v0 = vadd.f32 %v573_v31, %v4090_v10  ;;  %v575_v21 = vpop.f32.mrb[30].mxu1  ;;  %2648 = vrsqrt.f32 %v1030_v49 }
 0x150   :  { %6248 = vst [vmem:[#allocation31_spill] sm:$0xff] %v4379_v43  ;;  %6249 = vst [vmem:[#allocation32_spill] sm:$0xff] %v4382_v32  ;;  %1260 = vadd.xlane.f32.xlu1 %v1259_v23  ;;  %v1184_v18 = vmul.f32 %v4379_v43, %v4379_v43  ;;  %v1216_v28 = vmul.f32 %v4382_v32, %v4382_v32  ;;  %v4395_v62 = vadd.f32 %v495_v35, %v4088_v2  ;;  %v497_v29 = vpop.f32.mrb[31].mxu0  ;;  %v577_v7 = vpop.f32.mrb[31].mxu1 }
 0x151   :  { %6250 = vst [vmem:[#allocation33_spill] sm:$0xff] %v4385_v19  ;;  %6251 = vst [vmem:[#allocation34_spill] sm:$0xff] %v4388_v0  ;;  %v4398_v6 = vadd.f32 %v575_v21, %v4088_v2  ;;  %v1185_v31 = vmul.f32 %v4385_v19, %v4385_v19  ;;  %v1217_v23 = vmul.f32 %v4388_v0, %v4388_v0  ;;  %1305 = vadd.xlane.f32.xlu0 %v1304_v25  ;;  %v943_v35 = vpop.xlane.xlu1 %942 }
 0x152   :  { %6252 = vst [vmem:[#allocation35_spill] sm:$0xff] %v4395_v62  ;;  %v4405_v36 = vadd.f32 %v497_v29, %v4090_v10  ;;  %v4408_v37 = vadd.f32 %v577_v7, %v4090_v10  ;;  %v1186_v20 = vmul.f32 %v4395_v62, %v4395_v62  ;;  %v946_v7 = vpop.xlane.xlu0 %945  ;;  %v1031_v47 = vmax.f32 %v943_v35, 1e-24 }
 0x153   :  { %6253 = vst [vmem:[#allocation36_spill] sm:$0xff] %v4398_v6  ;;  %v1262_v21 = vadd.f32 %v1185_v31, %v1184_v18  ;;  %v1218_v32 = vmul.f32 %v4398_v6, %v4398_v6  ;;  %v1310_v10 = vadd.f32 %v1217_v23, %v1216_v28  ;;  %v2334_v31 = vld [vmem:[%s5961_s0] ss:$0 sm:$0xff]  ;;  %v6256_v23 = vmov 1  }
 0x154   :  { %6254 = vst [vmem:[#allocation37_spill] sm:$0xff] %v4405_v36  ;;  %6255 = vst [vmem:[#allocation38_spill] sm:$0xff] %v4408_v37  ;;  %v1187_v2 = vmul.f32 %v4405_v36, %v4405_v36  ;;  %1308 = vadd.xlane.f32.xlu1 %v1307_v1  ;;  %v1219_v29 = vmul.f32 %v4408_v37, %v4408_v37  ;;  %v1032_v61 = vmax.f32 %v946_v7, 1e-24  ;;  %2650 = vrsqrt.f32 %v1031_v47  ;;  %v2645_v47 = vpop.eup %2644 }
 0x155   :  { %1263 = vadd.xlane.f32.xlu0 %v1262_v21  ;;  %v949_v25 = vpop.xlane.xlu1 %948 }
 0x156   :  { %v1265_v0 = vadd.f32 %v1187_v2, %v1186_v20  ;;  %v1313_v62 = vadd.f32 %v1219_v29, %v1218_v32  ;;  %v952_v19 = vpop.xlane.xlu0 %951  ;;  %v1033_v39 = vmax.f32 %v949_v25, 1e-24  ;;  %2652 = vrsqrt.f32 %v1032_v61 }
 0x157   :  { %v1034_v55 = vmax.f32 %v952_v19, 1e-24  ;;  %v2647_v19 = vpop.eup %2646 }
 0x158   :  { %1266 = vadd.xlane.f32.xlu1 %v1265_v0  ;;  %2654 = vrsqrt.f32 %v1033_v39 }
 0x159   :  { %1311 = vadd.xlane.f32.xlu0 %v1310_v10  ;;  %v955_v43 = vpop.xlane.xlu1 %954  ;;  %2656 = vrsqrt.f32 %v1034_v55  ;;  %v2649_v39 = vpop.eup %2648 }
 0x15a   :  { %v958_v36 = vpop.xlane.xlu0 %957  ;;  %v1035_v56 = vmax.f32 %v955_v43, 1e-24 }
 0x15b   :  { %v1036_v53 = vmax.f32 %v958_v36, 1e-24 }
 0x15c   :  { %1314 = vadd.xlane.f32.xlu1 %v1313_v62  ;;  %2658 = vrsqrt.f32 %v1035_v56 }
 0x15d   :  { %v961_v1 = vpop.xlane.xlu1 %960  ;;  %2660 = vrsqrt.f32 %v1036_v53 }
 0x15e   :  { %v964_v18 = vpop.xlane.xlu0 %963  ;;  %v1037_v45 = vmax.f32 %v961_v1, 1e-24  ;;  %v2651_v53 = vpop.eup %2650 }
 0x15f   :  { %v1038_v38 = vmax.f32 %v964_v18, 1e-24 }
 0x160   :  { %2662 = vrsqrt.f32 %v1037_v45  ;;  %v2653_v7 = vpop.eup %2652 }
 0x161   :  { %v967_v6 = vpop.xlane.xlu1 %966  ;;  %2664 = vrsqrt.f32 %v1038_v38 }
 0x162   :  { %v970_v21 = vpop.xlane.xlu0 %969  ;;  %v1039_v8 = vmax.f32 %v967_v6, 1e-24  ;;  %v2655_v18 = vpop.eup %2654 }
 0x163   :  { %v1040_v35 = vmax.f32 %v970_v21, 1e-24 }
 0x164   :  { %2666 = vrsqrt.f32 %v1039_v8 }
 0x165   :  { %v973_v28 = vpop.xlane.xlu1 %972  ;;  %2668 = vrsqrt.f32 %v1040_v35 }
 0x166   :  { %v976_v0 = vpop.xlane.xlu0 %975  ;;  %v1041_v49 = vmax.f32 %v973_v28, 1e-24  ;;  %v4476_v28 = vpop.eup %2656 }
 0x167   :  { %v1042_v61 = vmax.f32 %v976_v0, 1e-24 }
 0x168   :  { %2670 = vrsqrt.f32 %v1041_v49 }
 0x169   :  { %v4422_v20 = vpop.xlane.xlu1 %978  ;;  %2672 = vrsqrt.f32 %v1042_v61 }
 0x16a   :  { %v4424_v32 = vpop.xlane.xlu0 %981  ;;  %v1043_v55 = vmax.f32 %v4422_v20, 1e-24 }
 0x16b   :  { %v1044_v56 = vmax.f32 %v4424_v32, 1e-24  ;;  %v4481_v32 = vpop.eup %2658 }
 0x16c   :  { %2674 = vrsqrt.f32 %v1043_v55  ;;  %v4484_v45 = vpop.eup %2660  ;;  %v2773_v55 = vld [vmem:[%s5957_s2 + $0x8] sm:$0xff] }
 0x16d   :  { %1967 = vperm.xlu1 %2530, %v2334_v31   ;;  %v4426_v62 = vpop.xlane.xlu1 %984  ;;  %2676 = vrsqrt.f32 %v1044_v56 }
 0x16e   :  { %v4428_v2 = vpop.xlane.xlu0 %987  ;;  %v1045_v36 = vmax.f32 %v4426_v62, 1e-24 }
 0x16f   :  { %1675 = vperm.xlu0 %2529, %v2334_v31   ;;  %v1046_v25 = vmax.f32 %v4428_v2, 1e-24 }
 0x170   :  { %2678 = vrsqrt.f32 %v1045_v36  ;;  %v2774_v36 = vld [vmem:[%s5957_s2 + $0x10] sm:$0xff] }
 0x171   :  { %v4430_v29 = vpop.xlane.xlu1 %990  ;;  %2680 = vrsqrt.f32 %v1046_v25  ;;  %v4515_v25 = vmul.f32 %v2774_v36, %v2647_v19  ;;  %v2777_v36 = vld [vmem:[%s5957_s2 + $0x28] sm:$0xff] }
 0x172   :  { %v4432_v10 = vpop.xlane.xlu0 %993  ;;  %v1047_v21 = vmax.f32 %v4430_v29, 1e-24  ;;  %v4489_v29 = vpop.eup %2662 }
 0x173   :  { %2531 = vset.pattern.permute.xlu0 %v6256_v23  ;;  %v1048_v0 = vmax.f32 %v4432_v10, 1e-24  ;;  %v4492_v10 = vpop.eup %2664  ;;  %6259 = vst [vmem:[#allocation41_spill] sm:$0xff] %v4515_v25  ;;  %v4535_v25 = vmul.f32 %v2777_v36, %v2649_v39  ;;  %v2780_v36 = vld [vmem:[%s5957_s2 + $0x40] sm:$0xff] }
 0x174   :  { %2682 = vrsqrt.f32 %v1047_v21  ;;  %v2775_v21 = vld [vmem:[%s5957_s2 + $0x18] sm:$0xff] }
 0x175   :  { %v4434_v37 = vpop.xlane.xlu1 %996  ;;  %2684 = vrsqrt.f32 %v1048_v0  ;;  %v4520_v0 = vmul.f32 %v2775_v21, %v2647_v19  ;;  %6262 = vst [vmem:[#allocation44_spill] sm:$0xff] %v4535_v25  ;;  %v4558_v25 = vmul.f32 %v2780_v36, %v2653_v7  ;;  %v2783_v36 = vld [vmem:[%s5957_s2 + $0x58] sm:$0xff] }
 0x176   :  { %v4436_v52 = vpop.xlane.xlu0 %999  ;;  %v1049_v62 = vmax.f32 %v4434_v37, 1e-24  ;;  %v4497_v37 = vpop.eup %2666 }
 0x177   :  { %v1050_v2 = vmax.f32 %v4436_v52, 1e-24  ;;  %v2772_v52 = vld [vmem:[%s5957_s2] sm:$0xff]  ;;  %6260 = vst [vmem:[#allocation42_spill] sm:$0xff] %v4520_v0  ;;  %6265 = vst [vmem:[#allocation47_spill] sm:$0xff] %v4558_v25  ;;  %v4576_v25 = vmul.f32 %v2783_v36, %v2655_v18  ;;  %v2786_v36 = vld [vmem:[%s5957_s2 + $0x70] sm:$0xff] }
 0x178   :  { %v4502_v61 = vmul.f32 %v2772_v52, %v2645_v47  ;;  %2686 = vrsqrt.f32 %v1049_v62  ;;  %v2776_v52 = vld [vmem:[%s5957_s2 + $0x20] sm:$0xff] }
 0x179   :  { %v4438_v31 = vpop.xlane.xlu1 %1002  ;;  %2688 = vrsqrt.f32 %v1050_v2  ;;  %v2778_v2 = vld [vmem:[%s5957_s2 + $0x30] sm:$0xff]  ;;  %6268 = vst [vmem:[#allocation52_spill] sm:$0xff] %v4576_v25  ;;  %v4602_v25 = vmul.f32 %v2786_v36, %v4481_v32 }
 0x17a   :  { %v4440_v23 = vpop.xlane.xlu0 %1005  ;;  %v1051_v8 = vmax.f32 %v4438_v31, 1e-24  ;;  %6257 = vst [vmem:[#allocation39_spill] sm:$0xff] %v4502_v61  ;;  %v4507_v31 = vmul.f32 %v2773_v55, %v2645_v47  ;;  %v4530_v55 = vmul.f32 %v2776_v52, %v2649_v39  ;;  %v4543_v21 = vmul.f32 %v2778_v2, %v2651_v53  ;;  %v2779_v52 = vld [vmem:[%s5957_s2 + $0x38] sm:$0xff]  ;;  %v2781_v2 = vld [vmem:[%s5957_s2 + $0x48] sm:$0xff]  ;;  %v6350_v61 = vld [vmem:[#allocation22_spill] sm:$0xff] }
 0x17b   :  { %v1052_v35 = vmax.f32 %v4440_v23, 1e-24  ;;  %v4510_v23 = vpop.eup %2668  ;;  %6271 = vst [vmem:[#allocation55_spill] sm:$0xff] %v4602_v25  ;;  %v2789_v25 = vld [vmem:[%s5957_s2 + $0x88] sm:$0xff] }
 0x17c   :  { %6258 = vst [vmem:[#allocation40_spill] sm:$0xff] %v4507_v31  ;;  %6261 = vst [vmem:[#allocation43_spill] sm:$0xff] %v4530_v55  ;;  %2690 = vrsqrt.f32 %v1051_v8  ;;  %v4548_v55 = vmul.f32 %v2779_v52, %v2651_v53 }
 0x17d   :  { %v4442_v14 = vpop.xlane.xlu1 %1008  ;;  %6263 = vst [vmem:[#allocation45_spill] sm:$0xff] %v4543_v21  ;;  %2692 = vrsqrt.f32 %v1052_v35  ;;  %v4563_v21 = vmul.f32 %v2781_v2, %v2653_v7  ;;  %v2782_v35 = vld [vmem:[%s5957_s2 + $0x50] sm:$0xff]  ;;  %v2784_v2 = vld [vmem:[%s5957_s2 + $0x60] sm:$0xff] }
 0x17e   :  { %v4444_v57 = vpop.xlane.xlu0 %1011  ;;  %v1053_v56 = vmax.f32 %v4442_v14, 1e-24  ;;  %v4525_v14 = vpop.eup %2670  ;;  %6264 = vst [vmem:[#allocation46_spill] sm:$0xff] %v4548_v55  ;;  %v4571_v52 = vmul.f32 %v2782_v35, %v2655_v18  ;;  %v4587_v35 = vmul.f32 %v2784_v2, %v4476_v28  ;;  %v2787_v2 = vld [vmem:[%s5957_s2 + $0x78] sm:$0xff] }
 0x17f   :  { %v1054_v47 = vmax.f32 %v4444_v57, 1e-24  ;;  %v4538_v57 = vpop.eup %2672  ;;  %6266 = vst [vmem:[#allocation48_spill] sm:$0xff] %v4563_v21 }
 0x180   :  { %2694 = vrsqrt.f32 %v1053_v56  ;;  %6267 = vst [vmem:[#allocation49_spill] sm:$0xff] %v4571_v52  ;;  %6269 = vst [vmem:[#allocation53_spill] sm:$0xff] %v4587_v35  ;;  %v2785_v52 = vld [vmem:[%s5957_s2 + $0x68] sm:$0xff]  ;;  %v4608_v35 = vmul.f32 %v2787_v2, %v4481_v32  ;;  %v4625_v32 = vmul.f32 %v2789_v25, %v4484_v45  ;;  %v2790_v2 = vld [vmem:[%s5957_s2 + $0x90] sm:$0xff] }
 0x181   :  { %v4446_v9 = vpop.xlane.xlu1 %1014  ;;  %2696 = vrsqrt.f32 %v1054_v47  ;;  %v4593_v18 = vmul.f32 %v2785_v52, %v4476_v28  ;;  %v2788_v52 = vld [vmem:[%s5957_s2 + $0x80] sm:$0xff] }
 0x182   :  { %v4448_v48 = vpop.xlane.xlu0 %1017  ;;  %v1055_v19 = vmax.f32 %v4446_v9, 1e-24  ;;  %v4553_v9 = vpop.eup %2674  ;;  %6272 = vst [vmem:[#allocation56_spill] sm:$0xff] %v4608_v35  ;;  %v4619_v36 = vmul.f32 %v2788_v52, %v4484_v45  ;;  %6274 = vst [vmem:[#allocation58_spill] sm:$0xff] %v4625_v32  ;;  %v4634_v35 = vmul.f32 %v2790_v2, %v4489_v29  ;;  %v2791_v52 = vld [vmem:[%s5957_s2 + $0x98] sm:$0xff] }
 0x183   :  { %v1056_v39 = vmax.f32 %v4448_v48, 1e-24  ;;  %v4566_v48 = vpop.eup %2676  ;;  %6270 = vst [vmem:[#allocation54_spill] sm:$0xff] %v4593_v18 }
 0x184   :  { %2698 = vrsqrt.f32 %v1055_v19  ;;  %6273 = vst [vmem:[#allocation57_spill] sm:$0xff] %v4619_v36  ;;  %6275 = vst [vmem:[#allocation59_spill] sm:$0xff] %v4634_v35  ;;  %v4640_v36 = vmul.f32 %v2791_v52, %v4489_v29  ;;  %v2793_v35 = vld [vmem:[%s5957_s2 + $0xa8] sm:$0xff]  ;;  %v2794_v52 = vld [vmem:[%s5957_s2 + $0xb0] sm:$0xff] }
 0x185   :  { %v4450_v34 = vpop.xlane.xlu1 %1020  ;;  %2700 = vrsqrt.f32 %v1056_v39  ;;  %v4657_v29 = vmul.f32 %v2793_v35, %v4492_v10 }
 0x186   :  { %v4455_v33 = vpop.xlane.xlu0 %1023  ;;  %v1057_v53 = vmax.f32 %v4450_v34, 1e-24  ;;  %v4581_v34 = vpop.eup %2678  ;;  %6276 = vst [vmem:[#allocation63_spill] sm:$0xff] %v4640_v36  ;;  %v4666_v36 = vmul.f32 %v2794_v52, %v4497_v37 }
 0x187   :  { %v1058_v7 = vmax.f32 %v4455_v33, 1e-24  ;;  %v4596_v47 = vpop.eup %2680  ;;  %6278 = vst [vmem:[#allocation65_spill] sm:$0xff] %v4657_v29 }
 0x188   :  { %v4613_v19 = vpop.eup %2682  ;;  %2702 = vrsqrt.f32 %v1057_v53  ;;  %v2792_v53 = vld [vmem:[%s5957_s2 + $0xa0] sm:$0xff]  ;;  %6279 = vst [vmem:[#allocation66_spill] sm:$0xff] %v4666_v36  ;;  %v2797_v36 = vld [vmem:[%s5957_s2 + $0xc8] sm:$0xff] }
 0x189   :  { %v4457_v46 = vpop.xlane.xlu1 %1026  ;;  %v4628_v39 = vpop.eup %2684  ;;  %2704 = vrsqrt.f32 %v1058_v7  ;;  %v4651_v2 = vmul.f32 %v2792_v53, %v4492_v10  ;;  %v2795_v53 = vld [vmem:[%s5957_s2 + $0xb8] sm:$0xff] }
 0x18a   :  { %v1059_v33 = vmax.f32 %v4457_v46, 1e-24  ;;  %v4645_v25 = vpop.eup %2686 }
 0x18b   :  { %6277 = vst [vmem:[#allocation64_spill] sm:$0xff] %v4651_v2  ;;  %v4660_v7 = vpop.eup %2688  ;;  %v4672_v2 = vmul.f32 %v2795_v53, %v4497_v37  ;;  %v4689_v37 = vmul.f32 %v2797_v36, %v4510_v23  ;;  %v2798_v53 = vld [vmem:[%s5957_s2 + $0xd0] sm:$0xff] }
 0x18c   :  { %2706 = vrsqrt.f32 %v1059_v33  ;;  %v4677_v35 = vpop.eup %2690  ;;  %v2796_v33 = vld [vmem:[%s5957_s2 + $0xc0] sm:$0xff] }
 0x18d   :  { %6280 = vst [vmem:[#allocation67_spill] sm:$0xff] %v4672_v2  ;;  %v4683_v52 = vmul.f32 %v2796_v33, %v4510_v23  ;;  %6282 = vst [vmem:[#allocation69_spill] sm:$0xff] %v4689_v37  ;;  %v4698_v2 = vmul.f32 %v2798_v53, %v4525_v14  ;;  %v2799_v33 = vld [vmem:[%s5957_s2 + $0xd8] sm:$0xff] }
 0x18e   :  { %v6334_v37 = vld [vmem:[#allocation13_spill] sm:$0xff] }
 0x18f   :  { %6281 = vst [vmem:[#allocation68_spill] sm:$0xff] %v4683_v52  ;;  %6283 = vst [vmem:[#allocation70_spill] sm:$0xff] %v4698_v2  ;;  %v4704_v52 = vmul.f32 %v2799_v33, %v4525_v14  ;;  %v2801_v2 = vld [vmem:[%s5957_s2 + $0xe8] sm:$0xff]  ;;  %v2802_v33 = vld [vmem:[%s5957_s2 + $0xf0] sm:$0xff] }
 0x190   :  { %v4721_v14 = vmul.f32 %v2801_v2, %v4538_v57 }
 0x191   :  { %6284 = vst [vmem:[#allocation71_spill] sm:$0xff] %v4704_v52  ;;  %v4730_v52 = vmul.f32 %v2802_v33, %v4553_v9 }
 0x192   :  { %6286 = vst [vmem:[#allocation73_spill] sm:$0xff] %v4721_v14 }
 0x193   :  { %6287 = vst [vmem:[#allocation74_spill] sm:$0xff] %v4730_v52  ;;  %v2805_v52 = vld [vmem:[%s5957_s2 + $0x108] sm:$0xff] }
 0x1aa   :  { %v4459_v54 = vpop.xlane.xlu0 %1221 }
 0x1ab   :  { %v1316_v28 = vmax.f32 %v4459_v54, 1e-24 }
 0x1ac   :  { %v4461_v27 = vpop.xlane.xlu1 %1224 }
 0x1ad   :  { %v1317_v54 = vmax.f32 %v4461_v27, 1e-24  ;;  %2708 = vrsqrt.f32 %v1316_v28  ;;  %v4692_v28 = vpop.eup %2692 }
 0x1ae   :  { %v4463_v11 = vpop.xlane.xlu0 %1269  ;;  %v4709_v36 = vpop.eup %2694 }
 0x1af   :  { %v1332_v45 = vmax.f32 %v4463_v11, 1e-24  ;;  %2710 = vrsqrt.f32 %v1317_v54  ;;  %v2800_v54 = vld [vmem:[%s5957_s2 + $0xe0] sm:$0xff] }
 0x1b0   :  { %v4465_v43 = vpop.xlane.xlu1 %1272  ;;  %v4715_v53 = vmul.f32 %v2800_v54, %v4538_v57  ;;  %v2803_v54 = vld [vmem:[%s5957_s2 + $0xf8] sm:$0xff] }
 0x1b1   :  { %v1333_v11 = vmax.f32 %v4465_v43, 1e-24  ;;  %2712 = vrsqrt.f32 %v1332_v45  ;;  %v4724_v45 = vpop.eup %2696 }
 0x1b2   :  { %v4469_v6 = vpop.xlane.xlu0 %1227  ;;  %6285 = vst [vmem:[#allocation72_spill] sm:$0xff] %v4715_v53  ;;  %v4736_v53 = vmul.f32 %v2803_v54, %v4553_v9  ;;  %v4741_v2 = vpop.eup %2698  ;;  %v4753_v9 = vmul.f32 %v2805_v52, %v4566_v48  ;;  %v2806_v54 = vld [vmem:[%s5957_s2 + $0x110] sm:$0xff] }
 0x1b3   :  { %v1318_v10 = vmax.f32 %v4469_v6, 1e-24  ;;  %2714 = vrsqrt.f32 %v1333_v11  ;;  %v2804_v11 = vld [vmem:[%s5957_s2 + $0x100] sm:$0xff] }
 0x1b4   :  { %v4473_v1 = vpop.xlane.xlu1 %1230  ;;  %6288 = vst [vmem:[#allocation75_spill] sm:$0xff] %v4736_v53  ;;  %v4747_v33 = vmul.f32 %v2804_v11, %v4566_v48  ;;  %6290 = vst [vmem:[#allocation77_spill] sm:$0xff] %v4753_v9  ;;  %v4762_v53 = vmul.f32 %v2806_v54, %v4581_v34  ;;  %v2807_v11 = vld [vmem:[%s5957_s2 + $0x118] sm:$0xff] }
 0x1b5   :  { %v1319_v6 = vmax.f32 %v4473_v1, 1e-24  ;;  %2716 = vrsqrt.f32 %v1318_v10  ;;  %v4756_v10 = vpop.eup %2700 }
 0x1b6   :  { %v4479_v20 = vpop.xlane.xlu0 %1275  ;;  %6289 = vst [vmem:[#allocation76_spill] sm:$0xff] %v4747_v33  ;;  %6291 = vst [vmem:[#allocation78_spill] sm:$0xff] %v4762_v53  ;;  %v4768_v33 = vmul.f32 %v2807_v11, %v4581_v34  ;;  %v4773_v52 = vpop.eup %2702  ;;  %v2809_v53 = vld [vmem:[%s5957_s2 + $0x128] sm:$0xff]  ;;  %v2810_v11 = vld [vmem:[%s5957_s2 + $0x130] sm:$0xff] }
 0x1b7   :  { %v1334_v23 = vmax.f32 %v4479_v20, 1e-24  ;;  %2718 = vrsqrt.f32 %v1319_v6  ;;  %v2808_v6 = vld [vmem:[%s5957_s2 + $0x120] sm:$0xff]  ;;  %v4785_v34 = vmul.f32 %v2809_v53, %v4596_v47 }
 0x1b8   :  { %v4487_v38 = vpop.xlane.xlu1 %1278  ;;  %6292 = vst [vmem:[#allocation79_spill] sm:$0xff] %v4768_v33  ;;  %v4779_v54 = vmul.f32 %v2808_v6, %v4596_v47  ;;  %v4794_v33 = vmul.f32 %v2810_v11, %v4613_v19  ;;  %v2811_v6 = vld [vmem:[%s5957_s2 + $0x138] sm:$0xff] }
 0x1b9   :  { %v1335_v20 = vmax.f32 %v4487_v38, 1e-24  ;;  %2720 = vrsqrt.f32 %v1334_v23  ;;  %6294 = vst [vmem:[#allocation81_spill] sm:$0xff] %v4785_v34  ;;  %v4788_v23 = vpop.eup %2704 }
 0x1ba   :  { %v4495_v49 = vpop.xlane.xlu0 %1233  ;;  %6293 = vst [vmem:[#allocation80_spill] sm:$0xff] %v4779_v54  ;;  %6295 = vst [vmem:[#allocation82_spill] sm:$0xff] %v4794_v33  ;;  %v4800_v54 = vmul.f32 %v2811_v6, %v4613_v19  ;;  %v4805_v53 = vpop.eup %2706  ;;  %v2813_v33 = vld [vmem:[%s5957_s2 + $0x148] sm:$0xff]  ;;  %v2814_v6 = vld [vmem:[%s5957_s2 + $0x150] sm:$0xff] }
 0x1bb   :  { %v1320_v57 = vmax.f32 %v4495_v49, 1e-24  ;;  %2722 = vrsqrt.f32 %v1335_v20  ;;  %v2812_v20 = vld [vmem:[%s5957_s2 + $0x140] sm:$0xff]  ;;  %v4817_v19 = vmul.f32 %v2813_v33, %v4628_v39 }
 0x1bc   :  { %v4523_v62 = vpop.xlane.xlu1 %1236  ;;  %6296 = vst [vmem:[#allocation83_spill] sm:$0xff] %v4800_v54  ;;  %v4811_v11 = vmul.f32 %v2812_v20, %v4628_v39  ;;  %v4826_v54 = vmul.f32 %v2814_v6, %v4645_v25  ;;  %v2815_v20 = vld [vmem:[%s5957_s2 + $0x158] sm:$0xff] }
 0x1bd   :  { %v1321_v49 = vmax.f32 %v4523_v62, 1e-24  ;;  %2724 = vrsqrt.f32 %v1320_v57  ;;  %6298 = vst [vmem:[#allocation85_spill] sm:$0xff] %v4817_v19  ;;  %v4820_v57 = vpop.eup %2708 }
 0x1be   :  { %v4551_v8 = vpop.xlane.xlu0 %1281  ;;  %6297 = vst [vmem:[#allocation84_spill] sm:$0xff] %v4811_v11  ;;  %6299 = vst [vmem:[#allocation86_spill] sm:$0xff] %v4826_v54  ;;  %v4832_v11 = vmul.f32 %v2815_v20, %v4645_v25  ;;  %v4837_v33 = vpop.eup %2710  ;;  %v2817_v54 = vld [vmem:[%s5957_s2 + $0x168] sm:$0xff]  ;;  %v2818_v20 = vld [vmem:[%s5957_s2 + $0x170] sm:$0xff] }
 0x1bf   :  { %v1336_v48 = vmax.f32 %v4551_v8, 1e-24  ;;  %2726 = vrsqrt.f32 %v1321_v49  ;;  %v2816_v49 = vld [vmem:[%s5957_s2 + $0x160] sm:$0xff]  ;;  %v4849_v25 = vmul.f32 %v2817_v54, %v4660_v7 }
 0x1c0   :  { %v4579_v56 = vpop.xlane.xlu1 %1284  ;;  %6300 = vst [vmem:[#allocation87_spill] sm:$0xff] %v4832_v11  ;;  %v4843_v6 = vmul.f32 %v2816_v49, %v4660_v7  ;;  %v4858_v11 = vmul.f32 %v2818_v20, %v4677_v35  ;;  %v2819_v49 = vld [vmem:[%s5957_s2 + $0x178] sm:$0xff] }
 0x1c1   :  { %v1337_v8 = vmax.f32 %v4579_v56, 1e-24  ;;  %2728 = vrsqrt.f32 %v1336_v48  ;;  %6302 = vst [vmem:[#allocation89_spill] sm:$0xff] %v4849_v25  ;;  %v4852_v48 = vpop.eup %2712  ;;  %v6331_v25 = vld [vmem:[#allocation7_spill] sm:$0xff] }
 0x1c2   :  { %v4611_v46 = vpop.xlane.xlu0 %1239  ;;  %6301 = vst [vmem:[#allocation88_spill] sm:$0xff] %v4843_v6  ;;  %6303 = vst [vmem:[#allocation90_spill] sm:$0xff] %v4858_v11  ;;  %v4864_v6 = vmul.f32 %v2819_v49, %v4677_v35  ;;  %v4867_v54 = vpop.eup %2714  ;;  %v2821_v11 = vld [vmem:[%s5957_s2 + $0x188] sm:$0xff]  ;;  %v2822_v49 = vld [vmem:[%s5957_s2 + $0x190] sm:$0xff] }
 0x1c3   :  { %v1322_v47 = vmax.f32 %v4611_v46, 1e-24  ;;  %2730 = vrsqrt.f32 %v1337_v8  ;;  %v2820_v8 = vld [vmem:[%s5957_s2 + $0x180] sm:$0xff]  ;;  %v4879_v35 = vmul.f32 %v2821_v11, %v4692_v28 }
 0x1c4   :  { %6304 = vst [vmem:[#allocation91_spill] sm:$0xff] %v4864_v6  ;;  %v4873_v20 = vmul.f32 %v2820_v8, %v4692_v28  ;;  %v4888_v6 = vmul.f32 %v2822_v49, %v4709_v36  ;;  %v2823_v8 = vld [vmem:[%s5957_s2 + $0x198] sm:$0xff] }
 0x1c5   :  { %v4643_v27 = vpop.xlane.xlu1 %1242  ;;  %2732 = vrsqrt.f32 %v1322_v47  ;;  %6306 = vst [vmem:[#allocation93_spill] sm:$0xff] %v4879_v35  ;;  %v4882_v47 = vpop.eup %2716  ;;  %v6330_v35 = vld [vmem:[#allocation6_spill] sm:$0xff] }
 0x1c6   :  { %v4675_v43 = vpop.xlane.xlu0 %1287  ;;  %v1323_v46 = vmax.f32 %v4643_v27, 1e-24  ;;  %6305 = vst [vmem:[#allocation92_spill] sm:$0xff] %v4873_v20  ;;  %6307 = vst [vmem:[#allocation94_spill] sm:$0xff] %v4888_v6  ;;  %v4894_v20 = vmul.f32 %v2823_v8, %v4709_v36  ;;  %v4897_v11 = vpop.eup %2718  ;;  %v2825_v6 = vld [vmem:[%s5957_s2 + $0x1a8] sm:$0xff]  ;;  %v2826_v8 = vld [vmem:[%s5957_s2 + $0x1b0] sm:$0xff] }
 0x1c7   :  { %v1338_v39 = vmax.f32 %v4675_v43, 1e-24  ;;  %v4909_v36 = vmul.f32 %v2825_v6, %v4724_v45 }
 0x1c8   :  { %2734 = vrsqrt.f32 %v1323_v46  ;;  %6308 = vst [vmem:[#allocation95_spill] sm:$0xff] %v4894_v20  ;;  %v2824_v46 = vld [vmem:[%s5957_s2 + $0x1a0] sm:$0xff]  ;;  %v4918_v20 = vmul.f32 %v2826_v8, %v4741_v2  ;;  %v2829_v8 = vld [vmem:[%s5957_s2 + $0x1c8] sm:$0xff] }
 0x1c9   :  { %v4707_v1 = vpop.xlane.xlu1 %1290  ;;  %2736 = vrsqrt.f32 %v1338_v39  ;;  %v4903_v49 = vmul.f32 %v2824_v46, %v4724_v45  ;;  %6310 = vst [vmem:[#allocation97_spill] sm:$0xff] %v4909_v36  ;;  %v4912_v39 = vpop.eup %2720  ;;  %v2827_v46 = vld [vmem:[%s5957_s2 + $0x1b8] sm:$0xff] }
 0x1ca   :  { %v4739_v38 = vpop.xlane.xlu0 %1245  ;;  %v1339_v43 = vmax.f32 %v4707_v1, 1e-24  ;;  %6311 = vst [vmem:[#allocation98_spill] sm:$0xff] %v4918_v20  ;;  %v4936_v20 = vmul.f32 %v2829_v8, %v4756_v10 }
 0x1cb   :  { %v1324_v7 = vmax.f32 %v4739_v38, 1e-24  ;;  %6309 = vst [vmem:[#allocation96_spill] sm:$0xff] %v4903_v49  ;;  %v4924_v49 = vmul.f32 %v2827_v46, %v4741_v2 }
 0x1cc   :  { %2738 = vrsqrt.f32 %v1339_v43  ;;  %v2828_v43 = vld [vmem:[%s5957_s2 + $0x1c0] sm:$0xff]  ;;  %6314 = vst [vmem:[#allocation101_spill] sm:$0xff] %v4936_v20 }
 0x1cd   :  { %v4771_v62 = vpop.xlane.xlu1 %1248  ;;  %6312 = vst [vmem:[#allocation99_spill] sm:$0xff] %v4924_v49  ;;  %2740 = vrsqrt.f32 %v1324_v7  ;;  %v4930_v36 = vmul.f32 %v2828_v43, %v4756_v10  ;;  %v2831_v43 = vld [vmem:[%s5957_s2 + $0x1d8] sm:$0xff]  ;;  %v6328_v49 = vld [vmem:[#allocation2_spill] sm:$0xff] }
 0x1ce   :  { %v4803_v56 = vpop.xlane.xlu0 %1293  ;;  %v1325_v38 = vmax.f32 %v4771_v62, 1e-24 }
 0x1cf   :  { %v1340_v28 = vmax.f32 %v4803_v56, 1e-24  ;;  %6313 = vst [vmem:[#allocation100_spill] sm:$0xff] %v4930_v36  ;;  %v4948_v36 = vmul.f32 %v2831_v43, %v4773_v52 }
 0x1d0   :  { %2742 = vrsqrt.f32 %v1325_v38 }
 0x1d1   :  { %v4835_v27 = vpop.xlane.xlu1 %1296  ;;  %6316 = vst [vmem:[#allocation103_spill] sm:$0xff] %v4948_v36  ;;  %2744 = vrsqrt.f32 %v1340_v28 }
 0x1d2   :  { %v1252_v1 = vpop.xlane.xlu0 %1251  ;;  %v1341_v56 = vmax.f32 %v4835_v27, 1e-24  ;;  %v2723_v27 = vpop.eup %2722 }
 0x1d3   :  { %v1326_v45 = vmax.f32 %v1252_v1, 1e-24  ;;  %v2725_v7 = vpop.eup %2724  ;;  %v2830_v1 = vld [vmem:[%s5957_s2 + $0x1d0] sm:$0xff] }
 0x1d4   :  { %v4942_v46 = vmul.f32 %v2830_v1, %v4773_v52  ;;  %v2727_v38 = vpop.eup %2726  ;;  %v2833_v1 = vld [vmem:[%s5957_s2 + $0x1e8] sm:$0xff]  ;;  %2746 = vrsqrt.f32 %v1341_v56 }
 0x1d5   :  { %v1255_v62 = vpop.xlane.xlu1 %1254  ;;  %v2729_v28 = vpop.eup %2728  ;;  %2748 = vrsqrt.f32 %v1326_v45  ;;  %v4996_v45 = vmul.f32 %v4852_v48, %v4102_v16  ;;  %v5012_v16 = vmul.f32 %v4882_v47, %v4139_v40  ;;  %v5028_v40 = vmul.f32 %v4912_v39, %v4142_v51 }
 0x1d6   :  { %v1300_v6 = vpop.xlane.xlu0 %1299  ;;  %v1327_v2 = vmax.f32 %v1255_v62, 1e-24  ;;  %6315 = vst [vmem:[#allocation102_spill] sm:$0xff] %v4942_v46  ;;  %v2832_v62 = vld [vmem:[%s5957_s2 + $0x1e0] sm:$0xff]  ;;  %v4960_v46 = vmul.f32 %v2833_v1, %v4788_v23  ;;  %v4980_v1 = vmul.f32 %v4820_v57, %v4099_v30 }
 0x1d7   :  { %v1342_v10 = vmax.f32 %v1300_v6, 1e-24  ;;  %v4954_v20 = vmul.f32 %v2832_v62, %v4788_v23  ;;  %v2834_v6 = vld [vmem:[%s5957_s2 + $0x1f0] sm:$0xff]  ;;  %v2835_v62 = vld [vmem:[%s5957_s2 + $0x1f8] sm:$0xff]  ;;  %v4976_v23 = vmul.f32 %v4820_v57, %v4093_v24  ;;  %v4992_v24 = vmul.f32 %v4852_v48, %v4096_v58 }
 0x1d8   :  { %6318 = vst [vmem:[#allocation105_spill] sm:$0xff] %v4960_v46  ;;  %v4966_v43 = vmul.f32 %v2834_v6, %v4805_v53  ;;  %v4984_v6 = vmul.f32 %v4837_v33, %v4109_v26  ;;  %2750 = vrsqrt.f32 %v1327_v2  ;;  %v5000_v26 = vmul.f32 %v4867_v54, %v4112_v12 }
 0x1d9   :  { %v1303_v8 = vpop.xlane.xlu1 %1302  ;;  %6317 = vst [vmem:[#allocation104_spill] sm:$0xff] %v4954_v20  ;;  %v4972_v20 = vmul.f32 %v2835_v62, %v4805_v53  ;;  %v4988_v53 = vmul.f32 %v4837_v33, %v4119_v3  ;;  %2752 = vrsqrt.f32 %v1342_v10  ;;  %v5004_v2 = vmul.f32 %v4867_v54, %v4122_v50 }
 0x1da   :  { %v1343_v52 = vmax.f32 %v1303_v8, 1e-24  ;;  %6319 = vst [vmem:[#allocation106_spill] sm:$0xff] %v4966_v43  ;;  %v1258_v56 = vpop.xlane.xlu0 %1257  ;;  %v2731_v8 = vpop.eup %2730  ;;  %v5008_v58 = vmul.f32 %v4882_v47, %v4133_v17  ;;  %v5016_v48 = vmul.f32 %v4897_v11, %v4149_v59  ;;  %v5020_v50 = vmul.f32 %v4897_v11, %v4159_v41 }
 0x1db   :  { %6320 = vst [vmem:[#allocation107_spill] sm:$0xff] %v4972_v20  ;;  %v1328_v43 = vmax.f32 %v1258_v56, 1e-24  ;;  %v2733_v46 = vpop.eup %2732  ;;  %v5024_v54 = vmul.f32 %v4912_v39, %v4136_v15  ;;  %v5031_v59 = vmul.f32 %v2723_v27, %v4152_v42  ;;  %v5034_v47 = vmul.f32 %v2723_v27, %v4162_v63  ;;  %v6321_v27 = vld [vmem:[#allocation50_spill] sm:$0xff]  ;;  %v6327_v20 = vld [vmem:[#allocation61_spill] sm:$0xff] }
 0x1dc   :  { %v2735_v57 = vpop.eup %2734  ;;  %2754 = vrsqrt.f32 %v1343_v52  ;;  %v5037_v41 = vmul.f32 %v2725_v7, %v4173_v22  ;;  %v5040_v15 = vmul.f32 %v2725_v7, %v4179_v13  ;;  %v5043_v62 = vmul.f32 %v2727_v38, %v4189_v4 }
 0x1dd   :  { %v1261_v30 = vpop.xlane.xlu1 %1260  ;;  %v2737_v33 = vpop.eup %2736  ;;  %2756 = vrsqrt.f32 %v1328_v43  ;;  %v5046_v42 = vmul.f32 %v2727_v38, %v4199_v5  ;;  %v5049_v63 = vmul.f32 %v2729_v28, %v4176_v60  ;;  %v5052_v22 = vmul.f32 %v2729_v28, %v4182_v44  ;;  %v6326_v28 = vld [vmem:[#allocation5_spill] sm:$0xff] }
 0x1de   :  { %v1329_v3 = vmax.f32 %v1261_v30, 1e-24  ;;  %v1306_v12 = vpop.xlane.xlu0 %1305  ;;  %v2739_v10 = vpop.eup %2738  ;;  %v5055_v56 = vmul.f32 %v2731_v8, %v6321_v27  ;;  %v6322_v30 = vld [vmem:[#allocation60_spill] sm:$0xff]  ;;  %v5070_v27 = vmul.f32 %v2735_v57, %v6326_v28  ;;  %v5073_v36 = vmul.f32 %v2737_v33, %v6327_v20  ;;  %v6332_v28 = vld [vmem:[#allocation9_spill] sm:$0xff]  ;;  %v6333_v20 = vld [vmem:[#allocation11_spill] sm:$0xff] }
 0x1df   :  { %v1344_v17 = vmax.f32 %v1306_v12, 1e-24  ;;  %v2741_v52 = vpop.eup %2740  ;;  %v5058_v4 = vmul.f32 %v2731_v8, %v6322_v30 }
 0x1e0   :  { %2758 = vrsqrt.f32 %v1329_v3  ;;  %v2743_v43 = vpop.eup %2742  ;;  %v6323_v3 = vld [vmem:[#allocation51_spill] sm:$0xff]  ;;  %v1397_v19 = vmul.f32 %v2741_v52, %v6332_v28 }
 0x1e1   :  { %v1309_v11 = vpop.xlane.xlu1 %1308  ;;  %2760 = vrsqrt.f32 %v1344_v17  ;;  %v2745_v39 = vpop.eup %2744  ;;  %v5061_v12 = vmul.f32 %v2733_v46, %v6323_v3  ;;  %v6324_v17 = vld [vmem:[#allocation62_spill] sm:$0xff]  ;;  %v5076_v3 = vmul.f32 %v2737_v33, %v6328_v49  ;;  %v1398_v34 = vmul.f32 %v2743_v43, %v6333_v20  ;;  %v6335_v33 = vld [vmem:[#allocation8_spill] sm:$0xff]  ;;  %v6341_v28 = vld [vmem:[#allocation15_spill] sm:$0xff] }
 0x1e2   :  { %v1345_v51 = vmax.f32 %v1309_v11, 1e-24  ;;  %v1264_v13 = vpop.xlane.xlu0 %1263  ;;  %v2747_v7 = vpop.eup %2746  ;;  %v5064_v60 = vmul.f32 %v2733_v46, %v6324_v17  ;;  %v6325_v11 = vld [vmem:[#allocation3_spill] sm:$0xff]  ;;  %v1399_v49 = vmul.f32 %v2743_v43, %v6334_v37  ;;  %v5089_v29 = vmul.f32 %v2745_v39, %v6335_v33  ;;  %v6342_v37 = vld [vmem:[#allocation17_spill] sm:$0xff] }
 0x1e3   :  { %v1330_v5 = vmax.f32 %v1264_v13, 1e-24  ;;  %v2749_v38 = vpop.eup %2748  ;;  %v5067_v44 = vmul.f32 %v2735_v57, %v6325_v11  ;;  %v5082_v11 = vmul.f32 %v2739_v10, %v6330_v35  ;;  %v1396_v57 = vmul.f32 %v2741_v52, %v6331_v25  ;;  %v6337_v35 = vld [vmem:[#allocation12_spill] sm:$0xff]  ;;  %v6339_v25 = vld [vmem:[#allocation14_spill] sm:$0xff]  ;;  %v6343_v33 = vld [vmem:[#allocation19_spill] sm:$0xff] }
 0x1e4   :  { %2762 = vrsqrt.f32 %v1345_v51  ;;  %v2751_v30 = vpop.eup %2750  ;;  %v6329_v51 = vld [vmem:[#allocation4_spill] sm:$0xff]  ;;  %v5098_v52 = vmul.f32 %v2747_v7, %v6339_v25  ;;  %v1400_v20 = vmul.f32 %v2749_v38, %v6341_v28  ;;  %v1401_v43 = vmul.f32 %v2749_v38, %v6342_v37  ;;  %v6351_v38 = vld [vmem:[#allocation23_spill] sm:$0xff] }
 0x1e5   :  { %v1267_v8 = vpop.xlane.xlu1 %1266  ;;  %v5079_v13 = vmul.f32 %v2739_v10, %v6329_v51  ;;  %2764 = vrsqrt.f32 %v1330_v5  ;;  %v2753_v17 = vpop.eup %2752  ;;  %v6336_v51 = vld [vmem:[#allocation10_spill] sm:$0xff]  ;;  %v5095_v10 = vmul.f32 %v2747_v7, %v6337_v35  ;;  %v1402_v55 = vmul.f32 %v2751_v30, %v6343_v33  ;;  %v6348_v7 = vld [vmem:[#allocation20_spill] sm:$0xff]  ;;  %v6352_v33 = vld [vmem:[#allocation25_spill] sm:$0xff] }
 0x1e6   :  { %v1331_v46 = vmax.f32 %v1267_v8, 1e-24  ;;  %v1312_v9 = vpop.xlane.xlu0 %1311  ;;  %v2755_v14 = vpop.eup %2754  ;;  %v5092_v32 = vmul.f32 %v2745_v39, %v6336_v51  ;;  %6340 = vst [vmem:[#allocation60_spill] sm:$0xff] %v5098_v52  ;;  %v6345_v39 = vld [vmem:[#allocation16_spill] sm:$0xff]  ;;  %v6347_v35 = vld [vmem:[#allocation18_spill] sm:$0xff] }
 0x1e7   :  { %v1346_v5 = vmax.f32 %v1312_v9, 1e-24  ;;  %v2757_v8 = vpop.eup %2756  ;;  %6338 = vst [vmem:[#allocation50_spill] sm:$0xff] %v5095_v10  ;;  %v5105_v51 = vmul.f32 %v2753_v17, %v6345_v39  ;;  %v5108_v31 = vmul.f32 %v2753_v17, %v6347_v35  ;;  %v5111_v25 = vmul.f32 %v2755_v14, %v6348_v7  ;;  %v6356_v17 = vld [vmem:[#allocation26_spill] sm:$0xff] }
 0x1e8   :  { %2766 = vrsqrt.f32 %v1331_v46  ;;  %v6344_v46 = vld [vmem:[#allocation21_spill] sm:$0xff]  ;;  %v5114_v52 = vmul.f32 %v2755_v14, %v6350_v61  ;;  %v1404_v37 = vmul.f32 %v2757_v8, %v6351_v38 }
 0x1e9   :  { %v1315_v18 = vpop.xlane.xlu1 %1314  ;;  %2768 = vrsqrt.f32 %v1346_v5  ;;  %v1403_v0 = vmul.f32 %v2751_v30, %v6344_v46  ;;  %6346 = vst [vmem:[#allocation51_spill] sm:$0xff] %v5105_v51  ;;  %6349 = vst [vmem:[#allocation62_spill] sm:$0xff] %v5111_v25  ;;  %v1405_v5 = vmul.f32 %v2757_v8, %v6352_v33  ;;  %v6354_v46 = vld [vmem:[#allocation29_spill] sm:$0xff]  ;;  %v6355_v51 = vld [vmem:[#allocation24_spill] sm:$0xff] }
 0x1ea   :  { %v2759_v21 = vpop.eup %2758  ;;  %v1347_v9 = vmax.f32 %v1315_v18, 1e-24  ;;  %v6353_v18 = vld [vmem:[#allocation27_spill] sm:$0xff] }
 0x1eb   :  { %v2761_v28 = vpop.eup %2760  ;;  %v1406_v30 = vmul.f32 %v2759_v21, %v6353_v18  ;;  %v1407_v39 = vmul.f32 %v2759_v21, %v6354_v46  ;;  %v6359_v18 = vld [vmem:[#allocation31_spill] sm:$0xff]  ;;  %v6360_v46 = vld [vmem:[#allocation33_spill] sm:$0xff] }
 0x1ec   :  { %2770 = vrsqrt.f32 %v1347_v9  ;;  %v5121_v10 = vmul.f32 %v2761_v28, %v6355_v51  ;;  %v5124_v35 = vmul.f32 %v2761_v28, %v6356_v17  ;;  %v6357_v9 = vld [vmem:[#allocation28_spill] sm:$0xff]  ;;  %v6358_v28 = vld [vmem:[#allocation30_spill] sm:$0xff] }
 0x1ed   :  { %v5126_v7 = vpop.permute.xlu1 %1967 }
 0x1ee   :  { %v2763_v25 = vpop.eup %2762  ;;  %v5130_v61 = vmul.f32 %v5126_v7, %v4976_v23  ;;  %v5134_v14 = vmul.f32 %v5126_v7, %v4980_v1  ;;  %v5138_v21 = vmul.f32 %v5126_v7, %v4984_v6  ;;  %v5142_v8 = vmul.f32 %v5126_v7, %v4988_v53 }
 0x1ef   :  { %v5145_v51 = vmul.f32 %v2763_v25, %v6357_v9  ;;  %v5148_v38 = vmul.f32 %v2763_v25, %v6358_v28  ;;  %v5152_v23 = vmul.f32 %v5126_v7, %v5008_v58  ;;  %v5156_v1 = vmul.f32 %v5126_v7, %v5012_v16  ;;  %v2765_v6 = vpop.eup %2764 }
 0x1f0   :  { %v5160_v33 = vmul.f32 %v5126_v7, %v5016_v48  ;;  %v5164_v53 = vmul.f32 %v5126_v7, %v5020_v50  ;;  %v5168_v25 = vmul.f32 %v5126_v7, %v5037_v41  ;;  %v5172_v58 = vmul.f32 %v5126_v7, %v5040_v15 }
 0x1f1   :  { %v1408_v16 = vmul.f32 %v2765_v6, %v6359_v18  ;;  %v1409_v17 = vmul.f32 %v2765_v6, %v6360_v46  ;;  %v5178_v48 = vmul.f32 %v5126_v7, %v5043_v62  ;;  %v5182_v50 = vmul.f32 %v5126_v7, %v5046_v42  ;;  %v6363_v6 = vld [vmem:[#allocation35_spill] sm:$0xff]  ;;  %v6364_v18 = vld [vmem:[#allocation37_spill] sm:$0xff] }
 0x1f2   :  { %v2767_v9 = vpop.eup %2766  ;;  %v5186_v41 = vmul.f32 %v5126_v7, %v5061_v12  ;;  %v5190_v15 = vmul.f32 %v5126_v7, %v5064_v60  ;;  %v5194_v28 = vmul.f32 %v5126_v7, %v5067_v44  ;;  %v5198_v62 = vmul.f32 %v5126_v7, %v5070_v27 }
 0x1f3   :  { %6361 = vst [vmem:[#allocation3_spill] sm:$0xff] %v5182_v50  ;;  %v1410_v42 = vmul.f32 %v2767_v9, %v6363_v6  ;;  %v1411_v46 = vmul.f32 %v2767_v9, %v6364_v18  ;;  %v5203_v50 = vmul.f32 %v5126_v7, %v1396_v57  ;;  %v5206_v12 = vmul.f32 %v5126_v7, %v1397_v19  ;;  %v2769_v60 = vpop.eup %2768  ;;  %v6367_v9 = vld [vmem:[#allocation32_spill] sm:$0xff]  ;;  %v6368_v57 = vld [vmem:[#allocation34_spill] sm:$0xff] }
 0x1f4   :  { %6362 = vst [vmem:[#allocation5_spill] sm:$0xff] %v5190_v15  ;;  %v5209_v15 = vmul.f32 %v5126_v7, %v1398_v34  ;;  %v5212_v44 = vmul.f32 %v5126_v7, %v1399_v49  ;;  %v5215_v27 = vmul.f32 %v5126_v7, %v1400_v20  ;;  %v5218_v6 = vmul.f32 %v5126_v7, %v1401_v43 }
 0x1f5   :  { %6365 = vst [vmem:[#allocation61_spill] sm:$0xff] %v5203_v50  ;;  %6366 = vst [vmem:[#allocation2_spill] sm:$0xff] %v5206_v12  ;;  %v1440_v18 = vmul.f32 %v2769_v60, %v6367_v9  ;;  %v1441_v50 = vmul.f32 %v2769_v60, %v6368_v57  ;;  %v5223_v19 = vmul.f32 %v5126_v7, %v1402_v55  ;;  %v6371_v60 = vld [vmem:[#allocation36_spill] sm:$0xff]  ;;  %v6372_v55 = vld [vmem:[#allocation38_spill] sm:$0xff] }
 0x1f6   :  { %v5226_v12 = vmul.f32 %v5126_v7, %v1403_v0  ;;  %v2771_v34 = vpop.eup %2770  ;;  %v5229_v49 = vmul.f32 %v5126_v7, %v1404_v37  ;;  %v5232_v20 = vmul.f32 %v5126_v7, %v1405_v5  ;;  %v5235_v43 = vmul.f32 %v5126_v7, %v1406_v30 }
 0x1f7   :  { %6369 = vst [vmem:[#allocation4_spill] sm:$0xff] %v5223_v19  ;;  %v5238_v9 = vmul.f32 %v5126_v7, %v1407_v39  ;;  %v1442_v57 = vmul.f32 %v2771_v34, %v6371_v60  ;;  %v1443_v19 = vmul.f32 %v2771_v34, %v6372_v55  ;;  %v5243_v0 = vmul.f32 %v5126_v7, %v1408_v16  ;;  %v6374_v34 = vld [vmem:[#allocation60_spill] sm:$0xff]  ;;  %v6375_v60 = vld [vmem:[#allocation51_spill] sm:$0xff]  ;;  %v6376_v55 = vld [vmem:[#allocation62_spill] sm:$0xff] }
 0x1f8   :  { %6370 = vst [vmem:[#allocation6_spill] sm:$0xff] %v5226_v12  ;;  %v5246_v12 = vmul.f32 %v5126_v7, %v1409_v17  ;;  %v5249_v37 = vmul.f32 %v5126_v7, %v1410_v42  ;;  %v5252_v5 = vmul.f32 %v5126_v7, %v1411_v46  ;;  %v5256_v30 = vmul.f32 %v5126_v7, %v4992_v24  ;;  %v6373_v46 = vld [vmem:[#allocation50_spill] sm:$0xff] }
 0x1f9   :  { %v5260_v39 = vmul.f32 %v5126_v7, %v4996_v45  ;;  %v5264_v16 = vmul.f32 %v5126_v7, %v5000_v26  ;;  %v5268_v17 = vmul.f32 %v5126_v7, %v5004_v2  ;;  %v5272_v42 = vmul.f32 %v5126_v7, %v5024_v54 }
 0x1fa   :  { %v5276_v24 = vmul.f32 %v5126_v7, %v5028_v40  ;;  %v5280_v45 = vmul.f32 %v5126_v7, %v5031_v59  ;;  %v5284_v26 = vmul.f32 %v5126_v7, %v5034_v47  ;;  %v5288_v2 = vmul.f32 %v5126_v7, %v5049_v63 }
 0x1fb   :  { %v5292_v54 = vmul.f32 %v5126_v7, %v5052_v22  ;;  %v5296_v40 = vmul.f32 %v5126_v7, %v5055_v56  ;;  %v5300_v59 = vmul.f32 %v5126_v7, %v5058_v4  ;;  %v5304_v47 = vmul.f32 %v5126_v7, %v5073_v36 }
 0x1fc   :  { %v5308_v63 = vmul.f32 %v5126_v7, %v5076_v3  ;;  %v5312_v22 = vmul.f32 %v5126_v7, %v5079_v13  ;;  %v5316_v56 = vmul.f32 %v5126_v7, %v5082_v11  ;;  %v5320_v4 = vmul.f32 %v5126_v7, %v5089_v29 }
 0x1fd   :  { %v5324_v36 = vmul.f32 %v5126_v7, %v5092_v32  ;;  %v5328_v3 = vmul.f32 %v5126_v7, %v6373_v46  ;;  %v5332_v13 = vmul.f32 %v5126_v7, %v6374_v34  ;;  %v5336_v11 = vmul.f32 %v5126_v7, %v6375_v60 }
 0x1fe   :  { %v5340_v29 = vmul.f32 %v5126_v7, %v5108_v31  ;;  %v5344_v32 = vmul.f32 %v5126_v7, %v6376_v55  ;;  %v5348_v46 = vmul.f32 %v5126_v7, %v5114_v52  ;;  %v5352_v34 = vmul.f32 %v5126_v7, %v5121_v10 }
 0x1ff   :  { %v5356_v60 = vmul.f32 %v5126_v7, %v5124_v35  ;;  %v5360_v31 = vmul.f32 %v5126_v7, %v5145_v51  ;;  %v5364_v55 = vmul.f32 %v5126_v7, %v5148_v38  ;;  %v5370_v52 = vmul.f32 %v5126_v7, %v1441_v50 }
 0x200   :  { %6377 = vst [vmem:[#allocation7_spill] sm:$0xff] %v5344_v32  ;;  %v5367_v32 = vmul.f32 %v5126_v7, %v1440_v18  ;;  %v5373_v10 = vmul.f32 %v5126_v7, %v1442_v57  ;;  %v5376_v35 = vmul.f32 %v5126_v7, %v1443_v19  ;;  %v2463_v51 = vpack.c.bf16 %v5134_v14, %v5130_v61  ;;  %v6380_v57 = vld [vmem:[#allocation3_spill] sm:$0xff]  ;;  %v6381_v7 = vld [vmem:[#allocation5_spill] sm:$0xff] }
 0x201   :  { %6378 = vst [vmem:[#allocation9_spill] sm:$0xff] %v5360_v31  ;;  %v2464_v31 = vpack.c.bf16 %v5142_v8, %v5138_v21  ;;  %v2465_v38 = vpack.c.bf16 %v5156_v1, %v5152_v23  ;;  %v2466_v18 = vpack.c.bf16 %v5164_v53, %v5160_v33  ;;  %v2467_v50 = vpack.c.bf16 %v5172_v58, %v5168_v25  ;;  %v6382_v14 = vld [vmem:[#allocation61_spill] sm:$0xff]  ;;  %v6383_v21 = vld [vmem:[#allocation2_spill] sm:$0xff]  ;;  %v6384_v33 = vld [vmem:[#allocation4_spill] sm:$0xff] }
 0x202   :  { %6379 = vst [vmem:[#allocation11_spill] sm:$0xff] %v5373_v10  ;;  %v2468_v10 = vpack.c.bf16 %v6380_v57, %v5178_v48  ;;  %v2469_v19 = vpack.c.bf16 %v6381_v7, %v5186_v41  ;;  %v2470_v61 = vpack.c.bf16 %v5198_v62, %v5194_v28  ;;  %v2471_v8 = vpack.c.bf16 %v6383_v21, %v6382_v14  ;;  %v6385_v53 = vld [vmem:[#allocation6_spill] sm:$0xff]  ;;  %v6403_v57 = vld [vmem:[#allocation55_spill] sm:$0xff]  ;;  %v6405_v14 = vld [vmem:[#allocation57_spill] sm:$0xff] }
 0x203   :  { %v2472_v23 = vpack.c.bf16 %v5212_v44, %v5209_v15  ;;  %2226 = vst [vmem:[%s5962_s7] sm:$0xff] %v2463_v51  ;;  %2227 = vst [vmem:[%s5962_s7 + $0x8] sm:$0xff] %v2464_v31  ;;  %v2473_v1 = vpack.c.bf16 %v5218_v6, %v5215_v27  ;;  %v2474_v25 = vpack.c.bf16 %v6385_v53, %v6384_v33  ;;  %v6401_v51 = vld [vmem:[#allocation53_spill] sm:$0xff]  ;;  %v6408_v53 = vld [vmem:[#allocation63_spill] sm:$0xff] }
 0x204   :  { %v2475_v58 = vpack.c.bf16 %v5232_v20, %v5229_v49  ;;  %v2476_v48 = vpack.c.bf16 %v5238_v9, %v5235_v43  ;;  %2228 = vst [vmem:[%s5962_s7 + $0x10] sm:$0xff] %v2465_v38  ;;  %2229 = vst [vmem:[%s5962_s7 + $0x18] sm:$0xff] %v2466_v18  ;;  %v2477_v41 = vpack.c.bf16 %v5246_v12, %v5243_v0  ;;  %v5464_v49 = vpop.permute.xlu0 %1675  ;;  %v6402_v18 = vld [vmem:[#allocation54_spill] sm:$0xff] }
 0x205   :  { %2230 = vst [vmem:[%s5962_s7 + $0x20] sm:$0xff] %v2467_v50  ;;  %2231 = vst [vmem:[%s5962_s7 + $0x28] sm:$0xff] %v2468_v10  ;;  %v2478_v15 = vpack.c.bf16 %v5252_v5, %v5249_v37  ;;  %v2479_v28 = vpack.c.bf16 %v5260_v39, %v5256_v30  ;;  %v2480_v62 = vpack.c.bf16 %v5268_v17, %v5264_v16  ;;  %v6400_v10 = vld [vmem:[#allocation52_spill] sm:$0xff] }
 0x206   :  { %2232 = vst [vmem:[%s5962_s7 + $0x30] sm:$0xff] %v2469_v19  ;;  %2233 = vst [vmem:[%s5962_s7 + $0x38] sm:$0xff] %v2470_v61  ;;  %v2481_v12 = vpack.c.bf16 %v5276_v24, %v5272_v42  ;;  %v2482_v44 = vpack.c.bf16 %v5284_v26, %v5280_v45  ;;  %v2483_v27 = vpack.c.bf16 %v5292_v54, %v5288_v2  ;;  %v6389_v26 = vld [vmem:[#allocation39_spill] sm:$0xff]  ;;  %v6390_v54 = vld [vmem:[#allocation40_spill] sm:$0xff] }
 0x207   :  { %2234 = vst [vmem:[%s5962_s7 + $0x40] sm:$0xff] %v2471_v8  ;;  %2235 = vst [vmem:[%s5962_s7 + $0x48] sm:$0xff] %v2472_v23  ;;  %v2484_v6 = vpack.c.bf16 %v5300_v59, %v5296_v40  ;;  %v2485_v20 = vpack.c.bf16 %v5308_v63, %v5304_v47  ;;  %v2486_v43 = vpack.c.bf16 %v5316_v56, %v5312_v22  ;;  %v6386_v5 = vld [vmem:[#allocation7_spill] sm:$0xff]  ;;  %v6391_v59 = vld [vmem:[#allocation41_spill] sm:$0xff] }
 0x208   :  { %2236 = vst [vmem:[%s5962_s7 + $0x50] sm:$0xff] %v2473_v1  ;;  %2237 = vst [vmem:[%s5962_s7 + $0x58] sm:$0xff] %v2474_v25  ;;  %v2487_v9 = vpack.c.bf16 %v5324_v36, %v5320_v4  ;;  %v2488_v0 = vpack.c.bf16 %v5332_v13, %v5328_v3  ;;  %v2489_v37 = vpack.c.bf16 %v5340_v29, %v5336_v11  ;;  %v6387_v16 = vld [vmem:[#allocation9_spill] sm:$0xff]  ;;  %v6392_v63 = vld [vmem:[#allocation42_spill] sm:$0xff] }
 0x209   :  { %2238 = vst [vmem:[%s5962_s7 + $0x60] sm:$0xff] %v2475_v58  ;;  %2239 = vst [vmem:[%s5962_s7 + $0x68] sm:$0xff] %v2476_v48  ;;  %v2490_v30 = vpack.c.bf16 %v5348_v46, %v6386_v5  ;;  %v2491_v39 = vpack.c.bf16 %v5356_v60, %v5352_v34  ;;  %v2492_v17 = vpack.c.bf16 %v5364_v55, %v6387_v16  ;;  %v6388_v24 = vld [vmem:[#allocation11_spill] sm:$0xff]  ;;  %v6394_v36 = vld [vmem:[#allocation44_spill] sm:$0xff] }
 0x20a   :  { %2240 = vst [vmem:[%s5962_s7 + $0x70] sm:$0xff] %v2477_v41  ;;  %2241 = vst [vmem:[%s5962_s7 + $0x78] sm:$0xff] %v2478_v15  ;;  %v2493_v42 = vpack.c.bf16 %v5370_v52, %v5367_v32  ;;  %v2494_v45 = vpack.c.bf16 %v5376_v35, %v6388_v24  ;;  %v5524_v2 = vmul.f32 %v5464_v49, %v6389_v26  ;;  %v6393_v56 = vld [vmem:[#allocation43_spill] sm:$0xff]  ;;  %v6395_v13 = vld [vmem:[#allocation45_spill] sm:$0xff] }
 0x20b   :  { %2242 = vst [vmem:[%s5962_s7 + $0x80] sm:$0xff] %v2479_v28  ;;  %2243 = vst [vmem:[%s5962_s7 + $0x88] sm:$0xff] %v2480_v62  ;;  %v5528_v40 = vmul.f32 %v5464_v49, %v6390_v54  ;;  %v5544_v47 = vmul.f32 %v5464_v49, %v6391_v59  ;;  %v5548_v22 = vmul.f32 %v5464_v49, %v6392_v63  ;;  %v6396_v29 = vld [vmem:[#allocation46_spill] sm:$0xff]  ;;  %v6397_v46 = vld [vmem:[#allocation47_spill] sm:$0xff] }
 0x20c   :  { %2244 = vst [vmem:[%s5962_s7 + $0x90] sm:$0xff] %v2481_v12  ;;  %2245 = vst [vmem:[%s5962_s7 + $0x98] sm:$0xff] %v2482_v44  ;;  %v5552_v4 = vmul.f32 %v5464_v49, %v6393_v56  ;;  %v5556_v3 = vmul.f32 %v5464_v49, %v6394_v36  ;;  %v5566_v11 = vmul.f32 %v5464_v49, %v6395_v13  ;;  %v6398_v60 = vld [vmem:[#allocation48_spill] sm:$0xff]  ;;  %v6399_v55 = vld [vmem:[#allocation49_spill] sm:$0xff] }
 0x20d   :  { %2246 = vst [vmem:[%s5962_s7 + $0xa0] sm:$0xff] %v2483_v27  ;;  %2247 = vst [vmem:[%s5962_s7 + $0xa8] sm:$0xff] %v2484_v6  ;;  %v5570_v32 = vmul.f32 %v5464_v49, %v6396_v29  ;;  %v5574_v34 = vmul.f32 %v5464_v49, %v6397_v46  ;;  %v5578_v31 = vmul.f32 %v5464_v49, %v6398_v60  ;;  %v6404_v19 = vld [vmem:[#allocation56_spill] sm:$0xff]  ;;  %v6406_v8 = vld [vmem:[#allocation58_spill] sm:$0xff] }
 0x20e   :  { %2248 = vst [vmem:[%s5962_s7 + $0xb0] sm:$0xff] %v2485_v20  ;;  %2249 = vst [vmem:[%s5962_s7 + $0xb8] sm:$0xff] %v2486_v43  ;;  %v5582_v52 = vmul.f32 %v5464_v49, %v6399_v55  ;;  %v5586_v35 = vmul.f32 %v5464_v49, %v6400_v10  ;;  %v5590_v38 = vmul.f32 %v5464_v49, %v6401_v51  ;;  %v6407_v1 = vld [vmem:[#allocation59_spill] sm:$0xff]  ;;  %v6409_v58 = vld [vmem:[#allocation64_spill] sm:$0xff] }
 0x20f   :  { %2250 = vst [vmem:[%s5962_s7 + $0xc0] sm:$0xff] %v2487_v9  ;;  %2251 = vst [vmem:[%s5962_s7 + $0xc8] sm:$0xff] %v2488_v0  ;;  %v5594_v50 = vmul.f32 %v5464_v49, %v6402_v18  ;;  %v5598_v7 = vmul.f32 %v5464_v49, %v6403_v57  ;;  %v5602_v61 = vmul.f32 %v5464_v49, %v6404_v19  ;;  %v6410_v41 = vld [vmem:[#allocation65_spill] sm:$0xff]  ;;  %v6411_v28 = vld [vmem:[#allocation66_spill] sm:$0xff] }
 0x210   :  { %2252 = vst [vmem:[%s5962_s7 + $0xd0] sm:$0xff] %v2489_v37  ;;  %2253 = vst [vmem:[%s5962_s7 + $0xd8] sm:$0xff] %v2490_v30  ;;  %v5606_v21 = vmul.f32 %v5464_v49, %v6405_v14  ;;  %v5610_v23 = vmul.f32 %v5464_v49, %v6406_v8  ;;  %v5614_v33 = vmul.f32 %v5464_v49, %v6407_v1  ;;  %v6412_v12 = vld [vmem:[#allocation67_spill] sm:$0xff]  ;;  %v6413_v27 = vld [vmem:[#allocation68_spill] sm:$0xff] }
 0x211   :  { %2254 = vst [vmem:[%s5962_s7 + $0xe0] sm:$0xff] %v2491_v39  ;;  %2255 = vst [vmem:[%s5962_s7 + $0xe8] sm:$0xff] %v2492_v17  ;;  %v5618_v25 = vmul.f32 %v5464_v49, %v6408_v53  ;;  %v5622_v48 = vmul.f32 %v5464_v49, %v6409_v58  ;;  %v5626_v15 = vmul.f32 %v5464_v49, %v6410_v41  ;;  %v6414_v20 = vld [vmem:[#allocation69_spill] sm:$0xff]  ;;  %v6415_v9 = vld [vmem:[#allocation70_spill] sm:$0xff] }
 0x212   :  { %2256 = vst [vmem:[%s5962_s7 + $0xf0] sm:$0xff] %v2493_v42  ;;  %2257 = vst [vmem:[%s5962_s7 + $0xf8] sm:$0xff] %v2494_v45  ;;  %v5630_v62 = vmul.f32 %v5464_v49, %v6411_v28  ;;  %v5634_v44 = vmul.f32 %v5464_v49, %v6412_v12  ;;  %v5638_v6 = vmul.f32 %v5464_v49, %v6413_v27  ;;  %v6416_v37 = vld [vmem:[#allocation71_spill] sm:$0xff]  ;;  %v6417_v30 = vld [vmem:[#allocation72_spill] sm:$0xff] }
 0x213   :  { %v5642_v43 = vmul.f32 %v5464_v49, %v6414_v20  ;;  %v5646_v0 = vmul.f32 %v5464_v49, %v6415_v9  ;;  %v5650_v5 = vmul.f32 %v5464_v49, %v6416_v37  ;;  %v5654_v39 = vmul.f32 %v5464_v49, %v6417_v30  ;;  %v6418_v16 = vld [vmem:[#allocation73_spill] sm:$0xff]  ;;  %v6419_v42 = vld [vmem:[#allocation74_spill] sm:$0xff]  ;;  %v6420_v45 = vld [vmem:[#allocation75_spill] sm:$0xff] }
 0x214   :  { %v5658_v17 = vmul.f32 %v5464_v49, %v6418_v16  ;;  %v5662_v24 = vmul.f32 %v5464_v49, %v6419_v42  ;;  %v5666_v26 = vmul.f32 %v5464_v49, %v6420_v45  ;;  %v6421_v54 = vld [vmem:[#allocation76_spill] sm:$0xff]  ;;  %v6422_v63 = vld [vmem:[#allocation77_spill] sm:$0xff]  ;;  %v6423_v36 = vld [vmem:[#allocation78_spill] sm:$0xff] }
 0x215   :  { %v5670_v59 = vmul.f32 %v5464_v49, %v6421_v54  ;;  %v5674_v56 = vmul.f32 %v5464_v49, %v6422_v63  ;;  %v5678_v13 = vmul.f32 %v5464_v49, %v6423_v36  ;;  %v6424_v29 = vld [vmem:[#allocation79_spill] sm:$0xff]  ;;  %v6425_v60 = vld [vmem:[#allocation80_spill] sm:$0xff]  ;;  %v6426_v10 = vld [vmem:[#allocation81_spill] sm:$0xff] }
 0x216   :  { %v5682_v46 = vmul.f32 %v5464_v49, %v6424_v29  ;;  %v5686_v55 = vmul.f32 %v5464_v49, %v6425_v60  ;;  %v5690_v51 = vmul.f32 %v5464_v49, %v6426_v10  ;;  %v6427_v18 = vld [vmem:[#allocation82_spill] sm:$0xff]  ;;  %v6428_v19 = vld [vmem:[#allocation83_spill] sm:$0xff]  ;;  %v6429_v8 = vld [vmem:[#allocation84_spill] sm:$0xff] }
 0x217   :  { %v5694_v57 = vmul.f32 %v5464_v49, %v6427_v18  ;;  %v5698_v14 = vmul.f32 %v5464_v49, %v6428_v19  ;;  %v5702_v1 = vmul.f32 %v5464_v49, %v6429_v8  ;;  %v6430_v53 = vld [vmem:[#allocation85_spill] sm:$0xff]  ;;  %v6431_v41 = vld [vmem:[#allocation86_spill] sm:$0xff]  ;;  %v6432_v12 = vld [vmem:[#allocation87_spill] sm:$0xff] }
 0x218   :  { %v5706_v58 = vmul.f32 %v5464_v49, %v6430_v53  ;;  %v5710_v28 = vmul.f32 %v5464_v49, %v6431_v41  ;;  %v5714_v27 = vmul.f32 %v5464_v49, %v6432_v12  ;;  %v6433_v20 = vld [vmem:[#allocation88_spill] sm:$0xff]  ;;  %v6434_v37 = vld [vmem:[#allocation89_spill] sm:$0xff]  ;;  %v6435_v16 = vld [vmem:[#allocation90_spill] sm:$0xff] }
 0x219   :  { %v5718_v9 = vmul.f32 %v5464_v49, %v6433_v20  ;;  %v5722_v30 = vmul.f32 %v5464_v49, %v6434_v37  ;;  %v5726_v42 = vmul.f32 %v5464_v49, %v6435_v16  ;;  %v6436_v45 = vld [vmem:[#allocation91_spill] sm:$0xff]  ;;  %v6437_v63 = vld [vmem:[#allocation92_spill] sm:$0xff]  ;;  %v6438_v29 = vld [vmem:[#allocation93_spill] sm:$0xff] }
 0x21a   :  { %v5730_v54 = vmul.f32 %v5464_v49, %v6436_v45  ;;  %v5734_v36 = vmul.f32 %v5464_v49, %v6437_v63  ;;  %v5738_v60 = vmul.f32 %v5464_v49, %v6438_v29  ;;  %v6439_v10 = vld [vmem:[#allocation94_spill] sm:$0xff]  ;;  %v6440_v19 = vld [vmem:[#allocation95_spill] sm:$0xff]  ;;  %v6441_v53 = vld [vmem:[#allocation96_spill] sm:$0xff] }
 0x21b   :  { %v5742_v18 = vmul.f32 %v5464_v49, %v6439_v10  ;;  %v5746_v8 = vmul.f32 %v5464_v49, %v6440_v19  ;;  %v5750_v41 = vmul.f32 %v5464_v49, %v6441_v53  ;;  %v6443_v12 = vld [vmem:[#allocation97_spill] sm:$0xff]  ;;  %v6445_v37 = vld [vmem:[#allocation98_spill] sm:$0xff]  ;;  %v6447_v45 = vld [vmem:[#allocation99_spill] sm:$0xff] }
 0x21c   :  { %v5754_v20 = vmul.f32 %v5464_v49, %v6443_v12  ;;  %v5758_v16 = vmul.f32 %v5464_v49, %v6445_v37  ;;  %v5762_v63 = vmul.f32 %v5464_v49, %v6447_v45  ;;  %v6449_v29 = vld [vmem:[#allocation100_spill] sm:$0xff]  ;;  %v6451_v19 = vld [vmem:[#allocation101_spill] sm:$0xff] }
 0x21d   :  { %6442 = vst [vmem:[#allocation13_spill] sm:$0xff] %v5750_v41  ;;  %v5766_v10 = vmul.f32 %v5464_v49, %v6449_v29  ;;  %v5770_v53 = vmul.f32 %v5464_v49, %v6451_v19  ;;  %v6453_v41 = vld [vmem:[#allocation102_spill] sm:$0xff] }
 0x21e   :  { %6444 = vst [vmem:[#allocation8_spill] sm:$0xff] %v5754_v20  ;;  %6446 = vst [vmem:[#allocation10_spill] sm:$0xff] %v5758_v16  ;;  %v5774_v12 = vmul.f32 %v5464_v49, %v6453_v41  ;;  %v6454_v20 = vld [vmem:[#allocation103_spill] sm:$0xff]  ;;  %v6456_v16 = vld [vmem:[#allocation104_spill] sm:$0xff] }
 0x21f   :  { %6448 = vst [vmem:[#allocation12_spill] sm:$0xff] %v5762_v63  ;;  %6450 = vst [vmem:[#allocation14_spill] sm:$0xff] %v5766_v10  ;;  %v5778_v37 = vmul.f32 %v5464_v49, %v6454_v20  ;;  %v5782_v45 = vmul.f32 %v5464_v49, %v6456_v16  ;;  %v6457_v63 = vld [vmem:[#allocation105_spill] sm:$0xff]  ;;  %v6458_v10 = vld [vmem:[#allocation106_spill] sm:$0xff]  ;;  %v2431_v20 = vpack.c.bf16 %v5528_v40, %v5524_v2 }
 0x220   :  { %6452 = vst [vmem:[#allocation15_spill] sm:$0xff] %v5770_v53  ;;  %v5786_v29 = vmul.f32 %v5464_v49, %v6457_v63  ;;  %v5790_v19 = vmul.f32 %v5464_v49, %v6458_v10  ;;  %v6460_v53 = vld [vmem:[#allocation107_spill] sm:$0xff]  ;;  %v2433_v16 = vpack.c.bf16 %v5556_v3, %v5552_v4  ;;  %v2434_v63 = vpack.c.bf16 %v5570_v32, %v5566_v11 }
 0x221   :  { %6455 = vst [vmem:[#allocation17_spill] sm:$0xff] %v5778_v37  ;;  %v5794_v41 = vmul.f32 %v5464_v49, %v6460_v53  ;;  %v2432_v37 = vpack.c.bf16 %v5548_v22, %v5544_v47  ;;  %v2435_v10 = vpack.c.bf16 %v5578_v31, %v5574_v34  ;;  %v2437_v49 = vpack.c.bf16 %v5594_v50, %v5590_v38 }
 0x222   :  { %6459 = vst [vmem:[#allocation19_spill] sm:$0xff] %v5790_v19  ;;  %v2436_v19 = vpack.c.bf16 %v5586_v35, %v5582_v52  ;;  %v2438_v2 = vpack.c.bf16 %v5602_v61, %v5598_v7  ;;  %v2439_v40 = vpack.c.bf16 %v5610_v23, %v5606_v21  ;;  %v2440_v47 = vpack.c.bf16 %v5618_v25, %v5614_v33 }
 0x223   :  { %1934 = vst [vmem:[%s5963_s6] sm:$0xff] %v2431_v20  ;;  %1935 = vst [vmem:[%s5963_s6 + $0x8] sm:$0xff] %v2432_v37  ;;  %v2441_v22 = vpack.c.bf16 %v5626_v15, %v5622_v48  ;;  %v2442_v4 = vpack.c.bf16 %v5634_v44, %v5630_v62  ;;  %v2443_v3 = vpack.c.bf16 %v5642_v43, %v5638_v6 }
 0x224   :  { %v2444_v11 = vpack.c.bf16 %v5650_v5, %v5646_v0  ;;  %1936 = vst [vmem:[%s5963_s6 + $0x10] sm:$0xff] %v2433_v16  ;;  %1937 = vst [vmem:[%s5963_s6 + $0x18] sm:$0xff] %v2434_v63  ;;  %v2445_v32 = vpack.c.bf16 %v5658_v17, %v5654_v39  ;;  %v2446_v34 = vpack.c.bf16 %v5666_v26, %v5662_v24  ;;  %v6461_v25 = vld [vmem:[#allocation13_spill] sm:$0xff] }
 0x225   :  { %1938 = vst [vmem:[%s5963_s6 + $0x20] sm:$0xff] %v2435_v10  ;;  %1939 = vst [vmem:[%s5963_s6 + $0x28] sm:$0xff] %v2436_v19  ;;  %v2447_v31 = vpack.c.bf16 %v5674_v56, %v5670_v59  ;;  %v2448_v52 = vpack.c.bf16 %v5682_v46, %v5678_v13  ;;  %v2449_v35 = vpack.c.bf16 %v5690_v51, %v5686_v55  ;;  %v6462_v48 = vld [vmem:[#allocation8_spill] sm:$0xff]  ;;  %v6463_v62 = vld [vmem:[#allocation10_spill] sm:$0xff] }
 0x226   :  { %1940 = vst [vmem:[%s5963_s6 + $0x30] sm:$0xff] %v2437_v49  ;;  %1941 = vst [vmem:[%s5963_s6 + $0x38] sm:$0xff] %v2438_v2  ;;  %v2450_v38 = vpack.c.bf16 %v5698_v14, %v5694_v57  ;;  %v2451_v50 = vpack.c.bf16 %v5706_v58, %v5702_v1  ;;  %v2452_v7 = vpack.c.bf16 %v5714_v27, %v5710_v28  ;;  %v6464_v44 = vld [vmem:[#allocation12_spill] sm:$0xff]  ;;  %v6465_v43 = vld [vmem:[#allocation14_spill] sm:$0xff] }
 0x227   :  { %1942 = vst [vmem:[%s5963_s6 + $0x40] sm:$0xff] %v2439_v40  ;;  %1943 = vst [vmem:[%s5963_s6 + $0x48] sm:$0xff] %v2440_v47  ;;  %v2453_v61 = vpack.c.bf16 %v5722_v30, %v5718_v9  ;;  %v2454_v21 = vpack.c.bf16 %v5730_v54, %v5726_v42  ;;  %v2455_v23 = vpack.c.bf16 %v5738_v60, %v5734_v36  ;;  %v6466_v0 = vld [vmem:[#allocation15_spill] sm:$0xff] }
 0x228   :  { %1944 = vst [vmem:[%s5963_s6 + $0x50] sm:$0xff] %v2441_v22  ;;  %1945 = vst [vmem:[%s5963_s6 + $0x58] sm:$0xff] %v2442_v4  ;;  %v2456_v33 = vpack.c.bf16 %v5746_v8, %v5742_v18  ;;  %v2457_v15 = vpack.c.bf16 %v6462_v48, %v6461_v25  ;;  %v2458_v6 = vpack.c.bf16 %v6464_v44, %v6463_v62  ;;  %v6467_v39 = vld [vmem:[#allocation17_spill] sm:$0xff] }
 0x229   :  { %1946 = vst [vmem:[%s5963_s6 + $0x60] sm:$0xff] %v2443_v3  ;;  %1947 = vst [vmem:[%s5963_s6 + $0x68] sm:$0xff] %v2444_v11  ;;  %v2459_v5 = vpack.c.bf16 %v6466_v0, %v6465_v43  ;;  %v2460_v17 = vpack.c.bf16 %v6467_v39, %v5774_v12  ;;  %v2461_v24 = vpack.c.bf16 %v5786_v29, %v5782_v45  ;;  %v6468_v26 = vld [vmem:[#allocation19_spill] sm:$0xff] }
 0x22a   :  { %1948 = vst [vmem:[%s5963_s6 + $0x70] sm:$0xff] %v2445_v32  ;;  %1949 = vst [vmem:[%s5963_s6 + $0x78] sm:$0xff] %v2446_v34  ;;  %v2462_v59 = vpack.c.bf16 %v5794_v41, %v6468_v26 }
 0x22b   :  { %1950 = vst [vmem:[%s5963_s6 + $0x80] sm:$0xff] %v2447_v31  ;;  %1951 = vst [vmem:[%s5963_s6 + $0x88] sm:$0xff] %v2448_v52 }
 0x22c   :  { %1952 = vst [vmem:[%s5963_s6 + $0x90] sm:$0xff] %v2449_v35  ;;  %1953 = vst [vmem:[%s5963_s6 + $0x98] sm:$0xff] %v2450_v38 }
 0x22d   :  { %1954 = vst [vmem:[%s5963_s6 + $0xa0] sm:$0xff] %v2451_v50  ;;  %1955 = vst [vmem:[%s5963_s6 + $0xa8] sm:$0xff] %v2452_v7 }
 0x22e   :  { %1956 = vst [vmem:[%s5963_s6 + $0xb0] sm:$0xff] %v2453_v61  ;;  %1957 = vst [vmem:[%s5963_s6 + $0xb8] sm:$0xff] %v2454_v21 }
 0x22f   :  { %1958 = vst [vmem:[%s5963_s6 + $0xc0] sm:$0xff] %v2455_v23  ;;  %1959 = vst [vmem:[%s5963_s6 + $0xc8] sm:$0xff] %v2456_v33 }
 0x230   :  { %1960 = vst [vmem:[%s5963_s6 + $0xd0] sm:$0xff] %v2457_v15  ;;  %1961 = vst [vmem:[%s5963_s6 + $0xd8] sm:$0xff] %v2458_v6 }
 0x231   :  { %1962 = vst [vmem:[%s5963_s6 + $0xe0] sm:$0xff] %v2459_v5  ;;  %1963 = vst [vmem:[%s5963_s6 + $0xe8] sm:$0xff] %v2460_v17 }
 0x232   :  { %1964 = vst [vmem:[%s5963_s6 + $0xf0] sm:$0xff] %v2461_v24  ;;  %1965 = vst [vmem:[%s5963_s6 + $0xf8] sm:$0xff] %v2462_v59 }

// kernel: multilabel_contrastive_forward.3
= control target key start
LH: loop header
LB: loop body
LE: loop exit
PB: predicated region body
PF: predicated region fallthrough
CT: control target
= control target key end

     0   :  { %10 = vsyncpa [#allocation13], 0  ;;  %s9715_s0 = inlined_call_operand.vmem [shape: bf16[256,256], index: 0, kind: input, shape index: {}]   ;;  %s9716_s1 = inlined_call_operand.vmem [shape: bf16[256,256], index: 1, kind: input, shape index: {}]   ;;  %s9717_s2 = inlined_call_operand.vmem [shape: bf16[256,256], index: 2, kind: input, shape index: {}]   ;;  %s9718_s3 = inlined_call_operand.hbm [shape: f32[1,1], index: 3, kind: output, shape index: {0}]   ;;  %s9719_s4 = inlined_call_operand.hbm [shape: f32[1,1], index: 4, kind: output, shape index: {1}]  }
   0x1   :  { %v5369_v0 = vld [vmem:[%s9716_s1 + $0x4] ss:$8 sps:$4 sm:$0xff]   ;;  %v5373_v2 = vld [vmem:[%s9716_s1] ss:$8 sps:$4 sm:$0xff]   ;;  %v5375_v4 = vld [vmem:[%s9716_s1 + $0x14] ss:$8 sps:$4 sm:$0xff]  }
   0x2   :  { %v5371_v1 = vld [vmem:[%s9717_s2 + $0x4] ss:$8 sps:$4 sm:$0xff]   ;;  %434 = vmatprep.subr.bf16.mxu0 %v5369_v0  ;;  %v5374_v3 = vld [vmem:[%s9717_s2] ss:$8 sps:$4 sm:$0xff]   ;;  %v5377_v5 = vld [vmem:[%s9717_s2 + $0x14] ss:$8 sps:$4 sm:$0xff]  }
   0x3   :  { %787 = vmatprep.subr.bf16.mxu1 %v5371_v1  ;;  %435 = vmatpush1.bf16.xpose.msra.mxu0 %v5373_v2  ;;  %v5379_v6 = vld [vmem:[%s9716_s1 + $0x10] ss:$8 sps:$4 sm:$0xff]   ;;  %v5381_v8 = vld [vmem:[%s9716_s1 + $0x24] ss:$8 sps:$4 sm:$0xff]   ;;  %v5385_v10 = vld [vmem:[%s9716_s1 + $0x20] ss:$8 sps:$4 sm:$0xff]  }
   0x4   :  { %788 = vmatpush1.bf16.xpose.msra.mxu1 %v5374_v3  ;;  %436 = vmatprep.subr.bf16.mxu0 %v5375_v4  ;;  %v5380_v7 = vld [vmem:[%s9717_s2 + $0x10] ss:$8 sps:$4 sm:$0xff]   ;;  %v5383_v9 = vld [vmem:[%s9717_s2 + $0x24] ss:$8 sps:$4 sm:$0xff]   ;;  %v5386_v11 = vld [vmem:[%s9717_s2 + $0x20] ss:$8 sps:$4 sm:$0xff]  }
   0x5   :  { %789 = vmatprep.subr.bf16.mxu1 %v5377_v5  ;;  %v5387_v12 = vld [vmem:[%s9716_s1 + $0x34] ss:$8 sps:$4 sm:$0xff]   ;;  %v5391_v14 = vld [vmem:[%s9716_s1 + $0x30] ss:$8 sps:$4 sm:$0xff]   ;;  %v5393_v16 = vld [vmem:[%s9716_s1 + $0x44] ss:$8 sps:$4 sm:$0xff]  }
   0x6   :  { %v5389_v13 = vld [vmem:[%s9717_s2 + $0x34] ss:$8 sps:$4 sm:$0xff]   ;;  %v5392_v15 = vld [vmem:[%s9717_s2 + $0x30] ss:$8 sps:$4 sm:$0xff]   ;;  %v5395_v17 = vld [vmem:[%s9717_s2 + $0x44] ss:$8 sps:$4 sm:$0xff]  }
   0x7   :  { %v5397_v18 = vld [vmem:[%s9716_s1 + $0x40] ss:$8 sps:$4 sm:$0xff]   ;;  %v5399_v20 = vld [vmem:[%s9716_s1 + $0x54] ss:$8 sps:$4 sm:$0xff]   ;;  %v5403_v22 = vld [vmem:[%s9716_s1 + $0x50] ss:$8 sps:$4 sm:$0xff]  }
   0x8   :  { %v5398_v19 = vld [vmem:[%s9717_s2 + $0x40] ss:$8 sps:$4 sm:$0xff]   ;;  %v5401_v21 = vld [vmem:[%s9717_s2 + $0x54] ss:$8 sps:$4 sm:$0xff]   ;;  %v5404_v23 = vld [vmem:[%s9717_s2 + $0x50] ss:$8 sps:$4 sm:$0xff]  }
   0x9   :  { %v5405_v24 = vld [vmem:[%s9716_s1 + $0x64] ss:$8 sps:$4 sm:$0xff]   ;;  %v5409_v27 = vld [vmem:[%s9716_s1 + $0x60] ss:$8 sps:$4 sm:$0xff]   ;;  %v5411_v29 = vld [vmem:[%s9716_s1 + $0x74] ss:$8 sps:$4 sm:$0xff]  }
   0xa   :  { %v5407_v25 = vld [vmem:[%s9717_s2 + $0x64] ss:$8 sps:$4 sm:$0xff]   ;;  %v5410_v28 = vld [vmem:[%s9717_s2 + $0x60] ss:$8 sps:$4 sm:$0xff]   ;;  %v5413_v30 = vld [vmem:[%s9717_s2 + $0x74] ss:$8 sps:$4 sm:$0xff]  }
   0xb   :  { %437 = vmatpush1.bf16.xpose.msra.mxu0 %v5379_v6  ;;  %v5467_v26 = vld [vmem:[%s9715_s0 + $0x4] ss:$8 sps:$4 sm:$0xff]   ;;  %v5415_v31 = vld [vmem:[%s9716_s1 + $0x70] ss:$8 sps:$4 sm:$0xff]  }
   0xc   :  { %790 = vmatpush1.bf16.xpose.msra.mxu1 %v5380_v7  ;;  %438 = vmatprep.subr.bf16.mxu0 %v5381_v8  ;;  %v5416_v32 = vld [vmem:[%s9717_s2 + $0x70] ss:$8 sps:$4 sm:$0xff]   ;;  %v5417_v33 = vld [vmem:[%s9716_s1 + $0x84] ss:$8 sps:$4 sm:$0xff]  }
   0xd   :  { %791 = vmatprep.subr.bf16.mxu1 %v5383_v9  ;;  %466 = vmatprep.mubr.bf16.mxu0 %v5467_v26  ;;  %v5419_v34 = vld [vmem:[%s9717_s2 + $0x84] ss:$8 sps:$4 sm:$0xff]  }
   0xe   :  { %819 = vmatprep.mubr.bf16.mxu1 %v5467_v26 }
  0x13   :  { %439 = vmatpush1.bf16.xpose.msra.mxu0 %v5385_v10 }
  0x14   :  { %792 = vmatpush1.bf16.xpose.msra.mxu1 %v5386_v11  ;;  %440 = vmatprep.subr.bf16.mxu0 %v5387_v12 }
  0x15   :  { %793 = vmatprep.subr.bf16.mxu1 %v5389_v13 }
  0x1b   :  { %441 = vmatpush1.bf16.xpose.msra.mxu0 %v5391_v14 }
  0x1c   :  { %794 = vmatpush1.bf16.xpose.msra.mxu1 %v5392_v15  ;;  %442 = vmatprep.subr.bf16.mxu0 %v5393_v16 }
  0x1d   :  { %795 = vmatprep.subr.bf16.mxu1 %v5395_v17 }
  0x23   :  { %443 = vmatpush1.bf16.xpose.msra.mxu0 %v5397_v18 }
  0x24   :  { %796 = vmatpush1.bf16.xpose.msra.mxu1 %v5398_v19  ;;  %444 = vmatprep.subr.bf16.mxu0 %v5399_v20 }
  0x25   :  { %797 = vmatprep.subr.bf16.mxu1 %v5401_v21 }
  0x2b   :  { %445 = vmatpush1.bf16.xpose.msra.mxu0 %v5403_v22 }
  0x2c   :  { %798 = vmatpush1.bf16.xpose.msra.mxu1 %v5404_v23  ;;  %446 = vmatprep.subr.bf16.mxu0 %v5405_v24 }
  0x2d   :  { %799 = vmatprep.subr.bf16.mxu1 %v5407_v25 }
  0x33   :  { %447 = vmatpush1.bf16.xpose.msra.mxu0 %v5409_v27 }
  0x34   :  { %800 = vmatpush1.bf16.xpose.msra.mxu1 %v5410_v28  ;;  %448 = vmatprep.subr.bf16.mxu0 %v5411_v29 }
  0x35   :  { %801 = vmatprep.subr.bf16.mxu1 %v5413_v30 }
  0x36   :  { %11 = vsyncpa [#allocation15], 0  ;;  %v5421_v35 = vld [vmem:[%s9716_s1 + $0x80] ss:$8 sps:$4 sm:$0xff]   ;;  %v5423_v37 = vld [vmem:[%s9716_s1 + $0x94] ss:$8 sps:$4 sm:$0xff]  }
  0x37   :  { %v5422_v36 = vld [vmem:[%s9717_s2 + $0x80] ss:$8 sps:$4 sm:$0xff]   ;;  %v5425_v38 = vld [vmem:[%s9717_s2 + $0x94] ss:$8 sps:$4 sm:$0xff]   ;;  %v5427_v39 = vld [vmem:[%s9716_s1 + $0x90] ss:$8 sps:$4 sm:$0xff]  }
  0x38   :  { %v5428_v40 = vld [vmem:[%s9717_s2 + $0x90] ss:$8 sps:$4 sm:$0xff]   ;;  %v5429_v41 = vld [vmem:[%s9716_s1 + $0xa4] ss:$8 sps:$4 sm:$0xff]   ;;  %v5433_v43 = vld [vmem:[%s9716_s1 + $0xa0] ss:$8 sps:$4 sm:$0xff]  }
  0x39   :  { %v5431_v42 = vld [vmem:[%s9717_s2 + $0xa4] ss:$8 sps:$4 sm:$0xff]   ;;  %v5434_v44 = vld [vmem:[%s9717_s2 + $0xa0] ss:$8 sps:$4 sm:$0xff]   ;;  %v5435_v45 = vld [vmem:[%s9716_s1 + $0xb4] ss:$8 sps:$4 sm:$0xff]  }
  0x3a   :  { %v5437_v46 = vld [vmem:[%s9717_s2 + $0xb4] ss:$8 sps:$4 sm:$0xff]   ;;  %v5439_v47 = vld [vmem:[%s9716_s1 + $0xb0] ss:$8 sps:$4 sm:$0xff]   ;;  %v5441_v49 = vld [vmem:[%s9716_s1 + $0xc4] ss:$8 sps:$4 sm:$0xff]  }
  0x3b   :  { %449 = vmatpush1.bf16.xpose.msra.mxu0 %v5415_v31  ;;  %v5440_v48 = vld [vmem:[%s9717_s2 + $0xb0] ss:$8 sps:$4 sm:$0xff]   ;;  %v5443_v50 = vld [vmem:[%s9717_s2 + $0xc4] ss:$8 sps:$4 sm:$0xff]   ;;  %v5445_v51 = vld [vmem:[%s9716_s1 + $0xc0] ss:$8 sps:$4 sm:$0xff]  }
  0x3c   :  { %802 = vmatpush1.bf16.xpose.msra.mxu1 %v5416_v32  ;;  %450 = vmatprep.subr.bf16.mxu0 %v5417_v33  ;;  %v5446_v52 = vld [vmem:[%s9717_s2 + $0xc0] ss:$8 sps:$4 sm:$0xff]   ;;  %v5447_v53 = vld [vmem:[%s9716_s1 + $0xd4] ss:$8 sps:$4 sm:$0xff]   ;;  %v5451_v55 = vld [vmem:[%s9716_s1 + $0xd0] ss:$8 sps:$4 sm:$0xff]   ;;  %v9720_v32 = vlaneseq }
  0x3d   :  { %803 = vmatprep.subr.bf16.mxu1 %v5419_v34  ;;  %v5449_v54 = vld [vmem:[%s9717_s2 + $0xd4] ss:$8 sps:$4 sm:$0xff]   ;;  %v5452_v56 = vld [vmem:[%s9717_s2 + $0xd0] ss:$8 sps:$4 sm:$0xff]   ;;  %v5453_v57 = vld [vmem:[%s9716_s1 + $0xe4] ss:$8 sps:$4 sm:$0xff]  }
  0x3e   :  { %v5455_v58 = vld [vmem:[%s9717_s2 + $0xe4] ss:$8 sps:$4 sm:$0xff]   ;;  %v5457_v59 = vld [vmem:[%s9716_s1 + $0xe0] ss:$8 sps:$4 sm:$0xff]   ;;  %v5459_v61 = vld [vmem:[%s9716_s1 + $0xf4] ss:$8 sps:$4 sm:$0xff]  }
  0x3f   :  { %v5458_v60 = vld [vmem:[%s9717_s2 + $0xe0] ss:$8 sps:$4 sm:$0xff]   ;;  %v5461_v62 = vld [vmem:[%s9717_s2 + $0xf4] ss:$8 sps:$4 sm:$0xff]   ;;  %v5463_v63 = vld [vmem:[%s9716_s1 + $0xf0] ss:$8 sps:$4 sm:$0xff]  }
  0x40   :  { %v5464_v0 = vld [vmem:[%s9717_s2 + $0xf0] ss:$8 sps:$4 sm:$0xff]   ;;  %v5465_v1 = vld [vmem:[%s9715_s0] ss:$8 sps:$4 sm:$0xff]   ;;  %v5468_v2 = vld [vmem:[%s9715_s0 + $0x14] ss:$8 sps:$4 sm:$0xff]  }
  0x41   :  { %v5470_v3 = vld [vmem:[%s9715_s0 + $0x10] ss:$8 sps:$4 sm:$0xff]   ;;  %v5471_v4 = vld [vmem:[%s9715_s0 + $0x24] ss:$8 sps:$4 sm:$0xff]   ;;  %v5473_v5 = vld [vmem:[%s9715_s0 + $0x20] ss:$8 sps:$4 sm:$0xff]  }
  0x42   :  { %v5474_v6 = vld [vmem:[%s9715_s0 + $0x34] ss:$8 sps:$4 sm:$0xff]   ;;  %v5476_v7 = vld [vmem:[%s9715_s0 + $0x30] ss:$8 sps:$4 sm:$0xff]   ;;  %v5477_v8 = vld [vmem:[%s9715_s0 + $0x44] ss:$8 sps:$4 sm:$0xff]  }
  0x43   :  { %451 = vmatpush1.bf16.xpose.msra.mxu0 %v5421_v35  ;;  %v5479_v9 = vld [vmem:[%s9715_s0 + $0x40] ss:$8 sps:$4 sm:$0xff]   ;;  %v5480_v10 = vld [vmem:[%s9715_s0 + $0x54] ss:$8 sps:$4 sm:$0xff]   ;;  %v5482_v11 = vld [vmem:[%s9715_s0 + $0x50] ss:$8 sps:$4 sm:$0xff]  }
  0x44   :  { %804 = vmatpush1.bf16.xpose.msra.mxu1 %v5422_v36  ;;  %452 = vmatprep.subr.bf16.mxu0 %v5423_v37  ;;  %v5483_v12 = vld [vmem:[%s9715_s0 + $0x64] ss:$8 sps:$4 sm:$0xff]   ;;  %v5485_v13 = vld [vmem:[%s9715_s0 + $0x60] ss:$8 sps:$4 sm:$0xff]   ;;  %v5486_v14 = vld [vmem:[%s9715_s0 + $0x74] ss:$8 sps:$4 sm:$0xff]  }
  0x45   :  { %805 = vmatprep.subr.bf16.mxu1 %v5425_v38  ;;  %v5488_v15 = vld [vmem:[%s9715_s0 + $0x70] ss:$8 sps:$4 sm:$0xff]   ;;  %v5489_v16 = vld [vmem:[%s9715_s0 + $0x84] ss:$8 sps:$4 sm:$0xff]   ;;  %v5491_v17 = vld [vmem:[%s9715_s0 + $0x80] ss:$8 sps:$4 sm:$0xff]  }
  0x46   :  { %v5492_v18 = vld [vmem:[%s9715_s0 + $0x94] ss:$8 sps:$4 sm:$0xff]   ;;  %v5494_v19 = vld [vmem:[%s9715_s0 + $0x90] ss:$8 sps:$4 sm:$0xff]   ;;  %v5495_v20 = vld [vmem:[%s9715_s0 + $0xa4] ss:$8 sps:$4 sm:$0xff]  }
  0x47   :  { %v5497_v21 = vld [vmem:[%s9715_s0 + $0xa0] ss:$8 sps:$4 sm:$0xff]   ;;  %v5498_v22 = vld [vmem:[%s9715_s0 + $0xb4] ss:$8 sps:$4 sm:$0xff]   ;;  %v5500_v23 = vld [vmem:[%s9715_s0 + $0xb0] ss:$8 sps:$4 sm:$0xff]  }
  0x48   :  { %v5501_v24 = vld [vmem:[%s9715_s0 + $0xc4] ss:$8 sps:$4 sm:$0xff]   ;;  %v5503_v25 = vld [vmem:[%s9715_s0 + $0xc0] ss:$8 sps:$4 sm:$0xff]   ;;  %v5504_v26 = vld [vmem:[%s9715_s0 + $0xd4] ss:$8 sps:$4 sm:$0xff]  }
  0x49   :  { %v5506_v27 = vld [vmem:[%s9715_s0 + $0xd0] ss:$8 sps:$4 sm:$0xff]   ;;  %v5507_v28 = vld [vmem:[%s9715_s0 + $0xe4] ss:$8 sps:$4 sm:$0xff]   ;;  %v5509_v29 = vld [vmem:[%s9715_s0 + $0xe0] ss:$8 sps:$4 sm:$0xff]  }
  0x4a   :  { %v5510_v30 = vld [vmem:[%s9715_s0 + $0xf4] ss:$8 sps:$4 sm:$0xff]   ;;  %v5512_v31 = vld [vmem:[%s9715_s0 + $0xf0] ss:$8 sps:$4 sm:$0xff]   ;;  %v6523_v33 = vshrl.u32 %v9720_v32, 7  ;;  %v6526_v34 = vand.u32 127, %v9720_v32 }
  0x4b   :  { %453 = vmatpush1.bf16.xpose.msra.mxu0 %v5427_v39  ;;  %s6207_s0 = smov [#allocation12]   ;;  %s6208_s2 = smov [#allocation14]  }
  0x4c   :  { %806 = vmatpush1.bf16.xpose.msra.mxu1 %v5428_v40  ;;  %454 = vmatprep.subr.bf16.mxu0 %v5429_v41  ;;  %10115 = vst [vmem:[#allocation18_spill] sm:$0xff] %v6523_v33  ;;  %vm3827_vm0 = vcmp.eq.s32.totalorder %v6523_v33, %v6526_v34  ;;  %v3793_v37 = vadd.s32 8, %v6523_v33  ;;  %s5247_s20 = sshll.u32 %s6207_s0, 4  ;;  %s5257_s21 = sshll.u32 %s6208_s2, 4  ;;  %s5248_s20 = int_to_ptr.vmem [resolvable:$true] %s5247_s20  ;;  %s9682_s21 = int_to_ptr.vmem [resolvable:$true] %s5257_s21 }
  0x4d   :  { %807 = vmatprep.subr.bf16.mxu1 %v5431_v42  ;;  %s6157_s22 = scalar_lea.vmem %s5248_s20, 16  ;;  %s6161_s23 = scalar_lea.vmem %s5248_s20, 32 }
  0x4e   :  { %vm3829_vm1 = vcmp.eq.s32.totalorder %v3793_v37, %v6526_v34  ;;  %v3796_v37 = vadd.s32 32, %v6523_v33  ;;  %p6158_p0 = scmp.ne.s32.totalorder %s5248_s20, %s6157_s22  ;;  %p6162_p1 = scmp.lt.s32.totalorder %s5248_s20, %s5248_s20 }
  0x4f   :  { %p6163_p2 = scmp.lt.s32.totalorder %s6161_s23, %s6157_s22 }
  0x50   :  { %vm3835_vm4 = vcmp.eq.s32.totalorder %v3796_v37, %v6526_v34  ;;  %v3797_v37 = vadd.s32 40, %v6523_v33 }
  0x51   :  { %p6164_p3 = por %p6163_p2, %p6162_p1 }
  0x52   :  { %vm3837_vm5 = vcmp.eq.s32.totalorder %v3797_v37, %v6526_v34 }
  0x53   :  { %455 = vmatpush1.bf16.xpose.msra.mxu0 %v5433_v43  ;;  %p6165_p4 = pnand %p6164_p3, %p6158_p0 }
  0x54   :  { %808 = vmatpush1.bf16.xpose.msra.mxu1 %v5434_v44  ;;  %456 = vmatprep.subr.bf16.mxu0 %v5435_v45 }
  0x55   :  { %809 = vmatprep.subr.bf16.mxu1 %v5437_v46 }
  0x5b   :  { %457 = vmatpush1.bf16.xpose.msra.mxu0 %v5439_v47 }
  0x5c   :  { %810 = vmatpush1.bf16.xpose.msra.mxu1 %v5440_v48  ;;  %458 = vmatprep.subr.bf16.mxu0 %v5441_v49  ;;  %v3794_v48 = vadd.s32 16, %v6523_v33 }
  0x5d   :  { %811 = vmatprep.subr.bf16.mxu1 %v5443_v50 }
  0x5e   :  { %vm3831_vm2 = vcmp.eq.s32.totalorder %v3794_v48, %v6526_v34 }
  0x63   :  { %459 = vmatpush1.bf16.xpose.msra.mxu0 %v5445_v51 }
  0x64   :  { %812 = vmatpush1.bf16.xpose.msra.mxu1 %v5446_v52  ;;  %460 = vmatprep.subr.bf16.mxu0 %v5447_v53 }
  0x65   :  { %813 = vmatprep.subr.bf16.mxu1 %v5449_v54 }
  0x6b   :  { %461 = vmatpush1.bf16.xpose.msra.mxu0 %v5451_v55 }
  0x6c   :  { %814 = vmatpush1.bf16.xpose.msra.mxu1 %v5452_v56  ;;  %462 = vmatprep.subr.bf16.mxu0 %v5453_v57 }
  0x6d   :  { %815 = vmatprep.subr.bf16.mxu1 %v5455_v58 }
  0x73   :  { %463 = vmatpush1.bf16.xpose.msra.mxu0 %v5457_v59 }
  0x74   :  { %816 = vmatpush1.bf16.xpose.msra.mxu1 %v5458_v60  ;;  %464 = vmatprep.subr.bf16.mxu0 %v5459_v61 }
  0x75   :  { %817 = vmatprep.subr.bf16.mxu1 %v5461_v62 }
  0x7b   :  { %465 = vmatpush1.bf16.xpose.msra.mxu0 %v5463_v63 }
  0x7c   :  { %818 = vmatpush1.bf16.xpose.msra.mxu1 %v5464_v0 }
  0x82   :  { %467 = vmatmul.mubr.bf16.vlgmr.msra.gmra.mrb[0].mxu0 %v5465_v1 }
  0x83   :  { %820 = vmatmul.mubr.bf16.vlgmr.msra.gmra.mrb[0].mxu1 %v5465_v1  ;;  %476 = vmatprep.mubr.bf16.mxu0 %v5468_v2 }
  0x84   :  { %829 = vmatprep.mubr.bf16.mxu1 %v5468_v2 }
  0x8a   :  { %477 = vmatmul.mubr.bf16.gmra.mrb[4].mxu0 %v5470_v3 }
  0x8b   :  { %830 = vmatmul.mubr.bf16.gmra.mrb[4].mxu1 %v5470_v3  ;;  %486 = vmatprep.mubr.bf16.mxu0 %v5471_v4 }
  0x8c   :  { %839 = vmatprep.mubr.bf16.mxu1 %v5471_v4 }
  0x92   :  { %487 = vmatmul.mubr.bf16.gmra.mrb[8].mxu0 %v5473_v5 }
  0x93   :  { %840 = vmatmul.mubr.bf16.gmra.mrb[8].mxu1 %v5473_v5  ;;  %496 = vmatprep.mubr.bf16.mxu0 %v5474_v6 }
  0x94   :  { %849 = vmatprep.mubr.bf16.mxu1 %v5474_v6 }
  0x9a   :  { %497 = vmatmul.mubr.bf16.gmra.mrb[12].mxu0 %v5476_v7 }
  0x9b   :  { %850 = vmatmul.mubr.bf16.gmra.mrb[12].mxu1 %v5476_v7  ;;  %506 = vmatprep.mubr.bf16.mxu0 %v5477_v8 }
  0x9c   :  { %859 = vmatprep.mubr.bf16.mxu1 %v5477_v8 }
  0xa2   :  { %507 = vmatmul.mubr.bf16.gmra.mrb[16].mxu0 %v5479_v9 }
  0xa3   :  { %860 = vmatmul.mubr.bf16.gmra.mrb[16].mxu1 %v5479_v9  ;;  %516 = vmatprep.mubr.bf16.mxu0 %v5480_v10 }
  0xa4   :  { %869 = vmatprep.mubr.bf16.mxu1 %v5480_v10 }
  0xaa   :  { %517 = vmatmul.mubr.bf16.gmra.mrb[20].mxu0 %v5482_v11 }
  0xab   :  { %870 = vmatmul.mubr.bf16.gmra.mrb[20].mxu1 %v5482_v11  ;;  %526 = vmatprep.mubr.bf16.mxu0 %v5483_v12 }
  0xac   :  { %879 = vmatprep.mubr.bf16.mxu1 %v5483_v12 }
  0xb2   :  { %527 = vmatmul.mubr.bf16.gmra.mrb[24].mxu0 %v5485_v13 }
  0xb3   :  { %880 = vmatmul.mubr.bf16.gmra.mrb[24].mxu1 %v5485_v13  ;;  %536 = vmatprep.mubr.bf16.mxu0 %v5486_v14 }
  0xb4   :  { %889 = vmatprep.mubr.bf16.mxu1 %v5486_v14 }
  0xba   :  { %537 = vmatmul.mubr.bf16.gmra.mrb[28].mxu0 %v5488_v15 }
  0xbb   :  { %890 = vmatmul.mubr.bf16.gmra.mrb[28].mxu1 %v5488_v15  ;;  %546 = vmatprep.mubr.bf16.mxu0 %v5489_v16 }
  0xbc   :  { %899 = vmatprep.mubr.bf16.mxu1 %v5489_v16  ;;  %v3795_v16 = vadd.s32 24, %v6523_v33 }
  0xbe   :  { %vm3833_vm3 = vcmp.eq.s32.totalorder %v3795_v16, %v6526_v34 }
  0xc2   :  { %547 = vmatmul.mubr.bf16.gmra.mrb[32].mxu0 %v5491_v17 }
  0xc3   :  { %900 = vmatmul.mubr.bf16.gmra.mrb[32].mxu1 %v5491_v17  ;;  %556 = vmatprep.mubr.bf16.mxu0 %v5492_v18 }
  0xc4   :  { %909 = vmatprep.mubr.bf16.mxu1 %v5492_v18 }
  0xca   :  { %557 = vmatmul.mubr.bf16.gmra.mrb[36].mxu0 %v5494_v19 }
  0xcb   :  { %910 = vmatmul.mubr.bf16.gmra.mrb[36].mxu1 %v5494_v19  ;;  %566 = vmatprep.mubr.bf16.mxu0 %v5495_v20 }
  0xcc   :  { %919 = vmatprep.mubr.bf16.mxu1 %v5495_v20 }
  0xd2   :  { %567 = vmatmul.mubr.bf16.gmra.mrb[40].mxu0 %v5497_v21 }
  0xd3   :  { %920 = vmatmul.mubr.bf16.gmra.mrb[40].mxu1 %v5497_v21  ;;  %576 = vmatprep.mubr.bf16.mxu0 %v5498_v22 }
  0xd4   :  { %929 = vmatprep.mubr.bf16.mxu1 %v5498_v22 }
  0xda   :  { %577 = vmatmul.mubr.bf16.gmra.mrb[44].mxu0 %v5500_v23 }
  0xdb   :  { %930 = vmatmul.mubr.bf16.gmra.mrb[44].mxu1 %v5500_v23  ;;  %586 = vmatprep.mubr.bf16.mxu0 %v5501_v24 }
  0xdc   :  { %939 = vmatprep.mubr.bf16.mxu1 %v5501_v24 }
  0xe2   :  { %587 = vmatmul.mubr.bf16.gmra.mrb[48].mxu0 %v5503_v25 }
  0xe3   :  { %940 = vmatmul.mubr.bf16.gmra.mrb[48].mxu1 %v5503_v25  ;;  %596 = vmatprep.mubr.bf16.mxu0 %v5504_v26 }
  0xe4   :  { %949 = vmatprep.mubr.bf16.mxu1 %v5504_v26 }
  0xea   :  { %597 = vmatmul.mubr.bf16.gmra.mrb[52].mxu0 %v5506_v27 }
  0xeb   :  { %950 = vmatmul.mubr.bf16.gmra.mrb[52].mxu1 %v5506_v27  ;;  %606 = vmatprep.mubr.bf16.mxu0 %v5507_v28 }
  0xec   :  { %959 = vmatprep.mubr.bf16.mxu1 %v5507_v28 }
  0xf2   :  { %607 = vmatmul.mubr.bf16.gmra.mrb[56].mxu0 %v5509_v29 }
  0xf3   :  { %960 = vmatmul.mubr.bf16.gmra.mrb[56].mxu1 %v5509_v29  ;;  %616 = vmatprep.mubr.bf16.mxu0 %v5510_v30 }
  0xf4   :  { %969 = vmatprep.mubr.bf16.mxu1 %v5510_v30 }
  0xfa   :  { %617 = vmatmul.mubr.bf16.gmra.mrb[60].mxu0 %v5512_v31 }
  0xfb   :  { %970 = vmatmul.mubr.bf16.gmra.mrb[60].mxu1 %v5512_v31 }
 0x155   :  { %v6530_v35 = vpop.f32.mrb[0].mxu0 }
 0x156   :  { %10116 = vst [vmem:[#allocation19_spill] sm:$0xff] %v6530_v35  ;;  %v6532_v36 = vpop.f32.mrb[0].mxu1  ;;  %v6535_v38 = vpop.f32.mrb[1].mxu0  ;;  %v3891_v40 = vsel %vm3827_vm0, %v6530_v35, 0.0 }
 0x157   :  { %10117 = vst [vmem:[#allocation20_spill] sm:$0xff] %v6532_v36  ;;  %10118 = vst [vmem:[#allocation21_spill] sm:$0xff] %v6535_v38  ;;  %v6537_v39 = vpop.f32.mrb[1].mxu1  ;;  %3956 = vadd.xlane.f32.xlu1 %v3891_v40  ;;  %v6540_v41 = vpop.f32.mrb[2].mxu0  ;;  %v1051_v43 = vmax.f32 %v6530_v35, %v6535_v38  ;;  %v4051_v47 = vsel %vm3827_vm0, %v6532_v36, 0.0 }
 0x158   :  { %10119 = vst [vmem:[#allocation22_spill] sm:$0xff] %v6537_v39  ;;  %10120 = vst [vmem:[#allocation23_spill] sm:$0xff] %v6540_v41  ;;  %v6542_v42 = vpop.f32.mrb[2].mxu1  ;;  %v1956_v44 = vmax.f32 %v6532_v36, %v6537_v39  ;;  %v6548_v45 = vpop.f32.mrb[3].mxu0  ;;  %v3893_v51 = vsel %vm3829_vm1, %v6540_v41, 0.0 }
 0x159   :  { %10121 = vst [vmem:[#allocation24_spill] sm:$0xff] %v6542_v42  ;;  %10122 = vst [vmem:[#allocation25_spill] sm:$0xff] %v6548_v45  ;;  %v6550_v46 = vpop.f32.mrb[3].mxu1  ;;  %1052 = vmax.xlane.f32.xlu0 %v1051_v43  ;;  %v1054_v49 = vmax.f32 %v6540_v41, %v6548_v45  ;;  %v4053_v4 = vsel %vm3829_vm1, %v6542_v42, 0.0 }
 0x15a   :  { %10123 = vst [vmem:[#allocation26_spill] sm:$0xff] %v6550_v46  ;;  %v1959_v50 = vmax.f32 %v6542_v42, %v6550_v46 }
 0x15b   :  { %4116 = vadd.xlane.f32.xlu1 %v4051_v47 }
 0x15d   :  { %3959 = vadd.xlane.f32.xlu0 %v3893_v51  ;;  %v6564_v53 = vpop.f32.mrb[4].mxu0 }
 0x15e   :  { %v6562_v52 = vpop.f32.mrb[4].mxu1  ;;  %10125 = vst [vmem:[#allocation28_spill] sm:$0xff] %v6564_v53  ;;  %v2860_v55 = vmax.f32 %v6530_v35, %v6564_v53  ;;  %v6571_v56 = vpop.f32.mrb[5].mxu0  ;;  %v3895_v5 = vsel %vm3831_vm2, %v6564_v53, 0.0 }
 0x15f   :  { %10124 = vst [vmem:[#allocation27_spill] sm:$0xff] %v6562_v52  ;;  %v3324_v54 = vmax.f32 %v6532_v36, %v6562_v52  ;;  %10126 = vst [vmem:[#allocation29_spill] sm:$0xff] %v6571_v56  ;;  %v6573_v57 = vpop.f32.mrb[5].mxu1  ;;  %v2897_v58 = vmax.f32 %v6535_v38, %v6571_v56  ;;  %1957 = vmax.xlane.f32.xlu1 %v1956_v44  ;;  %v6581_v61 = vpop.f32.mrb[6].mxu0  ;;  %v1057_v62 = vmax.f32 %v6564_v53, %v6571_v56 }
 0x160   :  { %10127 = vst [vmem:[#allocation30_spill] sm:$0xff] %v6573_v57  ;;  %v3361_v59 = vmax.f32 %v6537_v39, %v6573_v57  ;;  %v6579_v60 = vpop.f32.mrb[6].mxu1  ;;  %10129 = vst [vmem:[#allocation32_spill] sm:$0xff] %v6581_v61  ;;  %v1962_v63 = vmax.f32 %v6562_v52, %v6573_v57  ;;  %v2861_v1 = vmax.f32 %v6540_v41, %v6581_v61  ;;  %v6591_v2 = vpop.f32.mrb[7].mxu0  ;;  %v4055_v31 = vsel %vm3831_vm2, %v6562_v52, 0.0 }
 0x161   :  { %10128 = vst [vmem:[#allocation31_spill] sm:$0xff] %v6579_v60  ;;  %v3325_v0 = vmax.f32 %v6542_v42, %v6579_v60  ;;  %10130 = vst [vmem:[#allocation33_spill] sm:$0xff] %v6591_v2  ;;  %v6593_v3 = vpop.f32.mrb[7].mxu1  ;;  %v2898_v6 = vmax.f32 %v6548_v45, %v6591_v2  ;;  %4119 = vadd.xlane.f32.xlu0 %v4053_v4  ;;  %v1060_v8 = vmax.f32 %v6581_v61, %v6591_v2 }
 0x162   :  { %10131 = vst [vmem:[#allocation34_spill] sm:$0xff] %v6593_v3  ;;  %v3362_v7 = vmax.f32 %v6550_v46, %v6593_v3  ;;  %v1965_v9 = vmax.f32 %v6579_v60, %v6593_v3  ;;  %v3897_v48 = vsel %vm3833_vm3, %v6581_v61, 0.0 }
 0x163   :  { %3962 = vadd.xlane.f32.xlu1 %v3895_v5  ;;  %v4057_v5 = vsel %vm3833_vm3, %v6579_v60, 0.0  ;;  %vm986_vm3 = vcmask 7168  }
 0x165   :  { %1055 = vmax.xlane.f32.xlu0 %v1054_v49  ;;  %v6611_v11 = vpop.f32.mrb[8].mxu0 }
 0x166   :  { %v6609_v10 = vpop.f32.mrb[8].mxu1  ;;  %10133 = vst [vmem:[#allocation36_spill] sm:$0xff] %v6611_v11  ;;  %v2862_v13 = vmax.f32 %v2860_v55, %v6611_v11  ;;  %v6615_v14 = vpop.f32.mrb[9].mxu0 }
 0x167   :  { %10132 = vst [vmem:[#allocation35_spill] sm:$0xff] %v6609_v10  ;;  %v3326_v12 = vmax.f32 %v3324_v54, %v6609_v10  ;;  %10134 = vst [vmem:[#allocation37_spill] sm:$0xff] %v6615_v14  ;;  %v6617_v15 = vpop.f32.mrb[9].mxu1  ;;  %v2899_v17 = vmax.f32 %v2897_v58, %v6615_v14  ;;  %1058 = vmax.xlane.f32.xlu1 %v1057_v62  ;;  %v6624_v20 = vpop.f32.mrb[10].mxu0  ;;  %v1063_v22 = vmax.f32 %v6611_v11, %v6615_v14 }
 0x168   :  { %10135 = vst [vmem:[#allocation38_spill] sm:$0xff] %v6617_v15  ;;  %v3363_v18 = vmax.f32 %v3361_v59, %v6617_v15  ;;  %v6622_v19 = vpop.f32.mrb[10].mxu1  ;;  %10137 = vst [vmem:[#allocation40_spill] sm:$0xff] %v6624_v20  ;;  %v1968_v21 = vmax.f32 %v6609_v10, %v6617_v15  ;;  %v2863_v24 = vmax.f32 %v2861_v1, %v6624_v20  ;;  %v6632_v25 = vpop.f32.mrb[11].mxu0 }
 0x169   :  { %10136 = vst [vmem:[#allocation39_spill] sm:$0xff] %v6622_v19  ;;  %v3327_v23 = vmax.f32 %v3325_v0, %v6622_v19  ;;  %10138 = vst [vmem:[#allocation41_spill] sm:$0xff] %v6632_v25  ;;  %v6634_v26 = vpop.f32.mrb[11].mxu1  ;;  %v2900_v27 = vmax.f32 %v2898_v6, %v6632_v25  ;;  %1960 = vmax.xlane.f32.xlu0 %v1959_v50 }
 0x16a   :  { %10139 = vst [vmem:[#allocation42_spill] sm:$0xff] %v6634_v26  ;;  %v3364_v28 = vmax.f32 %v3362_v7, %v6634_v26 }
 0x16b   :  { %1963 = vmax.xlane.f32.xlu1 %v1962_v63 }
 0x16d   :  { %4122 = vadd.xlane.f32.xlu0 %v4055_v31  ;;  %v6649_v43 = vpop.f32.mrb[12].mxu0  ;;  %v4059_v31 = vsel %vm3835_vm4, %v6609_v10, 0.0 }
 0x16e   :  { %v6647_v40 = vpop.f32.mrb[12].mxu1  ;;  %10141 = vst [vmem:[#allocation44_spill] sm:$0xff] %v6649_v43  ;;  %v2864_v47 = vmax.f32 %v2862_v13, %v6649_v43  ;;  %v6653_v49 = vpop.f32.mrb[13].mxu0 }
 0x16f   :  { %10140 = vst [vmem:[#allocation43_spill] sm:$0xff] %v6647_v40  ;;  %v3328_v44 = vmax.f32 %v3326_v12, %v6647_v40  ;;  %10142 = vst [vmem:[#allocation45_spill] sm:$0xff] %v6653_v49  ;;  %v6655_v50 = vpop.f32.mrb[13].mxu1  ;;  %v2901_v51 = vmax.f32 %v2899_v17, %v6653_v49  ;;  %3965 = vadd.xlane.f32.xlu1 %v3897_v48  ;;  %v6664_v58 = vpop.f32.mrb[14].mxu0  ;;  %v3899_v17 = vsel %vm3835_vm4, %v6611_v11, 0.0 }
 0x170   :  { %10143 = vst [vmem:[#allocation46_spill] sm:$0xff] %v6655_v50  ;;  %v3365_v54 = vmax.f32 %v3363_v18, %v6655_v50  ;;  %v6662_v55 = vpop.f32.mrb[14].mxu1  ;;  %10145 = vst [vmem:[#allocation48_spill] sm:$0xff] %v6664_v58  ;;  %v2865_v0 = vmax.f32 %v2863_v24, %v6664_v58  ;;  %v6672_v1 = vpop.f32.mrb[15].mxu0  ;;  %v10176_v45 = vmax.f32 %v6649_v43, %v6653_v49 }
 0x171   :  { %10144 = vst [vmem:[#allocation47_spill] sm:$0xff] %v6662_v55  ;;  %v3329_v63 = vmax.f32 %v3327_v23, %v6662_v55  ;;  %10146 = vst [vmem:[#allocation49_spill] sm:$0xff] %v6672_v1  ;;  %v6674_v4 = vpop.f32.mrb[15].mxu1  ;;  %v2902_v6 = vmax.f32 %v2900_v27, %v6672_v1  ;;  %4125 = vadd.xlane.f32.xlu0 %v4057_v5  ;;  %v10184_v11 = vmax.f32 %v6664_v58, %v6672_v1 }
 0x172   :  { %10147 = vst [vmem:[#allocation50_spill] sm:$0xff] %v6674_v4  ;;  %v3366_v7 = vmax.f32 %v3364_v28, %v6674_v4 }
 0x173   :  { %1061 = vmax.xlane.f32.xlu1 %v1060_v8 }
 0x175   :  { %1966 = vmax.xlane.f32.xlu0 %v1965_v9  ;;  %v6689_v16 = vpop.f32.mrb[16].mxu0 }
 0x176   :  { %v6687_v18 = vpop.f32.mrb[16].mxu1  ;;  %10149 = vst [vmem:[#allocation52_spill] sm:$0xff] %v6689_v16  ;;  %v2866_v24 = vmax.f32 %v2864_v47, %v6689_v16  ;;  %v6693_v27 = vpop.f32.mrb[17].mxu0 }
 0x177   :  { %10148 = vst [vmem:[#allocation51_spill] sm:$0xff] %v6687_v18  ;;  %v3330_v23 = vmax.f32 %v3328_v44, %v6687_v18  ;;  %10150 = vst [vmem:[#allocation53_spill] sm:$0xff] %v6693_v27  ;;  %v6695_v28 = vpop.f32.mrb[17].mxu1  ;;  %v2903_v8 = vmax.f32 %v2901_v51, %v6693_v27  ;;  %3968 = vadd.xlane.f32.xlu1 %v3899_v17  ;;  %v6703_v9 = vpop.f32.mrb[18].mxu0 }
 0x178   :  { %10151 = vst [vmem:[#allocation54_spill] sm:$0xff] %v6695_v28  ;;  %v3367_v48 = vmax.f32 %v3365_v54, %v6695_v28  ;;  %v6701_v5 = vpop.f32.mrb[18].mxu1  ;;  %10153 = vst [vmem:[#allocation56_spill] sm:$0xff] %v6703_v9  ;;  %v2867_v13 = vmax.f32 %v2865_v0, %v6703_v9  ;;  %v6711_v12 = vpop.f32.mrb[19].mxu0 }
 0x179   :  { %10152 = vst [vmem:[#allocation55_spill] sm:$0xff] %v6701_v5  ;;  %v3331_v32 = vmax.f32 %v3329_v63, %v6701_v5  ;;  %10154 = vst [vmem:[#allocation57_spill] sm:$0xff] %v6711_v12  ;;  %v6713_v51 = vpop.f32.mrb[19].mxu1  ;;  %v2904_v54 = vmax.f32 %v2902_v6, %v6711_v12  ;;  %4128 = vadd.xlane.f32.xlu0 %v4059_v31  ;;  %v3798_v63 = vadd.s32 48, %v6523_v33 }
 0x17a   :  { %10155 = vst [vmem:[#allocation58_spill] sm:$0xff] %v6713_v51  ;;  %v3368_v17 = vmax.f32 %v3366_v7, %v6713_v51 }
 0x17b   :  { %1969 = vmax.xlane.f32.xlu1 %v1968_v21  ;;  %v3901_v21 = vsel %vm3837_vm5, %v6624_v20, 0.0  ;;  %vm3839_vm6 = vcmp.eq.s32.totalorder %v3798_v63, %v6526_v34 }
 0x17c   :  { %v4063_v37 = vsel %vm3839_vm6, %v6647_v40, 0.0 }
 0x17d   :  { %1064 = vmax.xlane.f32.xlu0 %v1063_v22  ;;  %v6731_v6 = vpop.f32.mrb[20].mxu0 }
 0x17e   :  { %v6726_v0 = vpop.f32.mrb[20].mxu1  ;;  %10157 = vst [vmem:[#allocation60_spill] sm:$0xff] %v6731_v6  ;;  %v2868_v31 = vmax.f32 %v2866_v24, %v6731_v6  ;;  %v6735_v44 = vpop.f32.mrb[21].mxu0  ;;  %v10164_v24 = vmax.f32 %v6624_v20, %v6632_v25 }
 0x17f   :  { %10156 = vst [vmem:[#allocation59_spill] sm:$0xff] %v6726_v0  ;;  %v3332_v7 = vmax.f32 %v3330_v23, %v6726_v0  ;;  %10158 = vst [vmem:[#allocation61_spill] sm:$0xff] %v6735_v44  ;;  %v6737_v62 = vpop.f32.mrb[21].mxu1  ;;  %v2905_v47 = vmax.f32 %v2903_v8, %v6735_v44  ;;  %3971 = vadd.xlane.f32.xlu1 %v3901_v21  ;;  %v6746_v22 = vpop.f32.mrb[22].mxu0 }
 0x180   :  { %10159 = vst [vmem:[#allocation62_spill] sm:$0xff] %v6737_v62  ;;  %v3369_v59 = vmax.f32 %v3367_v48, %v6737_v62  ;;  %v6744_v30 = vpop.f32.mrb[22].mxu1  ;;  %10161 = vst [vmem:[#allocation64_spill] sm:$0xff] %v6746_v22  ;;  %v2869_v15 = vmax.f32 %v2867_v13, %v6746_v22  ;;  %v6754_v3 = vpop.f32.mrb[23].mxu0  ;;  %v4061_v48 = vsel %vm3837_vm5, %v6622_v19, 0.0 }
 0x181   :  { %10160 = vst [vmem:[#allocation63_spill] sm:$0xff] %v6744_v30  ;;  %v3333_v29 = vmax.f32 %v3331_v32, %v6744_v30  ;;  %10162 = vst [vmem:[#allocation65_spill] sm:$0xff] %v6754_v3  ;;  %v6756_v8 = vpop.f32.mrb[23].mxu1  ;;  %v2906_v21 = vmax.f32 %v2904_v54, %v6754_v3  ;;  %4131 = vadd.xlane.f32.xlu0 %v4061_v48  ;;  %v10166_v54 = vmax.f32 %v6622_v19, %v6634_v26 }
 0x182   :  { %10163 = vst [vmem:[#allocation66_spill] sm:$0xff] %v6756_v8  ;;  %v3370_v23 = vmax.f32 %v3368_v17, %v6756_v8 }
 0x183   :  { %1067 = vmax.xlane.f32.xlu1 %v10164_v24  ;;  %v3903_v24 = vsel %vm3839_vm6, %v6649_v43, 0.0 }
 0x185   :  { %1972 = vmax.xlane.f32.xlu0 %v10166_v54  ;;  %v6777_v17 = vpop.f32.mrb[24].mxu0 }
 0x186   :  { %v6772_v57 = vpop.f32.mrb[24].mxu1  ;;  %10167 = vst [vmem:[#allocation68_spill] sm:$0xff] %v6777_v17  ;;  %v2870_v48 = vmax.f32 %v2868_v31, %v6777_v17  ;;  %v6781_v32 = vpop.f32.mrb[25].mxu0 }
 0x187   :  { %10165 = vst [vmem:[#allocation67_spill] sm:$0xff] %v6772_v57  ;;  %v3334_v63 = vmax.f32 %v3332_v7, %v6772_v57  ;;  %10168 = vst [vmem:[#allocation69_spill] sm:$0xff] %v6781_v32  ;;  %v6783_v13 = vpop.f32.mrb[25].mxu1  ;;  %v2907_v46 = vmax.f32 %v2905_v47, %v6781_v32  ;;  %4134 = vadd.xlane.f32.xlu1 %v4063_v37  ;;  %v6790_v54 = vpop.f32.mrb[26].mxu0 }
 0x188   :  { %10169 = vst [vmem:[#allocation70_spill] sm:$0xff] %v6783_v13  ;;  %v3371_v39 = vmax.f32 %v3369_v59, %v6783_v13  ;;  %v6788_v25 = vpop.f32.mrb[26].mxu1  ;;  %10171 = vst [vmem:[#allocation72_spill] sm:$0xff] %v6790_v54  ;;  %v2871_v14 = vmax.f32 %v2869_v15, %v6790_v54  ;;  %v6798_v2 = vpop.f32.mrb[27].mxu0  ;;  %v3799_v59 = vadd.s32 56, %v6523_v33  ;;  %v10174_v15 = vmax.f32 %v6647_v40, %v6655_v50 }
 0x189   :  { %10170 = vst [vmem:[#allocation71_spill] sm:$0xff] %v6788_v25  ;;  %v3335_v26 = vmax.f32 %v3333_v29, %v6788_v25  ;;  %10172 = vst [vmem:[#allocation73_spill] sm:$0xff] %v6798_v2  ;;  %v6800_v47 = vpop.f32.mrb[27].mxu1  ;;  %v2908_v37 = vmax.f32 %v2906_v21, %v6798_v2  ;;  %3974 = vadd.xlane.f32.xlu0 %v3903_v24 }
 0x18a   :  { %10173 = vst [vmem:[#allocation74_spill] sm:$0xff] %v6800_v47  ;;  %v3372_v56 = vmax.f32 %v3370_v23, %v6800_v47  ;;  %vm3841_vm7 = vcmp.eq.s32.totalorder %v3799_v59, %v6526_v34  ;;  %v3800_v23 = vadd.s32 64, %v6523_v33 }
 0x18b   :  { %1975 = vmax.xlane.f32.xlu1 %v10174_v15  ;;  %v3905_v15 = vsel %vm3841_vm7, %v6664_v58, 0.0 }
 0x18c   :  { %vm3843_vm8 = vcmp.eq.s32.totalorder %v3800_v23, %v6526_v34 }
 0x18d   :  { %1070 = vmax.xlane.f32.xlu0 %v10176_v45  ;;  %v6817_v21 = vpop.f32.mrb[28].mxu0  ;;  %v4067_v20 = vsel %vm3843_vm8, %v6687_v18, 0.0 }
 0x18e   :  { %v6812_v29 = vpop.f32.mrb[28].mxu1  ;;  %10177 = vst [vmem:[#allocation76_spill] sm:$0xff] %v6817_v21  ;;  %v6821_v24 = vpop.f32.mrb[29].mxu0  ;;  %v2872_v50 = vmax.f32 %v2870_v48, %v6817_v21 }
 0x18f   :  { %10175 = vst [vmem:[#allocation75_spill] sm:$0xff] %v6812_v29  ;;  %10178 = vst [vmem:[#allocation77_spill] sm:$0xff] %v6821_v24  ;;  %v6823_v7 = vpop.f32.mrb[29].mxu1  ;;  %v3336_v31 = vmax.f32 %v3334_v63, %v6812_v29  ;;  %v2909_v45 = vmax.f32 %v2907_v46, %v6821_v24  ;;  %3977 = vadd.xlane.f32.xlu1 %v3905_v15  ;;  %v6834_v43 = vpop.f32.mrb[30].mxu0  ;;  %v4065_v46 = vsel %vm3841_vm7, %v6662_v55, 0.0 }
 0x190   :  { %10179 = vst [vmem:[#allocation78_spill] sm:$0xff] %v6823_v7  ;;  %v3373_v49 = vmax.f32 %v3371_v39, %v6823_v7  ;;  %v6832_v38 = vpop.f32.mrb[30].mxu1  ;;  %10181 = vst [vmem:[#allocation80_spill] sm:$0xff] %v6834_v43  ;;  %v6840_v61 = vpop.f32.mrb[31].mxu0  ;;  %v2873_v48 = vmax.f32 %v2871_v14, %v6834_v43 }
 0x191   :  { %10180 = vst [vmem:[#allocation79_spill] sm:$0xff] %v6832_v38  ;;  %10182 = vst [vmem:[#allocation81_spill] sm:$0xff] %v6840_v61  ;;  %v6842_v63 = vpop.f32.mrb[31].mxu1  ;;  %v3337_v39 = vmax.f32 %v3335_v26, %v6832_v38  ;;  %v2910_v15 = vmax.f32 %v2908_v37, %v6840_v61  ;;  %4137 = vadd.xlane.f32.xlu0 %v4065_v46  ;;  %v10186_v26 = vmax.f32 %v6662_v55, %v6674_v4 }
 0x192   :  { %10183 = vst [vmem:[#allocation82_spill] sm:$0xff] %v6842_v63  ;;  %v3374_v53 = vmax.f32 %v3372_v56, %v6842_v63 }
 0x193   :  { %1073 = vmax.xlane.f32.xlu1 %v10184_v11  ;;  %v3907_v11 = vsel %vm3843_vm8, %v6689_v16, 0.0 }
 0x195   :  { %1978 = vmax.xlane.f32.xlu0 %v10186_v26  ;;  %v6861_v14 = vpop.f32.mrb[32].mxu0 }
 0x196   :  { %v6856_v41 = vpop.f32.mrb[32].mxu1  ;;  %10187 = vst [vmem:[#allocation84_spill] sm:$0xff] %v6861_v14  ;;  %v2874_v56 = vmax.f32 %v2872_v50, %v6861_v14  ;;  %v6865_v37 = vpop.f32.mrb[33].mxu0 }
 0x197   :  { %10185 = vst [vmem:[#allocation83_spill] sm:$0xff] %v6856_v41  ;;  %v3338_v59 = vmax.f32 %v3336_v31, %v6856_v41  ;;  %10188 = vst [vmem:[#allocation85_spill] sm:$0xff] %v6865_v37  ;;  %v6867_v23 = vpop.f32.mrb[33].mxu1  ;;  %v2911_v46 = vmax.f32 %v2909_v45, %v6865_v37  ;;  %4140 = vadd.xlane.f32.xlu1 %v4067_v20  ;;  %v6874_v26 = vpop.f32.mrb[34].mxu0  ;;  %v10194_v20 = vmax.f32 %v6687_v18, %v6695_v28 }
 0x198   :  { %10189 = vst [vmem:[#allocation86_spill] sm:$0xff] %v6867_v23  ;;  %v3375_v1 = vmax.f32 %v3373_v49, %v6867_v23  ;;  %v6872_v58 = vpop.f32.mrb[34].mxu1  ;;  %10191 = vst [vmem:[#allocation88_spill] sm:$0xff] %v6874_v26  ;;  %v2875_v31 = vmax.f32 %v2873_v48, %v6874_v26  ;;  %v6878_v50 = vpop.f32.mrb[35].mxu0  ;;  %v3801_v49 = vadd.s32 72, %v6523_v33 }
 0x199   :  { %10190 = vst [vmem:[#allocation87_spill] sm:$0xff] %v6872_v58  ;;  %v3339_v4 = vmax.f32 %v3337_v39, %v6872_v58  ;;  %10192 = vst [vmem:[#allocation89_spill] sm:$0xff] %v6878_v50  ;;  %v6880_v35 = vpop.f32.mrb[35].mxu1  ;;  %v2912_v55 = vmax.f32 %v2910_v15, %v6878_v50  ;;  %3980 = vadd.xlane.f32.xlu0 %v3907_v11  ;;  %v10196_v39 = vmax.f32 %v6689_v16, %v6693_v27 }
 0x19a   :  { %10193 = vst [vmem:[#allocation90_spill] sm:$0xff] %v6880_v35  ;;  %v3376_v40 = vmax.f32 %v3374_v53, %v6880_v35  ;;  %vm3845_vm9 = vcmp.eq.s32.totalorder %v3801_v49, %v6526_v34  ;;  %v3802_v15 = vadd.s32 80, %v6523_v33 }
 0x19b   :  { %1981 = vmax.xlane.f32.xlu1 %v10194_v20  ;;  %v3909_v20 = vsel %vm3845_vm9, %v6703_v9, 0.0  ;;  %v4069_v10 = vsel %vm3845_vm9, %v6701_v5, 0.0 }
 0x19c   :  { %vm3847_vm10 = vcmp.eq.s32.totalorder %v3802_v15, %v6526_v34 }
 0x19d   :  { %1076 = vmax.xlane.f32.xlu0 %v10196_v39  ;;  %v6893_v48 = vpop.f32.mrb[36].mxu0 }
 0x19e   :  { %v6888_v45 = vpop.f32.mrb[36].mxu1  ;;  %10197 = vst [vmem:[#allocation92_spill] sm:$0xff] %v6893_v48  ;;  %v2876_v11 = vmax.f32 %v2874_v56, %v6893_v48  ;;  %v6899_v19 = vpop.f32.mrb[37].mxu0 }
 0x19f   :  { %10195 = vst [vmem:[#allocation91_spill] sm:$0xff] %v6888_v45  ;;  %v3340_v53 = vmax.f32 %v3338_v59, %v6888_v45  ;;  %10198 = vst [vmem:[#allocation93_spill] sm:$0xff] %v6899_v19  ;;  %v6901_v28 = vpop.f32.mrb[37].mxu1  ;;  %v2913_v39 = vmax.f32 %v2911_v46, %v6899_v19  ;;  %3983 = vadd.xlane.f32.xlu1 %v3909_v20  ;;  %v6910_v18 = vpop.f32.mrb[38].mxu0 }
 0x1a0   :  { %10199 = vst [vmem:[#allocation94_spill] sm:$0xff] %v6901_v28  ;;  %v3377_v27 = vmax.f32 %v3375_v1, %v6901_v28  ;;  %v6908_v16 = vpop.f32.mrb[38].mxu1  ;;  %10201 = vst [vmem:[#allocation96_spill] sm:$0xff] %v6910_v18  ;;  %v2877_v56 = vmax.f32 %v2875_v31, %v6910_v18  ;;  %v6914_v48 = vpop.f32.mrb[39].mxu0  ;;  %v4071_v31 = vsel %vm3847_vm10, %v6726_v0, 0.0  ;;  %v10206_v28 = vmax.f32 %v6701_v5, %v6713_v51 }
 0x1a1   :  { %10200 = vst [vmem:[#allocation95_spill] sm:$0xff] %v6908_v16  ;;  %v3341_v59 = vmax.f32 %v3339_v4, %v6908_v16  ;;  %10202 = vst [vmem:[#allocation97_spill] sm:$0xff] %v6914_v48  ;;  %v6916_v45 = vpop.f32.mrb[39].mxu1  ;;  %v2914_v46 = vmax.f32 %v2912_v55, %v6914_v48  ;;  %4143 = vadd.xlane.f32.xlu0 %v4069_v10  ;;  %v10204_v4 = vmax.f32 %v6703_v9, %v6711_v12 }
 0x1a2   :  { %10203 = vst [vmem:[#allocation98_spill] sm:$0xff] %v6916_v45  ;;  %v3378_v1 = vmax.f32 %v3376_v40, %v6916_v45 }
 0x1a3   :  { %1079 = vmax.xlane.f32.xlu1 %v10204_v4  ;;  %v3911_v4 = vsel %vm3847_vm10, %v6731_v6, 0.0 }
 0x1a5   :  { %1984 = vmax.xlane.f32.xlu0 %v10206_v28  ;;  %v6933_v49 = vpop.f32.mrb[40].mxu0 }
 0x1a6   :  { %v6928_v20 = vpop.f32.mrb[40].mxu1  ;;  %10207 = vst [vmem:[#allocation100_spill] sm:$0xff] %v6933_v49  ;;  %v2878_v10 = vmax.f32 %v2876_v11, %v6933_v49  ;;  %v6937_v40 = vpop.f32.mrb[41].mxu0 }
 0x1a7   :  { %10205 = vst [vmem:[#allocation99_spill] sm:$0xff] %v6928_v20  ;;  %v3342_v55 = vmax.f32 %v3340_v53, %v6928_v20  ;;  %10208 = vst [vmem:[#allocation101_spill] sm:$0xff] %v6937_v40  ;;  %v6939_v15 = vpop.f32.mrb[41].mxu1  ;;  %v2915_v45 = vmax.f32 %v2913_v39, %v6937_v40  ;;  %4146 = vadd.xlane.f32.xlu1 %v4071_v31  ;;  %v6946_v28 = vpop.f32.mrb[42].mxu0  ;;  %v10214_v39 = vmax.f32 %v6726_v0, %v6737_v62 }
 0x1a8   :  { %10209 = vst [vmem:[#allocation102_spill] sm:$0xff] %v6939_v15  ;;  %v3379_v48 = vmax.f32 %v3377_v27, %v6939_v15  ;;  %v6944_v19 = vpop.f32.mrb[42].mxu1  ;;  %10211 = vst [vmem:[#allocation104_spill] sm:$0xff] %v6946_v28  ;;  %v2879_v53 = vmax.f32 %v2877_v56, %v6946_v28  ;;  %v6950_v11 = vpop.f32.mrb[43].mxu0  ;;  %v3803_v27 = vadd.s32 88, %v6523_v33 }
 0x1a9   :  { %10210 = vst [vmem:[#allocation103_spill] sm:$0xff] %v6944_v19  ;;  %v3343_v51 = vmax.f32 %v3341_v59, %v6944_v19  ;;  %10212 = vst [vmem:[#allocation105_spill] sm:$0xff] %v6950_v11  ;;  %v6952_v12 = vpop.f32.mrb[43].mxu1  ;;  %v2916_v49 = vmax.f32 %v2914_v46, %v6950_v11  ;;  %3986 = vadd.xlane.f32.xlu0 %v3911_v4  ;;  %v10216_v59 = vmax.f32 %v6731_v6, %v6735_v44 }
 0x1aa   :  { %10213 = vst [vmem:[#allocation106_spill] sm:$0xff] %v6952_v12  ;;  %v3380_v18 = vmax.f32 %v3378_v1, %v6952_v12  ;;  %vm3849_vm11 = vcmp.eq.s32.totalorder %v3803_v27, %v6526_v34  ;;  %v3804_v46 = vadd.s32 96, %v6523_v33 }
 0x1ab   :  { %1987 = vmax.xlane.f32.xlu1 %v10214_v39  ;;  %v3913_v39 = vsel %vm3849_vm11, %v6746_v22, 0.0  ;;  %v4073_v28 = vsel %vm3849_vm11, %v6744_v30, 0.0 }
 0x1ac   :  { %vm3851_vm12 = vcmp.eq.s32.totalorder %v3804_v46, %v6526_v34 }
 0x1ad   :  { %1082 = vmax.xlane.f32.xlu0 %v10216_v59  ;;  %v6965_v56 = vpop.f32.mrb[44].mxu0 }
 0x1ae   :  { %v6960_v31 = vpop.f32.mrb[44].mxu1  ;;  %10217 = vst [vmem:[#allocation108_spill] sm:$0xff] %v6965_v56  ;;  %v2880_v4 = vmax.f32 %v2878_v10, %v6965_v56  ;;  %v6971_v12 = vpop.f32.mrb[45].mxu0 }
 0x1af   :  { %10215 = vst [vmem:[#allocation107_spill] sm:$0xff] %v6960_v31  ;;  %v3344_v1 = vmax.f32 %v3342_v55, %v6960_v31  ;;  %10218 = vst [vmem:[#allocation109_spill] sm:$0xff] %v6971_v12  ;;  %v6973_v15 = vpop.f32.mrb[45].mxu1  ;;  %v2917_v59 = vmax.f32 %v2915_v45, %v6971_v12  ;;  %3989 = vadd.xlane.f32.xlu1 %v3913_v39  ;;  %v6982_v40 = vpop.f32.mrb[46].mxu0 }
 0x1b0   :  { %10219 = vst [vmem:[#allocation110_spill] sm:$0xff] %v6973_v15  ;;  %v3381_v62 = vmax.f32 %v3379_v48, %v6973_v15  ;;  %v6980_v11 = vpop.f32.mrb[46].mxu1  ;;  %10221 = vst [vmem:[#allocation112_spill] sm:$0xff] %v6982_v40  ;;  %v2881_v10 = vmax.f32 %v2879_v53, %v6982_v40  ;;  %v6986_v44 = vpop.f32.mrb[47].mxu0  ;;  %v4075_v53 = vsel %vm3851_vm12, %v6772_v57, 0.0  ;;  %v10226_v15 = vmax.f32 %v6744_v30, %v6756_v8 }
 0x1b1   :  { %10220 = vst [vmem:[#allocation111_spill] sm:$0xff] %v6980_v11  ;;  %v3345_v55 = vmax.f32 %v3343_v51, %v6980_v11  ;;  %10222 = vst [vmem:[#allocation113_spill] sm:$0xff] %v6986_v44  ;;  %v6988_v56 = vpop.f32.mrb[47].mxu1  ;;  %v2918_v45 = vmax.f32 %v2916_v49, %v6986_v44  ;;  %4149 = vadd.xlane.f32.xlu0 %v4073_v28  ;;  %v10224_v51 = vmax.f32 %v6746_v22, %v6754_v3 }
 0x1b2   :  { %10223 = vst [vmem:[#allocation114_spill] sm:$0xff] %v6988_v56  ;;  %v3382_v48 = vmax.f32 %v3380_v18, %v6988_v56  ;;  %v3808_v22 = vadd.s32 128, %v6523_v33 }
 0x1b3   :  { %1085 = vmax.xlane.f32.xlu1 %v10224_v51  ;;  %v3915_v51 = vsel %vm3851_vm12, %v6777_v17, 0.0 }
 0x1b5   :  { %1990 = vmax.xlane.f32.xlu0 %v10226_v15  ;;  %v7005_v27 = vpop.f32.mrb[48].mxu0 }
 0x1b6   :  { %v7000_v39 = vpop.f32.mrb[48].mxu1  ;;  %10227 = vst [vmem:[#allocation116_spill] sm:$0xff] %v7005_v27  ;;  %v2882_v18 = vmax.f32 %v2880_v4, %v7005_v27  ;;  %v7009_v28 = vpop.f32.mrb[49].mxu0 }
 0x1b7   :  { %10225 = vst [vmem:[#allocation115_spill] sm:$0xff] %v7000_v39  ;;  %v3346_v49 = vmax.f32 %v3344_v1, %v7000_v39  ;;  %10228 = vst [vmem:[#allocation117_spill] sm:$0xff] %v7009_v28  ;;  %v7011_v46 = vpop.f32.mrb[49].mxu1  ;;  %v2919_v56 = vmax.f32 %v2917_v59, %v7009_v28  ;;  %4152 = vadd.xlane.f32.xlu1 %v4075_v53  ;;  %v7018_v15 = vpop.f32.mrb[50].mxu0  ;;  %v10234_v59 = vmax.f32 %v6772_v57, %v6783_v13 }
 0x1b8   :  { %10229 = vst [vmem:[#allocation118_spill] sm:$0xff] %v7011_v46  ;;  %v3383_v44 = vmax.f32 %v3381_v62, %v7011_v46  ;;  %v7016_v12 = vpop.f32.mrb[50].mxu1  ;;  %10231 = vst [vmem:[#allocation120_spill] sm:$0xff] %v7018_v15  ;;  %v2883_v1 = vmax.f32 %v2881_v10, %v7018_v15  ;;  %v7022_v4 = vpop.f32.mrb[51].mxu0  ;;  %v3805_v62 = vadd.s32 104, %v6523_v33 }
 0x1b9   :  { %10230 = vst [vmem:[#allocation119_spill] sm:$0xff] %v7016_v12  ;;  %v3347_v8 = vmax.f32 %v3345_v55, %v7016_v12  ;;  %10232 = vst [vmem:[#allocation121_spill] sm:$0xff] %v7022_v4  ;;  %v7024_v3 = vpop.f32.mrb[51].mxu1  ;;  %v2920_v27 = vmax.f32 %v2918_v45, %v7022_v4  ;;  %3992 = vadd.xlane.f32.xlu0 %v3915_v51  ;;  %v10236_v55 = vmax.f32 %v6777_v17, %v6781_v32 }
 0x1ba   :  { %10233 = vst [vmem:[#allocation122_spill] sm:$0xff] %v7024_v3  ;;  %v3384_v40 = vmax.f32 %v3382_v48, %v7024_v3  ;;  %vm3853_vm13 = vcmp.eq.s32.totalorder %v3805_v62, %v6526_v34  ;;  %v3806_v45 = vadd.s32 112, %v6523_v33 }
 0x1bb   :  { %1993 = vmax.xlane.f32.xlu1 %v10234_v59  ;;  %v3917_v59 = vsel %vm3853_vm13, %v6790_v54, 0.0  ;;  %v4077_v15 = vsel %vm3853_vm13, %v6788_v25, 0.0 }
 0x1bc   :  { %vm3855_vm14 = vcmp.eq.s32.totalorder %v3806_v45, %v6526_v34 }
 0x1bd   :  { %1088 = vmax.xlane.f32.xlu0 %v10236_v55  ;;  %v7037_v10 = vpop.f32.mrb[52].mxu0 }
 0x1be   :  { %v7032_v53 = vpop.f32.mrb[52].mxu1  ;;  %10237 = vst [vmem:[#allocation124_spill] sm:$0xff] %v7037_v10  ;;  %v2884_v51 = vmax.f32 %v2882_v18, %v7037_v10  ;;  %v7043_v3 = vpop.f32.mrb[53].mxu0 }
 0x1bf   :  { %10235 = vst [vmem:[#allocation123_spill] sm:$0xff] %v7032_v53  ;;  %v3348_v48 = vmax.f32 %v3346_v49, %v7032_v53  ;;  %10238 = vst [vmem:[#allocation125_spill] sm:$0xff] %v7043_v3  ;;  %v7045_v46 = vpop.f32.mrb[53].mxu1  ;;  %v2921_v55 = vmax.f32 %v2919_v56, %v7043_v3  ;;  %3995 = vadd.xlane.f32.xlu1 %v3917_v59  ;;  %v7054_v28 = vpop.f32.mrb[54].mxu0 }
 0x1c0   :  { %10239 = vst [vmem:[#allocation126_spill] sm:$0xff] %v7045_v46  ;;  %v3385_v13 = vmax.f32 %v3383_v44, %v7045_v46  ;;  %v7052_v4 = vpop.f32.mrb[54].mxu1  ;;  %10241 = vst [vmem:[#allocation128_spill] sm:$0xff] %v7054_v28  ;;  %v2885_v18 = vmax.f32 %v2883_v1, %v7054_v28  ;;  %v7058_v32 = vpop.f32.mrb[55].mxu0  ;;  %v4079_v1 = vsel %vm3855_vm14, %v6812_v29, 0.0  ;;  %v10246_v46 = vmax.f32 %v6788_v25, %v6800_v47 }
 0x1c1   :  { %10240 = vst [vmem:[#allocation127_spill] sm:$0xff] %v7052_v4  ;;  %v3349_v49 = vmax.f32 %v3347_v8, %v7052_v4  ;;  %10242 = vst [vmem:[#allocation129_spill] sm:$0xff] %v7058_v32  ;;  %v7060_v10 = vpop.f32.mrb[55].mxu1  ;;  %v2922_v56 = vmax.f32 %v2920_v27, %v7058_v32  ;;  %4155 = vadd.xlane.f32.xlu0 %v4077_v15  ;;  %v10244_v8 = vmax.f32 %v6790_v54, %v6798_v2 }
 0x1c2   :  { %10243 = vst [vmem:[#allocation130_spill] sm:$0xff] %v7060_v10  ;;  %v3386_v44 = vmax.f32 %v3384_v40, %v7060_v10 }
 0x1c3   :  { %1091 = vmax.xlane.f32.xlu1 %v10244_v8  ;;  %v3919_v8 = vsel %vm3855_vm14, %v6817_v21, 0.0 }
 0x1c5   :  { %1996 = vmax.xlane.f32.xlu0 %v10246_v46  ;;  %v7077_v62 = vpop.f32.mrb[56].mxu0 }
 0x1c6   :  { %v7072_v59 = vpop.f32.mrb[56].mxu1  ;;  %10247 = vst [vmem:[#allocation132_spill] sm:$0xff] %v7077_v62  ;;  %v2886_v40 = vmax.f32 %v2884_v51, %v7077_v62  ;;  %v7081_v15 = vpop.f32.mrb[57].mxu0  ;;  %v3807_v62 = vadd.s32 120, %v6523_v33 }
 0x1c7   :  { %10245 = vst [vmem:[#allocation131_spill] sm:$0xff] %v7072_v59  ;;  %v3350_v27 = vmax.f32 %v3348_v48, %v7072_v59  ;;  %10248 = vst [vmem:[#allocation133_spill] sm:$0xff] %v7081_v15  ;;  %v7083_v45 = vpop.f32.mrb[57].mxu1  ;;  %v2923_v10 = vmax.f32 %v2921_v55, %v7081_v15  ;;  %4158 = vadd.xlane.f32.xlu1 %v4079_v1  ;;  %v7090_v46 = vpop.f32.mrb[58].mxu0  ;;  %v2001_v1 = vmax.f32 %v6832_v38, %v6842_v63 }
 0x1c8   :  { %10249 = vst [vmem:[#allocation134_spill] sm:$0xff] %v7083_v45  ;;  %v3387_v32 = vmax.f32 %v3385_v13, %v7083_v45  ;;  %v7088_v3 = vpop.f32.mrb[58].mxu1  ;;  %10251 = vst [vmem:[#allocation136_spill] sm:$0xff] %v7090_v46  ;;  %v2887_v48 = vmax.f32 %v2885_v18, %v7090_v46  ;;  %v7094_v51 = vpop.f32.mrb[59].mxu0  ;;  %v10254_v45 = vmax.f32 %v6812_v29, %v6823_v7 }
 0x1c9   :  { %10250 = vst [vmem:[#allocation135_spill] sm:$0xff] %v7088_v3  ;;  %v3351_v47 = vmax.f32 %v3349_v49, %v7088_v3  ;;  %10252 = vst [vmem:[#allocation137_spill] sm:$0xff] %v7094_v51  ;;  %v7096_v2 = vpop.f32.mrb[59].mxu1  ;;  %3998 = vadd.xlane.f32.xlu0 %v3919_v8  ;;  %v2924_v55 = vmax.f32 %v2922_v56, %v7094_v51  ;;  %v10256_v18 = vmax.f32 %v6817_v21, %v6821_v24 }
 0x1ca   :  { %10253 = vst [vmem:[#allocation138_spill] sm:$0xff] %v7096_v2  ;;  %v3388_v13 = vmax.f32 %v3386_v44, %v7096_v2  ;;  %vm3857_vm15 = vcmp.eq.s32.totalorder %v3807_v62, %v6526_v34  ;;  %v1096_v7 = vmax.f32 %v6834_v43, %v6840_v61 }
 0x1cb   :  { %1999 = vmax.xlane.f32.xlu1 %v10254_v45  ;;  %v3921_v45 = vsel %vm3857_vm15, %v6834_v43, 0.0  ;;  %v4081_v61 = vsel %vm3857_vm15, %v6832_v38, 0.0  ;;  %v6205_v43 = vmov 1966171168  }
 0x1cc   :  { %v3207_v21 = vunpack.c.l.s4 %v6205_v43 }
 0x1cd   :  { %1094 = vmax.xlane.f32.xlu0 %v10256_v18  ;;  %v7111_v8 = vpop.f32.mrb[60].mxu0 }
 0x1ce   :  { %v7106_v49 = vpop.f32.mrb[60].mxu1  ;;  %10257 = vst [vmem:[#allocation140_spill] sm:$0xff] %v7111_v8  ;;  %v2888_v44 = vmax.f32 %v2886_v40, %v7111_v8  ;;  %v7116_v2 = vpop.f32.mrb[61].mxu0 }
 0x1cf   :  { %10255 = vst [vmem:[#allocation139_spill] sm:$0xff] %v7106_v49  ;;  %v3352_v56 = vmax.f32 %v3350_v27, %v7106_v49  ;;  %10258 = vst [vmem:[#allocation141_spill] sm:$0xff] %v7116_v2  ;;  %v7118_v63 = vpop.f32.mrb[61].mxu1  ;;  %v2925_v18 = vmax.f32 %v2923_v10, %v7116_v2  ;;  %4001 = vadd.xlane.f32.xlu1 %v3921_v45  ;;  %v7129_v27 = vpop.f32.mrb[62].mxu0 }
 0x1d0   :  { %10259 = vst [vmem:[#allocation142_spill] sm:$0xff] %v7118_v63  ;;  %v3389_v51 = vmax.f32 %v3387_v32, %v7118_v63  ;;  %v7127_v15 = vpop.f32.mrb[62].mxu1  ;;  %10261 = vst [vmem:[#allocation144_spill] sm:$0xff] %v7129_v27  ;;  %v2889_v24 = vmax.f32 %v2887_v48, %v7129_v27  ;;  %v7133_v8 = vpop.f32.mrb[63].mxu0 }
 0x1d1   :  { %10260 = vst [vmem:[#allocation143_spill] sm:$0xff] %v7127_v15  ;;  %v3353_v40 = vmax.f32 %v3351_v47, %v7127_v15  ;;  %10262 = vst [vmem:[#allocation145_spill] sm:$0xff] %v7133_v8  ;;  %v7135_v46 = vpop.f32.mrb[63].mxu1  ;;  %v2926_v10 = vmax.f32 %v2924_v55, %v7133_v8  ;;  %4161 = vadd.xlane.f32.xlu0 %v4081_v61  ;;  %v7144_v55 = vadd.s32 128, %v6526_v34 }
 0x1d2   :  { %10263 = vst [vmem:[#allocation146_spill] sm:$0xff] %v7135_v46  ;;  %v3390_v32 = vmax.f32 %v3388_v13, %v7135_v46  ;;  %v2890_v63 = vmax.f32 %v2888_v44, %v2889_v24  ;;  %v3809_v24 = vadd.s32 136, %v6523_v33 }
 0x1d3   :  { %v3354_v45 = vmax.f32 %v3352_v56, %v3353_v40  ;;  %v2927_v2 = vmax.f32 %v2925_v18, %v2926_v10  ;;  %1097 = vmax.xlane.f32.xlu1 %v1096_v7  ;;  %10264 = vst [vmem:[#allocation147_spill] sm:$0xff] %v7144_v55  ;;  %vm3860_vm0 = vcmp.eq.s32.totalorder %v3808_v22, %v7144_v55  ;;  %v3208_v40 = vunpack.c.0.s8 %v3207_v21 }
 0x1d4   :  { %v3391_v28 = vmax.f32 %v3389_v51, %v3390_v32  ;;  %v2891_v48 = vrot.slane %v2890_v63, 4  ;;  %v4084_v43 = vsel %vm3860_vm0, %v6867_v23, 0.0  ;;  %vm3862_vm1 = vcmp.eq.s32.totalorder %v3809_v24, %v7144_v55  ;;  %v10271_v24 = vld [vmem:[#allocation43_spill] sm:$0xff] }
 0x1d5   :  { %v3355_v47 = vrot.slane %v3354_v45, 4  ;;  %v2928_v27 = vrot.slane %v2927_v2, 4  ;;  %2002 = vmax.xlane.f32.xlu0 %v2001_v1  ;;  %v7160_v21 = vsub.s32 %v3208_v40, %v6523_v33 }
 0x1d6   :  { %v3392_v54 = vrot.slane %v3391_v28, 4  ;;  %v2892_v62 = vmax.f32 %v2890_v63, %v2891_v48  ;;  %v2004_v63 = vmax.f32 %v6856_v41, %v6867_v23  ;;  %v1102_v48 = vmax.f32 %v6874_v26, %v6878_v50 }
 0x1d7   :  { %v3356_v17 = vmax.f32 %v3354_v45, %v3355_v47  ;;  %v2929_v61 = vmax.f32 %v2927_v2, %v2928_v27  ;;  %4164 = vadd.xlane.f32.xlu1 %v4084_v43  ;;  %v3924_v27 = vsel %vm3860_vm0, %v6865_v37, 0.0  ;;  %10266 = vst [vmem:[#allocation149_spill] sm:$0xff] %v7160_v21  ;;  %v4086_v47 = vsel %vm3862_vm1, %v6880_v35, 0.0 }
 0x1d8   :  { %v3393_v13 = vmax.f32 %v3391_v28, %v3392_v54  ;;  %v2893_v7 = vrot.slane %v2892_v62, 2 }
 0x1d9   :  { %v3357_v51 = vrot.slane %v3356_v17, 2  ;;  %v2930_v56 = vrot.slane %v2929_v61, 2  ;;  %4004 = vadd.xlane.f32.xlu0 %v3924_v27 }
 0x1da   :  { %v3394_v44 = vrot.slane %v3393_v13, 2  ;;  %v2894_v18 = vmax.f32 %v2892_v62, %v2893_v7 }
 0x1db   :  { %v3358_v1 = vmax.f32 %v3356_v17, %v3357_v51  ;;  %v2931_v2 = vmax.f32 %v2929_v61, %v2930_v56  ;;  %v1099_v17 = vmax.f32 %v6861_v14, %v6865_v37  ;;  %2005 = vmax.xlane.f32.xlu1 %v2004_v63  ;;  %v3926_v51 = vsel %vm3862_vm1, %v6878_v50, 0.0  ;;  %v10269_v63 = vld [vmem:[#allocation35_spill] sm:$0xff] }
 0x1dc   :  { %v3395_v54 = vmax.f32 %v3393_v13, %v3394_v44  ;;  %v2895_v22 = vrot.slane %v2894_v18, 1 }
 0x1dd   :  { %v3359_v28 = vrot.slane %v3358_v1, 1  ;;  %v2932_v10 = vrot.slane %v2931_v2, 1  ;;  %1100 = vmax.xlane.f32.xlu0 %v1099_v17 }
 0x1de   :  { %v3396_v32 = vrot.slane %v3395_v54, 1  ;;  %v7167_v62 = vmax.f32 %v2894_v18, %v2895_v22  ;;  %v10270_v18 = vld [vmem:[#allocation39_spill] sm:$0xff] }
 0x1df   :  { %v7157_v45 = vmax.f32 %v3358_v1, %v3359_v28  ;;  %v7169_v61 = vmax.f32 %v2931_v2, %v2932_v10  ;;  %v10273_v22 = vld [vmem:[#allocation51_spill] sm:$0xff]  ;;  %4007 = vadd.xlane.f32.xlu1 %v3926_v51 }
 0x1e0   :  { %10267 = vst [vmem:[#allocation150_spill] sm:$0xff] %v7167_v62  ;;  %v7171_v13 = vmax.f32 %v3395_v54, %v3396_v32  ;;  %v10272_v54 = vld [vmem:[#allocation47_spill] sm:$0xff] }
 0x1e1   :  { %10265 = vst [vmem:[#allocation148_spill] sm:$0xff] %v7157_v45  ;;  %v3398_v7 = vsub.f32 %v6532_v36, %v7157_v45  ;;  %v3400_v56 = vsub.f32 %v6542_v42, %v7157_v45  ;;  %v3402_v44 = vsub.f32 %v6562_v52, %v7157_v45  ;;  %v3404_v43 = vsub.f32 %v6579_v60, %v7157_v45  ;;  %v10274_v51 = vld [vmem:[#allocation91_spill] sm:$0xff] }
 0x1e2   :  { %10268 = vst [vmem:[#allocation151_spill] sm:$0xff] %v7171_v13  ;;  %v3406_v1 = vsub.f32 %v10269_v63, %v7157_v45  ;;  %v3408_v40 = vsub.f32 %v10270_v18, %v7157_v45  ;;  %v3410_v2 = vsub.f32 %v10271_v24, %v7157_v45  ;;  %v3412_v28 = vsub.f32 %v10272_v54, %v7157_v45  ;;  %v10277_v36 = vld [vmem:[#allocation23_spill] sm:$0xff] }
 0x1e3   :  { %v3414_v27 = vsub.f32 %v10273_v22, %v7157_v45  ;;  %v3416_v10 = vsub.f32 %v6701_v5, %v7157_v45  ;;  %v3418_v32 = vsub.f32 %v6726_v0, %v7157_v45  ;;  %v3420_v34 = vsub.f32 %v6744_v30, %v7157_v45  ;;  %4167 = vadd.xlane.f32.xlu0 %v4086_v47 }
 0x1e4   :  { %v3422_v24 = vsub.f32 %v6772_v57, %v7157_v45  ;;  %v3424_v54 = vsub.f32 %v6788_v25, %v7157_v45  ;;  %v3426_v17 = vsub.f32 %v6812_v29, %v7157_v45  ;;  %v3428_v22 = vsub.f32 %v6832_v38, %v7157_v45  ;;  %1103 = vmax.xlane.f32.xlu1 %v1102_v48 }
 0x1e5   :  { %v3430_v5 = vsub.f32 %v6856_v41, %v7157_v45  ;;  %v3432_v0 = vsub.f32 %v6872_v58, %v7157_v45  ;;  %v3434_v30 = vsub.f32 %v10274_v51, %v7157_v45  ;;  %v3436_v57 = vsub.f32 %v6908_v16, %v7157_v45 }
 0x1e6   :  { %v3438_v25 = vsub.f32 %v6928_v20, %v7157_v45  ;;  %v3440_v29 = vsub.f32 %v6944_v19, %v7157_v45  ;;  %v3442_v38 = vsub.f32 %v6960_v31, %v7157_v45  ;;  %v3444_v41 = vsub.f32 %v6980_v11, %v7157_v45 }
 0x1e7   :  { %v3446_v18 = vsub.f32 %v7000_v39, %v7157_v45  ;;  %v3448_v63 = vsub.f32 %v7016_v12, %v7157_v45  ;;  %v3450_v60 = vsub.f32 %v7032_v53, %v7157_v45  ;;  %v3452_v20 = vsub.f32 %v7052_v4, %v7157_v45  ;;  %v10275_v53 = vld [vmem:[#allocation19_spill] sm:$0xff]  ;;  %v7242_v4 = vpop.xlane.xlu1 %3956 }
 0x1e8   :  { %v3454_v31 = vsub.f32 %v7072_v59, %v7157_v45  ;;  %v3456_v11 = vsub.f32 %v7088_v3, %v7157_v45  ;;  %v3458_v47 = vsub.f32 %v7106_v49, %v7157_v45  ;;  %v3460_v39 = vsub.f32 %v7127_v15, %v7157_v45  ;;  %10276 = vst [vmem:[#allocation152_spill] sm:$0xff] %v7242_v4  ;;  %v10307_v45 = vld [vmem:[#allocation120_spill] sm:$0xff] }
 0x1e9   :  { %v3462_v12 = vmul.f32 1.442695, %v3398_v7  ;;  %v3466_v19 = vmul.f32 1.442695, %v3400_v56  ;;  %v3470_v52 = vmul.f32 1.442695, %v3402_v44  ;;  %v10278_v49 = vmax.f32 %v6872_v58, %v6880_v35  ;;  %v7249_v44 = vpop.xlane.xlu0 %1052 }
 0x1ea   :  { %v3474_v48 = vmul.f32 1.442695, %v3404_v43  ;;  %v3478_v16 = vmul.f32 1.442695, %v3406_v1  ;;  %v3482_v59 = vmul.f32 1.442695, %v3408_v40  ;;  %v10315_v35 = vsub.f32 %v10275_v53, %v7167_v62 }
 0x1eb   :  { %2008 = vmax.xlane.f32.xlu0 %v10278_v49  ;;  %5513 = vpow2.f32 %v3462_v12  ;;  %v3486_v15 = vmul.f32 1.442695, %v3410_v2  ;;  %v3490_v7 = vmul.f32 1.442695, %v3412_v28  ;;  %v3494_v56 = vmul.f32 1.442695, %v3414_v27  ;;  %v7251_v33 = vpop.xlane.xlu1 %4116 }
 0x1ec   :  { %10279 = vst [vmem:[#allocation153_spill] sm:$0xff] %v7249_v44  ;;  %5515 = vpow2.f32 %v3466_v19  ;;  %v3498_v42 = vmul.f32 1.442695, %v3416_v10  ;;  %v3502_v51 = vmul.f32 1.442695, %v3418_v32  ;;  %10280 = vst [vmem:[#allocation154_spill] sm:$0xff] %v7251_v33 }
 0x1ed   :  { %v3506_v55 = vmul.f32 1.442695, %v3420_v34  ;;  %5517 = vpow2.f32 %v3470_v52  ;;  %v3510_v43 = vmul.f32 1.442695, %v3422_v24  ;;  %v3514_v1 = vmul.f32 1.442695, %v3424_v54  ;;  %v7261_v28 = vpop.xlane.xlu0 %3959 }
 0x1ee   :  { %v3518_v40 = vmul.f32 1.442695, %v3426_v17  ;;  %5519 = vpow2.f32 %v3474_v48  ;;  %v3522_v3 = vmul.f32 1.442695, %v3428_v22  ;;  %v3526_v58 = vmul.f32 1.442695, %v3430_v5 }
 0x1ef   :  { %v7253_v49 = vmul.f32 1.442695, %v3432_v0  ;;  %5521 = vpow2.f32 %v3478_v16  ;;  %v7255_v12 = vmul.f32 1.442695, %v3434_v30  ;;  %v7257_v2 = vmul.f32 1.442695, %v3436_v57  ;;  %v7275_v57 = vpop.xlane.xlu1 %1957 }
 0x1f0   :  { %v7259_v19 = vmul.f32 1.442695, %v3438_v25  ;;  %10281 = vst [vmem:[#allocation155_spill] sm:$0xff] %v7261_v28  ;;  %5523 = vpow2.f32 %v3482_v59  ;;  %v7263_v52 = vmul.f32 1.442695, %v3440_v29  ;;  %10282 = vst [vmem:[#allocation156_spill] sm:$0xff] %v7275_v57 }
 0x1f1   :  { %v7265_v34 = vmul.f32 1.442695, %v3442_v38  ;;  %v7267_v24 = vmul.f32 1.442695, %v3444_v41  ;;  %5525 = vpow2.f32 %v3486_v15  ;;  %v7269_v5 = vmul.f32 1.442695, %v3446_v18 }
 0x1f2   :  { %v7271_v0 = vmul.f32 1.442695, %v3448_v63  ;;  %v7273_v30 = vmul.f32 1.442695, %v3450_v60  ;;  %5527 = vpow2.f32 %v3490_v7  ;;  %v7277_v25 = vmul.f32 1.442695, %v3452_v20  ;;  %v7289_v63 = vpop.xlane.xlu0 %4119 }
 0x1f3   :  { %v7279_v16 = vmul.f32 1.442695, %v3454_v31  ;;  %v7281_v29 = vmul.f32 1.442695, %v3456_v11  ;;  %5529 = vpow2.f32 %v3494_v56  ;;  %v7283_v38 = vmul.f32 1.442695, %v3458_v47  ;;  %v7303_v47 = vpop.xlane.xlu1 %3962 }
 0x1f4   :  { %v7285_v41 = vmul.f32 1.442695, %v3460_v39  ;;  %v10283_v59 = vld [vmem:[#allocation28_spill] sm:$0xff]  ;;  %10284 = vst [vmem:[#allocation157_spill] sm:$0xff] %v7289_v63  ;;  %5531 = vpow2.f32 %v3498_v42  ;;  %10291 = vst [vmem:[#allocation158_spill] sm:$0xff] %v7303_v47  ;;  %v10368_v53 = vld [vmem:[#allocation45_spill] sm:$0xff] }
 0x1f5   :  { %v10285_v60 = vld [vmem:[#allocation32_spill] sm:$0xff]  ;;  %v5514_v22 = vpop.eup %5513  ;;  %5533 = vpow2.f32 %v3502_v51 }
 0x1f6   :  { %v10286_v20 = vld [vmem:[#allocation36_spill] sm:$0xff]  ;;  %v5516_v48 = vpop.eup %5515  ;;  %5535 = vpow2.f32 %v3506_v55  ;;  %v7315_v47 = vpop.xlane.xlu0 %1055 }
 0x1f7   :  { %v10287_v11 = vld [vmem:[#allocation40_spill] sm:$0xff]  ;;  %v5518_v27 = vpop.eup %5517  ;;  %5537 = vpow2.f32 %v3510_v43  ;;  %v3590_v31 = vadd.f32 %v5516_v48, %v5514_v22  ;;  %10295 = vst [vmem:[#allocation159_spill] sm:$0xff] %v7315_v47  ;;  %v7327_v33 = vpop.xlane.xlu1 %1058 }
 0x1f8   :  { %v10288_v39 = vld [vmem:[#allocation44_spill] sm:$0xff]  ;;  %v5520_v55 = vpop.eup %5519  ;;  %5539 = vpow2.f32 %v3514_v1  ;;  %10299 = vst [vmem:[#allocation160_spill] sm:$0xff] %v7327_v33 }
 0x1f9   :  { %v10289_v10 = vld [vmem:[#allocation48_spill] sm:$0xff]  ;;  %v5522_v22 = vpop.eup %5521  ;;  %5541 = vpow2.f32 %v3518_v40  ;;  %v3591_v48 = vadd.f32 %v5518_v27, %v3590_v31 }
 0x1fa   :  { %v10290_v17 = vld [vmem:[#allocation52_spill] sm:$0xff]  ;;  %v5524_v1 = vpop.eup %5523  ;;  %5543 = vpow2.f32 %v3522_v3  ;;  %v7339_v4 = vpop.xlane.xlu0 %1960 }
 0x1fb   :  { %v10292_v51 = vld [vmem:[#allocation64_spill] sm:$0xff]  ;;  %v5526_v31 = vpop.eup %5525  ;;  %5545 = vpow2.f32 %v3526_v58  ;;  %v3592_v27 = vadd.f32 %v5520_v55, %v3591_v48  ;;  %10305 = vst [vmem:[#allocation161_spill] sm:$0xff] %v7339_v4 }
 0x1fc   :  { %v10293_v32 = vld [vmem:[#allocation68_spill] sm:$0xff]  ;;  %v5528_v3 = vpop.eup %5527  ;;  %5547 = vpow2.f32 %v7253_v49  ;;  %v7353_v49 = vpop.xlane.xlu1 %1963 }
 0x1fd   :  { %v10294_v42 = vld [vmem:[#allocation72_spill] sm:$0xff]  ;;  %v5530_v48 = vpop.eup %5529  ;;  %5549 = vpow2.f32 %v7255_v12  ;;  %v3593_v44 = vadd.f32 %v5522_v22, %v3592_v27  ;;  %10311 = vst [vmem:[#allocation162_spill] sm:$0xff] %v7353_v49  ;;  %v7366_v49 = vmul.f32 1.442695, %v10315_v35  ;;  %v10318_v22 = vsub.f32 %v10283_v59, %v7167_v62 }
 0x1fe   :  { %v10296_v7 = vld [vmem:[#allocation76_spill] sm:$0xff]  ;;  %v5532_v23 = vpop.eup %5531  ;;  %5551 = vpow2.f32 %v7257_v2  ;;  %v10316_v2 = vsub.f32 %v10277_v36, %v7167_v62  ;;  %v7373_v57 = vpop.xlane.xlu0 %4122 }
 0x1ff   :  { %v10297_v56 = vld [vmem:[#allocation80_spill] sm:$0xff]  ;;  %v5534_v27 = vpop.eup %5533  ;;  %5553 = vpow2.f32 %v7259_v19  ;;  %v3594_v46 = vadd.f32 %v5524_v1, %v3593_v44  ;;  %10317 = vst [vmem:[#allocation163_spill] sm:$0xff] %v7373_v57  ;;  %v7379_v19 = vmul.f32 1.442695, %v10318_v22  ;;  %v10319_v44 = vsub.f32 %v10285_v60, %v7167_v62 }
 0x200   :  { %v10298_v15 = vld [vmem:[#allocation92_spill] sm:$0xff]  ;;  %v7371_v13 = vmul.f32 1.442695, %v10316_v2  ;;  %v5536_v21 = vpop.eup %5535  ;;  %5555 = vpow2.f32 %v7263_v52  ;;  %v10320_v1 = vsub.f32 %v10286_v20, %v7167_v62  ;;  %v10321_v57 = vsub.f32 %v10287_v11, %v7167_v62  ;;  %v7404_v59 = vpop.xlane.xlu1 %3965 }
 0x201   :  { %v10300_v63 = vld [vmem:[#allocation96_spill] sm:$0xff]  ;;  %v7384_v35 = vmul.f32 1.442695, %v10319_v44  ;;  %v7391_v36 = vpop.eup %5537  ;;  %5557 = vpow2.f32 %v7265_v34  ;;  %v3595_v52 = vadd.f32 %v5526_v31, %v3594_v46  ;;  %v10322_v60 = vsub.f32 %v10288_v39, %v7167_v62  ;;  %10323 = vst [vmem:[#allocation164_spill] sm:$0xff] %v7404_v59 }
 0x202   :  { %v10301_v28 = vld [vmem:[#allocation100_spill] sm:$0xff]  ;;  %v7389_v2 = vmul.f32 1.442695, %v10320_v1  ;;  %v7397_v22 = vmul.f32 1.442695, %v10321_v57  ;;  %v7406_v20 = vpop.eup %5539  ;;  %5559 = vpow2.f32 %v7267_v24  ;;  %v10324_v34 = vsub.f32 %v10289_v10, %v7167_v62  ;;  %v7437_v11 = vpop.xlane.xlu0 %4125 }
 0x203   :  { %v10302_v43 = vld [vmem:[#allocation104_spill] sm:$0xff]  ;;  %v7402_v44 = vmul.f32 1.442695, %v10322_v60  ;;  %v10325_v57 = vsub.f32 %v10290_v17, %v7167_v62  ;;  %v10326_v60 = vsub.f32 %v6703_v9, %v7167_v62  ;;  %v7424_v39 = vpop.eup %5541  ;;  %5561 = vpow2.f32 %v7269_v5  ;;  %10329 = vst [vmem:[#allocation165_spill] sm:$0xff] %v7437_v11 }
 0x204   :  { %v10303_v18 = vld [vmem:[#allocation108_spill] sm:$0xff]  ;;  %v7412_v46 = vmul.f32 1.442695, %v10324_v34  ;;  %v3596_v24 = vadd.f32 %v5528_v3, %v3595_v52  ;;  %v10327_v10 = vsub.f32 %v6731_v6, %v7167_v62  ;;  %v10328_v17 = vsub.f32 %v10292_v51, %v7167_v62  ;;  %v7439_v9 = vpop.eup %5543  ;;  %v7470_v6 = vpop.xlane.xlu1 %1061 }
 0x205   :  { %v10304_v54 = vld [vmem:[#allocation112_spill] sm:$0xff]  ;;  %v7417_v31 = vmul.f32 1.442695, %v10325_v57  ;;  %v7422_v1 = vmul.f32 1.442695, %v10326_v60  ;;  %5563 = vpow2.f32 %v7271_v0  ;;  %v10330_v5 = vsub.f32 %v10293_v32, %v7167_v62  ;;  %v7457_v51 = vpop.eup %5545  ;;  %10335 = vst [vmem:[#allocation166_spill] sm:$0xff] %v7470_v6 }
 0x206   :  { %v10306_v47 = vld [vmem:[#allocation116_spill] sm:$0xff]  ;;  %v7430_v34 = vmul.f32 1.442695, %v10327_v10  ;;  %v7435_v57 = vmul.f32 1.442695, %v10328_v17  ;;  %v10331_v10 = vsub.f32 %v10294_v42, %v7167_v62  ;;  %v10332_v17 = vsub.f32 %v10296_v7, %v7167_v62  ;;  %v7472_v7 = vpop.eup %5547  ;;  %v7503_v11 = vpop.xlane.xlu0 %1966  ;;  %v10379_v6 = vld [vmem:[#allocation73_spill] sm:$0xff] }
 0x207   :  { %v10308_v58 = vld [vmem:[#allocation124_spill] sm:$0xff]  ;;  %v7445_v3 = vmul.f32 1.442695, %v10330_v5  ;;  %5565 = vpow2.f32 %v7273_v30  ;;  %v3597_v0 = vadd.f32 %v5530_v48, %v3596_v24  ;;  %v10333_v32 = vsub.f32 %v10297_v56, %v7167_v62  ;;  %10341 = vst [vmem:[#allocation167_spill] sm:$0xff] %v7503_v11 }
 0x208   :  { %v10309_v33 = vld [vmem:[#allocation128_spill] sm:$0xff]  ;;  %v7450_v52 = vmul.f32 1.442695, %v10331_v10  ;;  %v7455_v60 = vmul.f32 1.442695, %v10332_v17  ;;  %v10334_v42 = vsub.f32 %v6861_v14, %v7167_v62  ;;  %5567 = vpow2.f32 %v7277_v25  ;;  %v7490_v14 = vpop.eup %5549 }
 0x209   :  { %v10310_v4 = vld [vmem:[#allocation132_spill] sm:$0xff]  ;;  %v7463_v5 = vmul.f32 1.442695, %v10333_v32  ;;  %v10336_v30 = vsub.f32 %v6874_v26, %v7167_v62  ;;  %v10337_v32 = vsub.f32 %v10298_v15, %v7167_v62  ;;  %5569 = vpow2.f32 %v7279_v16  ;;  %v7505_v59 = vpop.eup %5551 }
 0x20a   :  { %v10312_v40 = vld [vmem:[#allocation136_spill] sm:$0xff]  ;;  %v7468_v10 = vmul.f32 1.442695, %v10334_v42  ;;  %v10338_v42 = vsub.f32 %v10300_v63, %v7167_v62  ;;  %v3598_v25 = vadd.f32 %v5532_v23, %v3597_v0  ;;  %v10339_v26 = vsub.f32 %v10301_v28, %v7167_v62  ;;  %v7536_v28 = vpop.xlane.xlu1 %3968  ;;  %v10371_v63 = vld [vmem:[#allocation53_spill] sm:$0xff] }
 0x20b   :  { %v10313_v55 = vld [vmem:[#allocation140_spill] sm:$0xff]  ;;  %v7478_v48 = vmul.f32 1.442695, %v10336_v30  ;;  %v7483_v24 = vmul.f32 1.442695, %v10337_v32  ;;  %v10340_v56 = vsub.f32 %v10302_v43, %v7167_v62  ;;  %5571 = vpow2.f32 %v7281_v29  ;;  %v7523_v43 = vpop.eup %5553  ;;  %10348 = vst [vmem:[#allocation169_spill] sm:$0xff] %v7536_v28 }
 0x20c   :  { %v10314_v12 = vld [vmem:[#allocation144_spill] sm:$0xff]  ;;  %v7488_v17 = vmul.f32 1.442695, %v10338_v42  ;;  %v7496_v30 = vmul.f32 1.442695, %v10339_v26  ;;  %v10342_v16 = vsub.f32 %v10303_v18, %v7167_v62  ;;  %v10343_v26 = vsub.f32 %v10304_v54, %v7167_v62 }
 0x20d   :  { %v7501_v32 = vmul.f32 1.442695, %v10340_v56  ;;  %v10344_v56 = vsub.f32 %v10306_v47, %v7167_v62  ;;  %5573 = vpow2.f32 %v7283_v38  ;;  %v3599_v29 = vadd.f32 %v5534_v27, %v3598_v25  ;;  %v7538_v47 = vpop.eup %5555 }
 0x20e   :  { %v7511_v23 = vmul.f32 1.442695, %v10342_v16  ;;  %v7516_v0 = vmul.f32 1.442695, %v10343_v26  ;;  %v10345_v18 = vsub.f32 %v10307_v45, %v7167_v62  ;;  %v10346_v54 = vsub.f32 %v10308_v58, %v7167_v62  ;;  %v7556_v58 = vpop.eup %5557  ;;  %v7588_v15 = vpop.xlane.xlu1 %1969 }
 0x20f   :  { %v7521_v42 = vmul.f32 1.442695, %v10344_v56  ;;  %5575 = vpow2.f32 %v7285_v41  ;;  %v10349_v38 = vsub.f32 %v10309_v33, %v7167_v62  ;;  %v3600_v45 = vadd.f32 %v5536_v21, %v3599_v29  ;;  %v7569_v33 = vpop.xlane.xlu0 %4128  ;;  %v10360_v21 = vld [vmem:[#allocation21_spill] sm:$0xff]  ;;  %10365 = vst [vmem:[#allocation176_spill] sm:$0xff] %v7588_v15 }
 0x210   :  { %v7529_v16 = vmul.f32 1.442695, %v10345_v18  ;;  %v7534_v26 = vmul.f32 1.442695, %v10346_v54  ;;  %v10351_v18 = vsub.f32 %v10310_v4, %v7167_v62  ;;  %v10353_v54 = vsub.f32 %v10312_v40, %v7167_v62  ;;  %10359 = vst [vmem:[#allocation175_spill] sm:$0xff] %v7569_v33  ;;  %v7571_v40 = vpop.eup %5559 }
 0x211   :  { %v7544_v27 = vmul.f32 1.442695, %v10349_v38  ;;  %5577 = vpow2.f32 %v7366_v49  ;;  %v10355_v41 = vsub.f32 %v10313_v55, %v7167_v62  ;;  %v10357_v4 = vsub.f32 %v10314_v12, %v7167_v62  ;;  %v10361_v49 = vld [vmem:[#allocation25_spill] sm:$0xff]  ;;  %v7580_v28 = vpop.eup %5561 }
 0x212   :  { %10347 = vst [vmem:[#allocation168_spill] sm:$0xff] %v7534_v26  ;;  %v7549_v25 = vmul.f32 1.442695, %v10351_v18  ;;  %v7554_v56 = vmul.f32 1.442695, %v10353_v54  ;;  %5579 = vpow2.f32 %v7371_v13  ;;  %v10363_v12 = vld [vmem:[#allocation33_spill] sm:$0xff]  ;;  %v7590_v29 = vpop.eup %5563 }
 0x213   :  { %10350 = vst [vmem:[#allocation170_spill] sm:$0xff] %v7544_v27  ;;  %v7562_v38 = vmul.f32 1.442695, %v10355_v41  ;;  %v7567_v18 = vmul.f32 1.442695, %v10357_v4  ;;  %v10362_v41 = vld [vmem:[#allocation29_spill] sm:$0xff]  ;;  %v3601_v4 = vadd.f32 %v7391_v36, %v3600_v45  ;;  %5581 = vpow2.f32 %v7379_v19  ;;  %v7599_v11 = vpop.eup %5565 }
 0x214   :  { %10352 = vst [vmem:[#allocation171_spill] sm:$0xff] %v7549_v25  ;;  %10354 = vst [vmem:[#allocation172_spill] sm:$0xff] %v7554_v56  ;;  %v10364_v13 = vld [vmem:[#allocation37_spill] sm:$0xff]  ;;  %5583 = vpow2.f32 %v7384_v35  ;;  %v7609_v54 = vpop.eup %5567 }
 0x215   :  { %10356 = vst [vmem:[#allocation173_spill] sm:$0xff] %v7562_v38  ;;  %10358 = vst [vmem:[#allocation174_spill] sm:$0xff] %v7567_v18  ;;  %v10367_v55 = vld [vmem:[#allocation41_spill] sm:$0xff]  ;;  %v3602_v33 = vadd.f32 %v7406_v20, %v3601_v4  ;;  %5585 = vpow2.f32 %v7389_v2  ;;  %v7607_v18 = vpop.xlane.xlu0 %1064  ;;  %v7618_v38 = vpop.eup %5569 }
 0x216   :  { %10366 = vst [vmem:[#allocation177_spill] sm:$0xff] %v7590_v29  ;;  %v10369_v45 = vld [vmem:[#allocation49_spill] sm:$0xff]  ;;  %10370 = vst [vmem:[#allocation178_spill] sm:$0xff] %v7599_v11  ;;  %5587 = vpow2.f32 %v7397_v22  ;;  %v7626_v11 = vpop.xlane.xlu1 %3971  ;;  %v7628_v36 = vpop.eup %5571 }
 0x217   :  { %v10372_v35 = vld [vmem:[#allocation57_spill] sm:$0xff]  ;;  %10373 = vst [vmem:[#allocation179_spill] sm:$0xff] %v7607_v18  ;;  %10374 = vst [vmem:[#allocation180_spill] sm:$0xff] %v7609_v54  ;;  %v3603_v15 = vadd.f32 %v7424_v39, %v3602_v33  ;;  %5589 = vpow2.f32 %v7402_v44  ;;  %v7637_v44 = vpop.eup %5573 }
 0x218   :  { %v10375_v19 = vld [vmem:[#allocation61_spill] sm:$0xff]  ;;  %10378 = vst [vmem:[#allocation181_spill] sm:$0xff] %v7618_v38  ;;  %10381 = vst [vmem:[#allocation182_spill] sm:$0xff] %v7626_v11  ;;  %5591 = vpow2.f32 %v7412_v46 }
 0x219   :  { %v10376_v62 = vld [vmem:[#allocation65_spill] sm:$0xff]  ;;  %10382 = vst [vmem:[#allocation183_spill] sm:$0xff] %v7628_v36  ;;  %10384 = vst [vmem:[#allocation184_spill] sm:$0xff] %v7637_v44  ;;  %v3604_v18 = vadd.f32 %v7439_v9, %v3603_v15  ;;  %5593 = vpow2.f32 %v7417_v31  ;;  %v7645_v38 = vpop.xlane.xlu0 %4131  ;;  %v7647_v20 = vpop.eup %5575 }
 0x21a   :  { %v10377_v2 = vld [vmem:[#allocation69_spill] sm:$0xff]  ;;  %10387 = vst [vmem:[#allocation185_spill] sm:$0xff] %v7645_v38  ;;  %10388 = vst [vmem:[#allocation186_spill] sm:$0xff] %v7647_v20  ;;  %5595 = vpow2.f32 %v7422_v1  ;;  %v7662_v25 = vpop.xlane.xlu1 %1067 }
 0x21b   :  { %v10380_v22 = vld [vmem:[#allocation77_spill] sm:$0xff]  ;;  %v5578_v56 = vpop.eup %5577  ;;  %v3605_v11 = vadd.f32 %v7457_v51, %v3604_v18  ;;  %5597 = vpow2.f32 %v7430_v34  ;;  %10394 = vst [vmem:[#allocation187_spill] sm:$0xff] %v7662_v25  ;;  %v10404_v34 = vsub.f32 %v10361_v49, %v7169_v61 }
 0x21c   :  { %v10383_v4 = vld [vmem:[#allocation81_spill] sm:$0xff]  ;;  %v5580_v33 = vpop.eup %5579  ;;  %5599 = vpow2.f32 %v7435_v57 }
 0x21d   :  { %v10385_v54 = vld [vmem:[#allocation93_spill] sm:$0xff]  ;;  %v5582_v18 = vpop.eup %5581  ;;  %v3606_v38 = vadd.f32 %v7472_v7, %v3605_v11  ;;  %5601 = vpow2.f32 %v7445_v3  ;;  %v3126_v1 = vadd.f32 %v5580_v33, %v5578_v56  ;;  %v7675_v26 = vpop.xlane.xlu0 %1972  ;;  %v10402_v33 = vsub.f32 %v10360_v21, %v7169_v61  ;;  %v10462_v21 = vld [vmem:[#allocation151_spill] sm:$0xff] }
 0x21e   :  { %v10386_v46 = vld [vmem:[#allocation97_spill] sm:$0xff]  ;;  %10399 = vst [vmem:[#allocation188_spill] sm:$0xff] %v7675_v26  ;;  %v5584_v57 = vpop.eup %5583  ;;  %5603 = vpow2.f32 %v7450_v52  ;;  %v7691_v52 = vpop.xlane.xlu1 %4134  ;;  %v7697_v11 = vmul.f32 1.442695, %v10404_v34  ;;  %v10407_v34 = vsub.f32 %v10364_v13, %v7169_v61 }
 0x21f   :  { %v10389_v39 = vld [vmem:[#allocation101_spill] sm:$0xff]  ;;  %v5586_v7 = vpop.eup %5585  ;;  %v3607_v3 = vadd.f32 %v7490_v14, %v3606_v38  ;;  %5605 = vpow2.f32 %v7455_v60  ;;  %v3127_v56 = vadd.f32 %v5582_v18, %v3126_v1  ;;  %v7689_v20 = vmul.f32 1.442695, %v10402_v33  ;;  %10403 = vst [vmem:[#allocation189_spill] sm:$0xff] %v7691_v52 }
 0x220   :  { %v10390_v44 = vld [vmem:[#allocation105_spill] sm:$0xff]  ;;  %v5588_v27 = vpop.eup %5587  ;;  %5607 = vpow2.f32 %v7463_v5  ;;  %v10405_v14 = vsub.f32 %v10362_v41, %v7169_v61  ;;  %v10406_v38 = vsub.f32 %v10363_v12, %v7169_v61  ;;  %v7714_v52 = vmul.f32 1.442695, %v10407_v34  ;;  %v10450_v41 = vld [vmem:[#allocation172_spill] sm:$0xff] }
 0x221   :  { %v10391_v15 = vld [vmem:[#allocation109_spill] sm:$0xff]  ;;  %v5590_v18 = vpop.eup %5589  ;;  %v3608_v33 = vadd.f32 %v7505_v59, %v3607_v3  ;;  %5609 = vpow2.f32 %v7468_v10  ;;  %v3128_v5 = vadd.f32 %v5584_v57, %v3127_v56  ;;  %v7716_v49 = vpop.xlane.xlu0 %3974  ;;  %v10410_v59 = vsub.f32 %v10368_v53, %v7169_v61 }
 0x222   :  { %v10392_v36 = vld [vmem:[#allocation113_spill] sm:$0xff]  ;;  %v7702_v60 = vmul.f32 1.442695, %v10405_v14  ;;  %v7707_v1 = vmul.f32 1.442695, %v10406_v38  ;;  %10408 = vst [vmem:[#allocation190_spill] sm:$0xff] %v7716_v49  ;;  %v5592_v14 = vpop.eup %5591  ;;  %5611 = vpow2.f32 %v7478_v48  ;;  %v10409_v38 = vsub.f32 %v10367_v55, %v7169_v61  ;;  %v7741_v55 = vpop.xlane.xlu1 %1975 }
 0x223   :  { %v10395_v9 = vld [vmem:[#allocation121_spill] sm:$0xff]  ;;  %v7727_v10 = vmul.f32 1.442695, %v10410_v59  ;;  %v10411_v57 = vsub.f32 %v10369_v45, %v7169_v61  ;;  %v5594_v56 = vpop.eup %5593  ;;  %v3609_v34 = vadd.f32 %v7523_v43, %v3608_v33  ;;  %5613 = vpow2.f32 %v7483_v24  ;;  %10413 = vst [vmem:[#allocation191_spill] sm:$0xff] %v7741_v55  ;;  %v10474_v55 = vld [vmem:[#allocation46_spill] sm:$0xff] }
 0x224   :  { %v10397_v51 = vld [vmem:[#allocation129_spill] sm:$0xff]  ;;  %v7722_v12 = vmul.f32 1.442695, %v10409_v38  ;;  %v3129_v48 = vadd.f32 %v5586_v7, %v3128_v5  ;;  %v10412_v38 = vsub.f32 %v10371_v63, %v7169_v61  ;;  %v5596_v59 = vpop.eup %5595  ;;  %5615 = vpow2.f32 %v7488_v17 }
 0x225   :  { %v10398_v25 = vld [vmem:[#allocation133_spill] sm:$0xff]  ;;  %v7732_v3 = vmul.f32 1.442695, %v10411_v57  ;;  %v10414_v57 = vsub.f32 %v10372_v35, %v7169_v61  ;;  %v10415_v43 = vsub.f32 %v10375_v19, %v7169_v61  ;;  %v10416_v7 = vsub.f32 %v10376_v62, %v7169_v61  ;;  %v5598_v5 = vpop.eup %5597  ;;  %v7766_v63 = vpop.xlane.xlu0 %1070  ;;  %v10436_v19 = vld [vmem:[#allocation168_spill] sm:$0xff] }
 0x226   :  { %v10400_v29 = vld [vmem:[#allocation137_spill] sm:$0xff]  ;;  %v7739_v49 = vmul.f32 1.442695, %v10412_v38  ;;  %v3610_v38 = vadd.f32 %v7538_v47, %v3609_v34  ;;  %5617 = vpow2.f32 %v7496_v30  ;;  %v3130_v17 = vadd.f32 %v5588_v27, %v3129_v48  ;;  %10418 = vst [vmem:[#allocation192_spill] sm:$0xff] %v7766_v63 }
 0x227   :  { %v10401_v31 = vld [vmem:[#allocation141_spill] sm:$0xff]  ;;  %v7747_v45 = vmul.f32 1.442695, %v10414_v57  ;;  %v7752_v24 = vmul.f32 1.442695, %v10415_v43  ;;  %v10417_v57 = vsub.f32 %v10377_v2, %v7169_v61  ;;  %v7768_v43 = vpop.eup %5599  ;;  %5619 = vpow2.f32 %v7501_v32 }
 0x228   :  { %v7757_v33 = vmul.f32 1.442695, %v10416_v7  ;;  %v10419_v7 = vsub.f32 %v10379_v6, %v7169_v61  ;;  %v10420_v47 = vsub.f32 %v10380_v22, %v7169_v61  ;;  %v10421_v27 = vsub.f32 %v10383_v4, %v7169_v61  ;;  %v7786_v48 = vpop.eup %5601  ;;  %v7795_v22 = vpop.xlane.xlu1 %3977 }
 0x229   :  { %v7764_v35 = vmul.f32 1.442695, %v10417_v57  ;;  %v3611_v57 = vadd.f32 %v7556_v58, %v3610_v38  ;;  %5621 = vpow2.f32 %v7511_v23  ;;  %v3131_v32 = vadd.f32 %v5590_v18, %v3130_v17  ;;  %10423 = vst [vmem:[#allocation193_spill] sm:$0xff] %v7795_v22  ;;  %v10437_v22 = vld [vmem:[#allocation117_spill] sm:$0xff] }
 0x22a   :  { %v7774_v62 = vmul.f32 1.442695, %v10419_v7  ;;  %v7779_v30 = vmul.f32 1.442695, %v10420_v47  ;;  %v7784_v34 = vmul.f32 1.442695, %v10421_v27  ;;  %v10422_v7 = vsub.f32 %v6865_v37, %v7169_v61  ;;  %v7797_v47 = vpop.eup %5603  ;;  %v7824_v37 = vpop.xlane.xlu0 %4137 }
 0x22b   :  { %5623 = vpow2.f32 %v7516_v0  ;;  %v10424_v27 = vsub.f32 %v6878_v50, %v7169_v61  ;;  %v10425_v58 = vsub.f32 %v10385_v54, %v7169_v61  ;;  %v10426_v18 = vsub.f32 %v10386_v46, %v7169_v61  ;;  %v7815_v17 = vpop.eup %5605  ;;  %10428 = vst [vmem:[#allocation194_spill] sm:$0xff] %v7824_v37 }
 0x22c   :  { %v7793_v6 = vmul.f32 1.442695, %v10422_v7  ;;  %v3612_v7 = vadd.f32 %v7571_v40, %v3611_v57  ;;  %5625 = vpow2.f32 %v7521_v42  ;;  %v3132_v0 = vadd.f32 %v5592_v14, %v3131_v32 }
 0x22d   :  { %v7803_v4 = vmul.f32 1.442695, %v10424_v27  ;;  %v7808_v23 = vmul.f32 1.442695, %v10425_v58  ;;  %v7813_v38 = vmul.f32 1.442695, %v10426_v18  ;;  %v10427_v27 = vsub.f32 %v10389_v39, %v7169_v61  ;;  %v7826_v58 = vpop.eup %5607 }
 0x22e   :  { %5627 = vpow2.f32 %v7529_v16  ;;  %v10429_v18 = vsub.f32 %v10390_v44, %v7169_v61  ;;  %v10430_v40 = vsub.f32 %v10391_v15, %v7169_v61  ;;  %v10431_v14 = vsub.f32 %v10392_v36, %v7169_v61  ;;  %v7849_v16 = vpop.eup %5609  ;;  %v7858_v36 = vpop.xlane.xlu1 %1073 }
 0x22f   :  { %v7822_v50 = vmul.f32 1.442695, %v10427_v27  ;;  %v10432_v32 = vlaneseq  ;;  %v10433_v27 = vmov 0  ;;  %5629 = vpow2.f32 %v10436_v19  ;;  %10439 = vst [vmem:[#allocation168_spill] sm:$0xff] %v7858_v36  ;;  %v10469_v36 = vld [vmem:[#allocation34_spill] sm:$0xff] }
 0x230   :  { %v7832_v2 = vmul.f32 1.442695, %v10429_v18  ;;  %v7837_v42 = vmul.f32 1.442695, %v10430_v40  ;;  %v7842_v57 = vmul.f32 1.442695, %v10431_v14  ;;  %v3613_v18 = vadd.f32 %v7580_v28, %v3612_v7  ;;  %v7860_v14 = vpop.eup %5611 }
 0x231   :  { %vm7845_vm2 = vcmp.lt.s32.totalorder %v10432_v32, 256  ;;  %v3133_v37 = vadd.f32 %v5594_v56, %v3132_v0  ;;  %v10438_v40 = vsub.f32 %v10437_v22, %v7169_v61  ;;  %v10440_v32 = vld [vmem:[#allocation170_spill] sm:$0xff]  ;;  %v10441_v13 = vsub.f32 %v10395_v9, %v7169_v61  ;;  %v10442_v28 = vld [vmem:[#allocation125_spill] sm:$0xff] }
 0x232   :  { %v10434_v27 = vsel %vm7845_vm2, 4294967295, %v10433_v27  ;;  %5631 = vpow2.f32 %v10440_v32  ;;  %v10443_v19 = vsub.f32 %v10442_v28, %v7169_v61  ;;  %v10444_v7 = vsub.f32 %v10397_v51, %v7169_v61  ;;  %v10445_v22 = vld [vmem:[#allocation177_spill] sm:$0xff]  ;;  %v10446_v32 = vld [vmem:[#allocation171_spill] sm:$0xff]  ;;  %v7887_v28 = vpop.xlane.xlu0 %1978  ;;  %v7913_v54 = vpop.xlane.xlu1 %4140 }
 0x233   :  { %10435 = vst [vmem:[#allocation195_spill] sm:$0xff] %v10434_v27  ;;  %v7856_v53 = vmul.f32 1.442695, %v10438_v40  ;;  %v7866_v15 = vmul.f32 1.442695, %v10441_v13  ;;  %v7878_v40 = vpop.eup %5613  ;;  %v3614_v44 = vadd.f32 %v10445_v22, %v3613_v18  ;;  %5633 = vpow2.f32 %v10446_v32  ;;  %10449 = vst [vmem:[#allocation177_spill] sm:$0xff] %v7887_v28 }
 0x234   :  { %v7871_v56 = vmul.f32 1.442695, %v10443_v19  ;;  %v7876_v0 = vmul.f32 1.442695, %v10444_v7  ;;  %v3134_v39 = vadd.f32 %v5596_v59, %v3133_v37  ;;  %v10447_v13 = vsub.f32 %v10398_v25, %v7169_v61  ;;  %v7889_v19 = vpop.eup %5615  ;;  %v10464_v28 = vld [vmem:[#allocation26_spill] sm:$0xff] }
 0x235   :  { %5635 = vpow2.f32 %v10450_v41  ;;  %v10451_v7 = vsub.f32 %v10400_v29, %v7169_v61  ;;  %v10453_v22 = vsub.f32 %v10401_v31, %v7169_v61  ;;  %v10455_v59 = vsub.f32 %v7133_v8, %v7169_v61  ;;  %v7907_v32 = vpop.eup %5617  ;;  %v10458_v41 = vld [vmem:[#allocation173_spill] sm:$0xff]  ;;  %v10463_v8 = vld [vmem:[#allocation22_spill] sm:$0xff] }
 0x236   :  { %v7885_v9 = vmul.f32 1.442695, %v10447_v13  ;;  %v10457_v13 = vld [vmem:[#allocation178_spill] sm:$0xff]  ;;  %5637 = vpow2.f32 %v10458_v41  ;;  %v3135_v46 = vadd.f32 %v5598_v5, %v3134_v39  ;;  %v7915_v31 = vpop.eup %5619  ;;  %v10466_v39 = vld [vmem:[#allocation180_spill] sm:$0xff] }
 0x237   :  { %v7895_v51 = vmul.f32 1.442695, %v10451_v7  ;;  %v7900_v37 = vmul.f32 1.442695, %v10453_v22  ;;  %v7905_v18 = vmul.f32 1.442695, %v10455_v59  ;;  %v3615_v25 = vadd.f32 %v10457_v13, %v3614_v44  ;;  %v7924_v41 = vpop.eup %5621 }
 0x238   :  { %10448 = vst [vmem:[#allocation170_spill] sm:$0xff] %v7885_v9  ;;  %v10459_v7 = vld [vmem:[#allocation150_spill] sm:$0xff]  ;;  %10460 = vst [vmem:[#allocation178_spill] sm:$0xff] %v7913_v54  ;;  %v7932_v63 = vpop.eup %5623 }
 0x239   :  { %10452 = vst [vmem:[#allocation171_spill] sm:$0xff] %v7895_v51  ;;  %10454 = vst [vmem:[#allocation172_spill] sm:$0xff] %v7900_v37  ;;  %v3205_v29 = vcombine.low %v10459_v7, %v7169_v61  ;;  %v10461_v22 = vld [vmem:[#allocation174_spill] sm:$0xff]  ;;  %v3616_v5 = vadd.f32 %v10466_v39, %v3615_v25  ;;  %v3136_v61 = vadd.f32 %v7768_v43, %v3135_v46  ;;  %v10467_v7 = vld [vmem:[#allocation149_spill] sm:$0xff]  ;;  %v7941_v46 = vpop.eup %5625 }
 0x23a   :  { %10456 = vst [vmem:[#allocation196_spill] sm:$0xff] %v7905_v18  ;;  %5639 = vpow2.f32 %v10461_v22  ;;  %v10465_v44 = vld [vmem:[#allocation30_spill] sm:$0xff]  ;;  %v7930_v22 = vpop.xlane.xlu0 %3980  ;;  %v7949_v26 = vpop.eup %5627 }
 0x23b   :  { %5641 = vpow2.f32 %v7689_v20  ;;  %v3212_v54 = vrot.slane %v3205_v29, %v10467_v7  ;;  %10468 = vst [vmem:[#allocation173_spill] sm:$0xff] %v7930_v22  ;;  %v10470_v13 = vld [vmem:[#allocation38_spill] sm:$0xff]  ;;  %v10472_v20 = vld [vmem:[#allocation181_spill] sm:$0xff]  ;;  %v3137_v29 = vadd.f32 %v7786_v48, %v3136_v61  ;;  %v7958_v48 = vpop.eup %5629 }
 0x23c   :  { %5643 = vpow2.f32 %v7697_v11  ;;  %v10471_v25 = vld [vmem:[#allocation42_spill] sm:$0xff]  ;;  %v3617_v43 = vadd.f32 %v10472_v20, %v3616_v5  ;;  %v7947_v11 = vpop.xlane.xlu1 %1981  ;;  %10477 = vst [vmem:[#allocation174_spill] sm:$0xff] %v7958_v48  ;;  %v7969_v18 = vpop.eup %5631  ;;  %v10516_v48 = vsub.f32 %v10463_v8, %v10462_v21 }
 0x23d   :  { %5645 = vpow2.f32 %v7702_v60  ;;  %v3219_v22 = vrot.slane %v3212_v54, %v10467_v7  ;;  %10473 = vst [vmem:[#allocation150_spill] sm:$0xff] %v7947_v11  ;;  %v10475_v39 = vld [vmem:[#allocation50_spill] sm:$0xff]  ;;  %v10478_v60 = vld [vmem:[#allocation183_spill] sm:$0xff]  ;;  %v3138_v54 = vadd.f32 %v7797_v47, %v3137_v29  ;;  %10481 = vst [vmem:[#allocation22_spill] sm:$0xff] %v7969_v18 }
 0x23e   :  { %5647 = vpow2.f32 %v7707_v1  ;;  %v10476_v5 = vld [vmem:[#allocation54_spill] sm:$0xff]  ;;  %v3618_v61 = vadd.f32 %v10478_v60, %v3617_v43  ;;  %v7967_v11 = vpop.xlane.xlu0 %1076  ;;  %v7978_v60 = vpop.eup %5633 }
 0x23f   :  { %5649 = vpow2.f32 %v7714_v52  ;;  %3227 = vst.msk [vmem:[#allocation8] sm:$0x3] %vm7845_vm2, %v3219_v22  ;;  %v10479_v1 = vld [vmem:[#allocation58_spill] sm:$0xff]  ;;  %10480 = vst [vmem:[#allocation151_spill] sm:$0xff] %v7967_v11  ;;  %v10486_v22 = vld [vmem:[#allocation184_spill] sm:$0xff]  ;;  %v3139_v59 = vadd.f32 %v7815_v17, %v3138_v54  ;;  %v7987_v7 = vpop.eup %5635 }
 0x240   :  { %5651 = vpow2.f32 %v7722_v12  ;;  %v10482_v20 = vld [vmem:[#allocation62_spill] sm:$0xff]  ;;  %10485 = vst [vmem:[#allocation26_spill] sm:$0xff] %v7978_v60  ;;  %v3619_v27 = vadd.f32 %v10486_v22, %v3618_v61  ;;  %v7985_v18 = vpop.xlane.xlu1 %3983  ;;  %10489 = vst [vmem:[#allocation181_spill] sm:$0xff] %v7987_v7  ;;  %v7996_v54 = vpop.eup %5637 }
 0x241   :  { %v10483_v43 = vld [vmem:[#allocation66_spill] sm:$0xff]  ;;  %5653 = vpow2.f32 %v7727_v10  ;;  %10488 = vst [vmem:[#allocation180_spill] sm:$0xff] %v7985_v18  ;;  %10493 = vst [vmem:[#allocation183_spill] sm:$0xff] %v7996_v54  ;;  %v3140_v12 = vadd.f32 %v7826_v58, %v3139_v59 }
 0x242   :  { %v10484_v52 = vld [vmem:[#allocation70_spill] sm:$0xff]  ;;  %5655 = vpow2.f32 %v7732_v3  ;;  %v8003_v7 = vpop.xlane.xlu0 %4143 }
 0x243   :  { %v10487_v11 = vld [vmem:[#allocation74_spill] sm:$0xff]  ;;  %5657 = vpow2.f32 %v7739_v49  ;;  %10496 = vst [vmem:[#allocation184_spill] sm:$0xff] %v8003_v7 }
 0x244   :  { %v10490_v47 = vld [vmem:[#allocation78_spill] sm:$0xff]  ;;  %v8005_v29 = vpop.eup %5639  ;;  %5659 = vpow2.f32 %v7747_v45 }
 0x245   :  { %v10491_v60 = vld [vmem:[#allocation82_spill] sm:$0xff]  ;;  %v5642_v59 = vpop.eup %5641  ;;  %5661 = vpow2.f32 %v7752_v24 }
 0x246   :  { %v10492_v61 = vld [vmem:[#allocation86_spill] sm:$0xff]  ;;  %v5644_v45 = vpop.eup %5643  ;;  %5663 = vpow2.f32 %v7757_v33 }
 0x247   :  { %v10494_v10 = vld [vmem:[#allocation186_spill] sm:$0xff]  ;;  %5665 = vpow2.f32 %v7764_v35  ;;  %v3163_v7 = vadd.f32 %v5644_v45, %v5642_v59  ;;  %v8059_v45 = vmul.f32 1.442695, %v10516_v48  ;;  %v10519_v48 = vsub.f32 %v10465_v44, %v10462_v21 }
 0x248   :  { %v3620_v22 = vadd.f32 %v10494_v10, %v3619_v27  ;;  %v10495_v18 = vld [vmem:[#allocation90_spill] sm:$0xff]  ;;  %10497 = vst [vmem:[#allocation186_spill] sm:$0xff] %v8005_v29  ;;  %v3141_v10 = vadd.f32 %v7849_v16, %v3140_v12  ;;  %v8018_v29 = vpop.xlane.xlu1 %1079  ;;  %v5646_v16 = vpop.eup %5645  ;;  %5667 = vpow2.f32 %v7774_v62 }
 0x249   :  { %v10498_v37 = vld [vmem:[#allocation94_spill] sm:$0xff]  ;;  %10502 = vst [vmem:[#allocation197_spill] sm:$0xff] %v8018_v29  ;;  %v8029_v29 = vpop.xlane.xlu0 %1984  ;;  %v5648_v3 = vpop.eup %5647  ;;  %5669 = vpow2.f32 %v7779_v30  ;;  %v3164_v35 = vadd.f32 %v5646_v16, %v3163_v7 }
 0x24a   :  { %v10499_v54 = vld [vmem:[#allocation98_spill] sm:$0xff]  ;;  %v3621_v49 = vrot.slane %v3620_v22, 4  ;;  %v3142_v24 = vadd.f32 %v7860_v14, %v3141_v10  ;;  %10506 = vst [vmem:[#allocation198_spill] sm:$0xff] %v8029_v29  ;;  %5671 = vpow2.f32 %v7784_v34 }
 0x24b   :  { %v10503_v17 = vld [vmem:[#allocation110_spill] sm:$0xff]  ;;  %5673 = vpow2.f32 %v7793_v6  ;;  %v3165_v30 = vadd.f32 %v5648_v3, %v3164_v35 }
 0x24c   :  { %v3622_v12 = vadd.f32 %v3621_v49, %v3620_v22  ;;  %v10507_v33 = vld [vmem:[#allocation122_spill] sm:$0xff]  ;;  %v5650_v22 = vpop.eup %5649  ;;  %v3143_v14 = vadd.f32 %v7878_v40, %v3142_v24  ;;  %v8040_v59 = vpop.xlane.xlu1 %4146  ;;  %5675 = vpow2.f32 %v7803_v4  ;;  %v8074_v24 = vmul.f32 1.442695, %v10519_v48 }
 0x24d   :  { %10510 = vst [vmem:[#allocation199_spill] sm:$0xff] %v8040_v59  ;;  %v5652_v10 = vpop.eup %5651  ;;  %v10511_v62 = vld [vmem:[#allocation134_spill] sm:$0xff]  ;;  %v8051_v7 = vpop.xlane.xlu0 %3986  ;;  %5677 = vpow2.f32 %v7808_v23  ;;  %v3166_v4 = vadd.f32 %v5650_v22, %v3165_v30 }
 0x24e   :  { %v3623_v49 = vrot.slane %v3622_v12, 2  ;;  %v10512_v51 = vld [vmem:[#allocation138_spill] sm:$0xff]  ;;  %v5654_v9 = vpop.eup %5653  ;;  %v3144_v40 = vadd.f32 %v7889_v19, %v3143_v14  ;;  %10514 = vst [vmem:[#allocation200_spill] sm:$0xff] %v8051_v7  ;;  %5679 = vpow2.f32 %v7813_v38 }
 0x24f   :  { %v10513_v27 = vld [vmem:[#allocation142_spill] sm:$0xff]  ;;  %v5656_v16 = vpop.eup %5655  ;;  %5681 = vpow2.f32 %v7822_v50  ;;  %v3167_v30 = vadd.f32 %v5652_v10, %v3166_v4 }
 0x250   :  { %v3624_v58 = vadd.f32 %v3623_v49, %v3622_v12  ;;  %v10515_v34 = vld [vmem:[#allocation146_spill] sm:$0xff]  ;;  %v10517_v12 = vsub.f32 %v10464_v28, %v10462_v21  ;;  %v5658_v6 = vpop.eup %5657  ;;  %v3145_v49 = vadd.f32 %v7907_v32, %v3144_v40  ;;  %v8068_v14 = vpop.xlane.xlu1 %1987  ;;  %v10521_v32 = vsub.f32 %v10470_v13, %v10462_v21 }
 0x251   :  { %10518 = vst [vmem:[#allocation201_spill] sm:$0xff] %v8068_v14  ;;  %v5660_v35 = vpop.eup %5659  ;;  %v8090_v48 = vpop.xlane.xlu0 %1082  ;;  %5683 = vpow2.f32 %v7832_v2  ;;  %v3168_v2 = vadd.f32 %v5654_v9, %v3167_v30  ;;  %2354 = vst.msk [vmem:[#allocation6 + $0x50] sm:$0xff] %vm986_vm3, %v8068_v14  ;;  %v10600_v14 = vld [vmem:[#allocation19_spill] sm:$0xff] }
 0x252   :  { %v8064_v19 = vmul.f32 1.442695, %v10517_v12  ;;  %v3625_v3 = vrot.slane %v3624_v58, 1  ;;  %v10520_v12 = vsub.f32 %v10469_v36, %v10462_v21  ;;  %v8084_v23 = vmul.f32 1.442695, %v10521_v32  ;;  %v5662_v22 = vpop.eup %5661  ;;  %10523 = vst [vmem:[#allocation203_spill] sm:$0xff] %v8090_v48 }
 0x253   :  { %v3146_v38 = vadd.f32 %v7915_v31, %v3145_v49  ;;  %v5664_v7 = vpop.eup %5663  ;;  %v10525_v32 = vsub.f32 %v10474_v55, %v10462_v21  ;;  %v10526_v31 = vsub.f32 %v10475_v39, %v10462_v21  ;;  %5685 = vpow2.f32 %v7837_v42  ;;  %v10552_v55 = vld [vmem:[#allocation174_spill] sm:$0xff]  ;;  %1449 = vst.msk [vmem:[#allocation4 + $0x50] sm:$0xff] %vm986_vm3, %v8090_v48  ;;  %v10601_v48 = vld [vmem:[#allocation21_spill] sm:$0xff] }
 0x254   :  { %v8079_v29 = vmul.f32 1.442695, %v10520_v12  ;;  %v8086_v40 = vadd.f32 %v3625_v3, %v3624_v58  ;;  %v10524_v12 = vsub.f32 %v10471_v25, %v10462_v21  ;;  %v8108_v10 = vpop.eup %5665  ;;  %v10527_v49 = vsub.f32 %v10476_v5, %v10462_v21  ;;  %v10554_v36 = vld [vmem:[#allocation118_spill] sm:$0xff] }
 0x255   :  { %v8101_v58 = vmul.f32 1.442695, %v10525_v32  ;;  %v8106_v50 = vmul.f32 1.442695, %v10526_v31  ;;  %v3147_v3 = vadd.f32 %v7924_v41, %v3146_v38  ;;  %v8119_v32 = vpop.eup %5667  ;;  %5687 = vpow2.f32 %v7842_v57 }
 0x256   :  { %10522 = vst [vmem:[#allocation202_spill] sm:$0xff] %v8086_v40  ;;  %v8096_v59 = vmul.f32 1.442695, %v10524_v12  ;;  %v8115_v4 = vmul.f32 1.442695, %v10527_v49  ;;  %v8117_v12 = vpop.xlane.xlu1 %3989  ;;  %v10529_v31 = vsub.f32 %v10479_v1, %v10462_v21  ;;  %v10530_v42 = vsub.f32 %v10482_v20, %v10462_v21  ;;  %v8137_v30 = vpop.eup %5669  ;;  %v10546_v1 = vld [vmem:[#allocation171_spill] sm:$0xff] }
 0x257   :  { %10528 = vst [vmem:[#allocation204_spill] sm:$0xff] %v8117_v12  ;;  %v10531_v41 = vsub.f32 %v10483_v43, %v10462_v21  ;;  %v3148_v49 = vadd.f32 %v7932_v63, %v3147_v3  ;;  %5689 = vpow2.f32 %v7856_v53  ;;  %v3169_v57 = vadd.f32 %v5656_v16, %v3168_v2  ;;  %v8146_v20 = vpop.xlane.xlu0 %4149 }
 0x258   :  { %v8125_v40 = vmul.f32 1.442695, %v10529_v31  ;;  %v8130_v9 = vmul.f32 1.442695, %v10530_v42  ;;  %v10532_v31 = vsub.f32 %v10484_v52, %v10462_v21  ;;  %10533 = vst [vmem:[#allocation205_spill] sm:$0xff] %v8146_v20  ;;  %v8148_v42 = vpop.eup %5671  ;;  %5691 = vpow2.f32 %v7866_v15 }
 0x259   :  { %v8135_v38 = vmul.f32 1.442695, %v10531_v41  ;;  %v10534_v41 = vsub.f32 %v10487_v11, %v10462_v21  ;;  %v10535_v53 = vsub.f32 %v10490_v47, %v10462_v21  ;;  %v10536_v16 = vsub.f32 %v10491_v60, %v10462_v21  ;;  %v8166_v2 = vpop.eup %5673 }
 0x25a   :  { %v8144_v12 = vmul.f32 1.442695, %v10532_v31  ;;  %v3149_v31 = vadd.f32 %v7941_v46, %v3148_v49  ;;  %5693 = vpow2.f32 %v7871_v56  ;;  %v3170_v15 = vadd.f32 %v5658_v6, %v3169_v57  ;;  %v8175_v47 = vpop.xlane.xlu1 %1085 }
 0x25b   :  { %v8154_v43 = vmul.f32 1.442695, %v10534_v41  ;;  %v8159_v63 = vmul.f32 1.442695, %v10535_v53  ;;  %v8164_v3 = vmul.f32 1.442695, %v10536_v16  ;;  %v10537_v41 = vsub.f32 %v10492_v61, %v10462_v21  ;;  %v8177_v53 = vpop.eup %5675  ;;  %v8204_v20 = vpop.xlane.xlu0 %1990 }
 0x25c   :  { %10538 = vst [vmem:[#allocation206_spill] sm:$0xff] %v8175_v47  ;;  %5695 = vpow2.f32 %v7876_v0  ;;  %v10539_v16 = vsub.f32 %v10495_v18, %v10462_v21  ;;  %v10540_v56 = vsub.f32 %v10498_v37, %v10462_v21  ;;  %v10541_v6 = vsub.f32 %v10499_v54, %v10462_v21  ;;  %v8195_v57 = vpop.eup %5677  ;;  %v10542_v0 = vld [vmem:[#allocation170_spill] sm:$0xff]  ;;  %1450 = vst.msk [vmem:[#allocation4 + $0x58] sm:$0xff] %vm986_vm3, %v8175_v47 }
 0x25d   :  { %v8173_v11 = vmul.f32 1.442695, %v10537_v41  ;;  %v3150_v41 = vadd.f32 %v7949_v26, %v3149_v31  ;;  %5697 = vpow2.f32 %v10542_v0  ;;  %v3171_v61 = vadd.f32 %v5660_v35, %v3170_v15  ;;  %v10543_v18 = vld [vmem:[#allocation102_spill] sm:$0xff]  ;;  %10545 = vst [vmem:[#allocation170_spill] sm:$0xff] %v8204_v20  ;;  %2355 = vst.msk [vmem:[#allocation6 + $0x58] sm:$0xff] %vm986_vm3, %v8204_v20 }
 0x25e   :  { %v8183_v60 = vmul.f32 1.442695, %v10539_v16  ;;  %v8188_v46 = vmul.f32 1.442695, %v10540_v56  ;;  %v8193_v49 = vmul.f32 1.442695, %v10541_v6  ;;  %v10544_v16 = vsub.f32 %v10543_v18, %v10462_v21  ;;  %v8206_v56 = vpop.eup %5679 }
 0x25f   :  { %5699 = vpow2.f32 %v10546_v1  ;;  %v10547_v6 = vld [vmem:[#allocation106_spill] sm:$0xff]  ;;  %v10549_v26 = vsub.f32 %v10503_v17, %v10462_v21  ;;  %v3151_v25 = vadd.f32 %v10552_v55, %v3150_v41  ;;  %v10553_v1 = vld [vmem:[#allocation172_spill] sm:$0xff]  ;;  %v3172_v13 = vadd.f32 %v5662_v22, %v3171_v61  ;;  %v8233_v17 = vpop.xlane.xlu1 %4152 }
 0x260   :  { %v8202_v52 = vmul.f32 1.442695, %v10544_v16  ;;  %v10548_v5 = vsub.f32 %v10547_v6, %v10462_v21  ;;  %v10550_v31 = vld [vmem:[#allocation114_spill] sm:$0xff]  ;;  %v8224_v16 = vpop.eup %5681  ;;  %5701 = vpow2.f32 %v10553_v1  ;;  %10556 = vst [vmem:[#allocation171_spill] sm:$0xff] %v8233_v17  ;;  %v10557_v18 = vld [vmem:[#allocation196_spill] sm:$0xff] }
 0x261   :  { %v8217_v35 = vmul.f32 1.442695, %v10549_v26  ;;  %v10551_v15 = vsub.f32 %v10550_v31, %v10462_v21  ;;  %v8235_v26 = vpop.eup %5683  ;;  %5703 = vpow2.f32 %v10557_v18  ;;  %v10559_v55 = vld [vmem:[#allocation126_spill] sm:$0xff]  ;;  %v3173_v18 = vadd.f32 %v5664_v7, %v3172_v13 }
 0x262   :  { %v8212_v39 = vmul.f32 1.442695, %v10548_v5  ;;  %v10555_v5 = vsub.f32 %v10554_v36, %v10462_v21  ;;  %v10560_v41 = vsub.f32 %v10559_v55, %v10462_v21  ;;  %v10561_v22 = vld [vmem:[#allocation130_spill] sm:$0xff]  ;;  %v8253_v17 = vpop.eup %5685  ;;  %5705 = vpow2.f32 %v8059_v45  ;;  %v8262_v55 = vpop.xlane.xlu0 %3992 }
 0x263   :  { %v8222_v0 = vmul.f32 1.442695, %v10551_v15  ;;  %v10558_v15 = vsub.f32 %v10507_v33, %v10462_v21  ;;  %v10562_v1 = vsub.f32 %v10561_v22, %v10462_v21  ;;  %v10563_v36 = vld [vmem:[#allocation22_spill] sm:$0xff]  ;;  %10565 = vst [vmem:[#allocation174_spill] sm:$0xff] %v8262_v55  ;;  %5707 = vpow2.f32 %v8064_v19 }
 0x264   :  { %v8231_v6 = vmul.f32 1.442695, %v10555_v5  ;;  %v8246_v61 = vmul.f32 1.442695, %v10560_v41  ;;  %v3152_v44 = vadd.f32 %v10563_v36, %v3151_v25  ;;  %v8264_v41 = vpop.eup %5687  ;;  %v10568_v36 = vsub.f32 %v10513_v27, %v10462_v21 }
 0x265   :  { %v8241_v31 = vmul.f32 1.442695, %v10558_v15  ;;  %v8251_v5 = vmul.f32 1.442695, %v10562_v1  ;;  %v10564_v15 = vsub.f32 %v10511_v62, %v10462_v21  ;;  %v10566_v1 = vsub.f32 %v10512_v51, %v10462_v21  ;;  %v8282_v7 = vpop.eup %5689  ;;  %v8289_v62 = vpop.xlane.xlu1 %1993 }
 0x266   :  { %v8275_v13 = vmul.f32 1.442695, %v10568_v36  ;;  %v10570_v25 = vsub.f32 %v10515_v34, %v10462_v21  ;;  %v3174_v19 = vadd.f32 %v8108_v10, %v3173_v18  ;;  %5709 = vpow2.f32 %v8074_v24  ;;  %v8291_v36 = vpop.eup %5691  ;;  %2356 = vst.msk [vmem:[#allocation6 + $0x60] sm:$0xff] %vm986_vm3, %v8289_v62 }
 0x267   :  { %v8260_v33 = vmul.f32 1.442695, %v10564_v15  ;;  %v8270_v22 = vmul.f32 1.442695, %v10566_v1  ;;  %v10572_v15 = vld [vmem:[#allocation26_spill] sm:$0xff]  ;;  %v10573_v1 = vld [vmem:[#allocation148_spill] sm:$0xff]  ;;  %5711 = vpow2.f32 %v8079_v29  ;;  %v8297_v27 = vpop.eup %5693 }
 0x268   :  { %10569 = vst [vmem:[#allocation196_spill] sm:$0xff] %v8275_v13  ;;  %v8280_v45 = vmul.f32 1.442695, %v10570_v25  ;;  %v3153_v55 = vadd.f32 %v10572_v15, %v3152_v44  ;;  %v3669_v51 = vcombine.low %v10573_v1, %v10462_v21  ;;  %10574 = vst [vmem:[#allocation26_spill] sm:$0xff] %v8289_v62  ;;  %v10575_v25 = vld [vmem:[#allocation152_spill] sm:$0xff]  ;;  %v10577_v44 = vld [vmem:[#allocation181_spill] sm:$0xff]  ;;  %v8303_v24 = vadd.f32 %v8119_v32, %v3174_v19 }
 0x269   :  { %10567 = vst [vmem:[#allocation172_spill] sm:$0xff] %v8270_v22  ;;  %v8295_v34 = vmul.f32 -2.0, %v10575_v25  ;;  %10576 = vst [vmem:[#allocation148_spill] sm:$0xff] %v8297_v27  ;;  %5713 = vpow2.f32 %v8084_v23  ;;  %v10578_v21 = vld [vmem:[#allocation149_spill] sm:$0xff]  ;;  %v6206_v18 = vmov 0.0   ;;  %v10580_v29 = vld [vmem:[#allocation156_spill] sm:$0xff] }
 0x26a   :  { %10571 = vst [vmem:[#allocation22_spill] sm:$0xff] %v8280_v45  ;;  %v8300_v15 = vadd.f32 %v10577_v44, %v3153_v55  ;;  %v8307_v10 = vrot.slane %v3669_v51, %v10578_v21  ;;  %987 = vst.msk [vmem:[#allocation2] sm:$0xff] %vm986_vm3, %v6206_v18  ;;  %v10579_v51 = vld [vmem:[#allocation153_spill] sm:$0xff]  ;;  %v10581_v23 = vld [vmem:[#allocation159_spill] sm:$0xff]  ;;  %5715 = vpow2.f32 %v8096_v59 }
 0x26b   :  { %988 = vst.msk [vmem:[#allocation2 + $0x8] sm:$0xff] %vm986_vm3, %v6206_v18  ;;  %989 = vst.msk [vmem:[#allocation2 + $0x10] sm:$0xff] %vm986_vm3, %v6206_v18  ;;  %v10582_v32 = vld [vmem:[#allocation160_spill] sm:$0xff]  ;;  %v10583_v55 = vld [vmem:[#allocation161_spill] sm:$0xff]  ;;  %5717 = vpow2.f32 %v8101_v58 }
 0x26c   :  { %990 = vst.msk [vmem:[#allocation2 + $0x18] sm:$0xff] %vm986_vm3, %v6206_v18  ;;  %991 = vst.msk [vmem:[#allocation2 + $0x20] sm:$0xff] %vm986_vm3, %v6206_v18  ;;  %v10584_v19 = vld [vmem:[#allocation162_spill] sm:$0xff]  ;;  %v10586_v25 = vld [vmem:[#allocation167_spill] sm:$0xff]  ;;  %v3683_v59 = vrot.slane %v8307_v10, %v10578_v21  ;;  %5719 = vpow2.f32 %v8106_v50 }
 0x26d   :  { %992 = vst.msk [vmem:[#allocation2 + $0x28] sm:$0xff] %vm986_vm3, %v6206_v18  ;;  %993 = vst.msk [vmem:[#allocation2 + $0x30] sm:$0xff] %vm986_vm3, %v6206_v18  ;;  %v10585_v1 = vld [vmem:[#allocation166_spill] sm:$0xff]  ;;  %v10587_v44 = vld [vmem:[#allocation176_spill] sm:$0xff]  ;;  %5721 = vpow2.f32 %v8115_v4 }
 0x26e   :  { %994 = vst.msk [vmem:[#allocation2 + $0x38] sm:$0xff] %vm986_vm3, %v6206_v18  ;;  %995 = vst.msk [vmem:[#allocation2 + $0x40] sm:$0xff] %vm986_vm3, %v6206_v18  ;;  %v10589_v45 = vld [vmem:[#allocation187_spill] sm:$0xff]  ;;  %v10590_v13 = vld [vmem:[#allocation188_spill] sm:$0xff]  ;;  %5723 = vpow2.f32 %v8125_v40 }
 0x26f   :  { %996 = vst.msk [vmem:[#allocation2 + $0x48] sm:$0xff] %vm986_vm3, %v6206_v18  ;;  %997 = vst.msk [vmem:[#allocation2 + $0x50] sm:$0xff] %vm986_vm3, %v6206_v18  ;;  %v10591_v27 = vld [vmem:[#allocation191_spill] sm:$0xff]  ;;  %v10592_v22 = vld [vmem:[#allocation192_spill] sm:$0xff]  ;;  %5725 = vpow2.f32 %v8130_v9 }
 0x270   :  { %998 = vst.msk [vmem:[#allocation2 + $0x58] sm:$0xff] %vm986_vm3, %v6206_v18  ;;  %999 = vst.msk [vmem:[#allocation2 + $0x60] sm:$0xff] %vm986_vm3, %v6206_v18  ;;  %v10603_v62 = vld [vmem:[#allocation183_spill] sm:$0xff] }
 0x271   :  { %1000 = vst.msk [vmem:[#allocation2 + $0x68] sm:$0xff] %vm986_vm3, %v6206_v18  ;;  %1001 = vst.msk [vmem:[#allocation2 + $0x70] sm:$0xff] %vm986_vm3, %v6206_v18 }
 0x272   :  { %1002 = vst.msk [vmem:[#allocation2 + $0x78] sm:$0xff] %vm986_vm3, %v6206_v18  ;;  %1003 = vst.msk [vmem:[#allocation2 + $0x80] sm:$0xff] %vm986_vm3, %v6206_v18 }
 0x273   :  { %1004 = vst.msk [vmem:[#allocation2 + $0x88] sm:$0xff] %vm986_vm3, %v6206_v18  ;;  %1005 = vst.msk [vmem:[#allocation2 + $0x90] sm:$0xff] %vm986_vm3, %v6206_v18 }
 0x274   :  { %1006 = vst.msk [vmem:[#allocation2 + $0x98] sm:$0xff] %vm986_vm3, %v6206_v18  ;;  %1007 = vst.msk [vmem:[#allocation2 + $0xa0] sm:$0xff] %vm986_vm3, %v6206_v18 }
 0x275   :  { %1008 = vst.msk [vmem:[#allocation2 + $0xa8] sm:$0xff] %vm986_vm3, %v6206_v18  ;;  %1009 = vst.msk [vmem:[#allocation2 + $0xb0] sm:$0xff] %vm986_vm3, %v6206_v18 }
 0x276   :  { %1010 = vst.msk [vmem:[#allocation2 + $0xb8] sm:$0xff] %vm986_vm3, %v6206_v18  ;;  %1011 = vst.msk [vmem:[#allocation2 + $0xc0] sm:$0xff] %vm986_vm3, %v6206_v18 }
 0x277   :  { %1012 = vst.msk [vmem:[#allocation2 + $0xc8] sm:$0xff] %vm986_vm3, %v6206_v18  ;;  %1013 = vst.msk [vmem:[#allocation2 + $0xd0] sm:$0xff] %vm986_vm3, %v6206_v18 }
 0x278   :  { %1014 = vst.msk [vmem:[#allocation2 + $0xd8] sm:$0xff] %vm986_vm3, %v6206_v18  ;;  %1015 = vst.msk [vmem:[#allocation2 + $0xe0] sm:$0xff] %vm986_vm3, %v6206_v18 }
 0x279   :  { %1016 = vst.msk [vmem:[#allocation2 + $0xe8] sm:$0xff] %vm986_vm3, %v6206_v18  ;;  %1017 = vst.msk [vmem:[#allocation2 + $0xf0] sm:$0xff] %vm986_vm3, %v6206_v18 }
 0x27a   :  { %1018 = vst.msk [vmem:[#allocation2 + $0xf8] sm:$0xff] %vm986_vm3, %v6206_v18  ;;  %1019 = vst.msk [vmem:[#allocation3] sm:$0xff] %vm986_vm3, %v6206_v18 }
 0x27b   :  { %1020 = vst.msk [vmem:[#allocation3 + $0x8] sm:$0xff] %vm986_vm3, %v6206_v18  ;;  %1021 = vst.msk [vmem:[#allocation3 + $0x10] sm:$0xff] %vm986_vm3, %v6206_v18 }
 0x27c   :  { %1022 = vst.msk [vmem:[#allocation3 + $0x18] sm:$0xff] %vm986_vm3, %v6206_v18  ;;  %1023 = vst.msk [vmem:[#allocation3 + $0x20] sm:$0xff] %vm986_vm3, %v6206_v18 }
 0x27d   :  { %1024 = vst.msk [vmem:[#allocation3 + $0x28] sm:$0xff] %vm986_vm3, %v6206_v18  ;;  %1025 = vst.msk [vmem:[#allocation3 + $0x30] sm:$0xff] %vm986_vm3, %v6206_v18 }
 0x27e   :  { %1026 = vst.msk [vmem:[#allocation3 + $0x38] sm:$0xff] %vm986_vm3, %v6206_v18  ;;  %1027 = vst.msk [vmem:[#allocation3 + $0x40] sm:$0xff] %vm986_vm3, %v6206_v18 }
 0x27f   :  { %1028 = vst.msk [vmem:[#allocation3 + $0x48] sm:$0xff] %vm986_vm3, %v6206_v18  ;;  %1029 = vst.msk [vmem:[#allocation3 + $0x50] sm:$0xff] %vm986_vm3, %v6206_v18 }
 0x280   :  { %1030 = vst.msk [vmem:[#allocation3 + $0x58] sm:$0xff] %vm986_vm3, %v6206_v18  ;;  %1031 = vst.msk [vmem:[#allocation3 + $0x60] sm:$0xff] %vm986_vm3, %v6206_v18 }
 0x281   :  { %1032 = vst.msk [vmem:[#allocation3 + $0x68] sm:$0xff] %vm986_vm3, %v6206_v18  ;;  %1033 = vst.msk [vmem:[#allocation3 + $0x70] sm:$0xff] %vm986_vm3, %v6206_v18 }
 0x282   :  { %1034 = vst.msk [vmem:[#allocation3 + $0x78] sm:$0xff] %vm986_vm3, %v6206_v18  ;;  %1035 = vst.msk [vmem:[#allocation3 + $0x80] sm:$0xff] %vm986_vm3, %v6206_v18 }
 0x283   :  { %1036 = vst.msk [vmem:[#allocation3 + $0x88] sm:$0xff] %vm986_vm3, %v6206_v18  ;;  %1037 = vst.msk [vmem:[#allocation3 + $0x90] sm:$0xff] %vm986_vm3, %v6206_v18 }
 0x284   :  { %1038 = vst.msk [vmem:[#allocation3 + $0x98] sm:$0xff] %vm986_vm3, %v6206_v18  ;;  %1039 = vst.msk [vmem:[#allocation3 + $0xa0] sm:$0xff] %vm986_vm3, %v6206_v18 }
 0x285   :  { %1040 = vst.msk [vmem:[#allocation3 + $0xa8] sm:$0xff] %vm986_vm3, %v6206_v18  ;;  %1041 = vst.msk [vmem:[#allocation3 + $0xb0] sm:$0xff] %vm986_vm3, %v6206_v18 }
 0x286   :  { %1042 = vst.msk [vmem:[#allocation3 + $0xb8] sm:$0xff] %vm986_vm3, %v6206_v18  ;;  %1043 = vst.msk [vmem:[#allocation3 + $0xc0] sm:$0xff] %vm986_vm3, %v6206_v18 }
 0x287   :  { %1044 = vst.msk [vmem:[#allocation3 + $0xc8] sm:$0xff] %vm986_vm3, %v6206_v18  ;;  %1045 = vst.msk [vmem:[#allocation3 + $0xd0] sm:$0xff] %vm986_vm3, %v6206_v18 }
 0x288   :  { %1046 = vst.msk [vmem:[#allocation3 + $0xd8] sm:$0xff] %vm986_vm3, %v6206_v18  ;;  %1047 = vst.msk [vmem:[#allocation3 + $0xe0] sm:$0xff] %vm986_vm3, %v6206_v18 }
 0x289   :  { %1048 = vst.msk [vmem:[#allocation3 + $0xe8] sm:$0xff] %vm986_vm3, %v6206_v18  ;;  %1049 = vst.msk [vmem:[#allocation3 + $0xf0] sm:$0xff] %vm986_vm3, %v6206_v18 }
 0x28a   :  { %1050 = vst.msk [vmem:[#allocation3 + $0xf8] sm:$0xff] %vm986_vm3, %v6206_v18  ;;  %1439 = vst.msk [vmem:[#allocation4] sm:$0xff] %vm986_vm3, %v10579_v51  ;;  %v10588_v18 = vld [vmem:[#allocation179_spill] sm:$0xff] }
 0x28b   :  { %2344 = vst.msk [vmem:[#allocation6] sm:$0xff] %vm986_vm3, %v10580_v29  ;;  %1440 = vst.msk [vmem:[#allocation4 + $0x8] sm:$0xff] %vm986_vm3, %v10581_v23 }
 0x28c   :  { %1441 = vst.msk [vmem:[#allocation4 + $0x10] sm:$0xff] %vm986_vm3, %v10582_v32  ;;  %2345 = vst.msk [vmem:[#allocation6 + $0x8] sm:$0xff] %vm986_vm3, %v10583_v55 }
 0x28d   :  { %2346 = vst.msk [vmem:[#allocation6 + $0x10] sm:$0xff] %vm986_vm3, %v10584_v19  ;;  %1442 = vst.msk [vmem:[#allocation4 + $0x18] sm:$0xff] %vm986_vm3, %v10585_v1  ;;  %v10593_v1 = vld [vmem:[#allocation168_spill] sm:$0xff] }
 0x28e   :  { %2347 = vst.msk [vmem:[#allocation6 + $0x18] sm:$0xff] %vm986_vm3, %v10586_v25  ;;  %2348 = vst.msk [vmem:[#allocation6 + $0x20] sm:$0xff] %vm986_vm3, %v10587_v44  ;;  %v10594_v25 = vld [vmem:[#allocation177_spill] sm:$0xff]  ;;  %v10595_v44 = vld [vmem:[#allocation150_spill] sm:$0xff] }
 0x28f   :  { %1443 = vst.msk [vmem:[#allocation4 + $0x20] sm:$0xff] %vm986_vm3, %v10588_v18  ;;  %1444 = vst.msk [vmem:[#allocation4 + $0x28] sm:$0xff] %vm986_vm3, %v10589_v45  ;;  %v10596_v18 = vld [vmem:[#allocation151_spill] sm:$0xff]  ;;  %v10597_v45 = vld [vmem:[#allocation197_spill] sm:$0xff] }
 0x290   :  { %2349 = vst.msk [vmem:[#allocation6 + $0x28] sm:$0xff] %vm986_vm3, %v10590_v13  ;;  %2350 = vst.msk [vmem:[#allocation6 + $0x30] sm:$0xff] %vm986_vm3, %v10591_v27  ;;  %v10598_v13 = vld [vmem:[#allocation198_spill] sm:$0xff]  ;;  %v10606_v27 = vld [vmem:[#allocation147_spill] sm:$0xff] }
 0x291   :  { %1445 = vst.msk [vmem:[#allocation4 + $0x30] sm:$0xff] %vm986_vm3, %v10592_v22  ;;  %1446 = vst.msk [vmem:[#allocation4 + $0x38] sm:$0xff] %vm986_vm3, %v10593_v1  ;;  %v3155_v1 = vadd.f32 %v10603_v62, %v8300_v15  ;;  %v3176_v22 = vadd.f32 %v8137_v30, %v8303_v24  ;;  %v10608_v30 = vld [vmem:[#allocation186_spill] sm:$0xff] }
 0x292   :  { %2351 = vst.msk [vmem:[#allocation6 + $0x38] sm:$0xff] %vm986_vm3, %v10594_v25  ;;  %2352 = vst.msk [vmem:[#allocation6 + $0x40] sm:$0xff] %vm986_vm3, %v10595_v44  ;;  %v1148_v44 = vsub.f32 %v10601_v48, %v10579_v51  ;;  %v10602_v25 = vld [vmem:[#allocation18_spill] sm:$0xff] }
 0x293   :  { %1447 = vst.msk [vmem:[#allocation4 + $0x40] sm:$0xff] %vm986_vm3, %v10596_v18  ;;  %1448 = vst.msk [vmem:[#allocation4 + $0x48] sm:$0xff] %vm986_vm3, %v10597_v45  ;;  %v8487_v18 = vpop.xlane.xlu0 %1088  ;;  %v8489_v45 = vpop.eup %5695  ;;  %v3810_v47 = vadd.s32 144, %v10602_v25  ;;  %v3156_v15 = vadd.f32 %v10608_v30, %v3155_v1  ;;  %v3177_v58 = vadd.f32 %v8148_v42, %v3176_v22  ;;  %v10614_v30 = vld [vmem:[#allocation155_spill] sm:$0xff]  ;;  %5727 = vpow2.f32 %v8135_v38 }
 0x294   :  { %2353 = vst.msk [vmem:[#allocation6 + $0x48] sm:$0xff] %vm986_vm3, %v10598_v13  ;;  %10599 = vst [vmem:[#allocation152_spill] sm:$0xff] %v8487_v18  ;;  %v1147_v13 = vsub.f32 %v10600_v14, %v10579_v51  ;;  %v8499_v20 = vpop.eup %5697  ;;  %v8508_v14 = vpop.xlane.xlu1 %3995  ;;  %v4244_v42 = vmul.f32 -2.0, %v10614_v30  ;;  %5729 = vpow2.f32 %v8144_v12 }
 0x295   :  { %1451 = vst.msk [vmem:[#allocation4 + $0x60] sm:$0xff] %vm986_vm3, %v8487_v18  ;;  %10604 = vst [vmem:[#allocation181_spill] sm:$0xff] %v8508_v14  ;;  %v8510_v48 = vpop.eup %5699  ;;  %v8515_v18 = vmul.f32 1.442695, %v1148_v44  ;;  %vm3864_vm4 = vcmp.eq.s32.totalorder %v3810_v47, %v10606_v27  ;;  %v10612_v47 = vld [vmem:[#allocation154_spill] sm:$0xff]  ;;  %v10613_v14 = vld [vmem:[#allocation93_spill] sm:$0xff]  ;;  %v3178_v24 = vadd.f32 %v8166_v2, %v3177_v58  ;;  %5731 = vpow2.f32 %v8154_v43 }
 0x296   :  { %10605 = vst [vmem:[#allocation153_spill] sm:$0xff] %v8510_v48  ;;  %v8513_v51 = vmul.f32 1.442695, %v1147_v13  ;;  %v8518_v62 = vpop.eup %5701  ;;  %3691 = vst.msk [vmem:[#allocation10] sm:$0x3] %vm7845_vm2, %v3683_v59  ;;  %v4088_v10 = vsel %vm3864_vm4, %v10498_v37, 0.0  ;;  %5733 = vpow2.f32 %v8159_v63 }
 0x297   :  { %10607 = vst [vmem:[#allocation156_spill] sm:$0xff] %v8518_v62  ;;  %v8526_v50 = vpop.xlane.xlu0 %4155  ;;  %v8528_v13 = vpop.eup %5703  ;;  %4170 = vadd.xlane.f32.xlu1 %v4088_v10  ;;  %v4372_v44 = vmul.f32 -2.0, %v10612_v47  ;;  %v3928_v1 = vsel %vm3864_vm4, %v10613_v14, 0.0  ;;  %v3157_v4 = vrot.slane %v3156_v15, 4  ;;  %v10615_v59 = vld [vmem:[#allocation91_spill] sm:$0xff]  ;;  %v4211_v10 = vld [vmem:[#allocation2] sm:$0xff]  ;;  %v2053_v62 = vsub.f32 %v10463_v8, %v10580_v29 }
 0x298   :  { %10610 = vst [vmem:[#allocation159_spill] sm:$0xff] %v8526_v50  ;;  %10611 = vst [vmem:[#allocation160_spill] sm:$0xff] %v8528_v13  ;;  %v5706_v22 = vpop.eup %5705  ;;  %4010 = vadd.xlane.f32.xlu0 %v3928_v1  ;;  %v2010_v50 = vmax.f32 %v10615_v59, %v10498_v37  ;;  %v8538_v21 = vpop.xlane.xlu1 %1091  ;;  %v4340_v47 = vld [vmem:[#allocation3] sm:$0xff]  ;;  %v3179_v37 = vadd.f32 %v8177_v53, %v3178_v24  ;;  %v4212_v59 = vld [vmem:[#allocation2 + $0x8] sm:$0xff]  ;;  %v4275_v8 = vadd.f32 %v8295_v34, %v4211_v10  ;;  %vm5236_vm4 = vcmask 0  }
 0x299   :  { %v5708_v40 = vpop.eup %5707  ;;  %v10616_v13 = vld [vmem:[#allocation20_spill] sm:$0xff]  ;;  %1452 = vst.msk [vmem:[#allocation4 + $0x68] sm:$0xff] %vm986_vm3, %v8538_v21  ;;  %v3158_v1 = vadd.f32 %v3157_v4, %v3156_v15  ;;  %v4341_v24 = vld [vmem:[#allocation3 + $0x8] sm:$0xff]  ;;  %5735 = vpow2.f32 %v8164_v3  ;;  %v4213_v3 = vld [vmem:[#allocation2 + $0x10] sm:$0xff] }
 0x29a   :  { %v2052_v30 = vsub.f32 %v10616_v13, %v10580_v29  ;;  %v10617_v2 = vld [vmem:[#allocation92_spill] sm:$0xff]  ;;  %v5710_v58 = vpop.eup %5709  ;;  %v3627_v38 = vadd.f32 %v5708_v40, %v5706_v22  ;;  %v4404_v29 = vadd.f32 %v4372_v44, %v4340_v47  ;;  %v3180_v53 = vadd.f32 %v8195_v57, %v3179_v37  ;;  %4308 = vst.msk [vmem:[#allocation2] sm:$0xff] %vm986_vm3, %v4275_v8  ;;  %v10618_v37 = vld [vmem:[#allocation157_spill] sm:$0xff] }
 0x29b   :  { %v1105_v9 = vmax.f32 %v10617_v2, %v10613_v14  ;;  %v8551_v48 = vpop.xlane.xlu0 %1996  ;;  %v5712_v13 = vpop.eup %5711  ;;  %v4276_v14 = vadd.f32 %v4244_v42, %v4212_v59  ;;  %2011 = vmax.xlane.f32.xlu1 %v2010_v50  ;;  %v3159_v4 = vrot.slane %v3158_v1, 2  ;;  %v8567_v50 = vmul.f32 1.442695, %v2053_v62  ;;  %v10619_v62 = vld [vmem:[#allocation158_spill] sm:$0xff] }
 0x29c   :  { %2357 = vst.msk [vmem:[#allocation6 + $0x68] sm:$0xff] %vm986_vm3, %v8551_v48  ;;  %v5714_v15 = vpop.eup %5713  ;;  %v3628_v12 = vadd.f32 %v5710_v58, %v3627_v38  ;;  %v8559_v22 = vpop.xlane.xlu1 %4158  ;;  %4436 = vst.msk [vmem:[#allocation3] sm:$0xff] %vm986_vm3, %v4404_v29  ;;  %v8565_v34 = vmul.f32 1.442695, %v2052_v30  ;;  %v4373_v63 = vmul.f32 -2.0, %v10618_v37  ;;  %v3181_v42 = vadd.f32 %v8206_v56, %v3180_v53  ;;  %v10621_v53 = vld [vmem:[#allocation97_spill] sm:$0xff] }
 0x29d   :  { %1106 = vmax.xlane.f32.xlu0 %v1105_v9  ;;  %v5716_v43 = vpop.eup %5715  ;;  %4309 = vst.msk [vmem:[#allocation2 + $0x8] sm:$0xff] %vm986_vm3, %v4276_v14  ;;  %v3160_v44 = vadd.f32 %v3159_v4, %v3158_v1  ;;  %5737 = vpow2.f32 %v8173_v11  ;;  %v3811_v47 = vadd.s32 152, %v10602_v25  ;;  %v4245_v30 = vmul.f32 -2.0, %v10619_v62  ;;  %v10622_v37 = vld [vmem:[#allocation25_spill] sm:$0xff] }
 0x29e   :  { %v5718_v57 = vpop.eup %5717  ;;  %v3629_v59 = vadd.f32 %v5712_v13, %v3628_v12  ;;  %5739 = vpow2.f32 %v8183_v60  ;;  %v4405_v14 = vadd.f32 %v4373_v63, %v4341_v24  ;;  %v3182_v1 = vadd.f32 %v8224_v16, %v3181_v42  ;;  %v10620_v13 = vld [vmem:[#allocation23_spill] sm:$0xff]  ;;  %v10625_v62 = vld [vmem:[#allocation29_spill] sm:$0xff] }
 0x29f   :  { %v8572_v40 = vpop.xlane.xlu0 %3998  ;;  %v5720_v10 = vpop.eup %5719  ;;  %v3161_v58 = vrot.slane %v3160_v44, 1  ;;  %5741 = vpow2.f32 %v8188_v46  ;;  %vm3866_vm5 = vcmp.eq.s32.totalorder %v3811_v47, %v10606_v27  ;;  %v4277_v60 = vadd.f32 %v4245_v30, %v4213_v3 }
 0x2a0   :  { %v5722_v9 = vpop.eup %5721  ;;  %v3630_v56 = vadd.f32 %v5714_v15, %v3629_v59  ;;  %v8579_v11 = vpop.xlane.xlu1 %1999  ;;  %5743 = vpow2.f32 %v8193_v49  ;;  %4437 = vst.msk [vmem:[#allocation3 + $0x8] sm:$0xff] %vm986_vm3, %v4405_v14  ;;  %v1149_v8 = vsub.f32 %v10620_v13, %v10581_v23  ;;  %v3183_v29 = vadd.f32 %v8235_v26, %v3182_v1  ;;  %v10623_v59 = vld [vmem:[#allocation96_spill] sm:$0xff] }
 0x2a1   :  { %v5724_v38 = vpop.eup %5723  ;;  %2358 = vst.msk [vmem:[#allocation6 + $0x70] sm:$0xff] %vm986_vm3, %v8579_v11  ;;  %v8590_v46 = vadd.f32 %v3161_v58, %v3160_v44  ;;  %5745 = vpow2.f32 %v8202_v52  ;;  %v3930_v12 = vsel %vm3866_vm5, %v10621_v53, 0.0  ;;  %4310 = vst.msk [vmem:[#allocation2 + $0x10] sm:$0xff] %vm986_vm3, %v4277_v60  ;;  %v4090_v24 = vsel %vm3866_vm5, %v10499_v54, 0.0  ;;  %v10628_v13 = vld [vmem:[#allocation24_spill] sm:$0xff] }
 0x2a2   :  { %v8588_v16 = vpop.eup %5725  ;;  %v3631_v49 = vadd.f32 %v5716_v43, %v3630_v56  ;;  %5747 = vpow2.f32 %v8212_v39  ;;  %v1150_v63 = vsub.f32 %v10622_v37, %v10581_v23  ;;  %v3184_v26 = vadd.f32 %v8253_v17, %v3183_v29  ;;  %4013 = vadd.xlane.f32.xlu1 %v3930_v12  ;;  %4173 = vadd.xlane.f32.xlu0 %v4090_v24  ;;  %v10624_v17 = vld [vmem:[#allocation28_spill] sm:$0xff]  ;;  %v10627_v56 = vld [vmem:[#allocation95_spill] sm:$0xff] }
 0x2a3   :  { %v8594_v15 = vpop.xlane.xlu0 %1094  ;;  %v8596_v4 = vpop.eup %5727  ;;  %5749 = vpow2.f32 %v8217_v35  ;;  %v8610_v39 = vmul.f32 1.442695, %v1149_v8  ;;  %v1108_v3 = vmax.f32 %v10623_v59, %v10621_v53  ;;  %v1151_v14 = vsub.f32 %v10624_v17, %v10582_v32  ;;  %v10635_v17 = vld [vmem:[#allocation196_spill] sm:$0xff] }
 0x2a4   :  { %1453 = vst.msk [vmem:[#allocation4 + $0x70] sm:$0xff] %vm986_vm3, %v8594_v15  ;;  %v8606_v52 = vpop.eup %5729  ;;  %v3632_v43 = vadd.f32 %v5718_v57, %v3631_v49  ;;  %v8612_v44 = vpop.xlane.xlu1 %4001  ;;  %5751 = vpow2.f32 %v8222_v0  ;;  %v8617_v23 = vmul.f32 1.442695, %v1150_v63  ;;  %v3185_v57 = vadd.f32 %v8264_v41, %v3184_v26  ;;  %v10677_v59 = vld [vmem:[#allocation108_spill] sm:$0xff] }
 0x2a5   :  { %v8614_v42 = vpop.eup %5731  ;;  %5753 = vpow2.f32 %v8231_v6  ;;  %v1152_v30 = vsub.f32 %v10625_v62, %v10582_v32  ;;  %v8634_v1 = vmul.f32 1.442695, %v1151_v14  ;;  %v2013_v60 = vmax.f32 %v10627_v56, %v10499_v54  ;;  %v10671_v56 = vld [vmem:[#allocation109_spill] sm:$0xff] }
 0x2a6   :  { %v8623_v35 = vpop.eup %5733  ;;  %v3633_v47 = vadd.f32 %v5720_v10, %v3632_v43  ;;  %5755 = vpow2.f32 %v8241_v31  ;;  %v2054_v41 = vsub.f32 %v10628_v13, %v10583_v55  ;;  %v3186_v6 = vadd.f32 %v8282_v7, %v3185_v57  ;;  %1109 = vmax.xlane.f32.xlu1 %v1108_v3  ;;  %v10633_v43 = vld [vmem:[#allocation30_spill] sm:$0xff] }
 0x2a7   :  { %v8629_v58 = vpop.xlane.xlu0 %4161  ;;  %v8631_v0 = vpop.eup %5735  ;;  %5757 = vpow2.f32 %v8246_v61  ;;  %v8644_v10 = vmul.f32 1.442695, %v1152_v30  ;;  %2014 = vmax.xlane.f32.xlu0 %v2013_v60  ;;  %v2055_v49 = vsub.f32 %v10464_v28, %v10583_v55  ;;  %v3812_v7 = vadd.s32 160, %v10602_v25  ;;  %v10632_v55 = vld [vmem:[#allocation172_spill] sm:$0xff]  ;;  %v10636_v57 = vld [vmem:[#allocation102_spill] sm:$0xff] }
 0x2a8   :  { %10626 = vst [vmem:[#allocation161_spill] sm:$0xff] %v8629_v58  ;;  %v8640_v8 = vpop.eup %5737  ;;  %v3634_v32 = vadd.f32 %v5722_v9, %v3633_v47  ;;  %v8646_v29 = vpop.xlane.xlu1 %1097  ;;  %5759 = vpow2.f32 %v8251_v5  ;;  %v8653_v12 = vmul.f32 1.442695, %v2054_v41  ;;  %v3187_v9 = vadd.f32 %v8291_v36, %v3186_v6  ;;  %v10630_v5 = vld [vmem:[#allocation27_spill] sm:$0xff]  ;;  %v10634_v36 = vld [vmem:[#allocation148_spill] sm:$0xff]  ;;  %v10638_v60 = vld [vmem:[#allocation22_spill] sm:$0xff] }
 0x2a9   :  { %10629 = vst [vmem:[#allocation162_spill] sm:$0xff] %v8646_v29  ;;  %v8648_v31 = vpop.eup %5739  ;;  %1454 = vst.msk [vmem:[#allocation4 + $0x78] sm:$0xff] %vm986_vm3, %v8646_v29  ;;  %5761 = vpow2.f32 %v8260_v33  ;;  %v2056_v37 = vsub.f32 %v10630_v5, %v10584_v19  ;;  %v8669_v26 = vmul.f32 1.442695, %v2055_v49  ;;  %vm3868_vm6 = vcmp.eq.s32.totalorder %v3812_v7, %v10606_v27  ;;  %v10639_v41 = vld [vmem:[#allocation101_spill] sm:$0xff]  ;;  %v4214_v5 = vld [vmem:[#allocation2 + $0x18] sm:$0xff] }
 0x2aa   :  { %v8658_v61 = vpop.eup %5741  ;;  %v3635_v24 = vadd.f32 %v5724_v38, %v3634_v32  ;;  %5763 = vpow2.f32 %v10632_v55  ;;  %v2057_v3 = vsub.f32 %v10633_v43, %v10584_v19  ;;  %v3188_v38 = vadd.f32 %v10634_v36, %v3187_v9  ;;  %v4342_v32 = vld [vmem:[#allocation3 + $0x10] sm:$0xff]  ;;  %v10643_v36 = vld [vmem:[#allocation164_spill] sm:$0xff] }
 0x2ab   :  { %v8664_v63 = vpop.xlane.xlu0 %2002  ;;  %v8666_v28 = vpop.eup %5743  ;;  %5765 = vpow2.f32 %v10635_v17  ;;  %v4092_v47 = vsel %vm3868_vm6, %v10636_v57, 0.0  ;;  %v8687_v19 = vmul.f32 1.442695, %v2056_v37  ;;  %v3932_v6 = vsel %vm3868_vm6, %v10639_v41, 0.0  ;;  %v10640_v9 = vld [vmem:[#allocation163_spill] sm:$0xff] }
 0x2ac   :  { %10631 = vst [vmem:[#allocation19_spill] sm:$0xff] %v8664_v63  ;;  %2359 = vst.msk [vmem:[#allocation6 + $0x78] sm:$0xff] %vm986_vm3, %v8664_v63  ;;  %v8676_v33 = vpop.eup %5745  ;;  %v3636_v14 = vadd.f32 %v8588_v16, %v3635_v24  ;;  %v8682_v62 = vpop.xlane.xlu1 %4164  ;;  %5767 = vpow2.f32 %v10638_v60  ;;  %4176 = vadd.xlane.f32.xlu1 %v4092_v47  ;;  %v8689_v13 = vmul.f32 1.442695, %v2057_v3  ;;  %v3189_v16 = vadd.f32 %v8489_v45, %v3188_v38  ;;  %v10642_v43 = vld [vmem:[#allocation99_spill] sm:$0xff]  ;;  %v10644_v45 = vld [vmem:[#allocation100_spill] sm:$0xff] }
 0x2ad   :  { %10637 = vst [vmem:[#allocation21_spill] sm:$0xff] %v8682_v62  ;;  %v8684_v30 = vpop.eup %5747  ;;  %5769 = vpow2.f32 %v8513_v51  ;;  %4016 = vadd.xlane.f32.xlu0 %v3932_v6  ;;  %v4374_v24 = vmul.f32 -2.0, %v10640_v9  ;;  %v2016_v3 = vmax.f32 %v10642_v43, %v10636_v57  ;;  %v4246_v17 = vmul.f32 -2.0, %v10643_v36  ;;  %v4343_v60 = vld [vmem:[#allocation3 + $0x18] sm:$0xff]  ;;  %v10646_v36 = vld [vmem:[#allocation165_spill] sm:$0xff] }
 0x2ae   :  { %v8692_v49 = vpop.eup %5749  ;;  %v3637_v7 = vadd.f32 %v8596_v4, %v3636_v14  ;;  %5771 = vpow2.f32 %v8515_v18  ;;  %v1111_v4 = vmax.f32 %v10644_v45, %v10639_v41  ;;  %v3190_v51 = vadd.f32 %v8499_v20, %v3189_v16  ;;  %v10649_v16 = vld [vmem:[#allocation32_spill] sm:$0xff] }
 0x2af   :  { %v8698_v55 = vpop.xlane.xlu0 %4004  ;;  %v8700_v37 = vpop.eup %5751  ;;  %5773 = vpow2.f32 %v8565_v34  ;;  %v4406_v47 = vadd.f32 %v4374_v24, %v4342_v32  ;;  %v4278_v9 = vadd.f32 %v4246_v17, %v4214_v5  ;;  %v4375_v41 = vmul.f32 -2.0, %v10646_v36  ;;  %v10647_v34 = vld [vmem:[#allocation153_spill] sm:$0xff]  ;;  %v10655_v36 = vld [vmem:[#allocation106_spill] sm:$0xff] }
 0x2b0   :  { %10641 = vst [vmem:[#allocation183_spill] sm:$0xff] %v8698_v55  ;;  %v8708_v38 = vpop.eup %5753  ;;  %v3638_v14 = vadd.f32 %v8606_v52, %v3637_v7  ;;  %v8713_v6 = vpop.xlane.xlu1 %2005  ;;  %5775 = vpow2.f32 %v8567_v50  ;;  %2017 = vmax.xlane.f32.xlu1 %v2016_v3  ;;  %v3813_v45 = vadd.s32 168, %v10602_v25  ;;  %v3191_v52 = vadd.f32 %v10647_v34, %v3190_v51  ;;  %v10648_v50 = vld [vmem:[#allocation166_spill] sm:$0xff] }
 0x2b1   :  { %10645 = vst [vmem:[#allocation186_spill] sm:$0xff] %v8713_v6  ;;  %v8715_v18 = vpop.eup %5755  ;;  %2360 = vst.msk [vmem:[#allocation6 + $0x80] sm:$0xff] %vm986_vm3, %v8713_v6  ;;  %5777 = vpow2.f32 %v8610_v39  ;;  %1112 = vmax.xlane.f32.xlu0 %v1111_v4  ;;  %v1153_v7 = vsub.f32 %v10649_v16, %v10648_v50  ;;  %v4407_v3 = vadd.f32 %v4375_v41, %v4343_v60  ;;  %v10652_v4 = vld [vmem:[#allocation156_spill] sm:$0xff]  ;;  %v10658_v16 = vld [vmem:[#allocation31_spill] sm:$0xff]  ;;  %v3818_v55 = vadd.s32 208, %v10602_v25 }
 0x2b2   :  { %v8722_v20 = vpop.eup %5757  ;;  %v3639_v32 = vadd.f32 %v8614_v42, %v3638_v14  ;;  %4438 = vst.msk [vmem:[#allocation3 + $0x10] sm:$0xff] %vm986_vm3, %v4406_v47  ;;  %5779 = vpow2.f32 %v8617_v23  ;;  %4311 = vst.msk [vmem:[#allocation2 + $0x18] sm:$0xff] %vm986_vm3, %v4278_v9  ;;  %vm3870_vm7 = vcmp.eq.s32.totalorder %v3813_v45, %v10606_v27  ;;  %v10651_v42 = vld [vmem:[#allocation33_spill] sm:$0xff]  ;;  %v3192_v51 = vadd.f32 %v10652_v4, %v3191_v52 }
 0x2b3   :  { %v8730_v24 = vpop.xlane.xlu0 %1100  ;;  %v8732_v5 = vpop.eup %5759  ;;  %v1154_v39 = vsub.f32 %v10651_v42, %v10648_v50  ;;  %5781 = vpow2.f32 %v8634_v1  ;;  %v10653_v23 = vld [vmem:[#allocation105_spill] sm:$0xff]  ;;  %4439 = vst.msk [vmem:[#allocation3 + $0x18] sm:$0xff] %vm986_vm3, %v4407_v3  ;;  %v1223_v45 = vmul.f32 1.442695, %v1153_v7  ;;  %v4094_v34 = vsel %vm3870_vm7, %v10655_v36, 0.0  ;;  %v10657_v50 = vld [vmem:[#allocation167_spill] sm:$0xff] }
 0x2b4   :  { %10650 = vst [vmem:[#allocation154_spill] sm:$0xff] %v8730_v24  ;;  %1455 = vst.msk [vmem:[#allocation4 + $0x80] sm:$0xff] %vm986_vm3, %v8730_v24  ;;  %v8741_v17 = vpop.eup %5761  ;;  %v3640_v14 = vadd.f32 %v8623_v35, %v3639_v32  ;;  %v3934_v47 = vsel %vm3870_vm7, %v10653_v23, 0.0  ;;  %v8747_v9 = vpop.xlane.xlu1 %4007  ;;  %5783 = vpow2.f32 %v8644_v10  ;;  %v10656_v35 = vld [vmem:[#allocation160_spill] sm:$0xff]  ;;  %v2058_v42 = vsub.f32 %v10658_v16, %v10657_v50  ;;  %v10660_v7 = vld [vmem:[#allocation34_spill] sm:$0xff] }
 0x2b5   :  { %10654 = vst [vmem:[#allocation155_spill] sm:$0xff] %v8747_v9  ;;  %v8749_v41 = vpop.eup %5763  ;;  %4019 = vadd.xlane.f32.xlu1 %v3934_v47  ;;  %v1225_v60 = vmul.f32 1.442695, %v1154_v39  ;;  %v3193_v32 = vadd.f32 %v10656_v35, %v3192_v51  ;;  %5785 = vpow2.f32 %v8653_v12  ;;  %4179 = vadd.xlane.f32.xlu0 %v4094_v34  ;;  %v4215_v10 = vld [vmem:[#allocation2 + $0x20] sm:$0xff]  ;;  %v2059_v39 = vsub.f32 %v10660_v7, %v10657_v50  ;;  %v10664_v7 = vld [vmem:[#allocation103_spill] sm:$0xff] }
 0x2b6   :  { %v8754_v52 = vpop.eup %5765  ;;  %v3641_v1 = vadd.f32 %v8631_v0, %v3640_v14  ;;  %5787 = vpow2.f32 %v8669_v26  ;;  %v10661_v51 = vld [vmem:[#allocation104_spill] sm:$0xff]  ;;  %v10662_v0 = vld [vmem:[#allocation169_spill] sm:$0xff]  ;;  %v2128_v16 = vmul.f32 1.442695, %v2058_v42  ;;  %v10665_v42 = vld [vmem:[#allocation175_spill] sm:$0xff]  ;;  %vm3880_vm12 = vcmp.eq.s32.totalorder %v3818_v55, %v10606_v27 }
 0x2b7   :  { %v8761_v4 = vpop.xlane.xlu0 %4167  ;;  %v8763_v3 = vpop.eup %5767  ;;  %v1114_v47 = vmax.f32 %v10661_v51, %v10653_v23  ;;  %v4247_v14 = vmul.f32 -2.0, %v10662_v0  ;;  %v3194_v34 = vrot.slane %v3193_v32, 4  ;;  %5789 = vpow2.f32 %v8687_v19  ;;  %v4344_v23 = vld [vmem:[#allocation3 + $0x20] sm:$0xff]  ;;  %v10730_v55 = vld [vmem:[#allocation123_spill] sm:$0xff] }
 0x2b8   :  { %10659 = vst [vmem:[#allocation20_spill] sm:$0xff] %v8761_v4  ;;  %v8771_v12 = vpop.eup %5769  ;;  %v3642_v35 = vadd.f32 %v8640_v8, %v3641_v1  ;;  %v8775_v57 = vpop.xlane.xlu1 %1103  ;;  %5791 = vpow2.f32 %v8689_v13  ;;  %v2130_v26 = vmul.f32 1.442695, %v2059_v39  ;;  %v2019_v0 = vmax.f32 %v10664_v7, %v10655_v36  ;;  %v10667_v39 = vld [vmem:[#allocation176_spill] sm:$0xff]  ;;  %v10670_v36 = vld [vmem:[#allocation110_spill] sm:$0xff] }
 0x2b9   :  { %10663 = vst [vmem:[#allocation157_spill] sm:$0xff] %v8775_v57  ;;  %v8777_v43 = vpop.eup %5771  ;;  %1115 = vmax.xlane.f32.xlu1 %v1114_v47  ;;  %v4279_v50 = vadd.f32 %v4247_v14, %v4215_v10  ;;  %1456 = vst.msk [vmem:[#allocation4 + $0x88] sm:$0xff] %vm986_vm3, %v8775_v57  ;;  %v3195_v19 = vadd.f32 %v3194_v34, %v3193_v32  ;;  %5793 = vpow2.f32 %v1223_v45  ;;  %v4376_v51 = vmul.f32 -2.0, %v10665_v42  ;;  %v10668_v47 = vld [vmem:[#allocation35_spill] sm:$0xff]  ;;  %v10669_v32 = vld [vmem:[#allocation38_spill] sm:$0xff] }
 0x2ba   :  { %v8784_v8 = vpop.eup %5773  ;;  %v3643_v1 = vadd.f32 %v8648_v31, %v3642_v35  ;;  %5795 = vpow2.f32 %v1225_v60  ;;  %2020 = vmax.xlane.f32.xlu0 %v2019_v0  ;;  %v3814_v10 = vadd.s32 176, %v10602_v25  ;;  %v2060_v14 = vsub.f32 %v10668_v47, %v10667_v39 }
 0x2bb   :  { %v8788_v54 = vpop.xlane.xlu0 %2008  ;;  %v8790_v13 = vpop.eup %5775  ;;  %4312 = vst.msk [vmem:[#allocation2 + $0x20] sm:$0xff] %vm986_vm3, %v4279_v50  ;;  %v2061_v34 = vsub.f32 %v10669_v32, %v10667_v39  ;;  %v3196_v45 = vrot.slane %v3195_v19, 2  ;;  %5797 = vpow2.f32 %v2128_v16  ;;  %v4408_v60 = vadd.f32 %v4376_v51, %v4344_v23  ;;  %v10672_v23 = vld [vmem:[#allocation179_spill] sm:$0xff]  ;;  %v10673_v51 = vld [vmem:[#allocation36_spill] sm:$0xff] }
 0x2bc   :  { %10666 = vst [vmem:[#allocation158_spill] sm:$0xff] %v8788_v54  ;;  %2361 = vst.msk [vmem:[#allocation6 + $0x88] sm:$0xff] %vm986_vm3, %v8788_v54  ;;  %v8800_v31 = vpop.eup %5777  ;;  %v3644_v35 = vadd.f32 %v8658_v61, %v3643_v1  ;;  %5799 = vpow2.f32 %v2130_v26  ;;  %vm3872_vm8 = vcmp.eq.s32.totalorder %v3814_v10, %v10606_v27  ;;  %v2132_v0 = vmul.f32 1.442695, %v2060_v14  ;;  %v10674_v1 = vld [vmem:[#allocation37_spill] sm:$0xff] }
 0x2bd   :  { %v8803_v50 = vpop.eup %5779  ;;  %v2134_v42 = vmul.f32 1.442695, %v2061_v34  ;;  %v3197_v39 = vadd.f32 %v3196_v45, %v3195_v19  ;;  %4440 = vst.msk [vmem:[#allocation3 + $0x20] sm:$0xff] %vm986_vm3, %v4408_v60  ;;  %v4096_v7 = vsel %vm3872_vm8, %v10670_v36, 0.0  ;;  %v3936_v61 = vsel %vm3872_vm8, %v10671_v56, 0.0  ;;  %v10675_v19 = vld [vmem:[#allocation107_spill] sm:$0xff] }
 0x2be   :  { %v8806_v47 = vpop.eup %5781  ;;  %v3645_v32 = vadd.f32 %v8666_v28, %v3644_v35  ;;  %4182 = vadd.xlane.f32.xlu1 %v4096_v7  ;;  %5801 = vpow2.f32 %v2132_v0  ;;  %4022 = vadd.xlane.f32.xlu0 %v3936_v61  ;;  %v1155_v26 = vsub.f32 %v10673_v51, %v10672_v23  ;;  %v1156_v10 = vsub.f32 %v10674_v1, %v10672_v23  ;;  %v4216_v14 = vld [vmem:[#allocation2 + $0x28] sm:$0xff] }
 0x2bf   :  { %v8812_v16 = vpop.eup %5783  ;;  %v2022_v28 = vmax.f32 %v10675_v19, %v10670_v36  ;;  %v3198_v45 = vrot.slane %v3197_v39, 1  ;;  %5803 = vpow2.f32 %v2134_v42  ;;  %v10676_v60 = vld [vmem:[#allocation182_spill] sm:$0xff]  ;;  %v1117_v23 = vmax.f32 %v10677_v59, %v10671_v56  ;;  %v10678_v1 = vld [vmem:[#allocation185_spill] sm:$0xff] }
 0x2c0   :  { %v8820_v34 = vpop.eup %5785  ;;  %v3646_v35 = vadd.f32 %v8676_v33, %v3645_v32  ;;  %v4248_v7 = vmul.f32 -2.0, %v10676_v60  ;;  %v4345_v0 = vld [vmem:[#allocation3 + $0x28] sm:$0xff]  ;;  %v1227_v53 = vmul.f32 1.442695, %v1155_v26  ;;  %v1229_v51 = vmul.f32 1.442695, %v1156_v10 }
 0x2c1   :  { %v8824_v61 = vpop.eup %5787  ;;  %v4377_v2 = vmul.f32 -2.0, %v10678_v1  ;;  %v3199_v19 = vadd.f32 %v3198_v45, %v3197_v39  ;;  %v3815_v33 = vadd.s32 184, %v10602_v25  ;;  %v10679_v26 = vld [vmem:[#allocation187_spill] sm:$0xff]  ;;  %v10680_v10 = vld [vmem:[#allocation40_spill] sm:$0xff]  ;;  %v10681_v56 = vld [vmem:[#allocation41_spill] sm:$0xff] }
 0x2c2   :  { %v8829_v36 = vpop.eup %5789  ;;  %v3647_v54 = vadd.f32 %v8684_v30, %v3646_v35  ;;  %v4280_v57 = vadd.f32 %v4248_v7, %v4216_v14  ;;  %5805 = vpow2.f32 %v1227_v53  ;;  %2023 = vmax.xlane.f32.xlu1 %v2022_v28  ;;  %1118 = vmax.xlane.f32.xlu0 %v1117_v23  ;;  %v1157_v60 = vsub.f32 %v10680_v10, %v10679_v26 }
 0x2c3   :  { %v8833_v42 = vpop.eup %5791  ;;  %v4409_v32 = vadd.f32 %v4377_v2, %v4345_v0  ;;  %v1158_v1 = vsub.f32 %v10681_v56, %v10679_v26  ;;  %v3230_v39 = vcombine.low %v8590_v46, %v3199_v19  ;;  %5807 = vpow2.f32 %v1229_v51  ;;  %v10682_v2 = vld [vmem:[#allocation113_spill] sm:$0xff]  ;;  %v10683_v56 = vld [vmem:[#allocation114_spill] sm:$0xff]  ;;  %v10688_v26 = vld [vmem:[#allocation112_spill] sm:$0xff] }
 0x2c4   :  { %v8839_v59 = vpop.eup %5793  ;;  %v3648_v30 = vadd.f32 %v8692_v49, %v3647_v54  ;;  %4313 = vst.msk [vmem:[#allocation2 + $0x28] sm:$0xff] %vm986_vm3, %v4280_v57  ;;  %vm3874_vm9 = vcmp.eq.s32.totalorder %v3815_v33, %v10606_v27  ;;  %v1231_v14 = vmul.f32 1.442695, %v1157_v60  ;;  %v10684_v46 = vld [vmem:[#allocation149_spill] sm:$0xff]  ;;  %v10685_v49 = vld [vmem:[#allocation188_spill] sm:$0xff]  ;;  %v10686_v57 = vld [vmem:[#allocation39_spill] sm:$0xff]  ;;  %v1120_v10 = vmax.f32 %v10688_v26, %v10682_v2 }
 0x2c5   :  { %v8845_v53 = vpop.eup %5795  ;;  %4441 = vst.msk [vmem:[#allocation3 + $0x28] sm:$0xff] %vm986_vm3, %v4409_v32  ;;  %v3938_v28 = vsel %vm3874_vm9, %v10682_v2, 0.0  ;;  %v1233_v45 = vmul.f32 1.442695, %v1158_v1  ;;  %v4098_v35 = vsel %vm3874_vm9, %v10683_v56, 0.0  ;;  %v3237_v19 = vrot.slane %v3230_v39, %v10684_v46  ;;  %v10687_v51 = vld [vmem:[#allocation42_spill] sm:$0xff] }
 0x2c6   :  { %v8850_v7 = vpop.eup %5797  ;;  %v3649_v54 = vadd.f32 %v8700_v37, %v3648_v30  ;;  %v2062_v0 = vsub.f32 %v10686_v57, %v10685_v49  ;;  %v2063_v23 = vsub.f32 %v10687_v51, %v10685_v49  ;;  %v4346_v33 = vld [vmem:[#allocation3 + $0x30] sm:$0xff]  ;;  %4025 = vadd.xlane.f32.xlu1 %v3938_v28  ;;  %5809 = vpow2.f32 %v1231_v14  ;;  %4185 = vadd.xlane.f32.xlu0 %v4098_v35  ;;  %v10689_v60 = vld [vmem:[#allocation189_spill] sm:$0xff] }
 0x2c7   :  { %v8858_v32 = vpop.eup %5799  ;;  %v4378_v1 = vmul.f32 -2.0, %v10689_v60  ;;  %v10690_v39 = vld [vmem:[#allocation111_spill] sm:$0xff]  ;;  %v3244_v30 = vrot.slane %v3237_v19, %v10684_v46  ;;  %5811 = vpow2.f32 %v1233_v45  ;;  %v10692_v35 = vld [vmem:[#allocation190_spill] sm:$0xff]  ;;  %v3816_v2 = vadd.s32 192, %v10602_v25 }
 0x2c8   :  { %v2025_v37 = vmax.f32 %v10690_v39, %v10683_v56  ;;  %v3650_v57 = vadd.f32 %v8708_v38, %v3649_v54  ;;  %v2136_v49 = vmul.f32 1.442695, %v2062_v0  ;;  %v4217_v51 = vld [vmem:[#allocation2 + $0x30] sm:$0xff]  ;;  %v8867_v4 = vpop.eup %5801  ;;  %v2138_v28 = vmul.f32 1.442695, %v2063_v23 }
 0x2c9   :  { %10691 = vst [vmem:[#allocation23_spill] sm:$0xff] %v8867_v4  ;;  %v4410_v14 = vadd.f32 %v4378_v1, %v4346_v33  ;;  %v4249_v9 = vmul.f32 -2.0, %v10692_v35  ;;  %v8871_v26 = vpop.eup %5803  ;;  %3247 = vst.msk [vmem:[#allocation9] sm:$0x3] %vm7845_vm2, %v3244_v30  ;;  %v10695_v38 = vld [vmem:[#allocation191_spill] sm:$0xff]  ;;  %v10697_v0 = vld [vmem:[#allocation46_spill] sm:$0xff]  ;;  %vm3876_vm10 = vcmp.eq.s32.totalorder %v3816_v2, %v10606_v27 }
 0x2ca   :  { %10693 = vst [vmem:[#allocation25_spill] sm:$0xff] %v8871_v26  ;;  %v3651_v19 = vadd.f32 %v8715_v18, %v3650_v57  ;;  %5813 = vpow2.f32 %v2136_v49  ;;  %v10696_v45 = vld [vmem:[#allocation43_spill] sm:$0xff]  ;;  %v2065_v56 = vsub.f32 %v10697_v0, %v10695_v38  ;;  %1121 = vmax.xlane.f32.xlu1 %v1120_v10  ;;  %2026 = vmax.xlane.f32.xlu0 %v2025_v37  ;;  %v10698_v33 = vld [vmem:[#allocation192_spill] sm:$0xff]  ;;  %v10700_v57 = vld [vmem:[#allocation118_spill] sm:$0xff] }
 0x2cb   :  { %v2064_v54 = vsub.f32 %v10696_v45, %v10695_v38  ;;  %5815 = vpow2.f32 %v2138_v28  ;;  %4442 = vst.msk [vmem:[#allocation3 + $0x30] sm:$0xff] %vm986_vm3, %v4410_v14  ;;  %v4281_v23 = vadd.f32 %v4249_v9, %v4217_v51  ;;  %v10699_v1 = vld [vmem:[#allocation44_spill] sm:$0xff]  ;;  %v4100_v49 = vsel %vm3876_vm10, %v10700_v57, 0.0  ;;  %v10701_v10 = vld [vmem:[#allocation117_spill] sm:$0xff]  ;;  %v10703_v2 = vld [vmem:[#allocation115_spill] sm:$0xff] }
 0x2cc   :  { %v1159_v30 = vsub.f32 %v10699_v1, %v10698_v33  ;;  %v3652_v18 = vadd.f32 %v8722_v20, %v3651_v19  ;;  %v2142_v45 = vmul.f32 1.442695, %v2065_v56  ;;  %v8886_v39 = vpop.eup %5805  ;;  %v3940_v28 = vsel %vm3876_vm10, %v10701_v10, 0.0  ;;  %v10702_v37 = vld [vmem:[#allocation45_spill] sm:$0xff]  ;;  %v4218_v38 = vld [vmem:[#allocation2 + $0x38] sm:$0xff] }
 0x2cd   :  { %v2140_v35 = vmul.f32 1.442695, %v2064_v54  ;;  %4314 = vst.msk [vmem:[#allocation2 + $0x30] sm:$0xff] %vm986_vm3, %v4281_v23  ;;  %v1160_v9 = vsub.f32 %v10702_v37, %v10698_v33  ;;  %v2028_v14 = vmax.f32 %v10703_v2, %v10700_v57  ;;  %v8894_v0 = vpop.eup %5807  ;;  %v10704_v56 = vld [vmem:[#allocation193_spill] sm:$0xff]  ;;  %v10705_v54 = vld [vmem:[#allocation116_spill] sm:$0xff]  ;;  %v3817_v57 = vadd.s32 200, %v10602_v25 }
 0x2ce   :  { %v1235_v51 = vmul.f32 1.442695, %v1159_v30  ;;  %v3653_v20 = vadd.f32 %v8732_v5, %v3652_v18  ;;  %v4250_v19 = vmul.f32 -2.0, %v10704_v56  ;;  %v1123_v23 = vmax.f32 %v10705_v54, %v10701_v10  ;;  %v4347_v1 = vld [vmem:[#allocation3 + $0x38] sm:$0xff]  ;;  %4188 = vadd.xlane.f32.xlu1 %v4100_v49  ;;  %4028 = vadd.xlane.f32.xlu0 %v3940_v28  ;;  %v10706_v30 = vld [vmem:[#allocation194_spill] sm:$0xff]  ;;  %v10709_v49 = vld [vmem:[#allocation49_spill] sm:$0xff] }
 0x2cf   :  { %5817 = vpow2.f32 %v2140_v35  ;;  %v1237_v33 = vmul.f32 1.442695, %v1160_v9  ;;  %v4379_v37 = vmul.f32 -2.0, %v10706_v30  ;;  %v10707_v5 = vld [vmem:[#allocation168_spill] sm:$0xff]  ;;  %vm3878_vm11 = vcmp.eq.s32.totalorder %v3817_v57, %v10606_v27  ;;  %v10712_v57 = vld [vmem:[#allocation177_spill] sm:$0xff] }
 0x2d0   :  { %5819 = vpow2.f32 %v2142_v45  ;;  %v3654_v2 = vadd.f32 %v8741_v17, %v3653_v20  ;;  %v4282_v24 = vadd.f32 %v4250_v19, %v4218_v38  ;;  %v10708_v18 = vld [vmem:[#allocation48_spill] sm:$0xff]  ;;  %v8905_v56 = vpop.eup %5809  ;;  %v1162_v45 = vsub.f32 %v10709_v49, %v10707_v5  ;;  %v10710_v17 = vld [vmem:[#allocation121_spill] sm:$0xff]  ;;  %v10711_v20 = vld [vmem:[#allocation122_spill] sm:$0xff] }
 0x2d1   :  { %5821 = vpow2.f32 %v1235_v51  ;;  %v1161_v35 = vsub.f32 %v10708_v18, %v10707_v5  ;;  %v4411_v10 = vadd.f32 %v4379_v37, %v4347_v1  ;;  %v8910_v28 = vpop.eup %5811  ;;  %v3942_v51 = vsel %vm3878_vm11, %v10710_v17, 0.0  ;;  %v10714_v37 = vld [vmem:[#allocation50_spill] sm:$0xff]  ;;  %v10775_v26 = vld [vmem:[#allocation64_spill] sm:$0xff] }
 0x2d2   :  { %5823 = vpow2.f32 %v1237_v33  ;;  %v3655_v9 = vadd.f32 %v8749_v41, %v3654_v2  ;;  %4315 = vst.msk [vmem:[#allocation2 + $0x38] sm:$0xff] %vm986_vm3, %v4282_v24  ;;  %v4102_v19 = vsel %vm3878_vm11, %v10711_v20, 0.0  ;;  %2029 = vmax.xlane.f32.xlu1 %v2028_v14  ;;  %1124 = vmax.xlane.f32.xlu0 %v1123_v23  ;;  %v1241_v1 = vmul.f32 1.442695, %v1162_v45  ;;  %v10713_v33 = vld [vmem:[#allocation47_spill] sm:$0xff]  ;;  %v10715_v41 = vld [vmem:[#allocation120_spill] sm:$0xff] }
 0x2d3   :  { %v1239_v38 = vmul.f32 1.442695, %v1161_v35  ;;  %4443 = vst.msk [vmem:[#allocation3 + $0x38] sm:$0xff] %vm986_vm3, %v4411_v10  ;;  %v2066_v30 = vsub.f32 %v10713_v33, %v10712_v57  ;;  %v2067_v5 = vsub.f32 %v10714_v37, %v10712_v57  ;;  %v1126_v2 = vmax.f32 %v10715_v41, %v10710_v17  ;;  %v4348_v24 = vld [vmem:[#allocation3 + $0x40] sm:$0xff]  ;;  %v10716_v14 = vld [vmem:[#allocation178_spill] sm:$0xff]  ;;  %v10717_v10 = vld [vmem:[#allocation119_spill] sm:$0xff] }
 0x2d4   :  { %v8923_v18 = vpop.eup %5813  ;;  %v3656_v35 = vadd.f32 %v8754_v52, %v3655_v9  ;;  %v4380_v23 = vmul.f32 -2.0, %v10716_v14  ;;  %v2031_v49 = vmax.f32 %v10717_v10, %v10711_v20  ;;  %v4219_v45 = vld [vmem:[#allocation2 + $0x40] sm:$0xff]  ;;  %v10719_v52 = vld [vmem:[#allocation150_spill] sm:$0xff]  ;;  %v10720_v9 = vld [vmem:[#allocation51_spill] sm:$0xff] }
 0x2d5   :  { %5825 = vpow2.f32 %v1239_v38  ;;  %v8929_v54 = vpop.eup %5815  ;;  %v2144_v33 = vmul.f32 1.442695, %v2066_v30  ;;  %v2146_v57 = vmul.f32 1.442695, %v2067_v5  ;;  %v10718_v37 = vld [vmem:[#allocation173_spill] sm:$0xff]  ;;  %v2068_v38 = vsub.f32 %v10720_v9, %v10719_v52  ;;  %v10721_v20 = vld [vmem:[#allocation54_spill] sm:$0xff] }
 0x2d6   :  { %5827 = vpow2.f32 %v1241_v1  ;;  %v4251_v6 = vmul.f32 -2.0, %v10718_v37  ;;  %v3657_v17 = vadd.f32 %v8763_v3, %v3656_v35  ;;  %v4412_v41 = vadd.f32 %v4380_v23, %v4348_v24  ;;  %4031 = vadd.xlane.f32.xlu1 %v3942_v51  ;;  %4191 = vadd.xlane.f32.xlu0 %v4102_v19  ;;  %v10722_v1 = vld [vmem:[#allocation151_spill] sm:$0xff]  ;;  %v10723_v30 = vld [vmem:[#allocation52_spill] sm:$0xff]  ;;  %v10728_v23 = vld [vmem:[#allocation53_spill] sm:$0xff] }
 0x2d7   :  { %5829 = vpow2.f32 %v2144_v33  ;;  %v2069_v10 = vsub.f32 %v10721_v20, %v10719_v52  ;;  %v1163_v5 = vsub.f32 %v10723_v30, %v10722_v1  ;;  %v2148_v3 = vmul.f32 1.442695, %v2068_v38  ;;  %v10727_v20 = vld [vmem:[#allocation125_spill] sm:$0xff] }
 0x2d8   :  { %v4283_v14 = vadd.f32 %v4251_v6, %v4219_v45  ;;  %v3658_v37 = vrot.slane %v3657_v17, 4  ;;  %5831 = vpow2.f32 %v2146_v57  ;;  %4444 = vst.msk [vmem:[#allocation3 + $0x40] sm:$0xff] %vm986_vm3, %v4412_v41  ;;  %v10726_v6 = vld [vmem:[#allocation126_spill] sm:$0xff]  ;;  %v3944_v35 = vsel %vm3880_vm12, %v10727_v20, 0.0 }
 0x2d9   :  { %v8940_v62 = vpop.eup %5817  ;;  %v4104_v51 = vsel %vm3880_vm12, %v10726_v6, 0.0  ;;  %v2150_v19 = vmul.f32 1.442695, %v2069_v10  ;;  %v1164_v45 = vsub.f32 %v10728_v23, %v10722_v1  ;;  %5833 = vpow2.f32 %v2148_v3  ;;  %v4220_v9 = vld [vmem:[#allocation2 + $0x48] sm:$0xff] }
 0x2da   :  { %10724 = vst [vmem:[#allocation28_spill] sm:$0xff] %v8940_v62  ;;  %v8944_v24 = vpop.eup %5819  ;;  %4316 = vst.msk [vmem:[#allocation2 + $0x40] sm:$0xff] %vm986_vm3, %v4283_v14  ;;  %v3659_v57 = vadd.f32 %v3658_v37, %v3657_v17  ;;  %v1243_v41 = vmul.f32 1.442695, %v1163_v5  ;;  %v2034_v52 = vmax.f32 %v10730_v55, %v10726_v6  ;;  %1127 = vmax.xlane.f32.xlu1 %v1126_v2  ;;  %2032 = vmax.xlane.f32.xlu0 %v2031_v49  ;;  %v10732_v14 = vld [vmem:[#allocation180_spill] sm:$0xff]  ;;  %v4349_v23 = vld [vmem:[#allocation3 + $0x48] sm:$0xff] }
 0x2db   :  { %10725 = vst [vmem:[#allocation29_spill] sm:$0xff] %v8944_v24  ;;  %v8951_v33 = vpop.eup %5821  ;;  %5835 = vpow2.f32 %v2150_v19  ;;  %v1245_v10 = vmul.f32 1.442695, %v1164_v45  ;;  %v4252_v30 = vmul.f32 -2.0, %v10732_v14  ;;  %v10733_v24 = vld [vmem:[#allocation124_spill] sm:$0xff]  ;;  %v3819_v37 = vadd.s32 216, %v10602_v25 }
 0x2dc   :  { %10729 = vst [vmem:[#allocation24_spill] sm:$0xff] %v8951_v33  ;;  %v8955_v38 = vpop.eup %5823  ;;  %v1129_v1 = vmax.f32 %v10733_v24, %v10727_v20  ;;  %v3660_v62 = vrot.slane %v3659_v57, 2  ;;  %5837 = vpow2.f32 %v1243_v41  ;;  %v10734_v17 = vld [vmem:[#allocation184_spill] sm:$0xff]  ;;  %v10735_v6 = vld [vmem:[#allocation197_spill] sm:$0xff]  ;;  %v10739_v20 = vld [vmem:[#allocation198_spill] sm:$0xff] }
 0x2dd   :  { %10731 = vst [vmem:[#allocation27_spill] sm:$0xff] %v8955_v38  ;;  %v4381_v5 = vmul.f32 -2.0, %v10734_v17  ;;  %5839 = vpow2.f32 %v1245_v10  ;;  %v4284_v3 = vadd.f32 %v4252_v30, %v4220_v9  ;;  %v10736_v55 = vld [vmem:[#allocation56_spill] sm:$0xff]  ;;  %v10737_v49 = vld [vmem:[#allocation57_spill] sm:$0xff]  ;;  %vm3882_vm13 = vcmp.eq.s32.totalorder %v3819_v37, %v10606_v27  ;;  %v10740_v41 = vld [vmem:[#allocation55_spill] sm:$0xff] }
 0x2de   :  { %v1165_v2 = vsub.f32 %v10736_v55, %v10735_v6  ;;  %v1166_v19 = vsub.f32 %v10737_v49, %v10735_v6  ;;  %v3661_v14 = vadd.f32 %v3660_v62, %v3659_v57  ;;  %v2070_v24 = vsub.f32 %v10740_v41, %v10739_v20  ;;  %4194 = vadd.xlane.f32.xlu1 %v4104_v51  ;;  %v10742_v9 = vld [vmem:[#allocation130_spill] sm:$0xff]  ;;  %v10743_v6 = vld [vmem:[#allocation129_spill] sm:$0xff]  ;;  %v10749_v38 = vld [vmem:[#allocation200_spill] sm:$0xff] }
 0x2df   :  { %v8966_v45 = vpop.eup %5825  ;;  %v4413_v63 = vadd.f32 %v4381_v5, %v4349_v23  ;;  %4034 = vadd.xlane.f32.xlu0 %v3944_v35  ;;  %4317 = vst.msk [vmem:[#allocation2 + $0x48] sm:$0xff] %vm986_vm3, %v4284_v3  ;;  %v4106_v55 = vsel %vm3882_vm13, %v10742_v9, 0.0  ;;  %v3946_v49 = vsel %vm3882_vm13, %v10743_v6, 0.0  ;;  %v10744_v62 = vld [vmem:[#allocation58_spill] sm:$0xff]  ;;  %v10745_v5 = vld [vmem:[#allocation128_spill] sm:$0xff]  ;;  %v10747_v3 = vld [vmem:[#allocation199_spill] sm:$0xff] }
 0x2e0   :  { %10738 = vst [vmem:[#allocation172_spill] sm:$0xff] %v8966_v45  ;;  %v8971_v17 = vpop.eup %5827  ;;  %v1247_v10 = vmul.f32 1.442695, %v1165_v2  ;;  %v1249_v30 = vmul.f32 1.442695, %v1166_v19  ;;  %v3662_v25 = vrot.slane %v3661_v14, 1  ;;  %v2071_v57 = vsub.f32 %v10744_v62, %v10739_v20 }
 0x2e1   :  { %10741 = vst [vmem:[#allocation30_spill] sm:$0xff] %v8971_v17  ;;  %4445 = vst.msk [vmem:[#allocation3 + $0x48] sm:$0xff] %vm986_vm3, %v4413_v63  ;;  %v2152_v23 = vmul.f32 1.442695, %v2070_v24  ;;  %v1132_v37 = vmax.f32 %v10745_v5, %v10743_v6  ;;  %v4350_v51 = vld [vmem:[#allocation3 + $0x50] sm:$0xff]  ;;  %v8981_v41 = vpop.eup %5829  ;;  %v4382_v2 = vmul.f32 -2.0, %v10747_v3 }
 0x2e2   :  { %v4221_v35 = vld [vmem:[#allocation2 + $0x50] sm:$0xff]  ;;  %10746 = vst [vmem:[#allocation148_spill] sm:$0xff] %v8981_v41  ;;  %5841 = vpow2.f32 %v1247_v10  ;;  %v4253_v33 = vmul.f32 -2.0, %v10749_v38  ;;  %v8987_v63 = vpop.eup %5831  ;;  %v3663_v29 = vadd.f32 %v3662_v25, %v3661_v14  ;;  %v2154_v24 = vmul.f32 1.442695, %v2071_v57  ;;  %2035 = vmax.xlane.f32.xlu1 %v2034_v52  ;;  %v10753_v41 = vld [vmem:[#allocation201_spill] sm:$0xff] }
 0x2e3   :  { %v10748_v19 = vld [vmem:[#allocation127_spill] sm:$0xff]  ;;  %10750 = vst [vmem:[#allocation196_spill] sm:$0xff] %v8987_v63  ;;  %5843 = vpow2.f32 %v1249_v30  ;;  %v10751_v20 = vld [vmem:[#allocation134_spill] sm:$0xff]  ;;  %1130 = vmax.xlane.f32.xlu0 %v1129_v1  ;;  %v4414_v5 = vadd.f32 %v4382_v2, %v4350_v51  ;;  %v8993_v45 = vpop.eup %5833  ;;  %v10758_v30 = vld [vmem:[#allocation133_spill] sm:$0xff] }
 0x2e4   :  { %v2037_v27 = vmax.f32 %v10748_v19, %v10742_v9  ;;  %v10752_v62 = vld [vmem:[#allocation131_spill] sm:$0xff]  ;;  %5845 = vpow2.f32 %v2152_v23  ;;  %v4285_v10 = vadd.f32 %v4253_v33, %v4221_v35  ;;  %10755 = vst [vmem:[#allocation22_spill] sm:$0xff] %v8993_v45  ;;  %v10756_v9 = vld [vmem:[#allocation202_spill] sm:$0xff]  ;;  %v10759_v57 = vld [vmem:[#allocation132_spill] sm:$0xff] }
 0x2e5   :  { %v10754_v3 = vld [vmem:[#allocation59_spill] sm:$0xff]  ;;  %v3694_v38 = vcombine.low %v10756_v9, %v3663_v29  ;;  %5847 = vpow2.f32 %v2154_v24  ;;  %v10757_v25 = vld [vmem:[#allocation62_spill] sm:$0xff]  ;;  %v1135_v19 = vmax.f32 %v10759_v57, %v10758_v30  ;;  %v9000_v6 = vpop.eup %5835  ;;  %4446 = vst.msk [vmem:[#allocation3 + $0x50] sm:$0xff] %vm986_vm3, %v4414_v5  ;;  %v10762_v1 = vld [vmem:[#allocation60_spill] sm:$0xff] }
 0x2e6   :  { %v2072_v17 = vsub.f32 %v10754_v3, %v10753_v41  ;;  %v2073_v14 = vsub.f32 %v10757_v25, %v10753_v41  ;;  %10760 = vst [vmem:[#allocation163_spill] sm:$0xff] %v9000_v6  ;;  %4318 = vst.msk [vmem:[#allocation2 + $0x50] sm:$0xff] %vm986_vm3, %v4285_v10  ;;  %v10761_v52 = vld [vmem:[#allocation203_spill] sm:$0xff]  ;;  %v10763_v51 = vld [vmem:[#allocation61_spill] sm:$0xff]  ;;  %v9010_v24 = vpop.eup %5837  ;;  %4197 = vadd.xlane.f32.xlu1 %v4106_v55 }
 0x2e7   :  { %v1167_v23 = vsub.f32 %v10762_v1, %v10761_v52  ;;  %v1168_v29 = vsub.f32 %v10763_v51, %v10761_v52  ;;  %v10764_v9 = vld [vmem:[#allocation137_spill] sm:$0xff]  ;;  %v10765_v35 = vld [vmem:[#allocation136_spill] sm:$0xff]  ;;  %10766 = vst [vmem:[#allocation164_spill] sm:$0xff] %v9010_v24  ;;  %v3701_v3 = vrot.slane %v3694_v38, %v10684_v46  ;;  %v10768_v57 = vld [vmem:[#allocation138_spill] sm:$0xff]  ;;  %v9016_v45 = vpop.eup %5839  ;;  %4037 = vadd.xlane.f32.xlu0 %v3946_v49 }
 0x2e8   :  { %v2156_v33 = vmul.f32 1.442695, %v2072_v17  ;;  %v4222_v41 = vld [vmem:[#allocation2 + $0x58] sm:$0xff]  ;;  %v2158_v25 = vmul.f32 1.442695, %v2073_v14  ;;  %10770 = vst [vmem:[#allocation165_spill] sm:$0xff] %v9016_v45 }
 0x2e9   :  { %v10767_v30 = vld [vmem:[#allocation204_spill] sm:$0xff]  ;;  %v10769_v10 = vld [vmem:[#allocation135_spill] sm:$0xff]  ;;  %v1251_v52 = vmul.f32 1.442695, %v1167_v23  ;;  %v1253_v1 = vmul.f32 1.442695, %v1168_v29  ;;  %v3708_v24 = vrot.slane %v3701_v3, %v10684_v46 }
 0x2ea   :  { %v4254_v5 = vmul.f32 -2.0, %v10767_v30  ;;  %v4351_v6 = vld [vmem:[#allocation3 + $0x58] sm:$0xff]  ;;  %5849 = vpow2.f32 %v2156_v33  ;;  %v10771_v51 = vld [vmem:[#allocation205_spill] sm:$0xff]  ;;  %v10772_v14 = vld [vmem:[#allocation142_spill] sm:$0xff]  ;;  %1133 = vmax.xlane.f32.xlu1 %v1132_v37 }
 0x2eb   :  { %v4383_v2 = vmul.f32 -2.0, %v10771_v51  ;;  %5851 = vpow2.f32 %v2158_v25  ;;  %v10773_v63 = vld [vmem:[#allocation139_spill] sm:$0xff]  ;;  %v10774_v17 = vld [vmem:[#allocation206_spill] sm:$0xff]  ;;  %v10776_v55 = vld [vmem:[#allocation65_spill] sm:$0xff]  ;;  %3711 = vst.msk [vmem:[#allocation11] sm:$0x3] %vm7845_vm2, %v3708_v24  ;;  %2038 = vmax.xlane.f32.xlu0 %v2037_v27 }
 0x2ec   :  { %v4286_v38 = vadd.f32 %v4254_v5, %v4222_v41  ;;  %5853 = vpow2.f32 %v1251_v52  ;;  %v1169_v4 = vsub.f32 %v10775_v26, %v10774_v17  ;;  %v1170_v49 = vsub.f32 %v10776_v55, %v10774_v17  ;;  %v10777_v46 = vld [vmem:[#allocation141_spill] sm:$0xff]  ;;  %v10778_v33 = vld [vmem:[#allocation140_spill] sm:$0xff]  ;;  %v10779_v29 = vld [vmem:[#allocation170_spill] sm:$0xff]  ;;  %v9035_v26 = vpop.eup %5841 }
 0x2ed   :  { %v4415_v58 = vadd.f32 %v4383_v2, %v4351_v6  ;;  %5855 = vpow2.f32 %v1253_v1  ;;  %v10780_v41 = vld [vmem:[#allocation63_spill] sm:$0xff]  ;;  %v10781_v6 = vld [vmem:[#allocation66_spill] sm:$0xff]  ;;  %v4352_v25 = vld [vmem:[#allocation3 + $0x60] sm:$0xff]  ;;  %10782 = vst [vmem:[#allocation153_spill] sm:$0xff] %v9035_v26  ;;  %v9041_v55 = vpop.eup %5843  ;;  %vm5008_vm2 = vcmask 1040384  }
 0x2ee   :  { %4319 = vst.msk [vmem:[#allocation2 + $0x58] sm:$0xff] %vm986_vm3, %v4286_v38  ;;  %v2074_v3 = vsub.f32 %v10780_v41, %v10779_v29  ;;  %v2075_v2 = vsub.f32 %v10781_v6, %v10779_v29  ;;  %v1255_v60 = vmul.f32 1.442695, %v1169_v4  ;;  %v1257_v24 = vmul.f32 1.442695, %v1170_v49  ;;  %v10783_v5 = vld [vmem:[#allocation145_spill] sm:$0xff]  ;;  %v9046_v27 = vpop.eup %5845 }
 0x2ef   :  { %4447 = vst.msk [vmem:[#allocation3 + $0x58] sm:$0xff] %vm986_vm3, %v4415_v58  ;;  %v10784_v17 = vld [vmem:[#allocation144_spill] sm:$0xff]  ;;  %v10785_v1 = vld [vmem:[#allocation171_spill] sm:$0xff]  ;;  %v10786_v29 = vld [vmem:[#allocation146_spill] sm:$0xff]  ;;  %v9050_v4 = vadd.f32 %v8803_v50, %v8800_v31  ;;  %v9054_v26 = vpop.eup %5847  ;;  %1136 = vmax.xlane.f32.xlu0 %v1135_v19 }
 0x2f0   :  { %v4384_v51 = vmul.f32 -2.0, %v10785_v1  ;;  %v4223_v38 = vld [vmem:[#allocation2 + $0x60] sm:$0xff]  ;;  %v2160_v41 = vmul.f32 1.442695, %v2074_v3  ;;  %v2162_v23 = vmul.f32 1.442695, %v2075_v2  ;;  %5857 = vpow2.f32 %v1255_v60 }
 0x2f1   :  { %v10787_v6 = vld [vmem:[#allocation143_spill] sm:$0xff]  ;;  %v10788_v45 = vld [vmem:[#allocation174_spill] sm:$0xff]  ;;  %5859 = vpow2.f32 %v1257_v24  ;;  %v10793_v50 = vld [vmem:[#allocation152_spill] sm:$0xff] }
 0x2f2   :  { %v4255_v37 = vmul.f32 -2.0, %v10788_v45  ;;  %v4416_v58 = vadd.f32 %v4384_v51, %v4352_v25  ;;  %v10789_v49 = vld [vmem:[#allocation26_spill] sm:$0xff]  ;;  %v10790_v1 = vld [vmem:[#allocation67_spill] sm:$0xff]  ;;  %v9060_v45 = vadd.f32 %v8777_v43, %v8771_v12  ;;  %v10792_v25 = vmax.f32 %v10752_v62, %v10751_v20  ;;  %v10794_v60 = vld [vmem:[#allocation68_spill] sm:$0xff] }
 0x2f3   :  { %v2076_v52 = vsub.f32 %v10790_v1, %v10789_v49  ;;  %v10791_v2 = vld [vmem:[#allocation70_spill] sm:$0xff]  ;;  %5861 = vpow2.f32 %v2160_v41  ;;  %v1171_v24 = vsub.f32 %v10794_v60, %v10793_v50  ;;  %v10795_v51 = vld [vmem:[#allocation69_spill] sm:$0xff]  ;;  %v9073_v12 = vadd.f32 %v8824_v61, %v8820_v34 }
 0x2f4   :  { %v4287_v3 = vadd.f32 %v4255_v37, %v4223_v38  ;;  %v2077_v30 = vsub.f32 %v10791_v2, %v10789_v49  ;;  %2041 = vmax.xlane.f32.xlu1 %v10792_v25  ;;  %4448 = vst.msk [vmem:[#allocation3 + $0x60] sm:$0xff] %vm986_vm3, %v4416_v58  ;;  %v1172_v38 = vsub.f32 %v10795_v51, %v10793_v50  ;;  %v4224_v37 = vld [vmem:[#allocation2 + $0x68] sm:$0xff]  ;;  %5863 = vpow2.f32 %v2162_v23  ;;  %v9076_v49 = vpop.eup %5849 }
 0x2f5   :  { %v2164_v31 = vmul.f32 1.442695, %v2076_v52  ;;  %v10796_v19 = vld [vmem:[#allocation181_spill] sm:$0xff]  ;;  %v1259_v52 = vmul.f32 1.442695, %v1171_v24  ;;  %v9080_v1 = vadd.f32 %v8790_v13, %v8784_v8  ;;  %v9082_v23 = vpop.eup %5851  ;;  %v9087_v34 = vadd.f32 %v8845_v53, %v8839_v59  ;;  %v10800_v13 = vld [vmem:[#allocation72_spill] sm:$0xff] }
 0x2f6   :  { %4320 = vst.msk [vmem:[#allocation2 + $0x60] sm:$0xff] %vm986_vm3, %v4287_v3  ;;  %v2166_v43 = vmul.f32 1.442695, %v2077_v30  ;;  %v4256_v41 = vmul.f32 -2.0, %v10796_v19  ;;  %v1261_v58 = vmul.f32 1.442695, %v1172_v38  ;;  %v9089_v61 = vpop.eup %5853  ;;  %v10799_v8 = vmax.f32 %v10769_v10, %v10768_v57 }
 0x2f7   :  { %5865 = vpow2.f32 %v2164_v31  ;;  %v4353_v2 = vld [vmem:[#allocation3 + $0x68] sm:$0xff]  ;;  %v10797_v3 = vld [vmem:[#allocation159_spill] sm:$0xff]  ;;  %v10798_v31 = vmax.f32 %v10765_v35, %v10764_v9  ;;  %v1173_v50 = vsub.f32 %v10800_v13, %v8538_v21  ;;  %v9103_v59 = vadd.f32 %v8812_v16, %v8806_v47  ;;  %v9105_v53 = vpop.eup %5855 }
 0x2f8   :  { %5867 = vpow2.f32 %v2166_v43  ;;  %v4288_v30 = vadd.f32 %v4256_v41, %v4224_v37  ;;  %v4385_v25 = vmul.f32 -2.0, %v10797_v3  ;;  %2044 = vmax.xlane.f32.xlu0 %v10799_v8  ;;  %v10801_v60 = vld [vmem:[#allocation73_spill] sm:$0xff]  ;;  %v10802_v38 = vld [vmem:[#allocation71_spill] sm:$0xff]  ;;  %v10803_v43 = vld [vmem:[#allocation74_spill] sm:$0xff]  ;;  %v4386_v47 = vmul.f32 -2.0, %v8559_v22 }
 0x2f9   :  { %1139 = vmax.xlane.f32.xlu1 %v10798_v31  ;;  %5869 = vpow2.f32 %v1259_v52  ;;  %v1174_v24 = vsub.f32 %v10801_v60, %v8538_v21  ;;  %v2078_v37 = vsub.f32 %v10802_v38, %v8551_v48  ;;  %v2079_v19 = vsub.f32 %v10803_v43, %v8551_v48  ;;  %v4354_v41 = vld [vmem:[#allocation3 + $0x70] sm:$0xff]  ;;  %v10809_v38 = vld [vmem:[#allocation77_spill] sm:$0xff]  ;;  %v4226_v43 = vld [vmem:[#allocation2 + $0x78] sm:$0xff] }
 0x2fa   :  { %5871 = vpow2.f32 %v1261_v58  ;;  %4321 = vst.msk [vmem:[#allocation2 + $0x68] sm:$0xff] %vm986_vm3, %v4288_v30  ;;  %v4417_v51 = vadd.f32 %v4385_v25, %v4353_v2  ;;  %v1263_v52 = vmul.f32 1.442695, %v1173_v50  ;;  %v9114_v21 = vadd.f32 %v8858_v32, %v8850_v7  ;;  %v4225_v16 = vld [vmem:[#allocation2 + $0x70] sm:$0xff]  ;;  %v9123_v25 = vpop.eup %5857 }
 0x2fb   :  { %v1265_v3 = vmul.f32 1.442695, %v1174_v24  ;;  %v2168_v58 = vmul.f32 1.442695, %v2078_v37  ;;  %v2170_v2 = vmul.f32 1.442695, %v2079_v19  ;;  %v9120_v30 = vadd.f32 %v8833_v42, %v8829_v36 }
 0x2fc   :  { %4449 = vst.msk [vmem:[#allocation3 + $0x68] sm:$0xff] %vm986_vm3, %v4417_v51  ;;  %v4257_v48 = vmul.f32 -2.0, %v8572_v40  ;;  %v10804_v31 = vmax.f32 %v10773_v63, %v10772_v14  ;;  %v10805_v22 = vmax.f32 %v10778_v33, %v10777_v46  ;;  %5873 = vpow2.f32 %v1263_v52  ;;  %v10806_v36 = vld [vmem:[#allocation75_spill] sm:$0xff]  ;;  %v9137_v40 = vpop.eup %5859  ;;  %v10807_v13 = vld [vmem:[#allocation78_spill] sm:$0xff] }
 0x2fd   :  { %v4418_v7 = vadd.f32 %v4386_v47, %v4354_v41  ;;  %v9133_v32 = vadd.f32 %v8910_v28, %v8905_v56  ;;  %v2080_v42 = vsub.f32 %v10806_v36, %v8579_v11  ;;  %5875 = vpow2.f32 %v1265_v3  ;;  %v9145_v24 = vpop.eup %5861  ;;  %v10808_v28 = vld [vmem:[#allocation76_spill] sm:$0xff] }
 0x2fe   :  { %2047 = vmax.xlane.f32.xlu1 %v10804_v31  ;;  %1142 = vmax.xlane.f32.xlu0 %v10805_v22  ;;  %v4289_v8 = vadd.f32 %v4257_v48, %v4225_v16  ;;  %v2081_v50 = vsub.f32 %v10807_v13, %v8579_v11  ;;  %v9143_v60 = vadd.f32 %v8894_v0, %v8886_v39  ;;  %5877 = vpow2.f32 %v2168_v58  ;;  %v9152_v19 = vpop.eup %5863  ;;  %v10812_v16 = vld [vmem:[#allocation23_spill] sm:$0xff]  ;;  %v10813_v58 = vld [vmem:[#allocation25_spill] sm:$0xff]  ;;  %v10815_v22 = vld [vmem:[#allocation172_spill] sm:$0xff] }
 0x2ff   :  { %4450 = vst.msk [vmem:[#allocation3 + $0x70] sm:$0xff] %vm986_vm3, %v4418_v7  ;;  %v2172_v56 = vmul.f32 1.442695, %v2080_v42  ;;  %v1175_v51 = vsub.f32 %v10808_v28, %v8594_v15  ;;  %v1176_v37 = vsub.f32 %v10809_v38, %v8594_v15  ;;  %5879 = vpow2.f32 %v2170_v2  ;;  %v10814_v48 = vld [vmem:[#allocation161_spill] sm:$0xff]  ;;  %v10816_v7 = vld [vmem:[#allocation30_spill] sm:$0xff]  ;;  %v10818_v13 = vld [vmem:[#allocation80_spill] sm:$0xff] }
 0x300   :  { %4322 = vst.msk [vmem:[#allocation2 + $0x70] sm:$0xff] %vm986_vm3, %v4289_v8  ;;  %v2174_v11 = vmul.f32 1.442695, %v2081_v50  ;;  %v9157_v39 = vadd.f32 %v8929_v54, %v8923_v18  ;;  %v4258_v0 = vmul.f32 -2.0, %v8612_v44  ;;  %v10810_v52 = vmax.f32 %v10784_v17, %v10783_v5  ;;  %v4355_v54 = vld [vmem:[#allocation3 + $0x78] sm:$0xff]  ;;  %v10817_v8 = vld [vmem:[#allocation162_spill] sm:$0xff] }
 0x301   :  { %v9160_v41 = vpop.eup %5865  ;;  %v10811_v15 = vmax.f32 %v10787_v6, %v10786_v29  ;;  %5881 = vpow2.f32 %v2172_v56  ;;  %v1267_v3 = vmul.f32 1.442695, %v1175_v51  ;;  %v1269_v47 = vmul.f32 1.442695, %v1176_v37  ;;  %v10819_v56 = vld [vmem:[#allocation81_spill] sm:$0xff]  ;;  %v10820_v51 = vld [vmem:[#allocation24_spill] sm:$0xff] }
 0x302   :  { %1145 = vmax.xlane.f32.xlu1 %v10810_v52  ;;  %v9170_v2 = vadd.f32 %v10813_v58, %v10812_v16  ;;  %v9172_v18 = vpop.eup %5867  ;;  %5883 = vpow2.f32 %v2174_v11  ;;  %v4290_v44 = vadd.f32 %v4258_v0, %v4226_v43  ;;  %v4387_v31 = vmul.f32 -2.0, %v10814_v48  ;;  %v10821_v38 = vld [vmem:[#allocation27_spill] sm:$0xff]  ;;  %v4356_v58 = vld [vmem:[#allocation3 + $0x80] sm:$0xff] }
 0x303   :  { %2050 = vmax.xlane.f32.xlu0 %v10811_v15  ;;  %v9177_v36 = vadd.f32 %v10816_v7, %v10815_v22  ;;  %v9179_v42 = vpop.eup %5869  ;;  %5885 = vpow2.f32 %v1267_v3  ;;  %v1177_v50 = vsub.f32 %v10818_v13, %v10817_v8  ;;  %v1178_v28 = vsub.f32 %v10819_v56, %v10817_v8  ;;  %v10822_v0 = vld [vmem:[#allocation19_spill] sm:$0xff]  ;;  %v10824_v3 = vld [vmem:[#allocation82_spill] sm:$0xff]  ;;  %v10825_v7 = vld [vmem:[#allocation148_spill] sm:$0xff] }
 0x304   :  { %v9187_v37 = vadd.f32 %v10821_v38, %v10820_v51  ;;  %v9189_v43 = vpop.eup %5871  ;;  %5887 = vpow2.f32 %v1269_v47  ;;  %4323 = vst.msk [vmem:[#allocation2 + $0x78] sm:$0xff] %vm986_vm3, %v4290_v44  ;;  %v4419_v11 = vadd.f32 %v4387_v31, %v4355_v54  ;;  %v10823_v52 = vld [vmem:[#allocation79_spill] sm:$0xff]  ;;  %v2083_v16 = vsub.f32 %v10824_v3, %v10822_v0  ;;  %v10826_v8 = vld [vmem:[#allocation196_spill] sm:$0xff]  ;;  %v10827_v47 = vld [vmem:[#allocation21_spill] sm:$0xff] }
 0x305   :  { %v2082_v15 = vsub.f32 %v10823_v52, %v10822_v0  ;;  %v1271_v48 = vmul.f32 1.442695, %v1177_v50  ;;  %v1273_v22 = vmul.f32 1.442695, %v1178_v28  ;;  %v9200_v13 = vadd.f32 %v10826_v8, %v10825_v7  ;;  %v4227_v54 = vld [vmem:[#allocation2 + $0x80] sm:$0xff]  ;;  %v10832_v7 = vld [vmem:[#allocation186_spill] sm:$0xff] }
 0x306   :  { %1343 = vadd.xlane.f32.xlu1 %v9050_v4  ;;  %v4388_v44 = vmul.f32 -2.0, %v10827_v47  ;;  %4451 = vst.msk [vmem:[#allocation3 + $0x78] sm:$0xff] %vm986_vm3, %v4419_v11  ;;  %v2178_v56 = vmul.f32 1.442695, %v2083_v16  ;;  %v10828_v51 = vld [vmem:[#allocation28_spill] sm:$0xff]  ;;  %v10829_v38 = vld [vmem:[#allocation29_spill] sm:$0xff] }
 0x307   :  { %1340 = vadd.xlane.f32.xlu0 %v9060_v45  ;;  %v2176_v31 = vmul.f32 1.442695, %v2082_v15  ;;  %v9206_v0 = vadd.f32 %v10829_v38, %v10828_v51  ;;  %v10830_v4 = vld [vmem:[#allocation183_spill] sm:$0xff]  ;;  %v5874_v45 = vpop.eup %5873  ;;  %5889 = vpow2.f32 %v1271_v48  ;;  %v10831_v28 = vld [vmem:[#allocation153_spill] sm:$0xff]  ;;  %v10834_v15 = vld [vmem:[#allocation86_spill] sm:$0xff] }
 0x308   :  { %v4259_v52 = vmul.f32 -2.0, %v10830_v4  ;;  %v4420_v50 = vadd.f32 %v4388_v44, %v4356_v58  ;;  %v9211_v3 = vadd.f32 %v9041_v55, %v10831_v28  ;;  %v10833_v8 = vld [vmem:[#allocation83_spill] sm:$0xff]  ;;  %v5876_v29 = vpop.eup %5875  ;;  %5891 = vpow2.f32 %v1273_v22  ;;  %v10835_v51 = vld [vmem:[#allocation164_spill] sm:$0xff]  ;;  %v10836_v38 = vld [vmem:[#allocation165_spill] sm:$0xff] }
 0x309   :  { %v2084_v47 = vsub.f32 %v10833_v8, %v10832_v7  ;;  %v2085_v16 = vsub.f32 %v10834_v15, %v10832_v7  ;;  %v9219_v6 = vadd.f32 %v10836_v38, %v10835_v51  ;;  %v5878_v4 = vpop.eup %5877  ;;  %5893 = vpow2.f32 %v2176_v31  ;;  %v10837_v58 = vld [vmem:[#allocation154_spill] sm:$0xff]  ;;  %v10838_v48 = vld [vmem:[#allocation84_spill] sm:$0xff]  ;;  %v10839_v44 = vld [vmem:[#allocation85_spill] sm:$0xff] }
 0x30a   :  { %v4291_v11 = vadd.f32 %v4259_v52, %v4227_v54  ;;  %2248 = vadd.xlane.f32.xlu1 %v9073_v12  ;;  %4452 = vst.msk [vmem:[#allocation3 + $0x80] sm:$0xff] %vm986_vm3, %v4420_v50  ;;  %v1179_v22 = vsub.f32 %v10838_v48, %v10837_v58  ;;  %v1180_v54 = vsub.f32 %v10839_v44, %v10837_v58  ;;  %v4228_v52 = vld [vmem:[#allocation2 + $0x88] sm:$0xff]  ;;  %v5880_v28 = vpop.eup %5879  ;;  %5895 = vpow2.f32 %v2178_v56  ;;  %v10842_v51 = vld [vmem:[#allocation163_spill] sm:$0xff] }
 0x30b   :  { %2245 = vadd.xlane.f32.xlu0 %v9080_v1  ;;  %v2180_v55 = vmul.f32 1.442695, %v2084_v47  ;;  %v2182_v7 = vmul.f32 1.442695, %v2085_v16  ;;  %v9231_v12 = vadd.f32 %v9054_v26, %v9046_v27  ;;  %v10840_v1 = vld [vmem:[#allocation155_spill] sm:$0xff]  ;;  %v5882_v50 = vpop.eup %5881  ;;  %v10841_v15 = vld [vmem:[#allocation22_spill] sm:$0xff]  ;;  %v9241_v26 = vadd.f32 %v9137_v40, %v9123_v25 }
 0x30c   :  { %4324 = vst.msk [vmem:[#allocation2 + $0x80] sm:$0xff] %vm986_vm3, %v4291_v11  ;;  %v4260_v31 = vmul.f32 -2.0, %v10840_v1  ;;  %v1275_v8 = vmul.f32 1.442695, %v1179_v22  ;;  %v1277_v47 = vmul.f32 1.442695, %v1180_v54  ;;  %v9236_v38 = vadd.f32 %v10842_v51, %v10841_v15  ;;  %v5884_v48 = vpop.eup %5883 }
 0x30d   :  { %5897 = vpow2.f32 %v2180_v55  ;;  %v4357_v58 = vld [vmem:[#allocation3 + $0x88] sm:$0xff]  ;;  %v10843_v11 = vld [vmem:[#allocation20_spill] sm:$0xff]  ;;  %v5886_v27 = vpop.eup %5885 }
 0x30e   :  { %5899 = vpow2.f32 %v2182_v7  ;;  %v4292_v56 = vadd.f32 %v4260_v31, %v4228_v52  ;;  %v4389_v16 = vmul.f32 -2.0, %v10843_v11  ;;  %1349 = vadd.xlane.f32.xlu1 %v9087_v34  ;;  %v10844_v55 = vld [vmem:[#allocation157_spill] sm:$0xff]  ;;  %v10845_v22 = vld [vmem:[#allocation88_spill] sm:$0xff]  ;;  %v1369_v52 = vadd.f32 %v9105_v53, %v9089_v61  ;;  %v5888_v7 = vpop.eup %5887  ;;  %v10847_v40 = vld [vmem:[#allocation158_spill] sm:$0xff] }
 0x30f   :  { %1346 = vadd.xlane.f32.xlu0 %v9103_v59  ;;  %5901 = vpow2.f32 %v1275_v8  ;;  %v1181_v44 = vsub.f32 %v10845_v22, %v10844_v55  ;;  %v10846_v54 = vld [vmem:[#allocation89_spill] sm:$0xff]  ;;  %v10848_v31 = vld [vmem:[#allocation87_spill] sm:$0xff]  ;;  %v10849_v59 = vld [vmem:[#allocation90_spill] sm:$0xff]  ;;  %v9258_v11 = vadd.f32 %v9152_v19, %v9145_v24  ;;  %v9262_v61 = vadd.f32 %v9082_v23, %v9076_v49 }
 0x310   :  { %v1182_v1 = vsub.f32 %v10846_v54, %v10844_v55  ;;  %5903 = vpow2.f32 %v1277_v47  ;;  %4325 = vst.msk [vmem:[#allocation2 + $0x88] sm:$0xff] %vm986_vm3, %v4292_v56  ;;  %v4421_v25 = vadd.f32 %v4389_v16, %v4357_v58  ;;  %v2086_v34 = vsub.f32 %v10848_v31, %v10847_v40  ;;  %v10853_v31 = vld [vmem:[#allocation93_spill] sm:$0xff] }
 0x311   :  { %v2087_v8 = vsub.f32 %v10849_v59, %v10847_v40  ;;  %v1279_v15 = vmul.f32 1.442695, %v1181_v44  ;;  %v9265_v58 = vadd.f32 %v5876_v29, %v5874_v45  ;;  %v9269_v56 = vadd.f32 %v9189_v43, %v9179_v42  ;;  %v5890_v16 = vpop.eup %5889 }
 0x312   :  { %v1281_v51 = vmul.f32 1.442695, %v1182_v1  ;;  %4453 = vst.msk [vmem:[#allocation3 + $0x88] sm:$0xff] %vm986_vm3, %v4421_v25  ;;  %v2184_v53 = vmul.f32 1.442695, %v2086_v34  ;;  %2254 = vadd.xlane.f32.xlu1 %v9114_v21  ;;  %v9273_v24 = vadd.f32 %v5880_v28, %v5878_v4  ;;  %v9277_v49 = vadd.f32 %v9172_v18, %v9160_v41  ;;  %v5892_v29 = vpop.eup %5891  ;;  %v10852_v25 = vld [vmem:[#allocation92_spill] sm:$0xff] }
 0x313   :  { %v2186_v47 = vmul.f32 1.442695, %v2087_v8  ;;  %2251 = vadd.xlane.f32.xlu0 %v9120_v30  ;;  %5905 = vpow2.f32 %v1279_v15  ;;  %v9279_v23 = vadd.f32 %v5888_v7, %v5886_v27  ;;  %v9281_v19 = vadd.f32 %v5884_v48, %v5882_v50  ;;  %v5894_v42 = vpop.eup %5893  ;;  %v10851_v7 = vld [vmem:[#allocation94_spill] sm:$0xff]  ;;  %v4230_v15 = vld [vmem:[#allocation2 + $0x98] sm:$0xff] }
 0x314   :  { %5907 = vpow2.f32 %v1281_v51  ;;  %v9283_v43 = vadd.f32 %v5892_v29, %v5890_v16  ;;  %v5896_v21 = vpop.eup %5895 }
 0x315   :  { %5909 = vpow2.f32 %v2184_v53  ;;  %v9287_v45 = vadd.f32 %v5896_v21, %v5894_v42  ;;  %v4359_v53 = vld [vmem:[#allocation3 + $0x98] sm:$0xff]  ;;  %v10855_v21 = vld [vmem:[#allocation97_spill] sm:$0xff] }
 0x316   :  { %5911 = vpow2.f32 %v2186_v47  ;;  %1355 = vadd.xlane.f32.xlu1 %v9133_v32 }
 0x317   :  { %v5898_v30 = vpop.eup %5897  ;;  %1352 = vadd.xlane.f32.xlu0 %v9143_v60 }
 0x318   :  { %v5900_v41 = vpop.eup %5899 }
 0x319   :  { %v5902_v18 = vpop.eup %5901  ;;  %v9289_v4 = vadd.f32 %v5900_v41, %v5898_v30 }
 0x31a   :  { %v5904_v28 = vpop.eup %5903  ;;  %2260 = vadd.xlane.f32.xlu1 %v9157_v39  ;;  %v4358_v39 = vld [vmem:[#allocation3 + $0x90] sm:$0xff] }
 0x31b   :  { %2257 = vadd.xlane.f32.xlu0 %v9170_v2  ;;  %v9293_v50 = vadd.f32 %v5904_v28, %v5902_v18  ;;  %v10857_v28 = vld [vmem:[#allocation98_spill] sm:$0xff] }
 0x31d   :  { %v5906_v48 = vpop.eup %5905 }
 0x31e   :  { %v5908_v27 = vpop.eup %5907  ;;  %1361 = vadd.xlane.f32.xlu1 %v9177_v36 }
 0x31f   :  { %v5910_v55 = vpop.eup %5909  ;;  %1358 = vadd.xlane.f32.xlu0 %v9187_v37  ;;  %v9297_v32 = vadd.f32 %v5908_v27, %v5906_v48  ;;  %v4229_v37 = vld [vmem:[#allocation2 + $0x90] sm:$0xff] }
 0x320   :  { %v5912_v60 = vpop.eup %5911 }
 0x321   :  { %v9299_v22 = vadd.f32 %v5912_v60, %v5910_v55 }
 0x322   :  { %2266 = vadd.xlane.f32.xlu1 %v9200_v13 }
 0x323   :  { %2263 = vadd.xlane.f32.xlu0 %v9206_v0 }
 0x324   :  { %v4171_v2 = vpop.xlane.xlu1 %4170 }
 0x325   :  { %v4390_v36 = vmul.f32 -2.0, %v4171_v2  ;;  %v4011_v44 = vpop.xlane.xlu0 %4010 }
 0x326   :  { %1367 = vadd.xlane.f32.xlu1 %v9211_v3  ;;  %v4261_v54 = vmul.f32 -2.0, %v4011_v44  ;;  %v10850_v3 = vld [vmem:[#allocation91_spill] sm:$0xff] }
 0x327   :  { %1364 = vadd.xlane.f32.xlu0 %v9219_v6  ;;  %v4422_v13 = vadd.f32 %v4390_v36, %v4358_v39 }
 0x328   :  { %v4293_v1 = vadd.f32 %v4261_v54, %v4229_v37  ;;  %v2012_v0 = vpop.xlane.xlu1 %2011  ;;  %v4360_v54 = vld [vmem:[#allocation3 + $0xa0] sm:$0xff] }
 0x329   :  { %4454 = vst.msk [vmem:[#allocation3 + $0x90] sm:$0xff] %vm986_vm3, %v4422_v13  ;;  %v2088_v6 = vsub.f32 %v10850_v3, %v2012_v0  ;;  %2362 = vst.msk [vmem:[#allocation6 + $0x90] sm:$0xff] %vm986_vm3, %v2012_v0  ;;  %v4231_v13 = vld [vmem:[#allocation2 + $0xa0] sm:$0xff] }
 0x32a   :  { %2272 = vadd.xlane.f32.xlu1 %v9231_v12  ;;  %v2089_v12 = vsub.f32 %v10851_v7, %v2012_v0  ;;  %4326 = vst.msk [vmem:[#allocation2 + $0x90] sm:$0xff] %vm986_vm3, %v4293_v1 }
 0x32b   :  { %2269 = vadd.xlane.f32.xlu0 %v9236_v38  ;;  %v1107_v38 = vpop.xlane.xlu0 %1106 }
 0x32c   :  { %v1183_v40 = vsub.f32 %v10852_v25, %v1107_v38  ;;  %v1184_v34 = vsub.f32 %v10853_v31, %v1107_v38  ;;  %1457 = vst.msk [vmem:[#allocation4 + $0x90] sm:$0xff] %vm986_vm3, %v1107_v38  ;;  %v10858_v38 = vld [vmem:[#allocation99_spill] sm:$0xff]  ;;  %v10860_v31 = vld [vmem:[#allocation100_spill] sm:$0xff] }
 0x32e   :  { %1373 = vadd.xlane.f32.xlu1 %v9241_v26  ;;  %v2188_v26 = vmul.f32 1.442695, %v2088_v6  ;;  %v1283_v59 = vmul.f32 1.442695, %v1183_v40  ;;  %v1285_v8 = vmul.f32 1.442695, %v1184_v34 }
 0x32f   :  { %1370 = vadd.xlane.f32.xlu0 %v1369_v52  ;;  %v2190_v52 = vmul.f32 1.442695, %v2089_v12  ;;  %v4014_v51 = vpop.xlane.xlu1 %4013  ;;  %v4174_v47 = vpop.xlane.xlu0 %4173  ;;  %v10859_v40 = vld [vmem:[#allocation102_spill] sm:$0xff] }
 0x330   :  { %5913 = vpow2.f32 %v2188_v26  ;;  %v4262_v16 = vmul.f32 -2.0, %v4014_v51  ;;  %v10861_v26 = vld [vmem:[#allocation101_spill] sm:$0xff] }
 0x331   :  { %5915 = vpow2.f32 %v2190_v52  ;;  %v4232_v51 = vld [vmem:[#allocation2 + $0xa8] sm:$0xff] }
 0x332   :  { %2278 = vadd.xlane.f32.xlu1 %v9258_v11  ;;  %5917 = vpow2.f32 %v1283_v59  ;;  %v4391_v11 = vmul.f32 -2.0, %v4174_v47 }
 0x333   :  { %2275 = vadd.xlane.f32.xlu0 %v9262_v61  ;;  %5919 = vpow2.f32 %v1285_v8  ;;  %v4294_v61 = vadd.f32 %v4262_v16, %v4230_v15  ;;  %v1110_v42 = vpop.xlane.xlu1 %1109 }
 0x334   :  { %v4423_v29 = vadd.f32 %v4391_v11, %v4359_v53  ;;  %v1186_v30 = vsub.f32 %v10855_v21, %v1110_v42  ;;  %1458 = vst.msk [vmem:[#allocation4 + $0x98] sm:$0xff] %vm986_vm3, %v1110_v42  ;;  %v2015_v41 = vpop.xlane.xlu0 %2014 }
 0x335   :  { %4327 = vst.msk [vmem:[#allocation2 + $0x98] sm:$0xff] %vm986_vm3, %v4294_v61  ;;  %v2091_v48 = vsub.f32 %v10857_v28, %v2015_v41  ;;  %2363 = vst.msk [vmem:[#allocation6 + $0x98] sm:$0xff] %vm986_vm3, %v2015_v41 }
 0x336   :  { %1379 = vadd.xlane.f32.xlu1 %v9265_v58  ;;  %4455 = vst.msk [vmem:[#allocation3 + $0x98] sm:$0xff] %vm986_vm3, %v4423_v29  ;;  %v10854_v58 = vld [vmem:[#allocation96_spill] sm:$0xff]  ;;  %v1289_v60 = vmul.f32 1.442695, %v1186_v30 }
 0x337   :  { %1376 = vadd.xlane.f32.xlu0 %v9269_v56  ;;  %v1185_v56 = vsub.f32 %v10854_v58, %v1110_v42  ;;  %v2194_v36 = vmul.f32 1.442695, %v2091_v48 }
 0x339   :  { %v1287_v55 = vmul.f32 1.442695, %v1185_v56 }
 0x33a   :  { %2284 = vadd.xlane.f32.xlu1 %v9273_v24  ;;  %v5914_v18 = vpop.eup %5913  ;;  %v10856_v24 = vld [vmem:[#allocation95_spill] sm:$0xff]  ;;  %v4017_v1 = vpop.xlane.xlu0 %4016 }
 0x33b   :  { %2281 = vadd.xlane.f32.xlu0 %v9277_v49  ;;  %v2090_v49 = vsub.f32 %v10856_v24, %v2015_v41  ;;  %v5916_v27 = vpop.eup %5915  ;;  %5921 = vpow2.f32 %v1287_v55  ;;  %v4263_v3 = vmul.f32 -2.0, %v4017_v1  ;;  %v10863_v24 = vld [vmem:[#allocation105_spill] sm:$0xff]  ;;  %v10864_v55 = vld [vmem:[#allocation103_spill] sm:$0xff] }
 0x33c   :  { %v5918_v39 = vpop.eup %5917  ;;  %v9332_v37 = vadd.f32 %v5916_v27, %v5914_v18  ;;  %5923 = vpow2.f32 %v1289_v60 }
 0x33d   :  { %v2192_v2 = vmul.f32 1.442695, %v2090_v49  ;;  %v5920_v44 = vpop.eup %5919  ;;  %v4295_v7 = vadd.f32 %v4263_v3, %v4231_v13 }
 0x33e   :  { %1385 = vadd.xlane.f32.xlu1 %v9283_v43  ;;  %v4177_v43 = vpop.xlane.xlu1 %4176  ;;  %v1393_v0 = vadd.f32 %v5920_v44, %v5918_v39  ;;  %v10865_v39 = vld [vmem:[#allocation106_spill] sm:$0xff] }
 0x33f   :  { %1382 = vadd.xlane.f32.xlu0 %v9279_v23  ;;  %v4392_v23 = vmul.f32 -2.0, %v4177_v43  ;;  %5925 = vpow2.f32 %v2192_v2  ;;  %4328 = vst.msk [vmem:[#allocation2 + $0xa0] sm:$0xff] %vm986_vm3, %v4295_v7 }
 0x340   :  { %5927 = vpow2.f32 %v2194_v36 }
 0x341   :  { %v4424_v6 = vadd.f32 %v4392_v23, %v4360_v54  ;;  %v4362_v54 = vld [vmem:[#allocation3 + $0xb0] sm:$0xff] }
 0x342   :  { %2290 = vadd.xlane.f32.xlu1 %v9287_v45  ;;  %v2018_v12 = vpop.xlane.xlu1 %2017  ;;  %v4233_v23 = vld [vmem:[#allocation2 + $0xb0] sm:$0xff] }
 0x343   :  { %2287 = vadd.xlane.f32.xlu0 %v9281_v19  ;;  %4456 = vst.msk [vmem:[#allocation3 + $0xa0] sm:$0xff] %vm986_vm3, %v4424_v6  ;;  %v2092_v25 = vsub.f32 %v10858_v38, %v2018_v12  ;;  %v2093_v45 = vsub.f32 %v10859_v40, %v2018_v12  ;;  %2364 = vst.msk [vmem:[#allocation6 + $0xa0] sm:$0xff] %vm986_vm3, %v2018_v12  ;;  %v1113_v19 = vpop.xlane.xlu0 %1112 }
 0x344   :  { %v1187_v34 = vsub.f32 %v10860_v31, %v1113_v19  ;;  %v1188_v52 = vsub.f32 %v10861_v26, %v1113_v19  ;;  %1459 = vst.msk [vmem:[#allocation4 + $0xa0] sm:$0xff] %vm986_vm3, %v1113_v19 }
 0x345   :  { %v2196_v59 = vmul.f32 1.442695, %v2092_v25  ;;  %v2198_v8 = vmul.f32 1.442695, %v2093_v45  ;;  %v5922_v11 = vpop.eup %5921 }
 0x346   :  { %1391 = vadd.xlane.f32.xlu1 %v9297_v32  ;;  %v1291_v32 = vmul.f32 1.442695, %v1187_v34  ;;  %v1293_v15 = vmul.f32 1.442695, %v1188_v52  ;;  %v4020_v53 = vpop.xlane.xlu1 %4019  ;;  %v5924_v29 = vpop.eup %5923  ;;  %v10867_v34 = vld [vmem:[#allocation110_spill] sm:$0xff]  ;;  %v10868_v52 = vld [vmem:[#allocation108_spill] sm:$0xff] }
 0x347   :  { %1388 = vadd.xlane.f32.xlu0 %v9293_v50  ;;  %5929 = vpow2.f32 %v2196_v59  ;;  %v4264_v47 = vmul.f32 -2.0, %v4020_v53  ;;  %v4361_v50 = vld [vmem:[#allocation3 + $0xa8] sm:$0xff]  ;;  %v4180_v16 = vpop.xlane.xlu0 %4179  ;;  %v1396_v30 = vadd.f32 %v5924_v29, %v5922_v11 }
 0x348   :  { %5931 = vpow2.f32 %v2198_v8  ;;  %v4393_v61 = vmul.f32 -2.0, %v4180_v16  ;;  %v10869_v8 = vld [vmem:[#allocation109_spill] sm:$0xff]  ;;  %v4234_v16 = vld [vmem:[#allocation2 + $0xb8] sm:$0xff] }
 0x349   :  { %5933 = vpow2.f32 %v1291_v32  ;;  %v4296_v42 = vadd.f32 %v4264_v47, %v4232_v51  ;;  %v5926_v58 = vpop.eup %5925 }
 0x34a   :  { %2296 = vadd.xlane.f32.xlu1 %v9299_v22  ;;  %5935 = vpow2.f32 %v1293_v15  ;;  %v4425_v56 = vadd.f32 %v4393_v61, %v4361_v50  ;;  %v1116_v21 = vpop.xlane.xlu1 %1115  ;;  %v5928_v41 = vpop.eup %5927  ;;  %v10862_v22 = vld [vmem:[#allocation104_spill] sm:$0xff] }
 0x34b   :  { %2293 = vadd.xlane.f32.xlu0 %v9289_v4  ;;  %4329 = vst.msk [vmem:[#allocation2 + $0xa8] sm:$0xff] %vm986_vm3, %v4296_v42  ;;  %v1189_v18 = vsub.f32 %v10862_v22, %v1116_v21  ;;  %v1190_v4 = vsub.f32 %v10863_v24, %v1116_v21  ;;  %1460 = vst.msk [vmem:[#allocation4 + $0xa8] sm:$0xff] %vm986_vm3, %v1116_v21  ;;  %v2021_v49 = vpop.xlane.xlu0 %2020  ;;  %v2301_v28 = vadd.f32 %v5928_v41, %v5926_v58  ;;  %v4363_v61 = vld [vmem:[#allocation3 + $0xb8] sm:$0xff] }
 0x34c   :  { %4457 = vst.msk [vmem:[#allocation3 + $0xa8] sm:$0xff] %vm986_vm3, %v4425_v56  ;;  %v2094_v60 = vsub.f32 %v10864_v55, %v2021_v49  ;;  %v2095_v2 = vsub.f32 %v10865_v39, %v2021_v49  ;;  %2365 = vst.msk [vmem:[#allocation6 + $0xa8] sm:$0xff] %vm986_vm3, %v2021_v49 }
 0x34d   :  { %v1295_v48 = vmul.f32 1.442695, %v1189_v18  ;;  %v1297_v27 = vmul.f32 1.442695, %v1190_v4 }
 0x34e   :  { %1397 = vadd.xlane.f32.xlu1 %v1396_v30  ;;  %v2200_v36 = vmul.f32 1.442695, %v2094_v60  ;;  %v2202_v44 = vmul.f32 1.442695, %v2095_v2  ;;  %v4183_v43 = vpop.xlane.xlu1 %4182  ;;  %v10872_v60 = vld [vmem:[#allocation111_spill] sm:$0xff]  ;;  %v10873_v2 = vld [vmem:[#allocation114_spill] sm:$0xff] }
 0x34f   :  { %1394 = vadd.xlane.f32.xlu0 %v1393_v0  ;;  %5937 = vpow2.f32 %v1295_v48  ;;  %v4023_v13 = vpop.xlane.xlu0 %4022  ;;  %v4394_v0 = vmul.f32 -2.0, %v4183_v43 }
 0x350   :  { %5939 = vpow2.f32 %v1297_v27  ;;  %v4265_v3 = vmul.f32 -2.0, %v4023_v13  ;;  %v10871_v27 = vld [vmem:[#allocation113_spill] sm:$0xff] }
 0x351   :  { %v5930_v1 = vpop.eup %5929  ;;  %5941 = vpow2.f32 %v2200_v36  ;;  %v4426_v12 = vadd.f32 %v4394_v0, %v4362_v54 }
 0x352   :  { %2302 = vadd.xlane.f32.xlu1 %v2301_v28  ;;  %v5932_v6 = vpop.eup %5931  ;;  %5943 = vpow2.f32 %v2202_v44  ;;  %v4297_v38 = vadd.f32 %v4265_v3, %v4233_v23  ;;  %v2024_v45 = vpop.xlane.xlu1 %2023  ;;  %v10870_v28 = vld [vmem:[#allocation112_spill] sm:$0xff] }
 0x353   :  { %2299 = vadd.xlane.f32.xlu0 %v9332_v37  ;;  %v5934_v7 = vpop.eup %5933  ;;  %v2304_v25 = vadd.f32 %v5932_v6, %v5930_v1  ;;  %v1119_v19 = vpop.xlane.xlu0 %1118  ;;  %4458 = vst.msk [vmem:[#allocation3 + $0xb0] sm:$0xff] %vm986_vm3, %v4426_v12  ;;  %v10866_v37 = vld [vmem:[#allocation107_spill] sm:$0xff]  ;;  %v2097_v26 = vsub.f32 %v10867_v34, %v2024_v45  ;;  %2366 = vst.msk [vmem:[#allocation6 + $0xb0] sm:$0xff] %vm986_vm3, %v2024_v45  ;;  %v4364_v1 = vld [vmem:[#allocation3 + $0xc0] sm:$0xff] }
 0x354   :  { %v5936_v40 = vpop.eup %5935  ;;  %4330 = vst.msk [vmem:[#allocation2 + $0xb0] sm:$0xff] %vm986_vm3, %v4297_v38  ;;  %v2096_v31 = vsub.f32 %v10866_v37, %v2024_v45  ;;  %v1191_v59 = vsub.f32 %v10868_v52, %v1119_v19  ;;  %v1192_v32 = vsub.f32 %v10869_v8, %v1119_v19  ;;  %1461 = vst.msk [vmem:[#allocation4 + $0xb0] sm:$0xff] %vm986_vm3, %v1119_v19  ;;  %v4235_v3 = vld [vmem:[#allocation2 + $0xc0] sm:$0xff]  ;;  %v10874_v34 = vld [vmem:[#allocation115_spill] sm:$0xff] }
 0x355   :  { %v1399_v15 = vadd.f32 %v5936_v40, %v5934_v7  ;;  %v2206_v53 = vmul.f32 1.442695, %v2097_v26  ;;  %v10875_v52 = vld [vmem:[#allocation118_spill] sm:$0xff]  ;;  %v10876_v8 = vld [vmem:[#allocation116_spill] sm:$0xff] }
 0x356   :  { %v2204_v51 = vmul.f32 1.442695, %v2096_v31  ;;  %v1299_v47 = vmul.f32 1.442695, %v1191_v59  ;;  %v1301_v50 = vmul.f32 1.442695, %v1192_v32  ;;  %v4026_v11 = vpop.xlane.xlu1 %4025 }
 0x357   :  { %1400 = vadd.xlane.f32.xlu0 %v1399_v15  ;;  %v4186_v29 = vpop.xlane.xlu0 %4185  ;;  %v4266_v58 = vmul.f32 -2.0, %v4026_v11  ;;  %v10877_v15 = vld [vmem:[#allocation117_spill] sm:$0xff] }
 0x358   :  { %5945 = vpow2.f32 %v2204_v51  ;;  %v4395_v56 = vmul.f32 -2.0, %v4186_v29 }
 0x359   :  { %v5938_v42 = vpop.eup %5937  ;;  %5947 = vpow2.f32 %v2206_v53  ;;  %v4298_v41 = vadd.f32 %v4266_v58, %v4234_v16 }
 0x35a   :  { %v5940_v21 = vpop.eup %5939  ;;  %5949 = vpow2.f32 %v1299_v47  ;;  %v4427_v22 = vadd.f32 %v4395_v56, %v4363_v61  ;;  %v1122_v4 = vpop.xlane.xlu1 %1121  ;;  %v4365_v56 = vld [vmem:[#allocation3 + $0xc8] sm:$0xff] }
 0x35b   :  { %v5942_v30 = vpop.eup %5941  ;;  %v1402_v18 = vadd.f32 %v5940_v21, %v5938_v42  ;;  %5951 = vpow2.f32 %v1301_v50  ;;  %2305 = vadd.xlane.f32.xlu0 %v2304_v25  ;;  %v2027_v49 = vpop.xlane.xlu0 %2026  ;;  %4331 = vst.msk [vmem:[#allocation2 + $0xb8] sm:$0xff] %vm986_vm3, %v4298_v41  ;;  %v1193_v48 = vsub.f32 %v10870_v28, %v1122_v4  ;;  %v1194_v55 = vsub.f32 %v10871_v27, %v1122_v4  ;;  %v4236_v42 = vld [vmem:[#allocation2 + $0xc8] sm:$0xff]  ;;  %v10878_v27 = vld [vmem:[#allocation120_spill] sm:$0xff] }
 0x35c   :  { %v5944_v24 = vpop.eup %5943  ;;  %4459 = vst.msk [vmem:[#allocation3 + $0xb8] sm:$0xff] %vm986_vm3, %v4427_v22  ;;  %1462 = vst.msk [vmem:[#allocation4 + $0xb8] sm:$0xff] %vm986_vm3, %v1122_v4  ;;  %v2098_v39 = vsub.f32 %v10872_v60, %v2027_v49  ;;  %v2099_v36 = vsub.f32 %v10873_v2, %v2027_v49  ;;  %v10879_v60 = vld [vmem:[#allocation121_spill] sm:$0xff]  ;;  %v10880_v2 = vld [vmem:[#allocation119_spill] sm:$0xff] }
 0x35d   :  { %2367 = vst.msk [vmem:[#allocation6 + $0xb8] sm:$0xff] %vm986_vm3, %v2027_v49  ;;  %1403 = vadd.xlane.f32.xlu1 %v1402_v18  ;;  %v2307_v44 = vadd.f32 %v5944_v24, %v5942_v30  ;;  %v1303_v54 = vmul.f32 1.442695, %v1193_v48  ;;  %v1305_v43 = vmul.f32 1.442695, %v1194_v55 }
 0x35e   :  { %v2208_v23 = vmul.f32 1.442695, %v2098_v39  ;;  %v2210_v13 = vmul.f32 1.442695, %v2099_v36  ;;  %v4189_v0 = vpop.xlane.xlu1 %4188 }
 0x35f   :  { %v4029_v6 = vpop.xlane.xlu0 %4028  ;;  %5953 = vpow2.f32 %v1303_v54  ;;  %v4396_v7 = vmul.f32 -2.0, %v4189_v0 }
 0x360   :  { %v4267_v12 = vmul.f32 -2.0, %v4029_v6  ;;  %5955 = vpow2.f32 %v1305_v43 }
 0x361   :  { %2308 = vadd.xlane.f32.xlu1 %v2307_v44  ;;  %5957 = vpow2.f32 %v2208_v23  ;;  %v4428_v25 = vadd.f32 %v4396_v7, %v4364_v1  ;;  %v10881_v44 = vld [vmem:[#allocation122_spill] sm:$0xff] }
 0x362   :  { %v5946_v38 = vpop.eup %5945  ;;  %v4299_v40 = vadd.f32 %v4267_v12, %v4235_v3  ;;  %5959 = vpow2.f32 %v2210_v13  ;;  %v2030_v19 = vpop.xlane.xlu1 %2029  ;;  %v4366_v7 = vld [vmem:[#allocation3 + $0xd0] sm:$0xff] }
 0x363   :  { %v5948_v45 = vpop.eup %5947  ;;  %v1125_v37 = vpop.xlane.xlu0 %1124  ;;  %4460 = vst.msk [vmem:[#allocation3 + $0xc0] sm:$0xff] %vm986_vm3, %v4428_v25  ;;  %v2100_v26 = vsub.f32 %v10874_v34, %v2030_v19  ;;  %v2101_v59 = vsub.f32 %v10875_v52, %v2030_v19  ;;  %2368 = vst.msk [vmem:[#allocation6 + $0xc0] sm:$0xff] %vm986_vm3, %v2030_v19 }
 0x364   :  { %v5950_v31 = vpop.eup %5949  ;;  %4332 = vst.msk [vmem:[#allocation2 + $0xc0] sm:$0xff] %vm986_vm3, %v4299_v40  ;;  %v1195_v32 = vsub.f32 %v10876_v8, %v1125_v37  ;;  %v1196_v51 = vsub.f32 %v10877_v15, %v1125_v37  ;;  %1463 = vst.msk [vmem:[#allocation4 + $0xc0] sm:$0xff] %vm986_vm3, %v1125_v37  ;;  %v2310_v47 = vadd.f32 %v5948_v45, %v5946_v38  ;;  %v4237_v38 = vld [vmem:[#allocation2 + $0xd0] sm:$0xff] }
 0x365   :  { %v5952_v53 = vpop.eup %5951  ;;  %v2212_v50 = vmul.f32 1.442695, %v2100_v26  ;;  %v2214_v16 = vmul.f32 1.442695, %v2101_v59  ;;  %v10882_v8 = vld [vmem:[#allocation123_spill] sm:$0xff]  ;;  %v10883_v15 = vld [vmem:[#allocation126_spill] sm:$0xff] }
 0x366   :  { %v1307_v11 = vmul.f32 1.442695, %v1195_v32  ;;  %v1405_v61 = vadd.f32 %v5952_v53, %v5950_v31  ;;  %v1309_v29 = vmul.f32 1.442695, %v1196_v51  ;;  %v4032_v58 = vpop.xlane.xlu1 %4031  ;;  %v10884_v53 = vld [vmem:[#allocation124_spill] sm:$0xff] }
 0x367   :  { %v4192_v21 = vpop.xlane.xlu0 %4191  ;;  %5961 = vpow2.f32 %v2212_v50  ;;  %v4268_v30 = vmul.f32 -2.0, %v4032_v58  ;;  %v10885_v50 = vld [vmem:[#allocation125_spill] sm:$0xff] }
 0x368   :  { %1406 = vadd.xlane.f32.xlu0 %v1405_v61  ;;  %v4397_v41 = vmul.f32 -2.0, %v4192_v21  ;;  %5963 = vpow2.f32 %v2214_v16 }
 0x369   :  { %v5954_v22 = vpop.eup %5953  ;;  %5965 = vpow2.f32 %v1307_v11  ;;  %v4300_v18 = vadd.f32 %v4268_v30, %v4236_v42  ;;  %v4367_v30 = vld [vmem:[#allocation3 + $0xd8] sm:$0xff] }
 0x36a   :  { %v4429_v24 = vadd.f32 %v4397_v41, %v4365_v56  ;;  %v5956_v4 = vpop.eup %5955  ;;  %5967 = vpow2.f32 %v1309_v29  ;;  %v1128_v49 = vpop.xlane.xlu1 %1127 }
 0x36b   :  { %v2033_v28 = vpop.xlane.xlu0 %2032  ;;  %v5958_v48 = vpop.eup %5957  ;;  %4333 = vst.msk [vmem:[#allocation2 + $0xc8] sm:$0xff] %vm986_vm3, %v4300_v18  ;;  %v1197_v55 = vsub.f32 %v10878_v27, %v1128_v49  ;;  %v1198_v39 = vsub.f32 %v10879_v60, %v1128_v49  ;;  %1464 = vst.msk [vmem:[#allocation4 + $0xc8] sm:$0xff] %vm986_vm3, %v1128_v49  ;;  %v1408_v23 = vadd.f32 %v5956_v4, %v5954_v22  ;;  %v4238_v22 = vld [vmem:[#allocation2 + $0xd8] sm:$0xff] }
 0x36c   :  { %4461 = vst.msk [vmem:[#allocation3 + $0xc8] sm:$0xff] %vm986_vm3, %v4429_v24  ;;  %2311 = vadd.xlane.f32.xlu0 %v2310_v47  ;;  %v2102_v36 = vsub.f32 %v10880_v2, %v2033_v28  ;;  %v2103_v54 = vsub.f32 %v10881_v44, %v2033_v28  ;;  %2369 = vst.msk [vmem:[#allocation6 + $0xc8] sm:$0xff] %vm986_vm3, %v2033_v28  ;;  %v5960_v43 = vpop.eup %5959  ;;  %v10886_v2 = vld [vmem:[#allocation128_spill] sm:$0xff]  ;;  %v10887_v44 = vld [vmem:[#allocation129_spill] sm:$0xff] }
 0x36d   :  { %v1311_v13 = vmul.f32 1.442695, %v1197_v55  ;;  %v1313_v1 = vmul.f32 1.442695, %v1198_v39  ;;  %v2313_v3 = vadd.f32 %v5960_v43, %v5958_v48  ;;  %1409 = vadd.xlane.f32.xlu1 %v1408_v23  ;;  %v10888_v43 = vld [vmem:[#allocation127_spill] sm:$0xff] }
 0x36e   :  { %v2216_v0 = vmul.f32 1.442695, %v2102_v36  ;;  %v2218_v6 = vmul.f32 1.442695, %v2103_v54  ;;  %v4195_v12 = vpop.xlane.xlu1 %4194 }
 0x36f   :  { %v4035_v25 = vpop.xlane.xlu0 %4034  ;;  %5969 = vpow2.f32 %v1311_v13  ;;  %v4398_v40 = vmul.f32 -2.0, %v4195_v12  ;;  %v10889_v13 = vld [vmem:[#allocation130_spill] sm:$0xff] }
 0x370   :  { %v4269_v45 = vmul.f32 -2.0, %v4035_v25  ;;  %5971 = vpow2.f32 %v1313_v1 }
 0x371   :  { %v5962_v19 = vpop.eup %5961  ;;  %5973 = vpow2.f32 %v2216_v0  ;;  %v4430_v37 = vadd.f32 %v4398_v40, %v4366_v7  ;;  %2314 = vadd.xlane.f32.xlu1 %v2313_v3 }
 0x372   :  { %v4301_v31 = vadd.f32 %v4269_v45, %v4237_v38  ;;  %v5964_v34 = vpop.eup %5963  ;;  %5975 = vpow2.f32 %v2218_v6  ;;  %v2036_v26 = vpop.xlane.xlu1 %2035 }
 0x373   :  { %v1131_v52 = vpop.xlane.xlu0 %1130  ;;  %v5966_v59 = vpop.eup %5965  ;;  %4462 = vst.msk [vmem:[#allocation3 + $0xd0] sm:$0xff] %vm986_vm3, %v4430_v37  ;;  %v2104_v32 = vsub.f32 %v10882_v8, %v2036_v26  ;;  %v2105_v51 = vsub.f32 %v10883_v15, %v2036_v26  ;;  %2370 = vst.msk [vmem:[#allocation6 + $0xd0] sm:$0xff] %vm986_vm3, %v2036_v26  ;;  %v2316_v61 = vadd.f32 %v5964_v34, %v5962_v19  ;;  %v10891_v26 = vld [vmem:[#allocation133_spill] sm:$0xff] }
 0x374   :  { %4334 = vst.msk [vmem:[#allocation2 + $0xd0] sm:$0xff] %vm986_vm3, %v4301_v31  ;;  %v1199_v47 = vsub.f32 %v10884_v53, %v1131_v52  ;;  %v1200_v16 = vsub.f32 %v10885_v50, %v1131_v52  ;;  %1465 = vst.msk [vmem:[#allocation4 + $0xd0] sm:$0xff] %vm986_vm3, %v1131_v52  ;;  %v5968_v11 = vpop.eup %5967  ;;  %v10890_v31 = vld [vmem:[#allocation132_spill] sm:$0xff] }
 0x375   :  { %v2220_v29 = vmul.f32 1.442695, %v2104_v32  ;;  %v2222_v42 = vmul.f32 1.442695, %v2105_v51  ;;  %v1411_v56 = vadd.f32 %v5968_v11, %v5966_v59 }
 0x376   :  { %v1315_v58 = vmul.f32 1.442695, %v1199_v47  ;;  %v1317_v21 = vmul.f32 1.442695, %v1200_v16  ;;  %v4198_v41 = vpop.xlane.xlu1 %4197 }
 0x377   :  { %v4038_v18 = vpop.xlane.xlu0 %4037  ;;  %5977 = vpow2.f32 %v2220_v29  ;;  %v4399_v24 = vmul.f32 -2.0, %v4198_v41  ;;  %1412 = vadd.xlane.f32.xlu0 %v1411_v56 }
 0x378   :  { %v4270_v4 = vmul.f32 -2.0, %v4038_v18  ;;  %5979 = vpow2.f32 %v2222_v42 }
 0x379   :  { %v5970_v49 = vpop.eup %5969  ;;  %5981 = vpow2.f32 %v1315_v58  ;;  %v4431_v28 = vadd.f32 %v4399_v24, %v4367_v30 }
 0x37a   :  { %v4302_v48 = vadd.f32 %v4270_v4, %v4238_v22  ;;  %v5972_v27 = vpop.eup %5971  ;;  %5983 = vpow2.f32 %v1317_v21  ;;  %v1134_v55 = vpop.xlane.xlu1 %1133 }
 0x37b   :  { %v2039_v60 = vpop.xlane.xlu0 %2038  ;;  %v5974_v39 = vpop.eup %5973  ;;  %4463 = vst.msk [vmem:[#allocation3 + $0xd8] sm:$0xff] %vm986_vm3, %v4431_v28  ;;  %v1201_v36 = vsub.f32 %v10886_v2, %v1134_v55  ;;  %v1202_v54 = vsub.f32 %v10887_v44, %v1134_v55  ;;  %1466 = vst.msk [vmem:[#allocation4 + $0xd8] sm:$0xff] %vm986_vm3, %v1134_v55  ;;  %2317 = vadd.xlane.f32.xlu0 %v2316_v61  ;;  %v1414_v3 = vadd.f32 %v5972_v27, %v5970_v49 }
 0x37c   :  { %4335 = vst.msk [vmem:[#allocation2 + $0xd8] sm:$0xff] %vm986_vm3, %v4302_v48  ;;  %v2106_v23 = vsub.f32 %v10888_v43, %v2039_v60  ;;  %v2107_v1 = vsub.f32 %v10889_v13, %v2039_v60  ;;  %2371 = vst.msk [vmem:[#allocation6 + $0xd8] sm:$0xff] %vm986_vm3, %v2039_v60  ;;  %v5976_v0 = vpop.eup %5975  ;;  %v10893_v13 = vld [vmem:[#allocation146_spill] sm:$0xff] }
 0x37d   :  { %v1319_v6 = vmul.f32 1.442695, %v1201_v36  ;;  %v1321_v7 = vmul.f32 1.442695, %v1202_v54  ;;  %v2319_v38 = vadd.f32 %v5976_v0, %v5974_v39  ;;  %1415 = vadd.xlane.f32.xlu1 %v1414_v3  ;;  %v10892_v54 = vld [vmem:[#allocation143_spill] sm:$0xff] }
 0x37e   :  { %v2224_v12 = vmul.f32 1.442695, %v2106_v23  ;;  %v2226_v25 = vmul.f32 1.442695, %v2107_v1 }
 0x37f   :  { %v1137_v45 = vpop.xlane.xlu0 %1136  ;;  %5985 = vpow2.f32 %v1319_v6 }
 0x380   :  { %v1203_v34 = vsub.f32 %v10890_v31, %v1137_v45  ;;  %1467 = vst.msk [vmem:[#allocation4 + $0xe0] sm:$0xff] %vm986_vm3, %v1137_v45  ;;  %5987 = vpow2.f32 %v1321_v7  ;;  %v1204_v52 = vsub.f32 %v10891_v26, %v1137_v45 }
 0x381   :  { %v2042_v40 = vpop.xlane.xlu1 %2041  ;;  %v5978_v59 = vpop.eup %5977  ;;  %5989 = vpow2.f32 %v2224_v12  ;;  %2320 = vadd.xlane.f32.xlu1 %v2319_v38 }
 0x382   :  { %v2108_v19 = vsub.f32 %v10752_v62, %v2042_v40  ;;  %v2109_v37 = vsub.f32 %v10751_v20, %v2042_v40  ;;  %2372 = vst.msk [vmem:[#allocation6 + $0xe0] sm:$0xff] %vm986_vm3, %v2042_v40  ;;  %v1323_v15 = vmul.f32 1.442695, %v1203_v34  ;;  %v5980_v51 = vpop.eup %5979  ;;  %5991 = vpow2.f32 %v2226_v25 }
 0x383   :  { %v1325_v53 = vmul.f32 1.442695, %v1204_v52  ;;  %v5982_v50 = vpop.eup %5981  ;;  %v2322_v58 = vadd.f32 %v5980_v51, %v5978_v59 }
 0x384   :  { %v2228_v8 = vmul.f32 1.442695, %v2108_v19  ;;  %v2230_v32 = vmul.f32 1.442695, %v2109_v37  ;;  %v5984_v29 = vpop.eup %5983 }
 0x385   :  { %v2045_v47 = vpop.xlane.xlu0 %2044  ;;  %v1417_v22 = vadd.f32 %v5984_v29, %v5982_v50 }
 0x386   :  { %v1140_v62 = vpop.xlane.xlu1 %1139  ;;  %5993 = vpow2.f32 %v2228_v8  ;;  %v2110_v61 = vsub.f32 %v10769_v10, %v2045_v47  ;;  %2373 = vst.msk [vmem:[#allocation6 + $0xe8] sm:$0xff] %vm986_vm3, %v2045_v47  ;;  %v2111_v42 = vsub.f32 %v10768_v57, %v2045_v47 }
 0x387   :  { %v1205_v16 = vsub.f32 %v10765_v35, %v1140_v62  ;;  %v1206_v11 = vsub.f32 %v10764_v9, %v1140_v62  ;;  %1468 = vst.msk [vmem:[#allocation4 + $0xe8] sm:$0xff] %vm986_vm3, %v1140_v62  ;;  %5995 = vpow2.f32 %v2230_v32  ;;  %1418 = vadd.xlane.f32.xlu0 %v1417_v22  ;;  %v4992_v62 = vld [vmem:[#allocation11] sm:$0x3] }
 0x388   :  { %5997 = vpow2.f32 %v1323_v15  ;;  %v2232_v30 = vmul.f32 1.442695, %v2110_v61  ;;  %v2234_v41 = vmul.f32 1.442695, %v2111_v42  ;;  %v4987_v15 = vld [vmem:[#allocation9] sm:$0x3] }
 0x389   :  { %v1327_v56 = vmul.f32 1.442695, %v1205_v16  ;;  %v1329_v21 = vmul.f32 1.442695, %v1206_v11  ;;  %5999 = vpow2.f32 %v1325_v53  ;;  %v5986_v28 = vpop.eup %5985 }
 0x38a   :  { %v5988_v60 = vpop.eup %5987 }
 0x38b   :  { %v2048_v35 = vpop.xlane.xlu1 %2047  ;;  %v1143_v18 = vpop.xlane.xlu0 %1142  ;;  %6001 = vpow2.f32 %v1327_v56  ;;  %2323 = vadd.xlane.f32.xlu0 %v2322_v58  ;;  %v1420_v0 = vadd.f32 %v5988_v60, %v5986_v28  ;;  %v10894_v56 = vld [vmem:[#allocation18_spill] sm:$0xff] }
 0x38c   :  { %v2112_v24 = vsub.f32 %v10773_v63, %v2048_v35  ;;  %v2113_v10 = vsub.f32 %v10772_v14, %v2048_v35  ;;  %2374 = vst.msk [vmem:[#allocation6 + $0xf0] sm:$0xff] %vm986_vm3, %v2048_v35  ;;  %v1207_v4 = vsub.f32 %v10778_v33, %v1143_v18  ;;  %1469 = vst.msk [vmem:[#allocation4 + $0xf0] sm:$0xff] %vm986_vm3, %v1143_v18  ;;  %6003 = vpow2.f32 %v1329_v21  ;;  %v5990_v36 = vpop.eup %5989 }
 0x38d   :  { %v1208_v49 = vsub.f32 %v10777_v46, %v1143_v18  ;;  %6005 = vpow2.f32 %v2232_v30  ;;  %v5992_v23 = vpop.eup %5991  ;;  %1421 = vadd.xlane.f32.xlu1 %v1420_v0  ;;  %v3820_v21 = vadd.s32 224, %v10894_v56  ;;  %v9449_v0 = vadd.s32 240, %v10894_v56 }
 0x38e   :  { %v2236_v48 = vmul.f32 1.442695, %v2112_v24  ;;  %v2238_v27 = vmul.f32 1.442695, %v2113_v10  ;;  %v1331_v55 = vmul.f32 1.442695, %v1207_v4  ;;  %6007 = vpow2.f32 %v2234_v41 }
 0x38f   :  { %v1333_v63 = vmul.f32 1.442695, %v1208_v49  ;;  %v1146_v39 = vpop.xlane.xlu1 %1145  ;;  %v2325_v45 = vadd.f32 %v5992_v23, %v5990_v36  ;;  %v3821_v23 = vadd.s32 232, %v10894_v56 }
 0x390   :  { %v2051_v2 = vpop.xlane.xlu0 %2050  ;;  %6009 = vpow2.f32 %v2236_v48  ;;  %v1209_v33 = vsub.f32 %v10784_v17, %v1146_v39  ;;  %v1210_v44 = vsub.f32 %v10783_v5, %v1146_v39  ;;  %1470 = vst.msk [vmem:[#allocation4 + $0xf8] sm:$0xff] %vm986_vm3, %v1146_v39  ;;  %v5994_v3 = vpop.eup %5993  ;;  %v10895_v48 = vld [vmem:[#allocation147_spill] sm:$0xff] }
 0x391   :  { %v2114_v43 = vsub.f32 %v10892_v54, %v2051_v2  ;;  %2375 = vst.msk [vmem:[#allocation6 + $0xf8] sm:$0xff] %vm986_vm3, %v2051_v2  ;;  %6011 = vpow2.f32 %v2238_v27  ;;  %v2115_v1 = vsub.f32 %v10893_v13, %v2051_v2  ;;  %v5996_v17 = vpop.eup %5995  ;;  %2326 = vadd.xlane.f32.xlu1 %v2325_v45  ;;  %vm3884_vm14 = vcmp.eq.s32.totalorder %v3820_v21, %v10895_v48 }
 0x392   :  { %6013 = vpow2.f32 %v1331_v55  ;;  %v1335_v6 = vmul.f32 1.442695, %v1209_v33  ;;  %v1337_v7 = vmul.f32 1.442695, %v1210_v44  ;;  %v5998_v19 = vpop.eup %5997  ;;  %v2328_v37 = vadd.f32 %v5996_v17, %v5994_v3 }
 0x393   :  { %v2240_v12 = vmul.f32 1.442695, %v2114_v43  ;;  %6015 = vpow2.f32 %v1333_v63  ;;  %v2242_v38 = vmul.f32 1.442695, %v2115_v1  ;;  %v1344_v25 = vpop.xlane.xlu1 %1343  ;;  %v6000_v31 = vpop.eup %5999  ;;  %v4108_v63 = vsel %vm3884_vm14, %v10751_v20, 0.0 }
 0x394   :  { %v1341_v40 = vpop.xlane.xlu0 %1340  ;;  %6017 = vpow2.f32 %v1335_v6  ;;  %1472 = vst.msk [vmem:[#allocation5 + $0x8] sm:$0xff] %vm986_vm3, %v1344_v25  ;;  %v1423_v52 = vadd.f32 %v6000_v31, %v5998_v19  ;;  %v3948_v20 = vsel %vm3884_vm14, %v10891_v26, 0.0  ;;  %v9454_v26 = vadd.s32 248, %v10894_v56  ;;  %v4503_v19 = vld [vmem:[#allocation4] sm:$0xff] }
 0x395   :  { %1471 = vst.msk [vmem:[#allocation5] sm:$0xff] %vm986_vm3, %v1341_v40  ;;  %6019 = vpow2.f32 %v1337_v7  ;;  %v6002_v34 = vpop.eup %6001  ;;  %v4504_v40 = vld [vmem:[#allocation4 + $0x8] sm:$0xff]  ;;  %vm3886_vm15 = vcmp.eq.s32.totalorder %v3821_v23, %v10895_v48  ;;  %v5000_v31 = vsub.s32 0, %v10894_v56  ;;  %vm3888_vm0 = vcmp.eq.s32.totalorder %v9449_v0, %v10895_v48 }
 0x396   :  { %6021 = vpow2.f32 %v2240_v12  ;;  %v6004_v59 = vpop.eup %6003  ;;  %1424 = vadd.xlane.f32.xlu0 %v1423_v52  ;;  %v4472_v52 = vld [vmem:[#allocation2 + $0x8] sm:$0xff]  ;;  %vm3890_vm1 = vcmp.eq.s32.totalorder %v9454_v26, %v10895_v48 }
 0x397   :  { %6023 = vpow2.f32 %v2242_v38  ;;  %v2249_v8 = vpop.xlane.xlu1 %2248  ;;  %v6006_v51 = vpop.eup %6005  ;;  %v1426_v53 = vadd.f32 %v6004_v59, %v6002_v34 }
 0x398   :  { %v2246_v32 = vpop.xlane.xlu0 %2245  ;;  %2377 = vst.msk [vmem:[#allocation7 + $0x8] sm:$0xff] %vm986_vm3, %v2249_v8  ;;  %v6008_v47 = vpop.eup %6007  ;;  %6025 = vlog2.f32 %v4987_v15  ;;  %v3950_v8 = vsel %vm3886_vm15, %v10764_v9, 0.0 }
 0x399   :  { %2376 = vst.msk [vmem:[#allocation7] sm:$0xff] %vm986_vm3, %v2246_v32  ;;  %v2331_v16 = vadd.f32 %v6008_v47, %v6006_v51  ;;  %1427 = vadd.xlane.f32.xlu1 %v1426_v53  ;;  %6027 = vlog2.f32 %v4992_v62  ;;  %v4986_v32 = vld [vmem:[#allocation8] sm:$0x3] }
 0x39a   :  { %v6010_v50 = vpop.eup %6009  ;;  %2329 = vadd.xlane.f32.xlu0 %v2328_v37  ;;  %v4471_v62 = vld [vmem:[#allocation2] sm:$0xff] }
 0x39b   :  { %v6012_v11 = vpop.eup %6011  ;;  %v4536_v61 = vld [vmem:[#allocation5 + $0x8] sm:$0xff]  ;;  %v1350_v42 = vpop.xlane.xlu1 %1349 }
 0x39c   :  { %v4535_v29 = vld [vmem:[#allocation5] sm:$0xff]  ;;  %v1347_v58 = vpop.xlane.xlu0 %1346  ;;  %v6014_v30 = vpop.eup %6013  ;;  %6029 = vlog2.f32 %v4536_v61  ;;  %1474 = vst.msk [vmem:[#allocation5 + $0x18] sm:$0xff] %vm986_vm3, %v1350_v42  ;;  %v2334_v41 = vadd.f32 %v6012_v11, %v6010_v50  ;;  %v5004_v42 = vsub.s32 1, %v10894_v56 }
 0x39d   :  { %1473 = vst.msk [vmem:[#allocation5 + $0x10] sm:$0xff] %vm986_vm3, %v1347_v58  ;;  %v6016_v35 = vpop.eup %6015  ;;  %6031 = vlog2.f32 %v4535_v29  ;;  %2332 = vadd.xlane.f32.xlu1 %v2331_v16  ;;  %v4761_v58 = vld [vmem:[#allocation6 + $0x8] sm:$0xff] }
 0x39e   :  { %v6018_v22 = vpop.eup %6017  ;;  %v1429_v18 = vadd.f32 %v6016_v35, %v6014_v30  ;;  %v4760_v30 = vld [vmem:[#allocation6] sm:$0xff]  ;;  %v4110_v35 = vsel %vm3886_vm15, %v10768_v57, 0.0 }
 0x39f   :  { %v6020_v24 = vpop.eup %6019  ;;  %v4793_v10 = vld [vmem:[#allocation7 + $0x8] sm:$0xff]  ;;  %v2255_v49 = vpop.xlane.xlu1 %2254 }
 0x3a0   :  { %v4792_v4 = vld [vmem:[#allocation7] sm:$0xff]  ;;  %v2252_v28 = vpop.xlane.xlu0 %2251  ;;  %v6022_v27 = vpop.eup %6021  ;;  %6033 = vlog2.f32 %v4793_v10  ;;  %1430 = vadd.xlane.f32.xlu0 %v1429_v18  ;;  %2379 = vst.msk [vmem:[#allocation7 + $0x18] sm:$0xff] %vm986_vm3, %v2255_v49  ;;  %v1432_v55 = vadd.f32 %v6020_v24, %v6018_v22  ;;  %v4729_v24 = vld [vmem:[#allocation3 + $0x8] sm:$0xff] }
 0x3a1   :  { %2378 = vst.msk [vmem:[#allocation7 + $0x10] sm:$0xff] %vm986_vm3, %v2252_v28  ;;  %v6024_v60 = vpop.eup %6023  ;;  %6035 = vlog2.f32 %v4792_v4  ;;  %4200 = vadd.xlane.f32.xlu1 %v4108_v63  ;;  %v4991_v22 = vld [vmem:[#allocation10] sm:$0x3]  ;;  %v3952_v4 = vsel %vm3888_vm0, %v10777_v46, 0.0 }
 0x3a2   :  { %v2337_v39 = vadd.f32 %v6024_v60, %v6022_v27  ;;  %v6026_v54 = vpop.eup %6025 }
 0x3a3   :  { %v4538_v2 = vld [vmem:[#allocation5 + $0x18] sm:$0xff]  ;;  %v1356_v33 = vpop.xlane.xlu1 %1355  ;;  %v6028_v43 = vpop.eup %6027  ;;  %v4989_v25 = vmul.f32 0.6931472, %v6026_v54 }
 0x3a4   :  { %v4537_v36 = vld [vmem:[#allocation5 + $0x10] sm:$0xff]  ;;  %v1353_v44 = vpop.xlane.xlu0 %1352  ;;  %6037 = vlog2.f32 %v4538_v2  ;;  %2335 = vadd.xlane.f32.xlu0 %v2334_v41  ;;  %1476 = vst.msk [vmem:[#allocation5 + $0x28] sm:$0xff] %vm986_vm3, %v1356_v33  ;;  %v4994_v15 = vmul.f32 0.6931472, %v6028_v43 }
 0x3a5   :  { %1475 = vst.msk [vmem:[#allocation5 + $0x20] sm:$0xff] %vm986_vm3, %v1353_v44  ;;  %6039 = vlog2.f32 %v4537_v36  ;;  %1433 = vadd.xlane.f32.xlu1 %v1432_v55  ;;  %v4990_v29 = vadd.f32 %v4989_v25, %v4986_v32  ;;  %v4728_v55 = vld [vmem:[#allocation3] sm:$0xff]  ;;  %v4506_v44 = vld [vmem:[#allocation4 + $0x18] sm:$0xff]  ;;  %v4505_v43 = vld [vmem:[#allocation4 + $0x10] sm:$0xff] }
 0x3a6   :  { %v6030_v1 = vpop.eup %6029  ;;  %v4995_v49 = vadd.f32 %v4994_v15, %v4991_v22 }
 0x3a7   :  { %v6032_v3 = vpop.eup %6031  ;;  %v4570_v6 = vmul.f32 0.6931472, %v6030_v1  ;;  %v4795_v7 = vld [vmem:[#allocation7 + $0x18] sm:$0xff]  ;;  %v2261_v17 = vpop.xlane.xlu1 %2260  ;;  %v5001_v36 = vrot.slane %v4990_v29, %v5000_v31  ;;  %v5005_v33 = vrot.slane %v4990_v29, %v5004_v42  ;;  %v4112_v1 = vsel %vm3888_vm0, %v10772_v14, 0.0 }
 0x3a8   :  { %v4794_v12 = vld [vmem:[#allocation7 + $0x10] sm:$0xff]  ;;  %v2258_v38 = vpop.xlane.xlu0 %2257  ;;  %v4568_v45 = vmul.f32 0.6931472, %v6032_v3  ;;  %6041 = vlog2.f32 %v4795_v7  ;;  %4040 = vadd.xlane.f32.xlu0 %v3948_v20  ;;  %2381 = vst.msk [vmem:[#allocation7 + $0x28] sm:$0xff] %vm986_vm3, %v2261_v17  ;;  %v4474_v3 = vld [vmem:[#allocation2 + $0x18] sm:$0xff]  ;;  %v5019_v17 = vrot.slane %v4995_v49, %v5000_v31  ;;  %v4114_v31 = vsel %vm3890_vm1, %v10893_v13, 0.0 }
 0x3a9   :  { %2380 = vst.msk [vmem:[#allocation7 + $0x20] sm:$0xff] %vm986_vm3, %v2258_v38  ;;  %v4632_v37 = vadd.f32 %v4570_v6, %v4504_v40  ;;  %6043 = vlog2.f32 %v4794_v12  ;;  %2338 = vadd.xlane.f32.xlu1 %v2337_v39  ;;  %v4473_v6 = vld [vmem:[#allocation2 + $0x10] sm:$0xff]  ;;  %v3954_v12 = vsel %vm3890_vm1, %v10783_v5, 0.0  ;;  %v5023_v38 = vrot.slane %v4995_v49, %v5004_v42  ;;  %v4508_v13 = vld [vmem:[#allocation4 + $0x28] sm:$0xff]  ;;  %v4475_v49 = vld [vmem:[#allocation2 + $0x20] sm:$0xff] }
 0x3aa   :  { %v6034_v34 = vpop.eup %6033  ;;  %v4631_v59 = vadd.f32 %v4568_v45, %v4503_v19  ;;  %v4762_v5 = vld [vmem:[#allocation6 + $0x10] sm:$0xff] }
 0x3ab   :  { %v6036_v51 = vpop.eup %6035  ;;  %v4664_v53 = vadd.f32 %v4632_v37, %v4472_v52  ;;  %v4827_v47 = vmul.f32 0.6931472, %v6034_v34  ;;  %v4540_v50 = vld [vmem:[#allocation5 + $0x28] sm:$0xff]  ;;  %v1362_v11 = vpop.xlane.xlu1 %1361  ;;  %v5009_v34 = vsel %vm5008_vm2, %v5001_v36, 0.0  ;;  %v5010_v52 = vsel %vm5008_vm2, %v5005_v33, 0.0  ;;  %v4764_v36 = vld [vmem:[#allocation6 + $0x20] sm:$0xff] }
 0x3ac   :  { %v4539_v16 = vld [vmem:[#allocation5 + $0x20] sm:$0xff]  ;;  %v1359_v61 = vpop.xlane.xlu0 %1358  ;;  %v4663_v21 = vadd.f32 %v4631_v59, %v4471_v62  ;;  %v4825_v9 = vmul.f32 0.6931472, %v6036_v51  ;;  %6045 = vlog2.f32 %v4540_v50  ;;  %4043 = vadd.xlane.f32.xlu0 %v3950_v8  ;;  %1478 = vst.msk [vmem:[#allocation5 + $0x38] sm:$0xff] %vm986_vm3, %v1362_v11  ;;  %v4763_v59 = vld [vmem:[#allocation6 + $0x18] sm:$0xff]  ;;  %v5011_v62 = vadd.f32 %v5010_v52, %v5009_v34  ;;  %v4477_v52 = vld [vmem:[#allocation2 + $0x30] sm:$0xff] }
 0x3ad   :  { %1477 = vst.msk [vmem:[#allocation5 + $0x30] sm:$0xff] %vm986_vm3, %v1359_v61  ;;  %4697 = vst.msk [vmem:[#allocation2 + $0x8] sm:$0xff] %vm986_vm3, %v4664_v53  ;;  %v4889_v41 = vadd.f32 %v4827_v47, %v4761_v58  ;;  %6047 = vlog2.f32 %v4539_v16  ;;  %4203 = vadd.xlane.f32.xlu1 %v4110_v35  ;;  %v4731_v51 = vld [vmem:[#allocation3 + $0x18] sm:$0xff]  ;;  %v5026_v47 = vsel %vm5008_vm2, %v5019_v17, 0.0  ;;  %v5027_v50 = vsel %vm5008_vm2, %v5023_v38, 0.0  ;;  %v4730_v61 = vld [vmem:[#allocation3 + $0x10] sm:$0xff] }
 0x3ae   :  { %v6038_v18 = vpop.eup %6037  ;;  %4696 = vst.msk [vmem:[#allocation2] sm:$0xff] %vm986_vm3, %v4663_v21  ;;  %v4888_v10 = vadd.f32 %v4825_v9, %v4760_v30  ;;  %v4507_v30 = vld [vmem:[#allocation4 + $0x20] sm:$0xff]  ;;  %v5028_v35 = vadd.f32 %v5027_v50, %v5026_v47  ;;  %v4510_v17 = vld [vmem:[#allocation4 + $0x38] sm:$0xff] }
 0x3af   :  { %v6040_v28 = vpop.eup %6039  ;;  %v4921_v27 = vadd.f32 %v4889_v41, %v4729_v24  ;;  %v4574_v60 = vmul.f32 0.6931472, %v6038_v18  ;;  %v4797_v57 = vld [vmem:[#allocation7 + $0x28] sm:$0xff]  ;;  %v2267_v39 = vpop.xlane.xlu1 %2266  ;;  %v4735_v50 = vld [vmem:[#allocation3 + $0x38] sm:$0xff] }
 0x3b0   :  { %v4796_v63 = vld [vmem:[#allocation7 + $0x20] sm:$0xff]  ;;  %v2264_v2 = vpop.xlane.xlu0 %2263  ;;  %v4920_v54 = vadd.f32 %v4888_v10, %v4728_v55  ;;  %v4572_v46 = vmul.f32 0.6931472, %v6040_v28  ;;  %6049 = vlog2.f32 %v4797_v57  ;;  %4046 = vadd.xlane.f32.xlu0 %v3952_v4  ;;  %2383 = vst.msk [vmem:[#allocation7 + $0x38] sm:$0xff] %vm986_vm3, %v2267_v39  ;;  %v4476_v18 = vld [vmem:[#allocation2 + $0x28] sm:$0xff] }
 0x3b1   :  { %2382 = vst.msk [vmem:[#allocation7 + $0x30] sm:$0xff] %vm986_vm3, %v2264_v2  ;;  %4953 = vst.msk [vmem:[#allocation3 + $0x8] sm:$0xff] %vm986_vm3, %v4921_v27  ;;  %v4634_v23 = vadd.f32 %v4574_v60, %v4506_v44  ;;  %6051 = vlog2.f32 %v4796_v63  ;;  %4206 = vadd.xlane.f32.xlu1 %v4112_v1  ;;  %v4765_v63 = vld [vmem:[#allocation6 + $0x28] sm:$0xff]  ;;  %v4732_v1 = vld [vmem:[#allocation3 + $0x20] sm:$0xff] }
 0x3b2   :  { %v6042_v20 = vpop.eup %6041  ;;  %4952 = vst.msk [vmem:[#allocation3] sm:$0xff] %vm986_vm3, %v4920_v54  ;;  %v4633_v7 = vadd.f32 %v4572_v46, %v4505_v43  ;;  %v4733_v54 = vld [vmem:[#allocation3 + $0x28] sm:$0xff] }
 0x3b3   :  { %v6044_v25 = vpop.eup %6043  ;;  %v4666_v40 = vadd.f32 %v4634_v23, %v4474_v3  ;;  %v4831_v45 = vmul.f32 0.6931472, %v6042_v20  ;;  %v4542_v0 = vld [vmem:[#allocation5 + $0x38] sm:$0xff]  ;;  %v1368_v19 = vpop.xlane.xlu1 %1367 }
 0x3b4   :  { %v4541_v14 = vld [vmem:[#allocation5 + $0x30] sm:$0xff]  ;;  %v1365_v37 = vpop.xlane.xlu0 %1364  ;;  %v4665_v8 = vadd.f32 %v4633_v7, %v4473_v6  ;;  %v4829_v32 = vmul.f32 0.6931472, %v6044_v25  ;;  %6053 = vlog2.f32 %v4542_v0  ;;  %4049 = vadd.xlane.f32.xlu0 %v3954_v12  ;;  %1480 = vst.msk [vmem:[#allocation5 + $0x48] sm:$0xff] %vm986_vm3, %v1368_v19 }
 0x3b5   :  { %1479 = vst.msk [vmem:[#allocation5 + $0x40] sm:$0xff] %vm986_vm3, %v1365_v37  ;;  %4699 = vst.msk [vmem:[#allocation2 + $0x18] sm:$0xff] %vm986_vm3, %v4666_v40  ;;  %v4891_v56 = vadd.f32 %v4831_v45, %v4763_v59  ;;  %6055 = vlog2.f32 %v4541_v14  ;;  %4209 = vadd.xlane.f32.xlu1 %v4114_v31  ;;  %v4509_v40 = vld [vmem:[#allocation4 + $0x30] sm:$0xff]  ;;  %v4478_v14 = vld [vmem:[#allocation2 + $0x38] sm:$0xff] }
 0x3b6   :  { %v6046_v15 = vpop.eup %6045  ;;  %4698 = vst.msk [vmem:[#allocation2 + $0x10] sm:$0xff] %vm986_vm3, %v4665_v8  ;;  %v4890_v53 = vadd.f32 %v4829_v32, %v4762_v5  ;;  %v4767_v31 = vld [vmem:[#allocation6 + $0x38] sm:$0xff] }
 0x3b7   :  { %v6048_v16 = vpop.eup %6047  ;;  %v4923_v11 = vadd.f32 %v4891_v56, %v4731_v51  ;;  %v4578_v29 = vmul.f32 0.6931472, %v6046_v15  ;;  %v4799_v42 = vld [vmem:[#allocation7 + $0x38] sm:$0xff]  ;;  %v2273_v21 = vpop.xlane.xlu1 %2272 }
 0x3b8   :  { %v4798_v58 = vld [vmem:[#allocation7 + $0x30] sm:$0xff]  ;;  %v2270_v48 = vpop.xlane.xlu0 %2269  ;;  %v4922_v26 = vadd.f32 %v4890_v53, %v4730_v61  ;;  %v4576_v9 = vmul.f32 0.6931472, %v6048_v16  ;;  %6057 = vlog2.f32 %v4799_v42  ;;  %5012 = vadd.xlane.f32.xlu0 %v5011_v62  ;;  %2385 = vst.msk [vmem:[#allocation7 + $0x48] sm:$0xff] %vm986_vm3, %v2273_v21 }
 0x3b9   :  { %2384 = vst.msk [vmem:[#allocation7 + $0x40] sm:$0xff] %vm986_vm3, %v2270_v48  ;;  %4955 = vst.msk [vmem:[#allocation3 + $0x18] sm:$0xff] %vm986_vm3, %v4923_v11  ;;  %v4636_v41 = vadd.f32 %v4578_v29, %v4508_v13  ;;  %6059 = vlog2.f32 %v4798_v58  ;;  %5029 = vadd.xlane.f32.xlu1 %v5028_v35  ;;  %v4766_v53 = vld [vmem:[#allocation6 + $0x30] sm:$0xff] }
 0x3ba   :  { %v6050_v22 = vpop.eup %6049  ;;  %4954 = vst.msk [vmem:[#allocation3 + $0x10] sm:$0xff] %vm986_vm3, %v4922_v26  ;;  %v4635_v24 = vadd.f32 %v4576_v9, %v4507_v30  ;;  %v4734_v29 = vld [vmem:[#allocation3 + $0x30] sm:$0xff]  ;;  %v4512_v26 = vld [vmem:[#allocation4 + $0x48] sm:$0xff] }
 0x3bb   :  { %v6052_v10 = vpop.eup %6051  ;;  %v4668_v4 = vadd.f32 %v4636_v41, %v4476_v18  ;;  %v4835_v28 = vmul.f32 0.6931472, %v6050_v22  ;;  %v4544_v27 = vld [vmem:[#allocation5 + $0x48] sm:$0xff]  ;;  %v1374_v60 = vpop.xlane.xlu1 %1373  ;;  %v4511_v41 = vld [vmem:[#allocation4 + $0x40] sm:$0xff] }
 0x3bc   :  { %v4543_v55 = vld [vmem:[#allocation5 + $0x40] sm:$0xff]  ;;  %v1371_v57 = vpop.xlane.xlu0 %1370  ;;  %v4667_v39 = vadd.f32 %v4635_v24, %v4475_v49  ;;  %v4833_v2 = vmul.f32 0.6931472, %v6052_v10  ;;  %6061 = vlog2.f32 %v4544_v27  ;;  %1482 = vst.msk [vmem:[#allocation5 + $0x58] sm:$0xff] %vm986_vm3, %v1374_v60  ;;  %v4480_v18 = vld [vmem:[#allocation2 + $0x48] sm:$0xff] }
 0x3bd   :  { %1481 = vst.msk [vmem:[#allocation5 + $0x50] sm:$0xff] %vm986_vm3, %v1371_v57  ;;  %4701 = vst.msk [vmem:[#allocation2 + $0x28] sm:$0xff] %vm986_vm3, %v4668_v4  ;;  %v4893_v33 = vadd.f32 %v4835_v28, %v4765_v63  ;;  %6063 = vlog2.f32 %v4543_v55  ;;  %v4479_v49 = vld [vmem:[#allocation2 + $0x40] sm:$0xff]  ;;  %v4769_v63 = vld [vmem:[#allocation6 + $0x48] sm:$0xff] }
 0x3be   :  { %v6054_v44 = vpop.eup %6053  ;;  %4700 = vst.msk [vmem:[#allocation2 + $0x20] sm:$0xff] %vm986_vm3, %v4667_v39  ;;  %v4892_v46 = vadd.f32 %v4833_v2, %v4764_v36  ;;  %v4768_v36 = vld [vmem:[#allocation6 + $0x40] sm:$0xff] }
 0x3bf   :  { %v6056_v43 = vpop.eup %6055  ;;  %v4925_v23 = vadd.f32 %v4893_v33, %v4733_v54  ;;  %v4582_v20 = vmul.f32 0.6931472, %v6054_v44  ;;  %v4801_v3 = vld [vmem:[#allocation7 + $0x48] sm:$0xff]  ;;  %v2279_v7 = vpop.xlane.xlu1 %2278 }
 0x3c0   :  { %v4800_v6 = vld [vmem:[#allocation7 + $0x40] sm:$0xff]  ;;  %v2276_v12 = vpop.xlane.xlu0 %2275  ;;  %v4924_v38 = vadd.f32 %v4892_v46, %v4732_v1  ;;  %v4580_v25 = vmul.f32 0.6931472, %v6056_v43  ;;  %6065 = vlog2.f32 %v4801_v3  ;;  %2387 = vst.msk [vmem:[#allocation7 + $0x58] sm:$0xff] %vm986_vm3, %v2279_v7  ;;  %v4737_v54 = vld [vmem:[#allocation3 + $0x48] sm:$0xff] }
 0x3c1   :  { %2386 = vst.msk [vmem:[#allocation7 + $0x50] sm:$0xff] %vm986_vm3, %v2276_v12  ;;  %4957 = vst.msk [vmem:[#allocation3 + $0x28] sm:$0xff] %vm986_vm3, %v4925_v23  ;;  %v4638_v45 = vadd.f32 %v4582_v20, %v4510_v17  ;;  %6067 = vlog2.f32 %v4800_v6  ;;  %v4736_v1 = vld [vmem:[#allocation3 + $0x40] sm:$0xff]  ;;  %v4514_v17 = vld [vmem:[#allocation4 + $0x58] sm:$0xff] }
 0x3c2   :  { %v6058_v0 = vpop.eup %6057  ;;  %4956 = vst.msk [vmem:[#allocation3 + $0x20] sm:$0xff] %vm986_vm3, %v4924_v38  ;;  %v4637_v19 = vadd.f32 %v4580_v25, %v4509_v40  ;;  %v4513_v40 = vld [vmem:[#allocation4 + $0x50] sm:$0xff] }
 0x3c3   :  { %v6060_v37 = vpop.eup %6059  ;;  %v4670_v34 = vadd.f32 %v4638_v45, %v4478_v14  ;;  %v4839_v59 = vmul.f32 0.6931472, %v6058_v0  ;;  %v4546_v8 = vld [vmem:[#allocation5 + $0x58] sm:$0xff]  ;;  %v1380_v5 = vpop.xlane.xlu1 %1379 }
 0x3c4   :  { %v4545_v32 = vld [vmem:[#allocation5 + $0x50] sm:$0xff]  ;;  %v1377_v56 = vpop.xlane.xlu0 %1376  ;;  %v4669_v15 = vadd.f32 %v4637_v19, %v4477_v52  ;;  %v4837_v51 = vmul.f32 0.6931472, %v6060_v37  ;;  %6069 = vlog2.f32 %v4546_v8  ;;  %1484 = vst.msk [vmem:[#allocation5 + $0x68] sm:$0xff] %vm986_vm3, %v1380_v5  ;;  %v4482_v14 = vld [vmem:[#allocation2 + $0x58] sm:$0xff] }
 0x3c5   :  { %1483 = vst.msk [vmem:[#allocation5 + $0x60] sm:$0xff] %vm986_vm3, %v1377_v56  ;;  %4703 = vst.msk [vmem:[#allocation2 + $0x38] sm:$0xff] %vm986_vm3, %v4670_v34  ;;  %v4895_v62 = vadd.f32 %v4839_v59, %v4767_v31  ;;  %6071 = vlog2.f32 %v4545_v32  ;;  %v4481_v52 = vld [vmem:[#allocation2 + $0x50] sm:$0xff]  ;;  %v4771_v31 = vld [vmem:[#allocation6 + $0x58] sm:$0xff] }
 0x3c6   :  { %v6062_v47 = vpop.eup %6061  ;;  %4702 = vst.msk [vmem:[#allocation2 + $0x30] sm:$0xff] %vm986_vm3, %v4669_v15  ;;  %v4894_v16 = vadd.f32 %v4837_v51, %v4766_v53  ;;  %v4770_v53 = vld [vmem:[#allocation6 + $0x50] sm:$0xff] }
 0x3c7   :  { %v6064_v11 = vpop.eup %6063  ;;  %v4927_v61 = vadd.f32 %v4895_v62, %v4735_v50  ;;  %v4586_v42 = vmul.f32 0.6931472, %v6062_v47  ;;  %v4803_v58 = vld [vmem:[#allocation7 + $0x58] sm:$0xff]  ;;  %v2285_v48 = vpop.xlane.xlu1 %2284 }
 0x3c8   :  { %v4802_v21 = vld [vmem:[#allocation7 + $0x50] sm:$0xff]  ;;  %v2282_v13 = vpop.xlane.xlu0 %2281  ;;  %v4926_v9 = vadd.f32 %v4894_v16, %v4734_v29  ;;  %v4584_v30 = vmul.f32 0.6931472, %v6064_v11  ;;  %6073 = vlog2.f32 %v4803_v58  ;;  %2389 = vst.msk [vmem:[#allocation7 + $0x68] sm:$0xff] %vm986_vm3, %v2285_v48  ;;  %v4739_v50 = vld [vmem:[#allocation3 + $0x58] sm:$0xff] }
 0x3c9   :  { %2388 = vst.msk [vmem:[#allocation7 + $0x60] sm:$0xff] %vm986_vm3, %v2282_v13  ;;  %4959 = vst.msk [vmem:[#allocation3 + $0x38] sm:$0xff] %vm986_vm3, %v4927_v61  ;;  %v4640_v35 = vadd.f32 %v4586_v42, %v4512_v26  ;;  %6075 = vlog2.f32 %v4802_v21  ;;  %v4738_v29 = vld [vmem:[#allocation3 + $0x50] sm:$0xff]  ;;  %v4516_v26 = vld [vmem:[#allocation4 + $0x68] sm:$0xff] }
 0x3ca   :  { %v6066_v22 = vpop.eup %6065  ;;  %4958 = vst.msk [vmem:[#allocation3 + $0x30] sm:$0xff] %vm986_vm3, %v4926_v9  ;;  %v4639_v24 = vadd.f32 %v4584_v30, %v4511_v41  ;;  %v4515_v41 = vld [vmem:[#allocation4 + $0x60] sm:$0xff] }
 0x3cb   :  { %v6068_v10 = vpop.eup %6067  ;;  %v4672_v4 = vadd.f32 %v4640_v35, %v4480_v18  ;;  %v4843_v28 = vmul.f32 0.6931472, %v6066_v22  ;;  %v4548_v27 = vld [vmem:[#allocation5 + $0x68] sm:$0xff]  ;;  %v1386_v60 = vpop.xlane.xlu1 %1385 }
 0x3cc   :  { %v4547_v55 = vld [vmem:[#allocation5 + $0x60] sm:$0xff]  ;;  %v1383_v57 = vpop.xlane.xlu0 %1382  ;;  %v4671_v39 = vadd.f32 %v4639_v24, %v4479_v49  ;;  %v4841_v2 = vmul.f32 0.6931472, %v6068_v10  ;;  %6077 = vlog2.f32 %v4548_v27  ;;  %1486 = vst.msk [vmem:[#allocation5 + $0x78] sm:$0xff] %vm986_vm3, %v1386_v60  ;;  %v4484_v18 = vld [vmem:[#allocation2 + $0x68] sm:$0xff] }
 0x3cd   :  { %1485 = vst.msk [vmem:[#allocation5 + $0x70] sm:$0xff] %vm986_vm3, %v1383_v57  ;;  %4705 = vst.msk [vmem:[#allocation2 + $0x48] sm:$0xff] %vm986_vm3, %v4672_v4  ;;  %v4897_v33 = vadd.f32 %v4843_v28, %v4769_v63  ;;  %6079 = vlog2.f32 %v4547_v55  ;;  %v4483_v49 = vld [vmem:[#allocation2 + $0x60] sm:$0xff]  ;;  %v4773_v57 = vld [vmem:[#allocation6 + $0x68] sm:$0xff] }
 0x3ce   :  { %v6070_v44 = vpop.eup %6069  ;;  %4704 = vst.msk [vmem:[#allocation2 + $0x40] sm:$0xff] %vm986_vm3, %v4671_v39  ;;  %v4896_v46 = vadd.f32 %v4841_v2, %v4768_v36  ;;  %v4772_v36 = vld [vmem:[#allocation6 + $0x60] sm:$0xff] }
 0x3cf   :  { %v6072_v43 = vpop.eup %6071  ;;  %v4929_v23 = vadd.f32 %v4897_v33, %v4737_v54  ;;  %v4590_v20 = vmul.f32 0.6931472, %v6070_v44  ;;  %v4805_v3 = vld [vmem:[#allocation7 + $0x68] sm:$0xff]  ;;  %v2291_v7 = vpop.xlane.xlu1 %2290 }
 0x3d0   :  { %v4804_v6 = vld [vmem:[#allocation7 + $0x60] sm:$0xff]  ;;  %v2288_v12 = vpop.xlane.xlu0 %2287  ;;  %v4928_v38 = vadd.f32 %v4896_v46, %v4736_v1  ;;  %v4588_v25 = vmul.f32 0.6931472, %v6072_v43  ;;  %6081 = vlog2.f32 %v4805_v3  ;;  %2391 = vst.msk [vmem:[#allocation7 + $0x78] sm:$0xff] %vm986_vm3, %v2291_v7  ;;  %v4741_v54 = vld [vmem:[#allocation3 + $0x68] sm:$0xff] }
 0x3d1   :  { %2390 = vst.msk [vmem:[#allocation7 + $0x70] sm:$0xff] %vm986_vm3, %v2288_v12  ;;  %4961 = vst.msk [vmem:[#allocation3 + $0x48] sm:$0xff] %vm986_vm3, %v4929_v23  ;;  %v4642_v45 = vadd.f32 %v4590_v20, %v4514_v17  ;;  %6083 = vlog2.f32 %v4804_v6  ;;  %v4740_v1 = vld [vmem:[#allocation3 + $0x60] sm:$0xff]  ;;  %v4518_v12 = vld [vmem:[#allocation4 + $0x78] sm:$0xff] }
 0x3d2   :  { %v6074_v0 = vpop.eup %6073  ;;  %4960 = vst.msk [vmem:[#allocation3 + $0x40] sm:$0xff] %vm986_vm3, %v4928_v38  ;;  %v4641_v19 = vadd.f32 %v4588_v25, %v4513_v40  ;;  %v4517_v40 = vld [vmem:[#allocation4 + $0x70] sm:$0xff] }
 0x3d3   :  { %v6076_v37 = vpop.eup %6075  ;;  %v4674_v34 = vadd.f32 %v4642_v45, %v4482_v14  ;;  %v4847_v59 = vmul.f32 0.6931472, %v6074_v0  ;;  %v4550_v8 = vld [vmem:[#allocation5 + $0x78] sm:$0xff]  ;;  %v1392_v5 = vpop.xlane.xlu1 %1391 }
 0x3d4   :  { %v4549_v32 = vld [vmem:[#allocation5 + $0x70] sm:$0xff]  ;;  %v1389_v56 = vpop.xlane.xlu0 %1388  ;;  %v4673_v15 = vadd.f32 %v4641_v19, %v4481_v52  ;;  %v4845_v51 = vmul.f32 0.6931472, %v6076_v37  ;;  %6085 = vlog2.f32 %v4550_v8  ;;  %1488 = vst.msk [vmem:[#allocation5 + $0x88] sm:$0xff] %vm986_vm3, %v1392_v5  ;;  %v4486_v14 = vld [vmem:[#allocation2 + $0x78] sm:$0xff] }
 0x3d5   :  { %1487 = vst.msk [vmem:[#allocation5 + $0x80] sm:$0xff] %vm986_vm3, %v1389_v56  ;;  %4707 = vst.msk [vmem:[#allocation2 + $0x58] sm:$0xff] %vm986_vm3, %v4674_v34  ;;  %v4899_v62 = vadd.f32 %v4847_v59, %v4771_v31  ;;  %6087 = vlog2.f32 %v4549_v32  ;;  %v4485_v52 = vld [vmem:[#allocation2 + $0x70] sm:$0xff]  ;;  %v4775_v32 = vld [vmem:[#allocation6 + $0x78] sm:$0xff] }
 0x3d6   :  { %v6078_v47 = vpop.eup %6077  ;;  %4706 = vst.msk [vmem:[#allocation2 + $0x50] sm:$0xff] %vm986_vm3, %v4673_v15  ;;  %v4898_v16 = vadd.f32 %v4845_v51, %v4770_v53  ;;  %v4774_v15 = vld [vmem:[#allocation6 + $0x70] sm:$0xff] }
 0x3d7   :  { %v6080_v11 = vpop.eup %6079  ;;  %v4931_v61 = vadd.f32 %v4899_v62, %v4739_v50  ;;  %v4594_v42 = vmul.f32 0.6931472, %v6078_v47  ;;  %v4807_v58 = vld [vmem:[#allocation7 + $0x78] sm:$0xff]  ;;  %v2297_v48 = vpop.xlane.xlu1 %2296 }
 0x3d8   :  { %v4806_v21 = vld [vmem:[#allocation7 + $0x70] sm:$0xff]  ;;  %v2294_v13 = vpop.xlane.xlu0 %2293  ;;  %v4930_v9 = vadd.f32 %v4898_v16, %v4738_v29  ;;  %v4592_v30 = vmul.f32 0.6931472, %v6080_v11  ;;  %6089 = vlog2.f32 %v4807_v58  ;;  %2393 = vst.msk [vmem:[#allocation7 + $0x88] sm:$0xff] %vm986_vm3, %v2297_v48  ;;  %v4743_v62 = vld [vmem:[#allocation3 + $0x78] sm:$0xff] }
 0x3d9   :  { %2392 = vst.msk [vmem:[#allocation7 + $0x80] sm:$0xff] %vm986_vm3, %v2294_v13  ;;  %4963 = vst.msk [vmem:[#allocation3 + $0x58] sm:$0xff] %vm986_vm3, %v4931_v61  ;;  %v4644_v35 = vadd.f32 %v4594_v42, %v4516_v26  ;;  %6091 = vlog2.f32 %v4806_v21  ;;  %v4742_v11 = vld [vmem:[#allocation3 + $0x70] sm:$0xff]  ;;  %v4520_v42 = vld [vmem:[#allocation4 + $0x88] sm:$0xff] }
 0x3da   :  { %v6082_v22 = vpop.eup %6081  ;;  %4962 = vst.msk [vmem:[#allocation3 + $0x50] sm:$0xff] %vm986_vm3, %v4930_v9  ;;  %v4643_v24 = vadd.f32 %v4592_v30, %v4515_v41  ;;  %v4519_v26 = vld [vmem:[#allocation4 + $0x80] sm:$0xff]  ;;  %v4488_v41 = vld [vmem:[#allocation2 + $0x88] sm:$0xff] }
 0x3db   :  { %v6084_v10 = vpop.eup %6083  ;;  %v4676_v4 = vadd.f32 %v4644_v35, %v4484_v18  ;;  %v4851_v28 = vmul.f32 0.6931472, %v6082_v22  ;;  %v4552_v27 = vld [vmem:[#allocation5 + $0x88] sm:$0xff]  ;;  %v1398_v2 = vpop.xlane.xlu1 %1397 }
 0x3dc   :  { %v4551_v55 = vld [vmem:[#allocation5 + $0x80] sm:$0xff]  ;;  %v1395_v60 = vpop.xlane.xlu0 %1394  ;;  %v4675_v63 = vadd.f32 %v4643_v24, %v4483_v49  ;;  %v4849_v39 = vmul.f32 0.6931472, %v6084_v10  ;;  %6093 = vlog2.f32 %v4552_v27  ;;  %1490 = vst.msk [vmem:[#allocation5 + $0x98] sm:$0xff] %vm986_vm3, %v1398_v2 }
 0x3dd   :  { %1489 = vst.msk [vmem:[#allocation5 + $0x90] sm:$0xff] %vm986_vm3, %v1395_v60  ;;  %4709 = vst.msk [vmem:[#allocation2 + $0x68] sm:$0xff] %vm986_vm3, %v4676_v4  ;;  %v4901_v33 = vadd.f32 %v4851_v28, %v4773_v57  ;;  %6095 = vlog2.f32 %v4551_v55  ;;  %v4487_v24 = vld [vmem:[#allocation2 + $0x80] sm:$0xff]  ;;  %v4777_v4 = vld [vmem:[#allocation6 + $0x88] sm:$0xff] }
 0x3de   :  { %v6086_v44 = vpop.eup %6085  ;;  %4708 = vst.msk [vmem:[#allocation2 + $0x60] sm:$0xff] %vm986_vm3, %v4675_v63  ;;  %v4900_v46 = vadd.f32 %v4849_v39, %v4772_v36  ;;  %v4776_v55 = vld [vmem:[#allocation6 + $0x80] sm:$0xff]  ;;  %v4745_v39 = vld [vmem:[#allocation3 + $0x88] sm:$0xff] }
 0x3df   :  { %v6088_v43 = vpop.eup %6087  ;;  %v4933_v23 = vadd.f32 %v4901_v33, %v4741_v54  ;;  %v4598_v20 = vmul.f32 0.6931472, %v6086_v44  ;;  %v4809_v3 = vld [vmem:[#allocation7 + $0x88] sm:$0xff]  ;;  %v2303_v25 = vpop.xlane.xlu1 %2302  ;;  %v4744_v44 = vld [vmem:[#allocation3 + $0x80] sm:$0xff] }
 0x3e0   :  { %v4808_v6 = vld [vmem:[#allocation7 + $0x80] sm:$0xff]  ;;  %v2300_v7 = vpop.xlane.xlu0 %2299  ;;  %v4932_v17 = vadd.f32 %v4900_v46, %v4740_v1  ;;  %v4596_v38 = vmul.f32 0.6931472, %v6088_v43  ;;  %6097 = vlog2.f32 %v4809_v3  ;;  %2395 = vst.msk [vmem:[#allocation7 + $0x98] sm:$0xff] %vm986_vm3, %v2303_v25  ;;  %v4521_v46 = vld [vmem:[#allocation4 + $0x90] sm:$0xff] }
 0x3e1   :  { %2394 = vst.msk [vmem:[#allocation7 + $0x90] sm:$0xff] %vm986_vm3, %v2300_v7  ;;  %4965 = vst.msk [vmem:[#allocation3 + $0x68] sm:$0xff] %vm986_vm3, %v4933_v23  ;;  %v4646_v45 = vadd.f32 %v4598_v20, %v4518_v12  ;;  %6099 = vlog2.f32 %v4808_v6  ;;  %v4522_v20 = vld [vmem:[#allocation4 + $0x98] sm:$0xff]  ;;  %v4489_v12 = vld [vmem:[#allocation2 + $0x90] sm:$0xff] }
 0x3e2   :  { %v6090_v0 = vpop.eup %6089  ;;  %4964 = vst.msk [vmem:[#allocation3 + $0x60] sm:$0xff] %vm986_vm3, %v4932_v17  ;;  %v4645_v19 = vadd.f32 %v4596_v38, %v4517_v40  ;;  %v4490_v40 = vld [vmem:[#allocation2 + $0x98] sm:$0xff] }
 0x3e3   :  { %v6092_v37 = vpop.eup %6091  ;;  %v4678_v34 = vadd.f32 %v4646_v45, %v4486_v14  ;;  %v4855_v59 = vmul.f32 0.6931472, %v6090_v0  ;;  %v4554_v31 = vld [vmem:[#allocation5 + $0x98] sm:$0xff]  ;;  %v4778_v0 = vld [vmem:[#allocation6 + $0x90] sm:$0xff] }
 0x3e4   :  { %v4553_v8 = vld [vmem:[#allocation5 + $0x90] sm:$0xff]  ;;  %v4677_v5 = vadd.f32 %v4645_v19, %v4485_v52  ;;  %v4853_v56 = vmul.f32 0.6931472, %v6092_v37  ;;  %v1401_v13 = vpop.xlane.xlu0 %1400 }
 0x3e5   :  { %6101 = vlog2.f32 %v4553_v8  ;;  %4711 = vst.msk [vmem:[#allocation2 + $0x78] sm:$0xff] %vm986_vm3, %v4678_v34  ;;  %v4903_v51 = vadd.f32 %v4855_v59, %v4775_v32  ;;  %1491 = vst.msk [vmem:[#allocation5 + $0xa0] sm:$0xff] %vm986_vm3, %v1401_v13  ;;  %v4779_v34 = vld [vmem:[#allocation6 + $0x98] sm:$0xff]  ;;  %v4746_v8 = vld [vmem:[#allocation3 + $0x90] sm:$0xff] }
 0x3e6   :  { %6103 = vlog2.f32 %v4554_v31  ;;  %v6094_v53 = vpop.eup %6093  ;;  %4710 = vst.msk [vmem:[#allocation2 + $0x70] sm:$0xff] %vm986_vm3, %v4677_v5  ;;  %v4902_v47 = vadd.f32 %v4853_v56, %v4774_v15  ;;  %v4747_v56 = vld [vmem:[#allocation3 + $0x98] sm:$0xff] }
 0x3e7   :  { %v6096_v50 = vpop.eup %6095  ;;  %v4935_v16 = vadd.f32 %v4903_v51, %v4743_v62  ;;  %v4602_v61 = vmul.f32 0.6931472, %v6094_v53  ;;  %v4811_v48 = vld [vmem:[#allocation7 + $0x98] sm:$0xff] }
 0x3e8   :  { %v4810_v29 = vld [vmem:[#allocation7 + $0x90] sm:$0xff]  ;;  %v4934_v58 = vadd.f32 %v4902_v47, %v4742_v11  ;;  %v4600_v21 = vmul.f32 0.6931472, %v6096_v50  ;;  %v2306_v27 = vpop.xlane.xlu0 %2305  ;;  %v4523_v47 = vld [vmem:[#allocation4 + $0xa0] sm:$0xff] }
 0x3e9   :  { %6105 = vlog2.f32 %v4810_v29  ;;  %4967 = vst.msk [vmem:[#allocation3 + $0x78] sm:$0xff] %vm986_vm3, %v4935_v16  ;;  %v4648_v9 = vadd.f32 %v4602_v61, %v4520_v42  ;;  %2396 = vst.msk [vmem:[#allocation7 + $0xa0] sm:$0xff] %vm986_vm3, %v2306_v27  ;;  %v4491_v61 = vld [vmem:[#allocation2 + $0xa0] sm:$0xff] }
 0x3ea   :  { %6107 = vlog2.f32 %v4811_v48  ;;  %v6098_v30 = vpop.eup %6097  ;;  %4966 = vst.msk [vmem:[#allocation3 + $0x70] sm:$0xff] %vm986_vm3, %v4934_v58  ;;  %v4647_v35 = vadd.f32 %v4600_v21, %v4519_v26  ;;  %v1404_v57 = vpop.xlane.xlu1 %1403  ;;  %v4780_v48 = vld [vmem:[#allocation6 + $0xa0] sm:$0xff] }
 0x3eb   :  { %v6100_v22 = vpop.eup %6099  ;;  %v4680_v18 = vadd.f32 %v4648_v9, %v4488_v41  ;;  %v4859_v10 = vmul.f32 0.6931472, %v6098_v30  ;;  %1492 = vst.msk [vmem:[#allocation5 + $0xa8] sm:$0xff] %vm986_vm3, %v1404_v57  ;;  %v4524_v9 = vld [vmem:[#allocation4 + $0xa8] sm:$0xff]  ;;  %v4748_v41 = vld [vmem:[#allocation3 + $0xa0] sm:$0xff] }
 0x3ec   :  { %v4679_v49 = vadd.f32 %v4647_v35, %v4487_v24  ;;  %v4857_v28 = vmul.f32 0.6931472, %v6100_v22  ;;  %v4555_v1 = vld [vmem:[#allocation5 + $0xa0] sm:$0xff] }
 0x3ed   :  { %4713 = vst.msk [vmem:[#allocation2 + $0x88] sm:$0xff] %vm986_vm3, %v4680_v18  ;;  %v4905_v60 = vadd.f32 %v4859_v10, %v4777_v4  ;;  %6109 = vlog2.f32 %v4555_v1  ;;  %v5031_v22 = vld [vmem:[#allocation2] sm:$0xff]  ;;  %v4492_v10 = vld [vmem:[#allocation2 + $0xa8] sm:$0xff] }
 0x3ee   :  { %4712 = vst.msk [vmem:[#allocation2 + $0x80] sm:$0xff] %vm986_vm3, %v4679_v49  ;;  %v4904_v2 = vadd.f32 %v4857_v28, %v4776_v55  ;;  %v2309_v6 = vpop.xlane.xlu1 %2308  ;;  %v5032_v49 = vld [vmem:[#allocation2 + $0x8] sm:$0xff]  ;;  %v5133_v57 = vld [vmem:[#allocation3] sm:$0xff] }
 0x3ef   :  { %v6102_v63 = vpop.eup %6101  ;;  %v4937_v33 = vadd.f32 %v4905_v60, %v4745_v39  ;;  %2397 = vst.msk [vmem:[#allocation7 + $0xa8] sm:$0xff] %vm986_vm3, %v2309_v6  ;;  %v5033_v60 = vld [vmem:[#allocation2 + $0x10] sm:$0xff]  ;;  %v5064_v39 = vsel %vm986_vm3, %v5031_v22, 0.0 }
 0x3f0   :  { %v6104_v36 = vpop.eup %6103  ;;  %v4604_v54 = vmul.f32 0.6931472, %v6102_v63  ;;  %v4936_v43 = vadd.f32 %v4904_v2, %v4744_v44  ;;  %v4812_v37 = vld [vmem:[#allocation7 + $0xa0] sm:$0xff]  ;;  %v4781_v63 = vld [vmem:[#allocation6 + $0xa8] sm:$0xff] }
 0x3f1   :  { %v4606_v23 = vmul.f32 0.6931472, %v6104_v36  ;;  %4969 = vst.msk [vmem:[#allocation3 + $0x88] sm:$0xff] %vm986_vm3, %v4937_v33  ;;  %6111 = vlog2.f32 %v4812_v37  ;;  %v5134_v36 = vld [vmem:[#allocation3 + $0x8] sm:$0xff]  ;;  %v5135_v33 = vld [vmem:[#allocation3 + $0x10] sm:$0xff]  ;;  %v5137_v37 = vld [vmem:[#allocation3 + $0x20] sm:$0xff] }
 0x3f2   :  { %v4649_v3 = vadd.f32 %v4604_v54, %v4521_v46  ;;  %4968 = vst.msk [vmem:[#allocation3 + $0x80] sm:$0xff] %vm986_vm3, %v4936_v43  ;;  %v4556_v59 = vld [vmem:[#allocation5 + $0xa8] sm:$0xff]  ;;  %v5067_v46 = vsel %vm986_vm3, %v5033_v60, 0.0  ;;  %v5065_v43 = vsel %vm986_vm3, %v5032_v49, 0.0  ;;  %v5166_v6 = vsel %vm986_vm3, %v5134_v36, 0.0  ;;  %v4494_v60 = vld [vmem:[#allocation2 + $0xb8] sm:$0xff] }
 0x3f3   :  { %v6106_v7 = vpop.eup %6105  ;;  %v4650_v17 = vadd.f32 %v4606_v23, %v4522_v20  ;;  %6113 = vlog2.f32 %v4556_v59  ;;  %v4749_v44 = vld [vmem:[#allocation3 + $0xa8] sm:$0xff]  ;;  %v5165_v23 = vsel %vm986_vm3, %v5133_v57, 0.0  ;;  %v5039_v57 = vld [vmem:[#allocation2 + $0x40] sm:$0xff] }
 0x3f4   :  { %v6108_v38 = vpop.eup %6107  ;;  %v4681_v25 = vadd.f32 %v4649_v3, %v4489_v12  ;;  %v4861_v45 = vmul.f32 0.6931472, %v6106_v7  ;;  %v5066_v3 = vadd.f32 %v5065_v43, %v5064_v39  ;;  %v5168_v7 = vsel %vm986_vm3, %v5135_v33, 0.0  ;;  %v5035_v12 = vld [vmem:[#allocation2 + $0x20] sm:$0xff] }
 0x3f5   :  { %v4682_v14 = vadd.f32 %v4650_v17, %v4490_v40  ;;  %v4863_v19 = vmul.f32 0.6931472, %v6108_v38  ;;  %v1407_v51 = vpop.xlane.xlu0 %1406  ;;  %v5034_v17 = vld [vmem:[#allocation2 + $0x18] sm:$0xff]  ;;  %v5071_v59 = vsel %vm986_vm3, %v5035_v12, 0.0  ;;  %v5141_v43 = vld [vmem:[#allocation3 + $0x40] sm:$0xff] }
 0x3f6   :  { %4714 = vst.msk [vmem:[#allocation2 + $0x90] sm:$0xff] %vm986_vm3, %v4681_v25  ;;  %v4906_v52 = vadd.f32 %v4861_v45, %v4778_v0  ;;  %v4813_v15 = vld [vmem:[#allocation7 + $0xa8] sm:$0xff]  ;;  %1493 = vst.msk [vmem:[#allocation5 + $0xb0] sm:$0xff] %vm986_vm3, %v1407_v51  ;;  %v5068_v38 = vadd.f32 %v5067_v46, %v5066_v3  ;;  %v5167_v25 = vadd.f32 %v5166_v6, %v5165_v23  ;;  %v5140_v46 = vld [vmem:[#allocation3 + $0x38] sm:$0xff]  ;;  %v5079_v3 = vsel %vm986_vm3, %v5039_v57, 0.0 }
 0x3f7   :  { %4715 = vst.msk [vmem:[#allocation2 + $0x98] sm:$0xff] %vm986_vm3, %v4682_v14  ;;  %v4907_v32 = vadd.f32 %v4863_v19, %v4779_v34  ;;  %6115 = vlog2.f32 %v4813_v15  ;;  %v6110_v53 = vpop.eup %6109  ;;  %v5136_v19 = vld [vmem:[#allocation3 + $0x18] sm:$0xff] }
 0x3f8   :  { %v4938_v5 = vadd.f32 %v4906_v52, %v4746_v8  ;;  %v4608_v62 = vmul.f32 0.6931472, %v6110_v53  ;;  %v5169_v34 = vadd.f32 %v5168_v7, %v5167_v25  ;;  %v4525_v52 = vld [vmem:[#allocation4 + $0xb0] sm:$0xff]  ;;  %v5069_v8 = vsel %vm986_vm3, %v5034_v17, 0.0  ;;  %v4751_v7 = vld [vmem:[#allocation3 + $0xb8] sm:$0xff] }
 0x3f9   :  { %v4939_v31 = vadd.f32 %v4907_v32, %v4747_v56  ;;  %v2312_v50 = vpop.xlane.xlu0 %2311  ;;  %v5170_v51 = vsel %vm986_vm3, %v5136_v19, 0.0  ;;  %v5172_v53 = vsel %vm986_vm3, %v5137_v37, 0.0  ;;  %v5040_v19 = vld [vmem:[#allocation2 + $0x48] sm:$0xff] }
 0x3fa   :  { %4970 = vst.msk [vmem:[#allocation3 + $0x90] sm:$0xff] %vm986_vm3, %v4938_v5  ;;  %v4651_v16 = vadd.f32 %v4608_v62, %v4523_v47  ;;  %2398 = vst.msk [vmem:[#allocation7 + $0xb0] sm:$0xff] %vm986_vm3, %v2312_v50  ;;  %v1410_v21 = vpop.xlane.xlu1 %1409  ;;  %v5070_v5 = vadd.f32 %v5069_v8, %v5068_v38 }
 0x3fb   :  { %4971 = vst.msk [vmem:[#allocation3 + $0x98] sm:$0xff] %vm986_vm3, %v4939_v31  ;;  %v6112_v11 = vpop.eup %6111  ;;  %1494 = vst.msk [vmem:[#allocation5 + $0xb8] sm:$0xff] %vm986_vm3, %v1410_v21  ;;  %v4493_v31 = vld [vmem:[#allocation2 + $0xb0] sm:$0xff] }
 0x3fc   :  { %v4683_v42 = vadd.f32 %v4651_v16, %v4491_v61  ;;  %v4865_v58 = vmul.f32 0.6931472, %v6112_v11  ;;  %v5037_v16 = vld [vmem:[#allocation2 + $0x30] sm:$0xff]  ;;  %v5036_v11 = vld [vmem:[#allocation2 + $0x28] sm:$0xff]  ;;  %v5072_v61 = vadd.f32 %v5071_v59, %v5070_v5 }
 0x3fd   :  { %v6114_v29 = vpop.eup %6113  ;;  %v4557_v26 = vld [vmem:[#allocation5 + $0xb0] sm:$0xff]  ;;  %v5073_v22 = vsel %vm986_vm3, %v5036_v11, 0.0  ;;  %v4784_v11 = vld [vmem:[#allocation6 + $0xc0] sm:$0xff] }
 0x3fe   :  { %v4610_v13 = vmul.f32 0.6931472, %v6114_v29  ;;  %4716 = vst.msk [vmem:[#allocation2 + $0xa0] sm:$0xff] %vm986_vm3, %v4683_v42  ;;  %v4908_v30 = vadd.f32 %v4865_v58, %v4780_v48  ;;  %6117 = vlog2.f32 %v4557_v26  ;;  %v2315_v4 = vpop.xlane.xlu1 %2314  ;;  %v5171_v29 = vadd.f32 %v5170_v51, %v5169_v34  ;;  %v4782_v42 = vld [vmem:[#allocation6 + $0xb0] sm:$0xff]  ;;  %v5138_v48 = vld [vmem:[#allocation3 + $0x28] sm:$0xff] }
 0x3ff   :  { %2399 = vst.msk [vmem:[#allocation7 + $0xb8] sm:$0xff] %vm986_vm3, %v2315_v4  ;;  %v5074_v4 = vadd.f32 %v5073_v22, %v5072_v61  ;;  %v5143_v5 = vld [vmem:[#allocation3 + $0x50] sm:$0xff]  ;;  %v4528_v22 = vld [vmem:[#allocation4 + $0xc8] sm:$0xff] }
 0x400   :  { %v4652_v35 = vadd.f32 %v4610_v13, %v4524_v9  ;;  %v4940_v24 = vadd.f32 %v4908_v30, %v4748_v41  ;;  %v5139_v13 = vld [vmem:[#allocation3 + $0x30] sm:$0xff]  ;;  %v5173_v26 = vadd.f32 %v5172_v53, %v5171_v29 }
 0x401   :  { %v6116_v18 = vpop.eup %6115  ;;  %v4814_v55 = vld [vmem:[#allocation7 + $0xb0] sm:$0xff] }
 0x402   :  { %v4684_v28 = vadd.f32 %v4652_v35, %v4492_v10  ;;  %v4867_v27 = vmul.f32 0.6931472, %v6116_v18  ;;  %4972 = vst.msk [vmem:[#allocation3 + $0xa0] sm:$0xff] %vm986_vm3, %v4940_v24  ;;  %6119 = vlog2.f32 %v4814_v55  ;;  %v4558_v54 = vld [vmem:[#allocation5 + $0xb8] sm:$0xff]  ;;  %v4750_v9 = vld [vmem:[#allocation3 + $0xb0] sm:$0xff]  ;;  %v5075_v35 = vsel %vm986_vm3, %v5037_v16, 0.0 }
 0x403   :  { %6121 = vlog2.f32 %v4558_v54  ;;  %v4526_v18 = vld [vmem:[#allocation4 + $0xb8] sm:$0xff]  ;;  %v5076_v39 = vadd.f32 %v5075_v35, %v5074_v4  ;;  %v5145_v4 = vld [vmem:[#allocation3 + $0x60] sm:$0xff] }
 0x404   :  { %4717 = vst.msk [vmem:[#allocation2 + $0xa8] sm:$0xff] %vm986_vm3, %v4684_v28  ;;  %v4909_v2 = vadd.f32 %v4867_v27, %v4781_v63  ;;  %v1413_v20 = vpop.xlane.xlu0 %1412  ;;  %v5174_v28 = vsel %vm986_vm3, %v5138_v48, 0.0  ;;  %v5176_v27 = vsel %vm986_vm3, %v5139_v13, 0.0  ;;  %v5038_v63 = vld [vmem:[#allocation2 + $0x38] sm:$0xff]  ;;  %v5043_v48 = vld [vmem:[#allocation2 + $0x60] sm:$0xff] }
 0x405   :  { %1495 = vst.msk [vmem:[#allocation5 + $0xc0] sm:$0xff] %vm986_vm3, %v1413_v20  ;;  %v4783_v54 = vld [vmem:[#allocation6 + $0xb8] sm:$0xff]  ;;  %v5077_v6 = vsel %vm986_vm3, %v5038_v63, 0.0  ;;  %v4496_v63 = vld [vmem:[#allocation2 + $0xc8] sm:$0xff] }
 0x406   :  { %v4941_v1 = vadd.f32 %v4909_v2, %v4749_v44  ;;  %v4815_v45 = vld [vmem:[#allocation7 + $0xb8] sm:$0xff]  ;;  %v5175_v2 = vadd.f32 %v5174_v28, %v5173_v26  ;;  %v5078_v12 = vadd.f32 %v5077_v6, %v5076_v39 }
 0x407   :  { %6123 = vlog2.f32 %v4815_v45  ;;  %v5180_v45 = vsel %vm986_vm3, %v5141_v43, 0.0  ;;  %v5042_v13 = vld [vmem:[#allocation2 + $0x58] sm:$0xff]  ;;  %v4785_v43 = vld [vmem:[#allocation6 + $0xc8] sm:$0xff] }
 0x408   :  { %4973 = vst.msk [vmem:[#allocation3 + $0xa8] sm:$0xff] %vm986_vm3, %v4941_v1  ;;  %v6118_v40 = vpop.eup %6117  ;;  %v2318_v14 = vpop.xlane.xlu0 %2317  ;;  %v5177_v23 = vadd.f32 %v5176_v27, %v5175_v2  ;;  %v5080_v37 = vadd.f32 %v5079_v3, %v5078_v12  ;;  %v4753_v12 = vld [vmem:[#allocation3 + $0xc8] sm:$0xff] }
 0x409   :  { %v4612_v0 = vmul.f32 0.6931472, %v6118_v40  ;;  %2400 = vst.msk [vmem:[#allocation7 + $0xc0] sm:$0xff] %vm986_vm3, %v2318_v14  ;;  %v5178_v40 = vsel %vm986_vm3, %v5140_v46, 0.0  ;;  %v5041_v14 = vld [vmem:[#allocation2 + $0x50] sm:$0xff]  ;;  %v5188_v46 = vsel %vm986_vm3, %v5145_v4, 0.0 }
 0x40a   :  { %v1416_v15 = vpop.xlane.xlu1 %1415  ;;  %v5179_v34 = vadd.f32 %v5178_v40, %v5177_v23  ;;  %v5083_v53 = vsel %vm986_vm3, %v5041_v14, 0.0  ;;  %v4530_v4 = vld [vmem:[#allocation4 + $0xd8] sm:$0xff] }
 0x40b   :  { %v4653_v32 = vadd.f32 %v4612_v0, %v4525_v52  ;;  %1496 = vst.msk [vmem:[#allocation5 + $0xc8] sm:$0xff] %vm986_vm3, %v1416_v15  ;;  %v4527_v52 = vld [vmem:[#allocation4 + $0xc0] sm:$0xff] }
 0x40c   :  { %v6120_v56 = vpop.eup %6119  ;;  %v4559_v50 = vld [vmem:[#allocation5 + $0xc0] sm:$0xff] }
 0x40d   :  { %v4685_v62 = vadd.f32 %v4653_v32, %v4493_v31  ;;  %v4869_v47 = vmul.f32 0.6931472, %v6120_v56  ;;  %6125 = vlog2.f32 %v4559_v50  ;;  %v6122_v58 = vpop.eup %6121  ;;  %v5142_v32 = vld [vmem:[#allocation3 + $0x48] sm:$0xff]  ;;  %v5181_v56 = vadd.f32 %v5180_v45, %v5179_v34  ;;  %v4495_v15 = vld [vmem:[#allocation2 + $0xc0] sm:$0xff] }
 0x40e   :  { %v4614_v30 = vmul.f32 0.6931472, %v6122_v58  ;;  %v2321_v41 = vpop.xlane.xlu1 %2320  ;;  %v5182_v29 = vsel %vm986_vm3, %v5142_v32, 0.0  ;;  %v5046_v32 = vld [vmem:[#allocation2 + $0x78] sm:$0xff] }
 0x40f   :  { %4718 = vst.msk [vmem:[#allocation2 + $0xb0] sm:$0xff] %vm986_vm3, %v4685_v62  ;;  %v4910_v21 = vadd.f32 %v4869_v47, %v4782_v42  ;;  %2401 = vst.msk [vmem:[#allocation7 + $0xc8] sm:$0xff] %vm986_vm3, %v2321_v41  ;;  %v5081_v62 = vsel %vm986_vm3, %v5040_v19, 0.0  ;;  %v5184_v42 = vsel %vm986_vm3, %v5143_v5, 0.0 }
 0x410   :  { %v4816_v10 = vld [vmem:[#allocation7 + $0xc0] sm:$0xff]  ;;  %v4654_v49 = vadd.f32 %v4614_v30, %v4526_v18  ;;  %v5082_v16 = vadd.f32 %v5081_v62, %v5080_v37  ;;  %v4497_v62 = vld [vmem:[#allocation2 + $0xd0] sm:$0xff] }
 0x411   :  { %v4942_v24 = vadd.f32 %v4910_v21, %v4750_v9  ;;  %6127 = vlog2.f32 %v4816_v10  ;;  %v6124_v55 = vpop.eup %6123  ;;  %v5183_v9 = vadd.f32 %v5182_v29, %v5181_v56  ;;  %v4752_v30 = vld [vmem:[#allocation3 + $0xc0] sm:$0xff]  ;;  %v5144_v10 = vld [vmem:[#allocation3 + $0x58] sm:$0xff] }
 0x412   :  { %v4686_v36 = vadd.f32 %v4654_v49, %v4494_v60  ;;  %v4871_v33 = vmul.f32 0.6931472, %v6124_v55  ;;  %v4560_v44 = vld [vmem:[#allocation5 + $0xc8] sm:$0xff]  ;;  %v5084_v26 = vadd.f32 %v5083_v53, %v5082_v16  ;;  %v5087_v55 = vsel %vm986_vm3, %v5043_v48, 0.0  ;;  %v5148_v48 = vld [vmem:[#allocation3 + $0x78] sm:$0xff] }
 0x413   :  { %4974 = vst.msk [vmem:[#allocation3 + $0xb0] sm:$0xff] %vm986_vm3, %v4942_v24  ;;  %6129 = vlog2.f32 %v4560_v44  ;;  %v5185_v49 = vadd.f32 %v5184_v42, %v5183_v9  ;;  %v5085_v60 = vsel %vm986_vm3, %v5042_v13, 0.0  ;;  %v5149_v13 = vld [vmem:[#allocation3 + $0x80] sm:$0xff] }
 0x414   :  { %4719 = vst.msk [vmem:[#allocation2 + $0xb8] sm:$0xff] %vm986_vm3, %v4686_v36  ;;  %v4911_v1 = vadd.f32 %v4871_v33, %v4783_v54  ;;  %v1419_v20 = vpop.xlane.xlu0 %1418  ;;  %v5086_v39 = vadd.f32 %v5085_v60, %v5084_v26  ;;  %v5186_v54 = vsel %vm986_vm3, %v5144_v10, 0.0  ;;  %v5194_v60 = vsel %vm986_vm3, %v5148_v48, 0.0 }
 0x415   :  { %1497 = vst.msk [vmem:[#allocation5 + $0xd0] sm:$0xff] %vm986_vm3, %v1419_v20  ;;  %v5044_v20 = vld [vmem:[#allocation2 + $0x68] sm:$0xff]  ;;  %v5187_v6 = vadd.f32 %v5186_v54, %v5185_v49 }
 0x416   :  { %v4943_v38 = vadd.f32 %v4911_v1, %v4751_v7  ;;  %v4817_v25 = vld [vmem:[#allocation7 + $0xc8] sm:$0xff]  ;;  %v5045_v1 = vld [vmem:[#allocation2 + $0x70] sm:$0xff]  ;;  %v5088_v3 = vadd.f32 %v5087_v55, %v5086_v39  ;;  %v5089_v19 = vsel %vm986_vm3, %v5044_v20, 0.0  ;;  %v4498_v20 = vld [vmem:[#allocation2 + $0xd8] sm:$0xff] }
 0x417   :  { %v6126_v17 = vpop.eup %6125  ;;  %6131 = vlog2.f32 %v4817_v25  ;;  %v5189_v25 = vadd.f32 %v5188_v46, %v5187_v6  ;;  %v5091_v14 = vsel %vm986_vm3, %v5045_v1, 0.0 }
 0x418   :  { %v4616_v0 = vmul.f32 0.6931472, %v6126_v17  ;;  %4975 = vst.msk [vmem:[#allocation3 + $0xb8] sm:$0xff] %vm986_vm3, %v4943_v38  ;;  %v2324_v59 = vpop.xlane.xlu0 %2323  ;;  %v5146_v17 = vld [vmem:[#allocation3 + $0x68] sm:$0xff]  ;;  %v5147_v38 = vld [vmem:[#allocation3 + $0x70] sm:$0xff] }
 0x419   :  { %2402 = vst.msk [vmem:[#allocation7 + $0xd0] sm:$0xff] %vm986_vm3, %v2324_v59  ;;  %v5090_v59 = vadd.f32 %v5089_v19, %v5088_v3  ;;  %v5190_v5 = vsel %vm986_vm3, %v5146_v17, 0.0  ;;  %v5192_v56 = vsel %vm986_vm3, %v5147_v38, 0.0  ;;  %v5150_v3 = vld [vmem:[#allocation3 + $0x88] sm:$0xff] }
 0x41a   :  { %v4655_v8 = vadd.f32 %v4616_v0, %v4527_v52  ;;  %v1422_v51 = vpop.xlane.xlu1 %1421  ;;  %v5191_v53 = vadd.f32 %v5190_v5, %v5189_v25  ;;  %v5198_v5 = vsel %vm986_vm3, %v5150_v3, 0.0 }
 0x41b   :  { %v6128_v31 = vpop.eup %6127  ;;  %1498 = vst.msk [vmem:[#allocation5 + $0xd8] sm:$0xff] %vm986_vm3, %v1422_v51  ;;  %v5092_v51 = vadd.f32 %v5091_v14, %v5090_v59  ;;  %v4240_v14 = vld [vmem:[#allocation2 + $0xe8] sm:$0xff] }
 0x41c   :  { %v4687_v47 = vadd.f32 %v4655_v8, %v4495_v15  ;;  %v4873_v50 = vmul.f32 0.6931472, %v6128_v31  ;;  %v4561_v61 = vld [vmem:[#allocation5 + $0xd0] sm:$0xff]  ;;  %v5047_v15 = vld [vmem:[#allocation2 + $0x80] sm:$0xff]  ;;  %v5193_v26 = vadd.f32 %v5192_v56, %v5191_v53  ;;  %v4755_v56 = vld [vmem:[#allocation3 + $0xd8] sm:$0xff] }
 0x41d   :  { %v6130_v58 = vpop.eup %6129  ;;  %6133 = vlog2.f32 %v4561_v61  ;;  %v4529_v31 = vld [vmem:[#allocation4 + $0xd0] sm:$0xff] }
 0x41e   :  { %4720 = vst.msk [vmem:[#allocation2 + $0xc0] sm:$0xff] %vm986_vm3, %v4687_v47  ;;  %v4912_v21 = vadd.f32 %v4873_v50, %v4784_v11  ;;  %v4618_v41 = vmul.f32 0.6931472, %v6130_v58  ;;  %v2327_v35 = vpop.xlane.xlu1 %2326  ;;  %v4368_v50 = vld [vmem:[#allocation3 + $0xe0] sm:$0xff] }
 0x41f   :  { %2403 = vst.msk [vmem:[#allocation7 + $0xd8] sm:$0xff] %vm986_vm3, %v2327_v35 }
 0x420   :  { %v4944_v18 = vadd.f32 %v4912_v21, %v4752_v30  ;;  %v4656_v28 = vadd.f32 %v4618_v41, %v4528_v22  ;;  %v4818_v27 = vld [vmem:[#allocation7 + $0xd0] sm:$0xff]  ;;  %v5093_v21 = vsel %vm986_vm3, %v5046_v32, 0.0  ;;  %v5095_v41 = vsel %vm986_vm3, %v5047_v15, 0.0  ;;  %v5050_v32 = vld [vmem:[#allocation2 + $0x98] sm:$0xff] }
 0x421   :  { %v6132_v57 = vpop.eup %6131  ;;  %6135 = vlog2.f32 %v4818_v27  ;;  %v4754_v22 = vld [vmem:[#allocation3 + $0xd0] sm:$0xff]  ;;  %v5094_v10 = vadd.f32 %v5093_v21, %v5092_v51 }
 0x422   :  { %4976 = vst.msk [vmem:[#allocation3 + $0xc0] sm:$0xff] %vm986_vm3, %v4944_v18  ;;  %v4688_v2 = vadd.f32 %v4656_v28, %v4496_v63  ;;  %v4875_v36 = vmul.f32 0.6931472, %v6132_v57  ;;  %v4562_v33 = vld [vmem:[#allocation5 + $0xd8] sm:$0xff]  ;;  %v4786_v18 = vld [vmem:[#allocation6 + $0xd0] sm:$0xff]  ;;  %v5196_v57 = vsel %vm986_vm3, %v5149_v13, 0.0 }
 0x423   :  { %v1425_v24 = vpop.xlane.xlu0 %1424  ;;  %6137 = vlog2.f32 %v4562_v33  ;;  %v4239_v63 = vld [vmem:[#allocation2 + $0xe0] sm:$0xff]  ;;  %v5096_v33 = vadd.f32 %v5095_v41, %v5094_v10  ;;  %v4241_v13 = vld [vmem:[#allocation2 + $0xf0] sm:$0xff] }
 0x424   :  { %1499 = vst.msk [vmem:[#allocation5 + $0xe0] sm:$0xff] %vm986_vm3, %v1425_v24  ;;  %4721 = vst.msk [vmem:[#allocation2 + $0xc8] sm:$0xff] %vm986_vm3, %v4688_v2  ;;  %v4913_v7 = vadd.f32 %v4875_v36, %v4785_v43  ;;  %v5048_v36 = vld [vmem:[#allocation2 + $0x88] sm:$0xff] }
 0x425   :  { %v5097_v25 = vsel %vm986_vm3, %v5048_v36, 0.0 }
 0x426   :  { %v1428_v44 = vpop.xlane.xlu1 %1427  ;;  %v4945_v40 = vadd.f32 %v4913_v7, %v4753_v12  ;;  %v4819_v45 = vld [vmem:[#allocation7 + $0xd8] sm:$0xff] }
 0x427   :  { %1500 = vst.msk [vmem:[#allocation5 + $0xe8] sm:$0xff] %vm986_vm3, %v1428_v44  ;;  %v2330_v23 = vpop.xlane.xlu0 %2329  ;;  %v6134_v37 = vpop.eup %6133  ;;  %6139 = vlog2.f32 %v4819_v45  ;;  %v5195_v44 = vadd.f32 %v5194_v60, %v5193_v26 }
 0x428   :  { %2404 = vst.msk [vmem:[#allocation7 + $0xe0] sm:$0xff] %vm986_vm3, %v2330_v23  ;;  %4977 = vst.msk [vmem:[#allocation3 + $0xc8] sm:$0xff] %vm986_vm3, %v4945_v40  ;;  %v4620_v8 = vmul.f32 0.6931472, %v6134_v37  ;;  %v5049_v23 = vld [vmem:[#allocation2 + $0x90] sm:$0xff] }
 0x429   :  { %v5197_v6 = vadd.f32 %v5196_v57, %v5195_v44  ;;  %v5151_v40 = vld [vmem:[#allocation3 + $0x90] sm:$0xff] }
 0x42a   :  { %v2333_v0 = vpop.xlane.xlu1 %2332  ;;  %v4657_v47 = vadd.f32 %v4620_v8, %v4529_v31  ;;  %v4369_v31 = vld [vmem:[#allocation3 + $0xe8] sm:$0xff]  ;;  %v5200_v51 = vsel %vm986_vm3, %v5151_v40, 0.0 }
 0x42b   :  { %2405 = vst.msk [vmem:[#allocation7 + $0xe8] sm:$0xff] %vm986_vm3, %v2333_v0  ;;  %v4563_v52 = vld [vmem:[#allocation5 + $0xe0] sm:$0xff]  ;;  %v6136_v61 = vpop.eup %6135  ;;  %v4787_v0 = vld [vmem:[#allocation6 + $0xd8] sm:$0xff]  ;;  %v5199_v15 = vadd.f32 %v5198_v5, %v5197_v6 }
 0x42c   :  { %6141 = vlog2.f32 %v4563_v52  ;;  %v4689_v9 = vadd.f32 %v4657_v47, %v4497_v62  ;;  %v4877_v30 = vmul.f32 0.6931472, %v6136_v61  ;;  %v5098_v52 = vadd.f32 %v5097_v25, %v5096_v33  ;;  %v5051_v61 = vld [vmem:[#allocation2 + $0xa0] sm:$0xff]  ;;  %v5053_v33 = vld [vmem:[#allocation2 + $0xb0] sm:$0xff]  ;;  %v4532_v25 = vld [vmem:[#allocation4 + $0xe8] sm:$0xff] }
 0x42d   :  { %v1431_v34 = vpop.xlane.xlu0 %1430  ;;  %v6138_v35 = vpop.eup %6137 }
 0x42e   :  { %1501 = vst.msk [vmem:[#allocation5 + $0xf0] sm:$0xff] %vm986_vm3, %v1431_v34  ;;  %v4201_v16 = vpop.xlane.xlu1 %4200  ;;  %v4564_v11 = vld [vmem:[#allocation5 + $0xe8] sm:$0xff]  ;;  %4722 = vst.msk [vmem:[#allocation2 + $0xd0] sm:$0xff] %vm986_vm3, %v4689_v9  ;;  %v4914_v49 = vadd.f32 %v4877_v30, %v4786_v18  ;;  %v4622_v28 = vmul.f32 0.6931472, %v6138_v35  ;;  %v5099_v34 = vsel %vm986_vm3, %v5049_v23, 0.0 }
 0x42f   :  { %v4820_v29 = vld [vmem:[#allocation7 + $0xe0] sm:$0xff]  ;;  %v4400_v42 = vmul.f32 -2.0, %v4201_v16  ;;  %v5101_v9 = vsel %vm986_vm3, %v5050_v32, 0.0  ;;  %v5052_v35 = vld [vmem:[#allocation2 + $0xa8] sm:$0xff] }
 0x430   :  { %6143 = vlog2.f32 %v4820_v29  ;;  %v4946_v54 = vadd.f32 %v4914_v49, %v4754_v22  ;;  %v4658_v46 = vadd.f32 %v4622_v28, %v4530_v4  ;;  %v5100_v29 = vadd.f32 %v5099_v34, %v5098_v52  ;;  %v4788_v30 = vld [vmem:[#allocation6 + $0xe0] sm:$0xff]  ;;  %v4370_v4 = vld [vmem:[#allocation3 + $0xf0] sm:$0xff] }
 0x431   :  { %v2336_v58 = vpop.xlane.xlu0 %2335  ;;  %v4432_v24 = vadd.f32 %v4400_v42, %v4368_v50  ;;  %6145 = vlog2.f32 %v4564_v11  ;;  %v6140_v1 = vpop.eup %6139  ;;  %v5152_v42 = vld [vmem:[#allocation3 + $0x98] sm:$0xff]  ;;  %v5201_v22 = vadd.f32 %v5200_v51, %v5199_v15  ;;  %v5103_v49 = vsel %vm986_vm3, %v5051_v61, 0.0  ;;  %v5153_v28 = vld [vmem:[#allocation3 + $0xa0] sm:$0xff] }
 0x432   :  { %2406 = vst.msk [vmem:[#allocation7 + $0xf0] sm:$0xff] %vm986_vm3, %v2336_v58  ;;  %v1434_v27 = vpop.xlane.xlu1 %1433  ;;  %v4821_v55 = vld [vmem:[#allocation7 + $0xe8] sm:$0xff]  ;;  %4978 = vst.msk [vmem:[#allocation3 + $0xd0] sm:$0xff] %vm986_vm3, %v4946_v54  ;;  %v4690_v7 = vadd.f32 %v4658_v46, %v4498_v20  ;;  %v4879_v12 = vmul.f32 0.6931472, %v6140_v1  ;;  %v5102_v44 = vadd.f32 %v5101_v9, %v5100_v29  ;;  %v4242_v1 = vld [vmem:[#allocation2 + $0xf8] sm:$0xff] }
 0x433   :  { %4464 = vst.msk [vmem:[#allocation3 + $0xe0] sm:$0xff] %vm986_vm3, %v4432_v24  ;;  %1502 = vst.msk [vmem:[#allocation5 + $0xf8] sm:$0xff] %vm986_vm3, %v1434_v27  ;;  %6147 = vlog2.f32 %v4821_v55  ;;  %v4531_v24 = vld [vmem:[#allocation4 + $0xe0] sm:$0xff]  ;;  %v5202_v27 = vsel %vm986_vm3, %v5152_v42, 0.0  ;;  %v5105_v3 = vsel %vm986_vm3, %v5052_v35, 0.0 }
 0x434   :  { %4723 = vst.msk [vmem:[#allocation2 + $0xd8] sm:$0xff] %vm986_vm3, %v4690_v7  ;;  %v4915_v59 = vadd.f32 %v4879_v12, %v4787_v0  ;;  %v5104_v12 = vadd.f32 %v5103_v49, %v5102_v44  ;;  %v5107_v0 = vsel %vm986_vm3, %v5053_v33, 0.0  ;;  %v5055_v51 = vld [vmem:[#allocation2 + $0xc0] sm:$0xff] }
 0x435   :  { %v4041_v39 = vpop.xlane.xlu0 %4040  ;;  %v4565_v2 = vld [vmem:[#allocation5 + $0xf0] sm:$0xff]  ;;  %v5111_v35 = vsel %vm986_vm3, %v5055_v51, 0.0 }
 0x436   :  { %v4271_v43 = vmul.f32 -2.0, %v4041_v39  ;;  %6149 = vlog2.f32 %v4565_v2  ;;  %v2339_v38 = vpop.xlane.xlu1 %2338  ;;  %v6142_v45 = vpop.eup %6141  ;;  %v4947_v62 = vadd.f32 %v4915_v59, %v4755_v56  ;;  %v5106_v5 = vadd.f32 %v5105_v3, %v5104_v12  ;;  %v5155_v56 = vld [vmem:[#allocation3 + $0xb0] sm:$0xff]  ;;  %v4791_v12 = vld [vmem:[#allocation6 + $0xf8] sm:$0xff] }
 0x437   :  { %2407 = vst.msk [vmem:[#allocation7 + $0xf8] sm:$0xff] %vm986_vm3, %v2339_v38  ;;  %v4624_v47 = vmul.f32 0.6931472, %v6142_v45  ;;  %v5203_v38 = vadd.f32 %v5202_v27, %v5201_v22  ;;  %v5157_v22 = vld [vmem:[#allocation3 + $0xc0] sm:$0xff] }
 0x438   :  { %v4303_v17 = vadd.f32 %v4271_v43, %v4239_v63  ;;  %4979 = vst.msk [vmem:[#allocation3 + $0xd8] sm:$0xff] %vm986_vm3, %v4947_v62 }
 0x439   :  { %v4044_v19 = vpop.xlane.xlu0 %4043  ;;  %v4822_v37 = vld [vmem:[#allocation7 + $0xf0] sm:$0xff]  ;;  %v4659_v57 = vadd.f32 %v4624_v47, %v4531_v24  ;;  %v4789_v47 = vld [vmem:[#allocation6 + $0xe8] sm:$0xff] }
 0x43a   :  { %4336 = vst.msk [vmem:[#allocation2 + $0xe0] sm:$0xff] %vm986_vm3, %v4303_v17  ;;  %v4272_v8 = vmul.f32 -2.0, %v4044_v19  ;;  %6151 = vlog2.f32 %v4822_v37  ;;  %v6144_v53 = vpop.eup %6143  ;;  %v4204_v16 = vpop.xlane.xlu1 %4203  ;;  %v4566_v11 = vld [vmem:[#allocation5 + $0xf8] sm:$0xff]  ;;  %v4756_v60 = vld [vmem:[#allocation3 + $0xe0] sm:$0xff]  ;;  %v5154_v17 = vld [vmem:[#allocation3 + $0xa8] sm:$0xff]  ;;  %v5204_v19 = vsel %vm986_vm3, %v5153_v28, 0.0 }
 0x43b   :  { %v6146_v58 = vpop.eup %6145  ;;  %v4881_v21 = vmul.f32 0.6931472, %v6144_v53  ;;  %v4401_v48 = vmul.f32 -2.0, %v4204_v16  ;;  %6153 = vlog2.f32 %v4566_v11  ;;  %v5206_v53 = vsel %vm986_vm3, %v5154_v17, 0.0  ;;  %v5156_v11 = vld [vmem:[#allocation3 + $0xb8] sm:$0xff] }
 0x43c   :  { %v4304_v50 = vadd.f32 %v4272_v8, %v4240_v14  ;;  %v4626_v63 = vmul.f32 0.6931472, %v6146_v58  ;;  %v5054_v14 = vld [vmem:[#allocation2 + $0xb8] sm:$0xff]  ;;  %v5205_v61 = vadd.f32 %v5204_v19, %v5203_v38  ;;  %v4533_v58 = vld [vmem:[#allocation4 + $0xf0] sm:$0xff]  ;;  %v5210_v28 = vsel %vm986_vm3, %v5156_v11, 0.0 }
 0x43d   :  { %v4047_v26 = vpop.xlane.xlu0 %4046  ;;  %v4916_v18 = vadd.f32 %v4881_v21, %v4788_v30  ;;  %v4433_v10 = vadd.f32 %v4401_v48, %v4369_v31  ;;  %v6148_v55 = vpop.eup %6147  ;;  %v4371_v8 = vld [vmem:[#allocation3 + $0xf8] sm:$0xff]  ;;  %v5109_v16 = vsel %vm986_vm3, %v5054_v14, 0.0 }
 0x43e   :  { %4337 = vst.msk [vmem:[#allocation2 + $0xe8] sm:$0xff] %vm986_vm3, %v4304_v50  ;;  %v4273_v41 = vmul.f32 -2.0, %v4047_v26  ;;  %v4207_v2 = vpop.xlane.xlu1 %4206  ;;  %v4823_v36 = vld [vmem:[#allocation7 + $0xf8] sm:$0xff]  ;;  %v4883_v40 = vmul.f32 0.6931472, %v6148_v55  ;;  %v4660_v34 = vadd.f32 %v4626_v63, %v4532_v25  ;;  %v5108_v50 = vadd.f32 %v5107_v0, %v5106_v5  ;;  %v4790_v55 = vld [vmem:[#allocation6 + $0xf0] sm:$0xff] }
 0x43f   :  { %v4948_v46 = vadd.f32 %v4916_v18, %v4756_v60  ;;  %4465 = vst.msk [vmem:[#allocation3 + $0xe8] sm:$0xff] %vm986_vm3, %v4433_v10  ;;  %v4402_v23 = vmul.f32 -2.0, %v4207_v2  ;;  %6155 = vlog2.f32 %v4823_v36  ;;  %v5208_v26 = vsel %vm986_vm3, %v5155_v56, 0.0  ;;  %v4534_v36 = vld [vmem:[#allocation4 + $0xf8] sm:$0xff] }
 0x440   :  { %v4305_v39 = vadd.f32 %v4273_v41, %v4241_v13  ;;  %v6150_v54 = vpop.eup %6149  ;;  %v4917_v42 = vadd.f32 %v4883_v40, %v4789_v47  ;;  %v5056_v13 = vld [vmem:[#allocation2 + $0xc8] sm:$0xff]  ;;  %v5207_v18 = vadd.f32 %v5206_v53, %v5205_v61  ;;  %v5110_v49 = vadd.f32 %v5109_v16, %v5108_v50  ;;  %v5058_v33 = vld [vmem:[#allocation2 + $0xd8] sm:$0xff] }
 0x441   :  { %v4499_v43 = vld [vmem:[#allocation2 + $0xe0] sm:$0xff]  ;;  %v4050_v20 = vpop.xlane.xlu0 %4049  ;;  %4980 = vst.msk [vmem:[#allocation3 + $0xe0] sm:$0xff] %vm986_vm3, %v4948_v46  ;;  %v4434_v45 = vadd.f32 %v4402_v23, %v4370_v4  ;;  %v4628_v52 = vmul.f32 0.6931472, %v6150_v54  ;;  %v5057_v4 = vld [vmem:[#allocation2 + $0xd0] sm:$0xff]  ;;  %v5113_v60 = vsel %vm986_vm3, %v5056_v13, 0.0 }
 0x442   :  { %v4691_v6 = vadd.f32 %v4659_v57, %v4499_v43  ;;  %4338 = vst.msk [vmem:[#allocation2 + $0xf0] sm:$0xff] %vm986_vm3, %v4305_v39  ;;  %v4274_v7 = vmul.f32 -2.0, %v4050_v20  ;;  %v4210_v32 = vpop.xlane.xlu1 %4209  ;;  %v5158_v57 = vld [vmem:[#allocation3 + $0xc8] sm:$0xff]  ;;  %v5209_v63 = vadd.f32 %v5208_v26, %v5207_v18  ;;  %v5112_v44 = vadd.f32 %v5111_v35, %v5110_v49  ;;  %v5159_v20 = vld [vmem:[#allocation3 + $0xd0] sm:$0xff]  ;;  %v5160_v14 = vld [vmem:[#allocation3 + $0xd8] sm:$0xff] }
 0x443   :  { %4466 = vst.msk [vmem:[#allocation3 + $0xf0] sm:$0xff] %vm986_vm3, %v4434_v45  ;;  %v4403_v15 = vmul.f32 -2.0, %v4210_v32  ;;  %v4661_v30 = vadd.f32 %v4628_v52, %v4533_v58  ;;  %v5212_v54 = vsel %vm986_vm3, %v5157_v22, 0.0  ;;  %v5214_v25 = vsel %vm986_vm3, %v5158_v57, 0.0 }
 0x444   :  { %v6152_v37 = vpop.eup %6151  ;;  %4724 = vst.msk [vmem:[#allocation2 + $0xe0] sm:$0xff] %vm986_vm3, %v4691_v6  ;;  %v4306_v59 = vadd.f32 %v4274_v7, %v4242_v1  ;;  %v5115_v1 = vsel %vm986_vm3, %v5057_v4, 0.0  ;;  %v5211_v3 = vadd.f32 %v5210_v28, %v5209_v63  ;;  %v5114_v38 = vadd.f32 %v5113_v60, %v5112_v44 }
 0x445   :  { %v4500_v31 = vld [vmem:[#allocation2 + $0xe8] sm:$0xff]  ;;  %v6154_v29 = vpop.eup %6153  ;;  %v4885_v21 = vmul.f32 0.6931472, %v6152_v37  ;;  %v4435_v48 = vadd.f32 %v4403_v15, %v4371_v8  ;;  %v5117_v0 = vsel %vm986_vm3, %v5058_v33, 0.0  ;;  %v5216_v52 = vsel %vm986_vm3, %v5159_v20, 0.0 }
 0x446   :  { %v4692_v62 = vadd.f32 %v4660_v34, %v4500_v31  ;;  %4339 = vst.msk [vmem:[#allocation2 + $0xf8] sm:$0xff] %vm986_vm3, %v4306_v59  ;;  %v4757_v9 = vld [vmem:[#allocation3 + $0xe8] sm:$0xff]  ;;  %v4630_v41 = vmul.f32 0.6931472, %v6154_v29  ;;  %v5213_v19 = vadd.f32 %v5212_v54, %v5211_v3  ;;  %v5116_v34 = vadd.f32 %v5115_v1, %v5114_v38 }
 0x447   :  { %v4949_v24 = vadd.f32 %v4917_v42, %v4757_v9  ;;  %4467 = vst.msk [vmem:[#allocation3 + $0xf8] sm:$0xff] %vm986_vm3, %v4435_v48  ;;  %v4918_v2 = vadd.f32 %v4885_v21, %v4790_v55  ;;  %v5218_v15 = vsel %vm986_vm3, %v5160_v14, 0.0 }
 0x448   :  { %4725 = vst.msk [vmem:[#allocation2 + $0xe8] sm:$0xff] %vm986_vm3, %v4692_v62  ;;  %v4662_v43 = vadd.f32 %v4630_v41, %v4534_v36  ;;  %v5161_v32 = vld [vmem:[#allocation3 + $0xe0] sm:$0xff]  ;;  %v5215_v5 = vadd.f32 %v5214_v25, %v5213_v19  ;;  %v5118_v31 = vadd.f32 %v5117_v0, %v5116_v34 }
 0x449   :  { %v4501_v10 = vld [vmem:[#allocation2 + $0xf0] sm:$0xff]  ;;  %v6156_v39 = vpop.eup %6155  ;;  %4981 = vst.msk [vmem:[#allocation3 + $0xe8] sm:$0xff] %vm986_vm3, %v4949_v24  ;;  %v5220_v16 = vsel %vm986_vm3, %v5161_v32, 0.0 }
 0x44a   :  { %v4693_v27 = vadd.f32 %v4661_v30, %v4501_v10  ;;  %v4758_v46 = vld [vmem:[#allocation3 + $0xf0] sm:$0xff]  ;;  %v4887_v23 = vmul.f32 0.6931472, %v6156_v39  ;;  %v5217_v62 = vadd.f32 %v5216_v52, %v5215_v5 }
 0x44b   :  { %v4950_v6 = vadd.f32 %v4918_v2, %v4758_v46  ;;  %v5059_v17 = vld [vmem:[#allocation2 + $0xe0] sm:$0xff]  ;;  %v5013_v2 = vpop.xlane.xlu0 %5012  ;;  %v5030_v46 = vpop.xlane.xlu1 %5029 }
 0x44c   :  { %4726 = vst.msk [vmem:[#allocation2 + $0xf0] sm:$0xff] %vm986_vm3, %v4693_v27  ;;  %v4919_v45 = vadd.f32 %v4887_v23, %v4791_v12  ;;  %v5119_v8 = vsel %vm986_vm3, %v5059_v17, 0.0  ;;  %v5219_v61 = vadd.f32 %v5218_v15, %v5217_v62 }
 0x44d   :  { %v4502_v7 = vld [vmem:[#allocation2 + $0xf8] sm:$0xff]  ;;  %4982 = vst.msk [vmem:[#allocation3 + $0xf0] sm:$0xff] %vm986_vm3, %v4950_v6  ;;  %v5120_v50 = vadd.f32 %v5119_v8, %v5118_v31 }
 0x44e   :  { %v4694_v40 = vadd.f32 %v4662_v43, %v4502_v7  ;;  %v4759_v59 = vld [vmem:[#allocation3 + $0xf8] sm:$0xff]  ;;  %v5221_v21 = vadd.f32 %v5220_v16, %v5219_v61 }
 0x44f   :  { %v5060_v37 = vld [vmem:[#allocation2 + $0xe8] sm:$0xff]  ;;  %v4951_v56 = vadd.f32 %v4919_v45, %v4759_v59 }
 0x450   :  { %4727 = vst.msk [vmem:[#allocation2 + $0xf8] sm:$0xff] %vm986_vm3, %v4694_v40  ;;  %v5121_v51 = vsel %vm986_vm3, %v5060_v37, 0.0  ;;  %v5162_v53 = vld [vmem:[#allocation3 + $0xe8] sm:$0xff] }
 0x451   :  { %4983 = vst.msk [vmem:[#allocation3 + $0xf8] sm:$0xff] %vm986_vm3, %v4951_v56  ;;  %v5122_v29 = vadd.f32 %v5121_v51, %v5120_v50  ;;  %v5222_v42 = vsel %vm986_vm3, %v5162_v53, 0.0 }
 0x452   :  { %v5223_v30 = vadd.f32 %v5222_v42, %v5221_v21 }
 0x453   :  { %v5061_v47 = vld [vmem:[#allocation2 + $0xf0] sm:$0xff] }
 0x454   :  { %v5123_v11 = vsel %vm986_vm3, %v5061_v47, 0.0  ;;  %v5163_v58 = vld [vmem:[#allocation3 + $0xf0] sm:$0xff] }
 0x455   :  { %v5124_v13 = vadd.f32 %v5123_v11, %v5122_v29  ;;  %v5224_v26 = vsel %vm986_vm3, %v5163_v58, 0.0 }
 0x456   :  { %v5225_v22 = vadd.f32 %v5224_v26, %v5223_v30 }
 0x457   :  { %v5062_v48 = vld [vmem:[#allocation2 + $0xf8] sm:$0xff] }
 0x458   :  { %v5125_v9 = vsel %vm986_vm3, %v5062_v48, 0.0  ;;  %v5164_v35 = vld [vmem:[#allocation3 + $0xf8] sm:$0xff] }
 0x459   :  { %v5126_v41 = vadd.f32 %v5125_v9, %v5124_v13  ;;  %v5226_v24 = vsel %vm986_vm3, %v5164_v35, 0.0 }
 0x45a   :  { %v5227_v10 = vadd.f32 %v5226_v24, %v5225_v22 }
 0x45b   :  { %v5127_v18 = vrot.slane %v5126_v41, 4 }
 0x45c   :  { %v5228_v49 = vrot.slane %v5227_v10, 4 }
 0x45d   :  { %v5128_v4 = vadd.f32 %v5127_v18, %v5126_v41 }
 0x45e   :  { %v5229_v27 = vadd.f32 %v5228_v49, %v5227_v10 }
 0x45f   :  { %v5129_v28 = vrot.slane %v5128_v4, 2 }
 0x460   :  { %v5230_v60 = vrot.slane %v5229_v27, 2 }
 0x461   :  { %v5130_v55 = vadd.f32 %v5129_v28, %v5128_v4 }
 0x462   :  { %v5231_v63 = vadd.f32 %v5230_v60, %v5229_v27 }
 0x463   :  { %v5131_v57 = vrot.slane %v5130_v55, 1 }
 0x464   :  { %v5232_v36 = vrot.slane %v5231_v63, 1 }
 0x465   :  { %v5132_v39 = vadd.f32 %v5131_v57, %v5130_v55 }
 0x466   :  { %v5233_v44 = vadd.f32 %v5232_v36, %v5231_v63 }
 0x467   :  { %v5234_v33 = vadd.f32 %v5132_v39, %v5013_v2 }
 0x468   :  { %v5238_v43 = vadd.f32 %v5233_v44, %v5030_v46 }
 0x469   :  { %v5235_v54 = vmul.f32 0.001953125, %v5234_v33 }
 0x46a   :  { %v5239_v23 = vmul.f32 0.001953125, %v5238_v43 }
 0x46b   :  { %5237 = vst.msk [vmem:[#allocation12] sm:$0x1] %vm5236_vm4, %v5235_v54 }
 0x46c   :  { %6168 = shalt.err (!%p6165_p4)
}
 0x46d   :  { %s6169_s26 = scalar_lea.hbm %s9718_s3, 16 }
 0x46e   :  { %p6170_p5 = scmp.ne.s32.totalorder %s9718_s3, %s6169_s26  ;;  %p6173_p6 = scmp.lt.u32.totalorder %s6169_s26, %s9718_s3 }
 0x470   :  { %p6175_p7 = pnand %p6173_p6, %p6170_p5 }
 0x472   :  { %6178 = shalt.err (!%p6175_p7)
}
 0x473   :  { %5250 = dma.vmem_to_hbm [thread:$0]  %s5248_s20, 16, %s9718_s3, [#allocation13]   ;;  %5240 = vst.msk [vmem:[#allocation14] sm:$0x1] %vm5236_vm4, %v5239_v23 }
 0x474   :  { %s6179_s7 = scalar_lea.vmem %s9682_s21, 16  ;;  %s6183_s8 = scalar_lea.vmem %s9682_s21, 32 }
 0x475   :  { %p6180_p8 = scmp.ne.s32.totalorder %s9682_s21, %s6179_s7  ;;  %p6184_p9 = scmp.lt.s32.totalorder %s9682_s21, %s9682_s21 }
 0x476   :  { %p6185_p10 = scmp.lt.s32.totalorder %s6183_s8, %s6179_s7 }
 0x478   :  { %p6186_p11 = por %p6185_p10, %p6184_p9 }
 0x47a   :  { %p6187_p12 = pnand %p6186_p11, %p6180_p8 }
 0x47c   :  { %6190 = shalt.err (!%p6187_p12)
}
 0x47d   :  { %s6191_s11 = scalar_lea.hbm %s9719_s4, 16 }
 0x47e   :  { %p6192_p13 = scmp.ne.s32.totalorder %s9719_s4, %s6191_s11  ;;  %p6195_p0 = scmp.lt.u32.totalorder %s6191_s11, %s9719_s4 }
 0x480   :  { %p6197_p1 = pnand %p6195_p0, %p6192_p13 }
 0x482   :  { %6200 = shalt.err (!%p6197_p1)
}
 0x483   :  { %5260 = dma.vmem_to_hbm [thread:$0]  %s9682_s21, 16, %s9719_s4, [#allocation15]  }
 0x484   :  { %6201 = dma.done.wait [#allocation13], 16  }
 0x485   :  { %6202 = vsyncadd [#allocation13], 4294967280 }
 0x486   :  { %6203 = dma.done.wait [#allocation15], 16  }
 0x487   :  { %6204 = vsyncadd [#allocation15], 4294967280 }
 0x488   :  { %5267 = vsyncpa [#allocation13], 1 }
 0x489   :  { %5268 = vsyncpa [#allocation15], 1 }

</bundles_post_ra>
